<compile_context>
chip_gen: v6e
topology: v6e:2x2x1
jax: 0.10.0
libtpu: 0.0.40
codegen_flags: <defaults>
</compile_context>

<pallas_src>
import numpy as np
import jax
import jax.numpy as jnp
from jax import lax
from jax.experimental import pallas as pl
from jax.experimental.pallas import tpu as pltpu

_K = 5  # conv kernel size


# ----------------------------- Pallas kernel -------------------------------

def _cnn_kernel(x_ref, a1_ref, bb1_ref, a2_ref, bb2_ref, a3_ref, bb3_ref,
                wf1_ref, bf1_ref, wf2_ref, bf2_ref, o_ref,
                p1w_ref, p1h_ref, p2w_ref, p2h_ref):
    """One grid step = one image.  All activations stay in VMEM/vregs."""

    def conv_relu(x2d, a_ref, brep_ref):
        # x2d: (H_in, W_in*C_in); a_ref: (K, W_in*C_in, W_out*C_out) banded.
        ho = x2d.shape[0] - _K + 1
        acc = brep_ref[...]                       # (1, W_out*C_out) -> broadcast
        for di in range(_K):
            acc = acc + jnp.dot(x2d[di:di + ho, :], a_ref[di],
                                preferred_element_type=jnp.float32)
        return jnp.maximum(acc, 0.0)              # (H_out, W_out*C_out)

    def maxpool2(y, c, s_w, s_h):
        # y: (H, W*C), channel-fastest lanes; 2x2 stride-2 max pool.
        h, wc = y.shape
        w = wc // c
        for j in range(w // 2):                   # pool along W (lane blocks)
            s_w[:, pl.ds(j * c, c)] = jnp.maximum(
                y[:, (2 * j) * c:(2 * j + 1) * c],
                y[:, (2 * j + 1) * c:(2 * j + 2) * c])
        for i in range(h // 2):                   # pool along H (row pairs)
            s_h[pl.ds(i, 1), :] = jnp.maximum(s_w[pl.ds(2 * i, 1), :],
                                              s_w[pl.ds(2 * i + 1, 1), :])
        return s_h[...]

    x2d = x_ref[0]                                # (28, 28)   H=28, W=28, C=1
    a1 = conv_relu(x2d, a1_ref, bb1_ref)          # (24, 384)  H=24, W=24, C=16
    a2 = conv_relu(a1, a2_ref, bb2_ref)           # (20, 640)  H=20, W=20, C=32
    p1 = maxpool2(a2, 32, p1w_ref, p1h_ref)       # (10, 320)  H=10, W=10, C=32
    a3 = conv_relu(p1, a3_ref, bb3_ref)           # (6, 384)   H=6,  W=6,  C=64
    p2 = maxpool2(a3, 64, p2w_ref, p2h_ref)       # (3, 192)   H=3,  W=3,  C=64

    # FC1: PyTorch's NCHW flatten permutation is folded into wf1_ref's packing.
    acc = bf1_ref[...]                            # (1, 100)
    for h in range(p2.shape[0]):
        acc = acc + jnp.dot(p2[h:h + 1, :], wf1_ref[h],
                            preferred_element_type=jnp.float32)
    f1 = jnp.maximum(acc, 0.0)                    # (1, 100)

    logits = jnp.dot(f1, wf2_ref[...],
                     preferred_element_type=jnp.float32) + bf2_ref[...]
    o_ref[0] = logits.astype(o_ref.dtype)         # (1, 10)


# ------------------------------ wrapper -------------------------------------

def _whole_array_spec(arr):
    nd = arr.ndim

    def index_map(b):
        return (0,) * nd

    return pl.BlockSpec(tuple(arr.shape), index_map)


def cnn_forward(x_nchw, packed):
    """x_nchw: (B, 1, 28, 28) f32 -> logits (B, 10) f32."""
    B = x_nchw.shape[0]
    x2d = x_nchw[:, 0, :, :]                      # (B, 28, 28): C_in == 1

    weights = (packed["A1"], packed["bb1"], packed["A2"], packed["bb2"],
               packed["A3"], packed["bb3"], packed["Wf1"], packed["bf1"],
               packed["Wf2"], packed["bf2"])

    out = pl.pallas_call(
        _cnn_kernel,
        out_shape=jax.ShapeDtypeStruct((B, 1, 10), jnp.float32),
        grid=(B,),
        in_specs=[pl.BlockSpec((1, 28, 28), lambda b: (b, 0, 0))] +
                 [_whole_array_spec(w) for w in weights],
        out_specs=pl.BlockSpec((1, 1, 10), lambda b: (b, 0, 0)),
        scratch_shapes=[
            pltpu.VMEM((20, 320), jnp.float32),   # pool1, W-stage
            pltpu.VMEM((10, 320), jnp.float32),   # pool1, H-stage
            pltpu.VMEM((6, 192), jnp.float32),    # pool2, W-stage
            pltpu.VMEM((3, 192), jnp.float32),    # pool2, H-stage
        ],
        compiler_params=pltpu.CompilerParams(
            dimension_semantics=("parallel",),
            vmem_limit_bytes=48 * 1024 * 1024),
    )(x2d, *weights)
    return out[:, 0, :]


# ------------------------ params & one-time packing --------------------------

def init_params(key):
    ks = jax.random.split(key, 10)
    s = 0.05
    return {
        "w1": jax.random.normal(ks[0], (16, 1, 5, 5), jnp.float32) * s,
        "b1": jax.random.normal(ks[1], (16,), jnp.float32) * s,
        "w2": jax.random.normal(ks[2], (32, 16, 5, 5), jnp.float32) * s,
        "b2": jax.random.normal(ks[3], (32,), jnp.float32) * s,
        "w3": jax.random.normal(ks[4], (64, 32, 5, 5), jnp.float32) * s,
        "b3": jax.random.normal(ks[5], (64,), jnp.float32) * s,
        "wf1": jax.random.normal(ks[6], (100, 64 * 3 * 3), jnp.float32) * s,
        "bf1": jax.random.normal(ks[7], (100,), jnp.float32) * s,
        "wf2": jax.random.normal(ks[8], (10, 100), jnp.float32) * s,
        "bf2": jax.random.normal(ks[9], (10,), jnp.float32) * s,
    }


def pack_params(p):
    """Pre-pack all weights (once, on host) into the layouts the kernel wants."""

    def pack_conv(w_oihw, bias, w_in):
        # Banded matrices A[di] : (w_in*C_in, w_out*C_out) with
        #   A[di][w*Ci + ci, wo*Co + co] = W[co, ci, di, w - wo]  for 0 <= w-wo < K
        w_np = np.asarray(w_oihw, np.float32)
        co, ci, kh, kw = w_np.shape
        w_out = w_in - kw + 1
        a = np.zeros((kh, w_in * ci, w_out * co), np.float32)
        for di in range(kh):
            for wo in range(w_out):
                for dj in range(kw):
                    wpos = wo + dj
                    a[di, wpos * ci:(wpos + 1) * ci, wo * co:(wo + 1) * co] = \
                        w_np[:, :, di, dj].T
        brep = np.tile(np.asarray(bias, np.float32), w_out)[None, :]
        return jnp.asarray(a), jnp.asarray(brep)

    A1, bb1 = pack_conv(p["w1"], p["b1"], 28)   # (5,  28, 384), (1, 384)
    A2, bb2 = pack_conv(p["w2"], p["b2"], 24)   # (5, 384, 640), (1, 640)
    A3, bb3 = pack_conv(p["w3"], p["b3"], 10)   # (5, 320, 384), (1, 384)

    # FC1: fold PyTorch's NCHW flatten (idx = c*9 + h*3 + w) into the weight.
    # Kernel layout of the pooled activation is p2[h, w*64 + c].
    wf1 = np.asarray(p["wf1"], np.float32)      # (100, 576)
    wf1p = np.zeros((3, 3 * 64, 100), np.float32)
    for h in range(3):
        for w in range(3):
            wf1p[h, w * 64:(w + 1) * 64, :] = wf1[:, (h * 3 + w)::9].T

    return {
        "A1": A1, "bb1": bb1, "A2": A2, "bb2": bb2, "A3": A3, "bb3": bb3,
        "Wf1": jnp.asarray(wf1p),
        "bf1": jnp.asarray(np.asarray(p["bf1"], np.float32)[None, :]),
        "Wf2": jnp.asarray(np.asarray(p["wf2"], np.float32).T),
        "bf2": jnp.asarray(np.asarray(p["bf2"], np.float32)[None, :]),
    }


# -------------------------- pure-JAX reference ------------------------------

def cnn_reference(x_nchw, p):
    dn = lax.conv_dimension_numbers(x_nchw.shape, p["w1"].shape,
                                    ("NCHW", "OIHW", "NCHW"))

    def conv(x, w, b):
        y = lax.conv_general_dilated(x, w, (1, 1), "VALID",
                                     dimension_numbers=dn)
        return jnp.maximum(y + b[None, :, None, None], 0.0)

    def pool(x):
        B, C, H, W = x.shape
        return x.reshape(B, C, H // 2, 2, W // 2, 2).max(axis=(3, 5))

    x = conv(x_nchw, p["w1"], p["b1"])
    x = conv(x, p["w2"], p["b2"])
    x = pool(x)
    x = conv(x, p["w3"], p["b3"])
    x = pool(x)
    flat = x.reshape(x.shape[0], 64 * 3 * 3)
    h = jnp.maximum(flat @ p["wf1"].T + p["bf1"], 0.0)
    return h @ p["wf2"].T + p["bf2"]


# --------------------------------- main -------------------------------------

if __name__ == "__main__":
    key = jax.random.PRNGKey(0)
    k_x, k_p = jax.random.split(key)
    # Architecture implies 28x28 single-channel input (64*3*3 flatten).
    x = jax.random.normal(k_x, (2, 1, 28, 28), jnp.float32)
    params = init_params(k_p)
    packed = pack_params(params)            # one-time host-side weight packing

    fwd = jax.jit(cnn_forward)
    out = jax.block_until_ready(fwd(x, packed))
    assert out.shape == (2, 10), out.shape

    ref = jax.block_until_ready(cnn_reference(x, params))
    assert jnp.allclose(out, ref, atol=2e-4, rtol=2e-4), (
        float(jnp.max(jnp.abs(out - ref))))

    print("KERNEL_OK")
</pallas_src>

<mosaic_0001>
module attributes {stable_mosaic.version = 11 : i64} {
  func.func @_cnn_kernel(%arg0: i32, %arg1: memref<1x28x28xf32, #tpu.memory_space<vmem>>, %arg2: memref<5x28x384xf32, #tpu.memory_space<vmem>>, %arg3: memref<1x384xf32, #tpu.memory_space<vmem>>, %arg4: memref<5x384x640xf32, #tpu.memory_space<vmem>>, %arg5: memref<1x640xf32, #tpu.memory_space<vmem>>, %arg6: memref<5x320x384xf32, #tpu.memory_space<vmem>>, %arg7: memref<1x384xf32, #tpu.memory_space<vmem>>, %arg8: memref<3x192x100xf32, #tpu.memory_space<vmem>>, %arg9: memref<1x100xf32, #tpu.memory_space<vmem>>, %arg10: memref<100x10xf32, #tpu.memory_space<vmem>>, %arg11: memref<1x10xf32, #tpu.memory_space<vmem>>, %arg12: memref<1x1x10xf32, #tpu.memory_space<vmem>>, %arg13: memref<20x320xf32, #tpu.memory_space<vmem>>, %arg14: memref<10x320xf32, #tpu.memory_space<vmem>>, %arg15: memref<6x192xf32, #tpu.memory_space<vmem>>, %arg16: memref<3x192xf32, #tpu.memory_space<vmem>>) attributes {dimension_semantics = [#tpu.dimension_semantics<parallel>], iteration_bounds = array<i64: 2>, scalar_prefetch = 0 : i64, scratch_operands = 4 : i64, tpu.core_type = #tpu.core_type<tc>, window_params = [{transform_indices = @transform_0, window_bounds = array<i64: 1, 28, 28>}, {pipeline_mode = #tpu.pipeline_mode<synchronous>, transform_indices = @transform_1, window_bounds = array<i64: 5, 28, 384>}, {pipeline_mode = #tpu.pipeline_mode<synchronous>, transform_indices = @transform_2, window_bounds = array<i64: 1, 384>}, {pipeline_mode = #tpu.pipeline_mode<synchronous>, transform_indices = @transform_3, window_bounds = array<i64: 5, 384, 640>}, {pipeline_mode = #tpu.pipeline_mode<synchronous>, transform_indices = @transform_4, window_bounds = array<i64: 1, 640>}, {pipeline_mode = #tpu.pipeline_mode<synchronous>, transform_indices = @transform_5, window_bounds = array<i64: 5, 320, 384>}, {pipeline_mode = #tpu.pipeline_mode<synchronous>, transform_indices = @transform_6, window_bounds = array<i64: 1, 384>}, {pipeline_mode = #tpu.pipeline_mode<synchronous>, transform_indices = @transform_7, window_bounds = array<i64: 3, 192, 100>}, {pipeline_mode = #tpu.pipeline_mode<synchronous>, transform_indices = @transform_8, window_bounds = array<i64: 1, 100>}, {pipeline_mode = #tpu.pipeline_mode<synchronous>, transform_indices = @transform_9, window_bounds = array<i64: 100, 10>}, {pipeline_mode = #tpu.pipeline_mode<synchronous>, transform_indices = @transform_10, window_bounds = array<i64: 1, 10>}, {transform_indices = @transform_11, window_bounds = array<i64: 1, 1, 10>}]} {
    %c0 = arith.constant 0 : index
    %c0_0 = arith.constant 0 : index
    %c0_1 = arith.constant 0 : index
    %0 = vector.load %arg1[%c0, %c0_0, %c0_1] : memref<1x28x28xf32, #tpu.memory_space<vmem>>, vector<1x28x28xf32>
    %1 = vector.shape_cast %0 : vector<1x28x28xf32> to vector<28x28xf32>
    %c0_2 = arith.constant 0 : index
    %c0_3 = arith.constant 0 : index
    %2 = vector.load %arg3[%c0_2, %c0_3] : memref<1x384xf32, #tpu.memory_space<vmem>>, vector<1x384xf32>
    %3 = vector.extract_strided_slice %1 {offsets = [0, 0], sizes = [24, 28], strides = [1, 1]} : vector<28x28xf32> to vector<24x28xf32>
    %c0_4 = arith.constant 0 : index
    %c0_5 = arith.constant 0 : index
    %c0_6 = arith.constant 0 : index
    %4 = vector.load %arg2[%c0_4, %c0_5, %c0_6] : memref<5x28x384xf32, #tpu.memory_space<vmem>>, vector<1x28x384xf32>
    %5 = vector.shape_cast %4 : vector<1x28x384xf32> to vector<28x384xf32>
    %cst = arith.constant dense<0.000000e+00> : vector<24x384xf32>
    %6 = tpu.matmul %3, %5, %cst {dimension_numbers = #tpu.dot_dimension_numbers<[1], [0], [0], [1], [0, 0, 1, 1], [], []>} : vector<24x28xf32>, vector<28x384xf32>, vector<24x384xf32> -> vector<24x384xf32>
    %7 = vector.broadcast %2 : vector<1x384xf32> to vector<24x384xf32>
    %8 = arith.addf %7, %6 : vector<24x384xf32>
    %9 = vector.extract_strided_slice %1 {offsets = [1, 0], sizes = [24, 28], strides = [1, 1]} : vector<28x28xf32> to vector<24x28xf32>
    %c1 = arith.constant 1 : index
    %c0_7 = arith.constant 0 : index
    %c0_8 = arith.constant 0 : index
    %10 = vector.load %arg2[%c1, %c0_7, %c0_8] : memref<5x28x384xf32, #tpu.memory_space<vmem>>, vector<1x28x384xf32>
    %11 = vector.shape_cast %10 : vector<1x28x384xf32> to vector<28x384xf32>
    %cst_9 = arith.constant dense<0.000000e+00> : vector<24x384xf32>
    %12 = tpu.matmul %9, %11, %cst_9 {dimension_numbers = #tpu.dot_dimension_numbers<[1], [0], [0], [1], [0, 0, 1, 1], [], []>} : vector<24x28xf32>, vector<28x384xf32>, vector<24x384xf32> -> vector<24x384xf32>
    %13 = arith.addf %8, %12 : vector<24x384xf32>
    %14 = vector.extract_strided_slice %1 {offsets = [2, 0], sizes = [24, 28], strides = [1, 1]} : vector<28x28xf32> to vector<24x28xf32>
    %c2 = arith.constant 2 : index
    %c0_10 = arith.constant 0 : index
    %c0_11 = arith.constant 0 : index
    %15 = vector.load %arg2[%c2, %c0_10, %c0_11] : memref<5x28x384xf32, #tpu.memory_space<vmem>>, vector<1x28x384xf32>
    %16 = vector.shape_cast %15 : vector<1x28x384xf32> to vector<28x384xf32>
    %cst_12 = arith.constant dense<0.000000e+00> : vector<24x384xf32>
    %17 = tpu.matmul %14, %16, %cst_12 {dimension_numbers = #tpu.dot_dimension_numbers<[1], [0], [0], [1], [0, 0, 1, 1], [], []>} : vector<24x28xf32>, vector<28x384xf32>, vector<24x384xf32> -> vector<24x384xf32>
    %18 = arith.addf %13, %17 : vector<24x384xf32>
    %19 = vector.extract_strided_slice %1 {offsets = [3, 0], sizes = [24, 28], strides = [1, 1]} : vector<28x28xf32> to vector<24x28xf32>
    %c3 = arith.constant 3 : index
    %c0_13 = arith.constant 0 : index
    %c0_14 = arith.constant 0 : index
    %20 = vector.load %arg2[%c3, %c0_13, %c0_14] : memref<5x28x384xf32, #tpu.memory_space<vmem>>, vector<1x28x384xf32>
    %21 = vector.shape_cast %20 : vector<1x28x384xf32> to vector<28x384xf32>
    %cst_15 = arith.constant dense<0.000000e+00> : vector<24x384xf32>
    %22 = tpu.matmul %19, %21, %cst_15 {dimension_numbers = #tpu.dot_dimension_numbers<[1], [0], [0], [1], [0, 0, 1, 1], [], []>} : vector<24x28xf32>, vector<28x384xf32>, vector<24x384xf32> -> vector<24x384xf32>
    %23 = arith.addf %18, %22 : vector<24x384xf32>
    %24 = vector.extract_strided_slice %1 {offsets = [4, 0], sizes = [24, 28], strides = [1, 1]} : vector<28x28xf32> to vector<24x28xf32>
    %c4 = arith.constant 4 : index
    %c0_16 = arith.constant 0 : index
    %c0_17 = arith.constant 0 : index
    %25 = vector.load %arg2[%c4, %c0_16, %c0_17] : memref<5x28x384xf32, #tpu.memory_space<vmem>>, vector<1x28x384xf32>
    %26 = vector.shape_cast %25 : vector<1x28x384xf32> to vector<28x384xf32>
    %cst_18 = arith.constant dense<0.000000e+00> : vector<24x384xf32>
    %27 = tpu.matmul %24, %26, %cst_18 {dimension_numbers = #tpu.dot_dimension_numbers<[1], [0], [0], [1], [0, 0, 1, 1], [], []>} : vector<24x28xf32>, vector<28x384xf32>, vector<24x384xf32> -> vector<24x384xf32>
    %28 = arith.addf %23, %27 : vector<24x384xf32>
    %cst_19 = arith.constant 0.000000e+00 : f32
    %29 = vector.broadcast %cst_19 : f32 to vector<24x384xf32>
    %30 = arith.maximumf %28, %29 : vector<24x384xf32>
    %c0_20 = arith.constant 0 : index
    %c0_21 = arith.constant 0 : index
    %31 = vector.load %arg5[%c0_20, %c0_21] : memref<1x640xf32, #tpu.memory_space<vmem>>, vector<1x640xf32>
    %32 = vector.extract_strided_slice %30 {offsets = [0, 0], sizes = [20, 384], strides = [1, 1]} : vector<24x384xf32> to vector<20x384xf32>
    %c0_22 = arith.constant 0 : index
    %c0_23 = arith.constant 0 : index
    %c0_24 = arith.constant 0 : index
    %33 = vector.load %arg4[%c0_22, %c0_23, %c0_24] : memref<5x384x640xf32, #tpu.memory_space<vmem>>, vector<1x384x640xf32>
    %34 = vector.shape_cast %33 : vector<1x384x640xf32> to vector<384x640xf32>
    %cst_25 = arith.constant dense<0.000000e+00> : vector<20x640xf32>
    %35 = tpu.matmul %32, %34, %cst_25 {dimension_numbers = #tpu.dot_dimension_numbers<[1], [0], [0], [1], [0, 0, 1, 1], [], []>} : vector<20x384xf32>, vector<384x640xf32>, vector<20x640xf32> -> vector<20x640xf32>
    %36 = vector.broadcast %31 : vector<1x640xf32> to vector<20x640xf32>
    %37 = arith.addf %36, %35 : vector<20x640xf32>
    %38 = vector.extract_strided_slice %30 {offsets = [1, 0], sizes = [20, 384], strides = [1, 1]} : vector<24x384xf32> to vector<20x384xf32>
    %c1_26 = arith.constant 1 : index
    %c0_27 = arith.constant 0 : index
    %c0_28 = arith.constant 0 : index
    %39 = vector.load %arg4[%c1_26, %c0_27, %c0_28] : memref<5x384x640xf32, #tpu.memory_space<vmem>>, vector<1x384x640xf32>
    %40 = vector.shape_cast %39 : vector<1x384x640xf32> to vector<384x640xf32>
    %cst_29 = arith.constant dense<0.000000e+00> : vector<20x640xf32>
    %41 = tpu.matmul %38, %40, %cst_29 {dimension_numbers = #tpu.dot_dimension_numbers<[1], [0], [0], [1], [0, 0, 1, 1], [], []>} : vector<20x384xf32>, vector<384x640xf32>, vector<20x640xf32> -> vector<20x640xf32>
    %42 = arith.addf %37, %41 : vector<20x640xf32>
    %43 = vector.extract_strided_slice %30 {offsets = [2, 0], sizes = [20, 384], strides = [1, 1]} : vector<24x384xf32> to vector<20x384xf32>
    %c2_30 = arith.constant 2 : index
    %c0_31 = arith.constant 0 : index
    %c0_32 = arith.constant 0 : index
    %44 = vector.load %arg4[%c2_30, %c0_31, %c0_32] : memref<5x384x640xf32, #tpu.memory_space<vmem>>, vector<1x384x640xf32>
    %45 = vector.shape_cast %44 : vector<1x384x640xf32> to vector<384x640xf32>
    %cst_33 = arith.constant dense<0.000000e+00> : vector<20x640xf32>
    %46 = tpu.matmul %43, %45, %cst_33 {dimension_numbers = #tpu.dot_dimension_numbers<[1], [0], [0], [1], [0, 0, 1, 1], [], []>} : vector<20x384xf32>, vector<384x640xf32>, vector<20x640xf32> -> vector<20x640xf32>
    %47 = arith.addf %42, %46 : vector<20x640xf32>
    %48 = vector.extract_strided_slice %30 {offsets = [3, 0], sizes = [20, 384], strides = [1, 1]} : vector<24x384xf32> to vector<20x384xf32>
    %c3_34 = arith.constant 3 : index
    %c0_35 = arith.constant 0 : index
    %c0_36 = arith.constant 0 : index
    %49 = vector.load %arg4[%c3_34, %c0_35, %c0_36] : memref<5x384x640xf32, #tpu.memory_space<vmem>>, vector<1x384x640xf32>
    %50 = vector.shape_cast %49 : vector<1x384x640xf32> to vector<384x640xf32>
    %cst_37 = arith.constant dense<0.000000e+00> : vector<20x640xf32>
    %51 = tpu.matmul %48, %50, %cst_37 {dimension_numbers = #tpu.dot_dimension_numbers<[1], [0], [0], [1], [0, 0, 1, 1], [], []>} : vector<20x384xf32>, vector<384x640xf32>, vector<20x640xf32> -> vector<20x640xf32>
    %52 = arith.addf %47, %51 : vector<20x640xf32>
    %53 = vector.extract_strided_slice %30 {offsets = [4, 0], sizes = [20, 384], strides = [1, 1]} : vector<24x384xf32> to vector<20x384xf32>
    %c4_38 = arith.constant 4 : index
    %c0_39 = arith.constant 0 : index
    %c0_40 = arith.constant 0 : index
    %54 = vector.load %arg4[%c4_38, %c0_39, %c0_40] : memref<5x384x640xf32, #tpu.memory_space<vmem>>, vector<1x384x640xf32>
    %55 = vector.shape_cast %54 : vector<1x384x640xf32> to vector<384x640xf32>
    %cst_41 = arith.constant dense<0.000000e+00> : vector<20x640xf32>
    %56 = tpu.matmul %53, %55, %cst_41 {dimension_numbers = #tpu.dot_dimension_numbers<[1], [0], [0], [1], [0, 0, 1, 1], [], []>} : vector<20x384xf32>, vector<384x640xf32>, vector<20x640xf32> -> vector<20x640xf32>
    %57 = arith.addf %52, %56 : vector<20x640xf32>
    %cst_42 = arith.constant 0.000000e+00 : f32
    %58 = vector.broadcast %cst_42 : f32 to vector<20x640xf32>
    %59 = arith.maximumf %57, %58 : vector<20x640xf32>
    %60 = vector.extract_strided_slice %59 {offsets = [0, 0], sizes = [20, 32], strides = [1, 1]} : vector<20x640xf32> to vector<20x32xf32>
    %61 = vector.extract_strided_slice %59 {offsets = [0, 32], sizes = [20, 32], strides = [1, 1]} : vector<20x640xf32> to vector<20x32xf32>
    %62 = arith.maximumf %60, %61 : vector<20x32xf32>
    %c0_43 = arith.constant 0 : index
    %c0_44 = arith.constant 0 : index
    %63 = vector.load %arg13[%c0_43, %c0_44] : memref<20x320xf32, #tpu.memory_space<vmem>>, vector<20x32xf32>
    tpu.vector_store %arg13[%c0_43, %c0_44], %62 {strides = array<i32>} : memref<20x320xf32, #tpu.memory_space<vmem>>, vector<20x32xf32>,
    %64 = vector.extract_strided_slice %59 {offsets = [0, 64], sizes = [20, 32], strides = [1, 1]} : vector<20x640xf32> to vector<20x32xf32>
    %65 = vector.extract_strided_slice %59 {offsets = [0, 96], sizes = [20, 32], strides = [1, 1]} : vector<20x640xf32> to vector<20x32xf32>
    %66 = arith.maximumf %64, %65 : vector<20x32xf32>
    %c0_45 = arith.constant 0 : index
    %c32 = arith.constant 32 : index
    %67 = vector.load %arg13[%c0_45, %c32] : memref<20x320xf32, #tpu.memory_space<vmem>>, vector<20x32xf32>
    tpu.vector_store %arg13[%c0_45, %c32], %66 {strides = array<i32>} : memref<20x320xf32, #tpu.memory_space<vmem>>, vector<20x32xf32>,
    %68 = vector.extract_strided_slice %59 {offsets = [0, 128], sizes = [20, 32], strides = [1, 1]} : vector<20x640xf32> to vector<20x32xf32>
    %69 = vector.extract_strided_slice %59 {offsets = [0, 160], sizes = [20, 32], strides = [1, 1]} : vector<20x640xf32> to vector<20x32xf32>
    %70 = arith.maximumf %68, %69 : vector<20x32xf32>
    %c0_46 = arith.constant 0 : index
    %c64 = arith.constant 64 : index
    %71 = vector.load %arg13[%c0_46, %c64] : memref<20x320xf32, #tpu.memory_space<vmem>>, vector<20x32xf32>
    tpu.vector_store %arg13[%c0_46, %c64], %70 {strides = array<i32>} : memref<20x320xf32, #tpu.memory_space<vmem>>, vector<20x32xf32>,
    %72 = vector.extract_strided_slice %59 {offsets = [0, 192], sizes = [20, 32], strides = [1, 1]} : vector<20x640xf32> to vector<20x32xf32>
    %73 = vector.extract_strided_slice %59 {offsets = [0, 224], sizes = [20, 32], strides = [1, 1]} : vector<20x640xf32> to vector<20x32xf32>
    %74 = arith.maximumf %72, %73 : vector<20x32xf32>
    %c0_47 = arith.constant 0 : index
    %c96 = arith.constant 96 : index
    %75 = vector.load %arg13[%c0_47, %c96] : memref<20x320xf32, #tpu.memory_space<vmem>>, vector<20x32xf32>
    tpu.vector_store %arg13[%c0_47, %c96], %74 {strides = array<i32>} : memref<20x320xf32, #tpu.memory_space<vmem>>, vector<20x32xf32>,
    %76 = vector.extract_strided_slice %59 {offsets = [0, 256], sizes = [20, 32], strides = [1, 1]} : vector<20x640xf32> to vector<20x32xf32>
    %77 = vector.extract_strided_slice %59 {offsets = [0, 288], sizes = [20, 32], strides = [1, 1]} : vector<20x640xf32> to vector<20x32xf32>
    %78 = arith.maximumf %76, %77 : vector<20x32xf32>
    %c0_48 = arith.constant 0 : index
    %c128 = arith.constant 128 : index
    %79 = vector.load %arg13[%c0_48, %c128] : memref<20x320xf32, #tpu.memory_space<vmem>>, vector<20x32xf32>
    tpu.vector_store %arg13[%c0_48, %c128], %78 {strides = array<i32>} : memref<20x320xf32, #tpu.memory_space<vmem>>, vector<20x32xf32>,
    %80 = vector.extract_strided_slice %59 {offsets = [0, 320], sizes = [20, 32], strides = [1, 1]} : vector<20x640xf32> to vector<20x32xf32>
    %81 = vector.extract_strided_slice %59 {offsets = [0, 352], sizes = [20, 32], strides = [1, 1]} : vector<20x640xf32> to vector<20x32xf32>
    %82 = arith.maximumf %80, %81 : vector<20x32xf32>
    %c0_49 = arith.constant 0 : index
    %c160 = arith.constant 160 : index
    %83 = vector.load %arg13[%c0_49, %c160] : memref<20x320xf32, #tpu.memory_space<vmem>>, vector<20x32xf32>
    tpu.vector_store %arg13[%c0_49, %c160], %82 {strides = array<i32>} : memref<20x320xf32, #tpu.memory_space<vmem>>, vector<20x32xf32>,
    %84 = vector.extract_strided_slice %59 {offsets = [0, 384], sizes = [20, 32], strides = [1, 1]} : vector<20x640xf32> to vector<20x32xf32>
    %85 = vector.extract_strided_slice %59 {offsets = [0, 416], sizes = [20, 32], strides = [1, 1]} : vector<20x640xf32> to vector<20x32xf32>
    %86 = arith.maximumf %84, %85 : vector<20x32xf32>
    %c0_50 = arith.constant 0 : index
    %c192 = arith.constant 192 : index
    %87 = vector.load %arg13[%c0_50, %c192] : memref<20x320xf32, #tpu.memory_space<vmem>>, vector<20x32xf32>
    tpu.vector_store %arg13[%c0_50, %c192], %86 {strides = array<i32>} : memref<20x320xf32, #tpu.memory_space<vmem>>, vector<20x32xf32>,
    %88 = vector.extract_strided_slice %59 {offsets = [0, 448], sizes = [20, 32], strides = [1, 1]} : vector<20x640xf32> to vector<20x32xf32>
    %89 = vector.extract_strided_slice %59 {offsets = [0, 480], sizes = [20, 32], strides = [1, 1]} : vector<20x640xf32> to vector<20x32xf32>
    %90 = arith.maximumf %88, %89 : vector<20x32xf32>
    %c0_51 = arith.constant 0 : index
    %c224 = arith.constant 224 : index
    %91 = vector.load %arg13[%c0_51, %c224] : memref<20x320xf32, #tpu.memory_space<vmem>>, vector<20x32xf32>
    tpu.vector_store %arg13[%c0_51, %c224], %90 {strides = array<i32>} : memref<20x320xf32, #tpu.memory_space<vmem>>, vector<20x32xf32>,
    %92 = vector.extract_strided_slice %59 {offsets = [0, 512], sizes = [20, 32], strides = [1, 1]} : vector<20x640xf32> to vector<20x32xf32>
    %93 = vector.extract_strided_slice %59 {offsets = [0, 544], sizes = [20, 32], strides = [1, 1]} : vector<20x640xf32> to vector<20x32xf32>
    %94 = arith.maximumf %92, %93 : vector<20x32xf32>
    %c0_52 = arith.constant 0 : index
    %c256 = arith.constant 256 : index
    %95 = vector.load %arg13[%c0_52, %c256] : memref<20x320xf32, #tpu.memory_space<vmem>>, vector<20x32xf32>
    tpu.vector_store %arg13[%c0_52, %c256], %94 {strides = array<i32>} : memref<20x320xf32, #tpu.memory_space<vmem>>, vector<20x32xf32>,
    %96 = vector.extract_strided_slice %59 {offsets = [0, 576], sizes = [20, 32], strides = [1, 1]} : vector<20x640xf32> to vector<20x32xf32>
    %97 = vector.extract_strided_slice %59 {offsets = [0, 608], sizes = [20, 32], strides = [1, 1]} : vector<20x640xf32> to vector<20x32xf32>
    %98 = arith.maximumf %96, %97 : vector<20x32xf32>
    %c0_53 = arith.constant 0 : index
    %c288 = arith.constant 288 : index
    %99 = vector.load %arg13[%c0_53, %c288] : memref<20x320xf32, #tpu.memory_space<vmem>>, vector<20x32xf32>
    tpu.vector_store %arg13[%c0_53, %c288], %98 {strides = array<i32>} : memref<20x320xf32, #tpu.memory_space<vmem>>, vector<20x32xf32>,
    %c0_54 = arith.constant 0 : index
    %c0_55 = arith.constant 0 : index
    %100 = vector.load %arg13[%c0_54, %c0_55] : memref<20x320xf32, #tpu.memory_space<vmem>>, vector<1x320xf32>
    %c1_56 = arith.constant 1 : index
    %c0_57 = arith.constant 0 : index
    %101 = vector.load %arg13[%c1_56, %c0_57] : memref<20x320xf32, #tpu.memory_space<vmem>>, vector<1x320xf32>
    %102 = arith.maximumf %100, %101 : vector<1x320xf32>
    %c0_58 = arith.constant 0 : index
    %c0_59 = arith.constant 0 : index
    %103 = vector.load %arg14[%c0_58, %c0_59] : memref<10x320xf32, #tpu.memory_space<vmem>>, vector<1x320xf32>
    tpu.vector_store %arg14[%c0_58, %c0_59], %102 {strides = array<i32>} : memref<10x320xf32, #tpu.memory_space<vmem>>, vector<1x320xf32>,
    %c2_60 = arith.constant 2 : index
    %c0_61 = arith.constant 0 : index
    %104 = vector.load %arg13[%c2_60, %c0_61] : memref<20x320xf32, #tpu.memory_space<vmem>>, vector<1x320xf32>
    %c3_62 = arith.constant 3 : index
    %c0_63 = arith.constant 0 : index
    %105 = vector.load %arg13[%c3_62, %c0_63] : memref<20x320xf32, #tpu.memory_space<vmem>>, vector<1x320xf32>
    %106 = arith.maximumf %104, %105 : vector<1x320xf32>
    %c1_64 = arith.constant 1 : index
    %c0_65 = arith.constant 0 : index
    %107 = vector.load %arg14[%c1_64, %c0_65] : memref<10x320xf32, #tpu.memory_space<vmem>>, vector<1x320xf32>
    tpu.vector_store %arg14[%c1_64, %c0_65], %106 {strides = array<i32>} : memref<10x320xf32, #tpu.memory_space<vmem>>, vector<1x320xf32>,
    %c4_66 = arith.constant 4 : index
    %c0_67 = arith.constant 0 : index
    %108 = vector.load %arg13[%c4_66, %c0_67] : memref<20x320xf32, #tpu.memory_space<vmem>>, vector<1x320xf32>
    %c5 = arith.constant 5 : index
    %c0_68 = arith.constant 0 : index
    %109 = vector.load %arg13[%c5, %c0_68] : memref<20x320xf32, #tpu.memory_space<vmem>>, vector<1x320xf32>
    %110 = arith.maximumf %108, %109 : vector<1x320xf32>
    %c2_69 = arith.constant 2 : index
    %c0_70 = arith.constant 0 : index
    %111 = vector.load %arg14[%c2_69, %c0_70] : memref<10x320xf32, #tpu.memory_space<vmem>>, vector<1x320xf32>
    tpu.vector_store %arg14[%c2_69, %c0_70], %110 {strides = array<i32>} : memref<10x320xf32, #tpu.memory_space<vmem>>, vector<1x320xf32>,
    %c6 = arith.constant 6 : index
    %c0_71 = arith.constant 0 : index
    %112 = vector.load %arg13[%c6, %c0_71] : memref<20x320xf32, #tpu.memory_space<vmem>>, vector<1x320xf32>
    %c7 = arith.constant 7 : index
    %c0_72 = arith.constant 0 : index
    %113 = vector.load %arg13[%c7, %c0_72] : memref<20x320xf32, #tpu.memory_space<vmem>>, vector<1x320xf32>
    %114 = arith.maximumf %112, %113 : vector<1x320xf32>
    %c3_73 = arith.constant 3 : index
    %c0_74 = arith.constant 0 : index
    %115 = vector.load %arg14[%c3_73, %c0_74] : memref<10x320xf32, #tpu.memory_space<vmem>>, vector<1x320xf32>
    tpu.vector_store %arg14[%c3_73, %c0_74], %114 {strides = array<i32>} : memref<10x320xf32, #tpu.memory_space<vmem>>, vector<1x320xf32>,
    %c8 = arith.constant 8 : index
    %c0_75 = arith.constant 0 : index
    %116 = vector.load %arg13[%c8, %c0_75] : memref<20x320xf32, #tpu.memory_space<vmem>>, vector<1x320xf32>
    %c9 = arith.constant 9 : index
    %c0_76 = arith.constant 0 : index
    %117 = vector.load %arg13[%c9, %c0_76] : memref<20x320xf32, #tpu.memory_space<vmem>>, vector<1x320xf32>
    %118 = arith.maximumf %116, %117 : vector<1x320xf32>
    %c4_77 = arith.constant 4 : index
    %c0_78 = arith.constant 0 : index
    %119 = vector.load %arg14[%c4_77, %c0_78] : memref<10x320xf32, #tpu.memory_space<vmem>>, vector<1x320xf32>
    tpu.vector_store %arg14[%c4_77, %c0_78], %118 {strides = array<i32>} : memref<10x320xf32, #tpu.memory_space<vmem>>, vector<1x320xf32>,
    %c10 = arith.constant 10 : index
    %c0_79 = arith.constant 0 : index
    %120 = vector.load %arg13[%c10, %c0_79] : memref<20x320xf32, #tpu.memory_space<vmem>>, vector<1x320xf32>
    %c11 = arith.constant 11 : index
    %c0_80 = arith.constant 0 : index
    %121 = vector.load %arg13[%c11, %c0_80] : memref<20x320xf32, #tpu.memory_space<vmem>>, vector<1x320xf32>
    %122 = arith.maximumf %120, %121 : vector<1x320xf32>
    %c5_81 = arith.constant 5 : index
    %c0_82 = arith.constant 0 : index
    %123 = vector.load %arg14[%c5_81, %c0_82] : memref<10x320xf32, #tpu.memory_space<vmem>>, vector<1x320xf32>
    tpu.vector_store %arg14[%c5_81, %c0_82], %122 {strides = array<i32>} : memref<10x320xf32, #tpu.memory_space<vmem>>, vector<1x320xf32>,
    %c12 = arith.constant 12 : index
    %c0_83 = arith.constant 0 : index
    %124 = vector.load %arg13[%c12, %c0_83] : memref<20x320xf32, #tpu.memory_space<vmem>>, vector<1x320xf32>
    %c13 = arith.constant 13 : index
    %c0_84 = arith.constant 0 : index
    %125 = vector.load %arg13[%c13, %c0_84] : memref<20x320xf32, #tpu.memory_space<vmem>>, vector<1x320xf32>
    %126 = arith.maximumf %124, %125 : vector<1x320xf32>
    %c6_85 = arith.constant 6 : index
    %c0_86 = arith.constant 0 : index
    %127 = vector.load %arg14[%c6_85, %c0_86] : memref<10x320xf32, #tpu.memory_space<vmem>>, vector<1x320xf32>
    tpu.vector_store %arg14[%c6_85, %c0_86], %126 {strides = array<i32>} : memref<10x320xf32, #tpu.memory_space<vmem>>, vector<1x320xf32>,
    %c14 = arith.constant 14 : index
    %c0_87 = arith.constant 0 : index
    %128 = vector.load %arg13[%c14, %c0_87] : memref<20x320xf32, #tpu.memory_space<vmem>>, vector<1x320xf32>
    %c15 = arith.constant 15 : index
    %c0_88 = arith.constant 0 : index
    %129 = vector.load %arg13[%c15, %c0_88] : memref<20x320xf32, #tpu.memory_space<vmem>>, vector<1x320xf32>
    %130 = arith.maximumf %128, %129 : vector<1x320xf32>
    %c7_89 = arith.constant 7 : index
    %c0_90 = arith.constant 0 : index
    %131 = vector.load %arg14[%c7_89, %c0_90] : memref<10x320xf32, #tpu.memory_space<vmem>>, vector<1x320xf32>
    tpu.vector_store %arg14[%c7_89, %c0_90], %130 {strides = array<i32>} : memref<10x320xf32, #tpu.memory_space<vmem>>, vector<1x320xf32>,
    %c16 = arith.constant 16 : index
    %c0_91 = arith.constant 0 : index
    %132 = vector.load %arg13[%c16, %c0_91] : memref<20x320xf32, #tpu.memory_space<vmem>>, vector<1x320xf32>
    %c17 = arith.constant 17 : index
    %c0_92 = arith.constant 0 : index
    %133 = vector.load %arg13[%c17, %c0_92] : memref<20x320xf32, #tpu.memory_space<vmem>>, vector<1x320xf32>
    %134 = arith.maximumf %132, %133 : vector<1x320xf32>
    %c8_93 = arith.constant 8 : index
    %c0_94 = arith.constant 0 : index
    %135 = vector.load %arg14[%c8_93, %c0_94] : memref<10x320xf32, #tpu.memory_space<vmem>>, vector<1x320xf32>
    tpu.vector_store %arg14[%c8_93, %c0_94], %134 {strides = array<i32>} : memref<10x320xf32, #tpu.memory_space<vmem>>, vector<1x320xf32>,
    %c18 = arith.constant 18 : index
    %c0_95 = arith.constant 0 : index
    %136 = vector.load %arg13[%c18, %c0_95] : memref<20x320xf32, #tpu.memory_space<vmem>>, vector<1x320xf32>
    %c19 = arith.constant 19 : index
    %c0_96 = arith.constant 0 : index
    %137 = vector.load %arg13[%c19, %c0_96] : memref<20x320xf32, #tpu.memory_space<vmem>>, vector<1x320xf32>
    %138 = arith.maximumf %136, %137 : vector<1x320xf32>
    %c9_97 = arith.constant 9 : index
    %c0_98 = arith.constant 0 : index
    %139 = vector.load %arg14[%c9_97, %c0_98] : memref<10x320xf32, #tpu.memory_space<vmem>>, vector<1x320xf32>
    tpu.vector_store %arg14[%c9_97, %c0_98], %138 {strides = array<i32>} : memref<10x320xf32, #tpu.memory_space<vmem>>, vector<1x320xf32>,
    %c0_99 = arith.constant 0 : index
    %c0_100 = arith.constant 0 : index
    %140 = vector.load %arg14[%c0_99, %c0_100] : memref<10x320xf32, #tpu.memory_space<vmem>>, vector<10x320xf32>
    %c0_101 = arith.constant 0 : index
    %c0_102 = arith.constant 0 : index
    %141 = vector.load %arg7[%c0_101, %c0_102] : memref<1x384xf32, #tpu.memory_space<vmem>>, vector<1x384xf32>
    %142 = vector.extract_strided_slice %140 {offsets = [0, 0], sizes = [6, 320], strides = [1, 1]} : vector<10x320xf32> to vector<6x320xf32>
    %c0_103 = arith.constant 0 : index
    %c0_104 = arith.constant 0 : index
    %c0_105 = arith.constant 0 : index
    %143 = vector.load %arg6[%c0_103, %c0_104, %c0_105] : memref<5x320x384xf32, #tpu.memory_space<vmem>>, vector<1x320x384xf32>
    %144 = vector.shape_cast %143 : vector<1x320x384xf32> to vector<320x384xf32>
    %cst_106 = arith.constant dense<0.000000e+00> : vector<6x384xf32>
    %145 = tpu.matmul %142, %144, %cst_106 {dimension_numbers = #tpu.dot_dimension_numbers<[1], [0], [0], [1], [0, 0, 1, 1], [], []>} : vector<6x320xf32>, vector<320x384xf32>, vector<6x384xf32> -> vector<6x384xf32>
    %146 = vector.broadcast %141 : vector<1x384xf32> to vector<6x384xf32>
    %147 = arith.addf %146, %145 : vector<6x384xf32>
    %148 = vector.extract_strided_slice %140 {offsets = [1, 0], sizes = [6, 320], strides = [1, 1]} : vector<10x320xf32> to vector<6x320xf32>
    %c1_107 = arith.constant 1 : index
    %c0_108 = arith.constant 0 : index
    %c0_109 = arith.constant 0 : index
    %149 = vector.load %arg6[%c1_107, %c0_108, %c0_109] : memref<5x320x384xf32, #tpu.memory_space<vmem>>, vector<1x320x384xf32>
    %150 = vector.shape_cast %149 : vector<1x320x384xf32> to vector<320x384xf32>
    %cst_110 = arith.constant dense<0.000000e+00> : vector<6x384xf32>
    %151 = tpu.matmul %148, %150, %cst_110 {dimension_numbers = #tpu.dot_dimension_numbers<[1], [0], [0], [1], [0, 0, 1, 1], [], []>} : vector<6x320xf32>, vector<320x384xf32>, vector<6x384xf32> -> vector<6x384xf32>
    %152 = arith.addf %147, %151 : vector<6x384xf32>
    %153 = vector.extract_strided_slice %140 {offsets = [2, 0], sizes = [6, 320], strides = [1, 1]} : vector<10x320xf32> to vector<6x320xf32>
    %c2_111 = arith.constant 2 : index
    %c0_112 = arith.constant 0 : index
    %c0_113 = arith.constant 0 : index
    %154 = vector.load %arg6[%c2_111, %c0_112, %c0_113] : memref<5x320x384xf32, #tpu.memory_space<vmem>>, vector<1x320x384xf32>
    %155 = vector.shape_cast %154 : vector<1x320x384xf32> to vector<320x384xf32>
    %cst_114 = arith.constant dense<0.000000e+00> : vector<6x384xf32>
    %156 = tpu.matmul %153, %155, %cst_114 {dimension_numbers = #tpu.dot_dimension_numbers<[1], [0], [0], [1], [0, 0, 1, 1], [], []>} : vector<6x320xf32>, vector<320x384xf32>, vector<6x384xf32> -> vector<6x384xf32>
    %157 = arith.addf %152, %156 : vector<6x384xf32>
    %158 = vector.extract_strided_slice %140 {offsets = [3, 0], sizes = [6, 320], strides = [1, 1]} : vector<10x320xf32> to vector<6x320xf32>
    %c3_115 = arith.constant 3 : index
    %c0_116 = arith.constant 0 : index
    %c0_117 = arith.constant 0 : index
    %159 = vector.load %arg6[%c3_115, %c0_116, %c0_117] : memref<5x320x384xf32, #tpu.memory_space<vmem>>, vector<1x320x384xf32>
    %160 = vector.shape_cast %159 : vector<1x320x384xf32> to vector<320x384xf32>
    %cst_118 = arith.constant dense<0.000000e+00> : vector<6x384xf32>
    %161 = tpu.matmul %158, %160, %cst_118 {dimension_numbers = #tpu.dot_dimension_numbers<[1], [0], [0], [1], [0, 0, 1, 1], [], []>} : vector<6x320xf32>, vector<320x384xf32>, vector<6x384xf32> -> vector<6x384xf32>
    %162 = arith.addf %157, %161 : vector<6x384xf32>
    %163 = vector.extract_strided_slice %140 {offsets = [4, 0], sizes = [6, 320], strides = [1, 1]} : vector<10x320xf32> to vector<6x320xf32>
    %c4_119 = arith.constant 4 : index
    %c0_120 = arith.constant 0 : index
    %c0_121 = arith.constant 0 : index
    %164 = vector.load %arg6[%c4_119, %c0_120, %c0_121] : memref<5x320x384xf32, #tpu.memory_space<vmem>>, vector<1x320x384xf32>
    %165 = vector.shape_cast %164 : vector<1x320x384xf32> to vector<320x384xf32>
    %cst_122 = arith.constant dense<0.000000e+00> : vector<6x384xf32>
    %166 = tpu.matmul %163, %165, %cst_122 {dimension_numbers = #tpu.dot_dimension_numbers<[1], [0], [0], [1], [0, 0, 1, 1], [], []>} : vector<6x320xf32>, vector<320x384xf32>, vector<6x384xf32> -> vector<6x384xf32>
    %167 = arith.addf %162, %166 : vector<6x384xf32>
    %cst_123 = arith.constant 0.000000e+00 : f32
    %168 = vector.broadcast %cst_123 : f32 to vector<6x384xf32>
    %169 = arith.maximumf %167, %168 : vector<6x384xf32>
    %170 = vector.extract_strided_slice %169 {offsets = [0, 0], sizes = [6, 64], strides = [1, 1]} : vector<6x384xf32> to vector<6x64xf32>
    %171 = vector.extract_strided_slice %169 {offsets = [0, 64], sizes = [6, 64], strides = [1, 1]} : vector<6x384xf32> to vector<6x64xf32>
    %172 = arith.maximumf %170, %171 : vector<6x64xf32>
    %c0_124 = arith.constant 0 : index
    %c0_125 = arith.constant 0 : index
    %173 = vector.load %arg15[%c0_124, %c0_125] : memref<6x192xf32, #tpu.memory_space<vmem>>, vector<6x64xf32>
    tpu.vector_store %arg15[%c0_124, %c0_125], %172 {strides = array<i32>} : memref<6x192xf32, #tpu.memory_space<vmem>>, vector<6x64xf32>,
    %174 = vector.extract_strided_slice %169 {offsets = [0, 128], sizes = [6, 64], strides = [1, 1]} : vector<6x384xf32> to vector<6x64xf32>
    %175 = vector.extract_strided_slice %169 {offsets = [0, 192], sizes = [6, 64], strides = [1, 1]} : vector<6x384xf32> to vector<6x64xf32>
    %176 = arith.maximumf %174, %175 : vector<6x64xf32>
    %c0_126 = arith.constant 0 : index
    %c64_127 = arith.constant 64 : index
    %177 = vector.load %arg15[%c0_126, %c64_127] : memref<6x192xf32, #tpu.memory_space<vmem>>, vector<6x64xf32>
    tpu.vector_store %arg15[%c0_126, %c64_127], %176 {strides = array<i32>} : memref<6x192xf32, #tpu.memory_space<vmem>>, vector<6x64xf32>,
    %178 = vector.extract_strided_slice %169 {offsets = [0, 256], sizes = [6, 64], strides = [1, 1]} : vector<6x384xf32> to vector<6x64xf32>
    %179 = vector.extract_strided_slice %169 {offsets = [0, 320], sizes = [6, 64], strides = [1, 1]} : vector<6x384xf32> to vector<6x64xf32>
    %180 = arith.maximumf %178, %179 : vector<6x64xf32>
    %c0_128 = arith.constant 0 : index
    %c128_129 = arith.constant 128 : index
    %181 = vector.load %arg15[%c0_128, %c128_129] : memref<6x192xf32, #tpu.memory_space<vmem>>, vector<6x64xf32>
    tpu.vector_store %arg15[%c0_128, %c128_129], %180 {strides = array<i32>} : memref<6x192xf32, #tpu.memory_space<vmem>>, vector<6x64xf32>,
    %c0_130 = arith.constant 0 : index
    %c0_131 = arith.constant 0 : index
    %182 = vector.load %arg15[%c0_130, %c0_131] : memref<6x192xf32, #tpu.memory_space<vmem>>, vector<1x192xf32>
    %c1_132 = arith.constant 1 : index
    %c0_133 = arith.constant 0 : index
    %183 = vector.load %arg15[%c1_132, %c0_133] : memref<6x192xf32, #tpu.memory_space<vmem>>, vector<1x192xf32>
    %184 = arith.maximumf %182, %183 : vector<1x192xf32>
    %c0_134 = arith.constant 0 : index
    %c0_135 = arith.constant 0 : index
    %185 = vector.load %arg16[%c0_134, %c0_135] : memref<3x192xf32, #tpu.memory_space<vmem>>, vector<1x192xf32>
    tpu.vector_store %arg16[%c0_134, %c0_135], %184 {strides = array<i32>} : memref<3x192xf32, #tpu.memory_space<vmem>>, vector<1x192xf32>,
    %c2_136 = arith.constant 2 : index
    %c0_137 = arith.constant 0 : index
    %186 = vector.load %arg15[%c2_136, %c0_137] : memref<6x192xf32, #tpu.memory_space<vmem>>, vector<1x192xf32>
    %c3_138 = arith.constant 3 : index
    %c0_139 = arith.constant 0 : index
    %187 = vector.load %arg15[%c3_138, %c0_139] : memref<6x192xf32, #tpu.memory_space<vmem>>, vector<1x192xf32>
    %188 = arith.maximumf %186, %187 : vector<1x192xf32>
    %c1_140 = arith.constant 1 : index
    %c0_141 = arith.constant 0 : index
    %189 = vector.load %arg16[%c1_140, %c0_141] : memref<3x192xf32, #tpu.memory_space<vmem>>, vector<1x192xf32>
    tpu.vector_store %arg16[%c1_140, %c0_141], %188 {strides = array<i32>} : memref<3x192xf32, #tpu.memory_space<vmem>>, vector<1x192xf32>,
    %c4_142 = arith.constant 4 : index
    %c0_143 = arith.constant 0 : index
    %190 = vector.load %arg15[%c4_142, %c0_143] : memref<6x192xf32, #tpu.memory_space<vmem>>, vector<1x192xf32>
    %c5_144 = arith.constant 5 : index
    %c0_145 = arith.constant 0 : index
    %191 = vector.load %arg15[%c5_144, %c0_145] : memref<6x192xf32, #tpu.memory_space<vmem>>, vector<1x192xf32>
    %192 = arith.maximumf %190, %191 : vector<1x192xf32>
    %c2_146 = arith.constant 2 : index
    %c0_147 = arith.constant 0 : index
    %193 = vector.load %arg16[%c2_146, %c0_147] : memref<3x192xf32, #tpu.memory_space<vmem>>, vector<1x192xf32>
    tpu.vector_store %arg16[%c2_146, %c0_147], %192 {strides = array<i32>} : memref<3x192xf32, #tpu.memory_space<vmem>>, vector<1x192xf32>,
    %c0_148 = arith.constant 0 : index
    %c0_149 = arith.constant 0 : index
    %194 = vector.load %arg16[%c0_148, %c0_149] : memref<3x192xf32, #tpu.memory_space<vmem>>, vector<3x192xf32>
    %c0_150 = arith.constant 0 : index
    %c0_151 = arith.constant 0 : index
    %195 = vector.load %arg9[%c0_150, %c0_151] : memref<1x100xf32, #tpu.memory_space<vmem>>, vector<1x100xf32>
    %196 = vector.extract_strided_slice %194 {offsets = [0, 0], sizes = [1, 192], strides = [1, 1]} : vector<3x192xf32> to vector<1x192xf32>
    %c0_152 = arith.constant 0 : index
    %c0_153 = arith.constant 0 : index
    %c0_154 = arith.constant 0 : index
    %197 = vector.load %arg8[%c0_152, %c0_153, %c0_154] : memref<3x192x100xf32, #tpu.memory_space<vmem>>, vector<1x192x100xf32>
    %198 = vector.shape_cast %197 : vector<1x192x100xf32> to vector<192x100xf32>
    %cst_155 = arith.constant dense<0.000000e+00> : vector<1x100xf32>
    %199 = tpu.matmul %196, %198, %cst_155 {dimension_numbers = #tpu.dot_dimension_numbers<[1], [0], [0], [1], [0, 0, 1, 1], [], []>} : vector<1x192xf32>, vector<192x100xf32>, vector<1x100xf32> -> vector<1x100xf32>
    %200 = arith.addf %195, %199 : vector<1x100xf32>
    %201 = vector.extract_strided_slice %194 {offsets = [1, 0], sizes = [1, 192], strides = [1, 1]} : vector<3x192xf32> to vector<1x192xf32>
    %c1_156 = arith.constant 1 : index
    %c0_157 = arith.constant 0 : index
    %c0_158 = arith.constant 0 : index
    %202 = vector.load %arg8[%c1_156, %c0_157, %c0_158] : memref<3x192x100xf32, #tpu.memory_space<vmem>>, vector<1x192x100xf32>
    %203 = vector.shape_cast %202 : vector<1x192x100xf32> to vector<192x100xf32>
    %cst_159 = arith.constant dense<0.000000e+00> : vector<1x100xf32>
    %204 = tpu.matmul %201, %203, %cst_159 {dimension_numbers = #tpu.dot_dimension_numbers<[1], [0], [0], [1], [0, 0, 1, 1], [], []>} : vector<1x192xf32>, vector<192x100xf32>, vector<1x100xf32> -> vector<1x100xf32>
    %205 = arith.addf %200, %204 : vector<1x100xf32>
    %206 = vector.extract_strided_slice %194 {offsets = [2, 0], sizes = [1, 192], strides = [1, 1]} : vector<3x192xf32> to vector<1x192xf32>
    %c2_160 = arith.constant 2 : index
    %c0_161 = arith.constant 0 : index
    %c0_162 = arith.constant 0 : index
    %207 = vector.load %arg8[%c2_160, %c0_161, %c0_162] : memref<3x192x100xf32, #tpu.memory_space<vmem>>, vector<1x192x100xf32>
    %208 = vector.shape_cast %207 : vector<1x192x100xf32> to vector<192x100xf32>
    %cst_163 = arith.constant dense<0.000000e+00> : vector<1x100xf32>
    %209 = tpu.matmul %206, %208, %cst_163 {dimension_numbers = #tpu.dot_dimension_numbers<[1], [0], [0], [1], [0, 0, 1, 1], [], []>} : vector<1x192xf32>, vector<192x100xf32>, vector<1x100xf32> -> vector<1x100xf32>
    %210 = arith.addf %205, %209 : vector<1x100xf32>
    %cst_164 = arith.constant 0.000000e+00 : f32
    %211 = vector.broadcast %cst_164 : f32 to vector<1x100xf32>
    %212 = arith.maximumf %210, %211 : vector<1x100xf32>
    %c0_165 = arith.constant 0 : index
    %c0_166 = arith.constant 0 : index
    %213 = vector.load %arg10[%c0_165, %c0_166] : memref<100x10xf32, #tpu.memory_space<vmem>>, vector<100x10xf32>
    %cst_167 = arith.constant dense<0.000000e+00> : vector<1x10xf32>
    %214 = tpu.matmul %212, %213, %cst_167 {dimension_numbers = #tpu.dot_dimension_numbers<[1], [0], [0], [1], [0, 0, 1, 1], [], []>} : vector<1x100xf32>, vector<100x10xf32>, vector<1x10xf32> -> vector<1x10xf32>
    %c0_168 = arith.constant 0 : index
    %c0_169 = arith.constant 0 : index
    %215 = vector.load %arg11[%c0_168, %c0_169] : memref<1x10xf32, #tpu.memory_space<vmem>>, vector<1x10xf32>
    %216 = arith.addf %214, %215 : vector<1x10xf32>
    %c0_170 = arith.constant 0 : index
    %c0_171 = arith.constant 0 : index
    %c0_172 = arith.constant 0 : index
    %217 = vector.load %arg12[%c0_170, %c0_171, %c0_172] : memref<1x1x10xf32, #tpu.memory_space<vmem>>, vector<1x1x10xf32>
    %218 = vector.shape_cast %217 : vector<1x1x10xf32> to vector<1x10xf32>
    %219 = vector.shape_cast %216 : vector<1x10xf32> to vector<1x1x10xf32>
    tpu.vector_store %arg12[%c0_170, %c0_171, %c0_172], %219 {strides = array<i32>} : memref<1x1x10xf32, #tpu.memory_space<vmem>>, vector<1x1x10xf32>,
    return
  }
  func.func @transform_0(%arg0: i32) -> (i32, i32, i32) {
    %c0_i32 = arith.constant 0 : i32
    %c0_i32_0 = arith.constant 0 : i32
    %c0_i32_1 = arith.constant 0 : i32
    return %arg0, %c0_i32, %c0_i32_0 : i32, i32, i32
  }
  func.func @transform_1(%arg0: i32) -> (i32, i32, i32) {
    %c0_i32 = arith.constant 0 : i32
    %c0_i32_0 = arith.constant 0 : i32
    %c0_i32_1 = arith.constant 0 : i32
    %c0_i32_2 = arith.constant 0 : i32
    return %c0_i32, %c0_i32_0, %c0_i32_1 : i32, i32, i32
  }
  func.func @transform_2(%arg0: i32) -> (i32, i32) {
    %c0_i32 = arith.constant 0 : i32
    %c0_i32_0 = arith.constant 0 : i32
    %c0_i32_1 = arith.constant 0 : i32
    return %c0_i32, %c0_i32_0 : i32, i32
  }
  func.func @transform_3(%arg0: i32) -> (i32, i32, i32) {
    %c0_i32 = arith.constant 0 : i32
    %c0_i32_0 = arith.constant 0 : i32
    %c0_i32_1 = arith.constant 0 : i32
    %c0_i32_2 = arith.constant 0 : i32
    return %c0_i32, %c0_i32_0, %c0_i32_1 : i32, i32, i32
  }
  func.func @transform_4(%arg0: i32) -> (i32, i32) {
    %c0_i32 = arith.constant 0 : i32
    %c0_i32_0 = arith.constant 0 : i32
    %c0_i32_1 = arith.constant 0 : i32
    return %c0_i32, %c0_i32_0 : i32, i32
  }
  func.func @transform_5(%arg0: i32) -> (i32, i32, i32) {
    %c0_i32 = arith.constant 0 : i32
    %c0_i32_0 = arith.constant 0 : i32
    %c0_i32_1 = arith.constant 0 : i32
    %c0_i32_2 = arith.constant 0 : i32
    return %c0_i32, %c0_i32_0, %c0_i32_1 : i32, i32, i32
  }
  func.func @transform_6(%arg0: i32) -> (i32, i32) {
    %c0_i32 = arith.constant 0 : i32
    %c0_i32_0 = arith.constant 0 : i32
    %c0_i32_1 = arith.constant 0 : i32
    return %c0_i32, %c0_i32_0 : i32, i32
  }
  func.func @transform_7(%arg0: i32) -> (i32, i32, i32) {
    %c0_i32 = arith.constant 0 : i32
    %c0_i32_0 = arith.constant 0 : i32
    %c0_i32_1 = arith.constant 0 : i32
    %c0_i32_2 = arith.constant 0 : i32
    return %c0_i32, %c0_i32_0, %c0_i32_1 : i32, i32, i32
  }
  func.func @transform_8(%arg0: i32) -> (i32, i32) {
    %c0_i32 = arith.constant 0 : i32
    %c0_i32_0 = arith.constant 0 : i32
    %c0_i32_1 = arith.constant 0 : i32
    return %c0_i32, %c0_i32_0 : i32, i32
  }
  func.func @transform_9(%arg0: i32) -> (i32, i32) {
    %c0_i32 = arith.constant 0 : i32
    %c0_i32_0 = arith.constant 0 : i32
    %c0_i32_1 = arith.constant 0 : i32
    return %c0_i32, %c0_i32_0 : i32, i32
  }
  func.func @transform_10(%arg0: i32) -> (i32, i32) {
    %c0_i32 = arith.constant 0 : i32
    %c0_i32_0 = arith.constant 0 : i32
    %c0_i32_1 = arith.constant 0 : i32
    return %c0_i32, %c0_i32_0 : i32, i32
  }
  func.func @transform_11(%arg0: i32) -> (i32, i32, i32) {
    %c0_i32 = arith.constant 0 : i32
    %c0_i32_0 = arith.constant 0 : i32
    %c0_i32_1 = arith.constant 0 : i32
    return %arg0, %c0_i32, %c0_i32_0 : i32, i32, i32
  }
}

</mosaic_0001>

<bundles_post_ra>
// kernel: cnn_forward.1
= control target key start
LH: loop header
LB: loop body
LE: loop exit
PB: predicated region body
PF: predicated region fallthrough
CT: control target
= control target key end

     0   :  { %s11845_s0 = inlined_call_operand.vmem [shape: f32[2,28,28], index: 0, kind: input, shape index: {}]   ;;  %s11846_s1 = inlined_call_operand.hbm [shape: f32[5,28,384], index: 1, kind: input, shape index: {}]   ;;  %s11847_s2 = inlined_call_operand.hbm [shape: f32[1,384], index: 2, kind: input, shape index: {}]   ;;  %s11848_s3 = inlined_call_operand.hbm [shape: f32[5,384,640], index: 3, kind: input, shape index: {}]   ;;  %s11849_s4 = inlined_call_operand.hbm [shape: f32[1,640], index: 4, kind: input, shape index: {}]   ;;  %s11850_s5 = inlined_call_operand.hbm [shape: f32[5,320,384], index: 5, kind: input, shape index: {}]   ;;  %s11851_s6 = inlined_call_operand.hbm [shape: f32[1,384], index: 6, kind: input, shape index: {}]   ;;  %s11852_s7 = inlined_call_operand.hbm [shape: f32[3,192,100], index: 7, kind: input, shape index: {}]   ;;  %s11853_s8 = inlined_call_operand.hbm [shape: f32[1,100], index: 8, kind: input, shape index: {}]   ;;  %s11854_s9 = inlined_call_operand.vmem [shape: f32[100,10], index: 9, kind: input, shape index: {}]   ;;  %s11855_s10 = inlined_call_operand.hbm [shape: f32[1,10], index: 10, kind: input, shape index: {}]   ;;  %s11856_s11 = inlined_call_operand.hbm [shape: f32[2,1,10], index: 11, kind: output, shape index: {}]  }
   0x1   :  { %11868 = sst [smem:[#allocation30_spill]] %s11846_s1 }
   0x2   :  { %11869 = sst [smem:[#allocation31_spill]] %s11847_s2 }
   0x3   :  { %16 = vsyncpa [#allocation7], 0 }
   0x4   :  { %17 = vsyncpa [#allocation10], 0 }
   0x5   :  { %18 = vsyncpa [#allocation13], 0 }
   0x6   :  { %19 = vsyncpa [#allocation16], 0 }
   0x7   :  { %20 = vsyncpa [#allocation19], 0 }
   0x8   :  { %21 = vsyncpa [#allocation8], 0 }
   0x9   :  { %23 = vsyncpa [#allocation8 + $0x1], 0  ;;  %s10064_s17 = smov 0   ;;  %s10066_s18 = smov 0  }
   0xa   :  { %s10068_s19 = smov 0   ;;  %s10070_s20 = smov 0  }
   0xb LB: > { %11870 = sst [smem:[#allocation28_spill]] %s9977_s19  ;;  %s10085_s21 = sadd.s32 4294967295, %s9981_s20   ;;  %s9981_s20 = sphi %s10070_s20, %s11903_s20   ;;  %s9977_s19 = sphi %s10068_s19, %s11900_s19   ;;  %s9973_s18 = sphi %s10066_s18, %s11902_s18   ;;  %s9969_s17 = sphi %s10064_s17, %s11901_s17  }
   0xc   : > { %s8452_s22 = sadd.s32 4294967294, %s9981_s20   ;;  %s10089_s23 = sadd.s32 1, %s9981_s20  }
   0xd   : > { %s272_s24 = sadd.s32 1, %s9977_s19  ;;  %s269_s25 = ssub.s32 %s9981_s20, %s10089_s23 }
   0xe   : > { %p282_p0 = scmp.ne.s32.totalorder %s9977_s19, %s9973_s18  ;;  %p270_p1 = scmp.eq.s32.totalorder %s269_s25, 0 }
   0xf   : > { %p283_p2 = scmp.eq.s32.totalorder %s10085_s21, 1  ;;  %p288_p3 = scmp.ne.s32.totalorder %s9973_s18, %s9969_s17 }
  0x10   : > { %p289_p4 = scmp.eq.s32.totalorder %s8452_s22, 1  ;;  %p8453_p7 = scmp.ge.s32.totalorder %s9981_s20, 1 }
  0x11   : > { %s10100_s26 = scalar_select %p270_p1, %s9977_s19, %s272_s24  }
  0x12   : > { %p10102_p5 = por %p283_p2, %p282_p0  ;;  %p10106_p6 = por %p289_p4, %p288_p3 }
  0x13   : > { %11871 = sst [smem:[#allocation29_spill]] %s10100_s26  ;;  %p296_p8 = scmp.lt.s32.totalorder %s9981_s20, 3 }
  0x14   : > { %s11872_s27 = scalar_select %p10102_p5, 1, 0 }
  0x15   : > { %s11873_s28 = scalar_select %p10106_p6, 1, 0 }
  0x16   : > { %p11857_p9 = scmp.eq.s32.totalorder %s10085_s21, 0  ;;  %p10113_p10 = pnand %p8453_p7, %p296_p8 }
  0x17   : > { %s9983_s30 = smov [#allocation9]   ;;  %s9984_s13 = smov [#allocation12]  }
  0x18   : > { %s11874_s29 = scalar_select %p10113_p10, 1, 0 }
  0x19   : > { %s322_s12 = sshll.u32 %s9983_s30, 4  ;;  %p9561_p11 = pneg %p10113_p10  ;;  %s323_s12 = int_to_ptr.vmem [resolvable:$true] %s322_s12 }
  0x1a   : > { %s346_s14 = sshll.u32 %s9984_s13, 4  ;;  %s9985_s16 = smov [#allocation15]   ;;  %s347_s14 = int_to_ptr.vmem [resolvable:$true] %s346_s14 }
  0x1b   : > { %p10121_p12 = pnand %p11857_p9, %p9561_p11  ;;  %s370_s22 = sshll.u32 %s9985_s16, 4  ;;  %s10125_s22 = int_to_ptr.vmem [resolvable:$true] %s370_s22 }
  0x1c   : > { %s9678_s25 = scalar_lea.vmem %s323_s12, 48  ;;  %s9685_s30 = scalar_lea.vmem %s323_s12, 64 }
  0x1d   : > { %p10129_p13 = pneg %p10121_p12  ;;  %p9679_p0 = scmp.ne.s32.totalorder %s323_s12, %s9678_s25 }
  0x1e   : > { %p9686_p3 = scmp.lt.s32.totalorder %s323_s12, %s323_s12  ;;  %p9687_p4 = scmp.lt.s32.totalorder %s9685_s30, %s9678_s25 }
  0x1f   : > { %p9681_p1 = pnand %p9679_p0, %p10129_p13 }
  0x20   : > { %p9688_p7 = por %p9687_p4, %p9686_p3 }
  0x21   : > { %p9682_p2 = pneg %p9681_p1 }
  0x23   : > { %p9689_p8 = pnand %p9688_p7, %p9682_p2 }
  0x25   : > { %9692 = shalt.err (!%p9689_p8)
}
  0x26   : > { %s11877_s2 = sld [smem:[#allocation31_spill]]  ;;  %s9704_s26 = scalar_lea.vmem %s347_s14, 80 }
  0x27   : > { %p9705_p11 = scmp.ne.s32.totalorder %s347_s14, %s9704_s26  ;;  %s9711_s19 = scalar_lea.vmem %s347_s14, 96 }
  0x28   : > { %p9712_p0 = scmp.lt.s32.totalorder %s347_s14, %s347_s14  ;;  %p9713_p1 = scmp.lt.s32.totalorder %s9711_s19, %s9704_s26 }
  0x29   : > { %p9707_p9 = pnand %p9705_p11, %p10129_p13 }
  0x2a   : > { %p9714_p5 = por %p9713_p1, %p9712_p0 }
  0x2b   : > { %p9708_p6 = pneg %p9707_p9 }
  0x2c   : > { %9567 = dma.hbm_to_vmem [thread:$0]  (!%p10121_p12), %s11877_s2, 48, %s323_s12, [#allocation10]  }
  0x2d   : > { %p9715_p10 = pnand %p9714_p5, %p9708_p6 }
  0x2f   : > { %9718 = shalt.err (!%p9715_p10)
}
  0x30   : > { %9573 = dma.hbm_to_vmem [thread:$0]  (!%p10121_p12), %s11849_s4, 80, %s347_s14, [#allocation13]  }
  0x31   : > { %s9730_s12 = scalar_lea.vmem %s10125_s22, 48  ;;  %s9737_s19 = scalar_lea.vmem %s10125_s22, 64 }
  0x32   : > { %p9731_p2 = scmp.ne.s32.totalorder %s10125_s22, %s9730_s12  ;;  %p9738_p5 = scmp.lt.s32.totalorder %s10125_s22, %s10125_s22 }
  0x33   : > { %p9739_p6 = scmp.lt.s32.totalorder %s9737_s19, %s9730_s12 }
  0x34   : > { %p9733_p9 = pnand %p9731_p2, %p10129_p13 }
  0x35   : > { %p9740_p10 = por %p9739_p6, %p9738_p5 }
  0x36   : > { %p9734_p3 = pneg %p9733_p9 }
  0x38   : > { %p9741_p4 = pnand %p9740_p10, %p9734_p3 }
  0x3a   : > { %9744 = shalt.err (!%p9741_p4)
}
  0x3b   : > { %9579 = dma.hbm_to_vmem [thread:$0]  (!%p10121_p12), %s11851_s6, 48, %s10125_s22, [#allocation16]  }
  0x3c   : > { %s9986_s14 = smov [#allocation18]   ;;  %s9987_s25 = smov [#allocation6]  }
  0x3d   : > { %s394_s16 = sshll.u32 %s9986_s14, 4  ;;  %s308_s30 = sshll.u32 %s9987_s25, 4  ;;  %s395_s16 = int_to_ptr.vmem [resolvable:$true] %s394_s16  ;;  %s309_s30 = int_to_ptr.vmem [resolvable:$true] %s308_s30 }
  0x3e   : > { %s9756_s2 = scalar_lea.vmem %s395_s16, 16  ;;  %s9763_s12 = scalar_lea.vmem %s395_s16, 32 }
  0x3f   : > { %p9757_p7 = scmp.ne.s32.totalorder %s395_s16, %s9756_s2  ;;  %p9764_p0 = scmp.lt.s32.totalorder %s395_s16, %s395_s16 }
  0x40   : > { %p9765_p1 = scmp.lt.s32.totalorder %s9763_s12, %s9756_s2 }
  0x41   : > { %p9759_p8 = pnand %p9757_p7, %p10129_p13 }
  0x42   : > { %p9766_p2 = por %p9765_p1, %p9764_p0 }
  0x43   : > { %p9760_p11 = pneg %p9759_p8 }
  0x45   : > { %p9767_p9 = pnand %p9766_p2, %p9760_p11 }
  0x47   : > { %9770 = shalt.err (!%p9767_p9)
}
  0x48   : > { %9585 = dma.hbm_to_vmem [thread:$0]  (!%p10121_p12), %s11853_s8, 16, %s395_s16, [#allocation19]  }
  0x49   : > { %s9782_s26 = scalar_lea.vmem %s309_s30, 7680  ;;  %p9790_p10 = scmp.lt.s32.totalorder %s309_s30, %s309_s30 }
  0x4a   : > { %p9783_p3 = scmp.ne.s32.totalorder %s309_s30, %s9782_s26  ;;  %p9791_p4 = scmp.lt.s32.totalorder %s9782_s26, %s9782_s26 }
  0x4c   : > { %p9785_p5 = pnand %p9783_p3, %p10129_p13  ;;  %p9792_p7 = por %p9791_p4, %p9790_p10 }
  0x4e   : > { %p9786_p6 = pneg %p9785_p5 }
  0x50   : > { %p9793_p8 = pnand %p9792_p7, %p9786_p6 }
  0x52   : > { %9796 = shalt.err (!%p9793_p8)
}
  0x53   : > { %s11861_s2 = smov 384   ;;  %s11862_s13 = smov 24  }
  0x54   : > { %s11878_s1 = sld [smem:[#allocation30_spill]]  ;;  %s9990_s25 = smov [#allocation11]  }
  0x55   : > { %s332_s12 = sshll.u32 %s9990_s25, 4  ;;  %s333_s12 = int_to_ptr.vmem [resolvable:$true] %s332_s12 }
  0x56   : > { %s9808_s19 = scalar_lea.vmem %s333_s12, 153600  ;;  %p9816_p2 = scmp.lt.s32.totalorder %s333_s12, %s333_s12 }
  0x57   : > { %p9809_p11 = scmp.ne.s32.totalorder %s333_s12, %s9808_s19  ;;  %p9817_p9 = scmp.lt.s32.totalorder %s9808_s19, %s9808_s19 }
  0x59   : > { %p9811_p0 = pnand %p9809_p11, %p10129_p13  ;;  %p9818_p3 = por %p9817_p9, %p9816_p2 }
  0x5a   : > { %9564 = dma.hbm_to_vmem [thread:$0]  (!%p10121_p12), %s11878_s1, 7680, %s309_s30, [#allocation7], %s11861_s2, %s11861_s2, %s11862_s13  }
  0x5b   : > { %p9812_p1 = pneg %p9811_p0 }
  0x5d   : > { %p9819_p5 = pnand %p9818_p3, %p9812_p1 }
  0x5f   : > { %9822 = shalt.err (!%p9819_p5)
}
  0x60   : > { %s9991_s22 = smov 640   ;;  %s9992_s26 = smov 40  }
  0x61   : > { %9570 = dma.hbm_to_vmem [thread:$0]  (!%p10121_p12), %s11848_s3, 153600, %s333_s12, [#allocation10], %s9991_s22, %s9991_s22, %s9992_s26  }
  0x62   : > { %s9993_s16 = smov [#allocation14]   ;;  %s9994_s2 = smov [#allocation17]  }
  0x63   : > { %s356_s25 = sshll.u32 %s9993_s16, 4  ;;  %s380_s13 = sshll.u32 %s9994_s2, 4  ;;  %s357_s25 = int_to_ptr.vmem [resolvable:$true] %s356_s25  ;;  %s381_s13 = int_to_ptr.vmem [resolvable:$true] %s380_s13 }
  0x64   : > { %s9834_s1 = scalar_lea.vmem %s357_s25, 76800  ;;  %p9842_p7 = scmp.lt.s32.totalorder %s357_s25, %s357_s25 }
  0x65   : > { %p9835_p6 = scmp.ne.s32.totalorder %s357_s25, %s9834_s1  ;;  %p9843_p8 = scmp.lt.s32.totalorder %s9834_s1, %s9834_s1 }
  0x67   : > { %p9837_p10 = pnand %p9835_p6, %p10129_p13  ;;  %p9844_p11 = por %p9843_p8, %p9842_p7 }
  0x69   : > { %p9838_p4 = pneg %p9837_p10 }
  0x6b   : > { %p9845_p0 = pnand %p9844_p11, %p9838_p4 }
  0x6d   : > { %9848 = shalt.err (!%p9845_p0)
}
  0x6e   : > { %s11879_s19 = smov 24   ;;  %s11880_s12 = smov 384  }
  0x6f   : > { %9576 = dma.hbm_to_vmem [thread:$0]  (!%p10121_p12), %s11850_s5, 76800, %s357_s25, [#allocation13], %s11880_s12, %s11880_s12, %s11879_s19  }
  0x70   : > { %s9860_s2 = scalar_lea.vmem %s381_s13, 9216  ;;  %p9868_p3 = scmp.lt.s32.totalorder %s381_s13, %s381_s13 }
  0x71   : > { %p9861_p1 = scmp.ne.s32.totalorder %s381_s13, %s9860_s2  ;;  %p9869_p5 = scmp.lt.s32.totalorder %s9860_s2, %s9860_s2 }
  0x73   : > { %p9863_p2 = pnand %p9861_p1, %p10129_p13  ;;  %p9870_p6 = por %p9869_p5, %p9868_p3 }
  0x75   : > { %p9864_p9 = pneg %p9863_p2 }
  0x77   : > { %p9871_p10 = pnand %p9870_p6, %p9864_p9 }
  0x79   : > { %9874 = shalt.err (!%p9871_p10)
}
  0x7a   : > { %s9995_s1 = smov 128   ;;  %s9996_s14 = smov 8  }
  0x7b   : > { %9582 = dma.hbm_to_vmem [thread:$0]  (!%p10121_p12), %s11852_s7, 9216, %s381_s13, [#allocation16], %s9995_s1, %s9995_s1, %s9996_s14  }
  0x7c   : > { %s9997_s25 = smov [#allocation20]  }
  0x7d   : > { %s408_s19 = sshll.u32 %s9997_s25, 4  ;;  %s409_s19 = int_to_ptr.vmem [resolvable:$true] %s408_s19 }
  0x7e   : > { %s9886_s12 = scalar_lea.vmem %s409_s19, 16  ;;  %s9893_s22 = scalar_lea.vmem %s409_s19, 32 }
  0x7f   : > { %p9887_p4 = scmp.ne.s32.totalorder %s409_s19, %s9886_s12  ;;  %p9894_p11 = scmp.lt.s32.totalorder %s409_s19, %s409_s19 }
  0x80   : > { %p9895_p0 = scmp.lt.s32.totalorder %s9893_s22, %s9886_s12 }
  0x81   : > { %p9889_p7 = pnand %p9887_p4, %p10129_p13 }
  0x82   : > { %p9896_p1 = por %p9895_p0, %p9894_p11 }
  0x83   : > { %p9890_p8 = pneg %p9889_p7 }
  0x85   : > { %p9897_p2 = pnand %p9896_p1, %p9890_p8 }
  0x87   : > { %9900 = shalt.err (!%p9897_p2)
}
  0x88   : > { %9588 = dma.hbm_to_vmem [thread:$0]  (!%p10121_p12), %s11855_s10, 16, %s409_s19, [#allocation19]  }
  0x89   : > { %p11881_p9 = scmp.ne.s32.totalorder %s11874_s29, 0 }
  0x8a   : > { %p11882_p3 = scmp.eq.s32.totalorder (!%p11881_p9), %s10085_s21, 0 }
  0x8b   : > { %429 = sbr.rel (%p11881_p9) target bundleno = 2756 (0xac4), region = 64 }
  0x90   : > { %9944 = dma.done.wait (%p11882_p3), [#allocation7], 7680   ;;  %p11883_p13 = pmov %p11882_p3 }
  0x91   : > { %p11884_p5 = pmov %p11882_p3 }
  0x92   : > { %9946 = vsyncadd (%p11883_p13), [#allocation7], 4294959616 }
  0x93   : > { %9948 = dma.done.wait (%p11884_p5), [#allocation10], 153648   ;;  %p11885_p6 = pmov %p11882_p3 }
  0x94   : > { %p11886_p10 = pmov %p11882_p3 }
  0x95   : > { %9950 = vsyncadd (%p11885_p6), [#allocation10], 4294813648 }
  0x96   : > { %9952 = dma.done.wait (%p11886_p10), [#allocation13], 76880   ;;  %p11887_p12 = pmov %p11882_p3 }
  0x97   : > { %p11888_p4 = pmov %p11882_p3 }
  0x98   : > { %9954 = vsyncadd (%p11887_p12), [#allocation13], 4294890416 }
  0x99   : > { %9956 = dma.done.wait (%p11888_p4), [#allocation16], 9264   ;;  %p11889_p7 = pmov %p11882_p3 }
  0x9a   : > { %p11890_p8 = pmov %p11882_p3 }
  0x9b   : > { %9958 = vsyncadd (%p11889_p7), [#allocation16], 4294958032 }
  0x9c   : > { %9960 = dma.done.wait (%p11890_p8), [#allocation19], 32   ;;  %p11891_p11 = pmov %p11882_p3 }
  0x9d   : > { %p500_p0 = scmp.lt.s32.totalorder %s10085_s21, 1  ;;  %v11866_v0 = vmov 0.0   ;;  %vm532_vm0 = vcmask 1043456   ;;  %v520_v1 = vld [vmem:[#allocation6 + $0x50] sm:$0xf]  ;;  %v517_v5 = vld [vmem:[#allocation6 + $0x38] sm:$0xff] }
  0x9e   : > { %9962 = vsyncadd (%p11891_p11), [#allocation19], 4294967264  ;;  %606 = vmatprep.mubr.f32.mxu1 %v11866_v0  ;;  %831 = vmatprep.mubr.f32.mxu0 %v11866_v0  ;;  %v741_v2 = vld [vmem:[#allocation6 + $0xb0] sm:$0xf]  ;;  %v519_v3 = vld [vmem:[#allocation6 + $0x48] sm:$0xf] }
  0x9f   : > { %s501_s29 = scalar_select %p500_p0, %s10085_s21, 1  ;;  %8476 = vmatprep.subr.msk.mxu1 %vm532_vm0, %v520_v1  ;;  %8485 = vmatprep.subr.msk.mxu0 %vm532_vm0, %v741_v2  ;;  %v740_v4 = vld [vmem:[#allocation6 + $0xa8] sm:$0xf]  ;;  %v738_v6 = vld [vmem:[#allocation6 + $0x98] sm:$0xff]  ;;  %v516_v7 = vld [vmem:[#allocation6 + $0x30] sm:$0xff]  ;;  %vm744_vm1 = vcmask 1046528  }
  0xa0   : > { %8477 = vmatpush1.msk.msra.mxu1 %vm532_vm0, %v519_v3  ;;  %8486 = vmatpush1.msk.msra.mxu0 %vm532_vm0, %v740_v4  ;;  %v737_v8 = vld [vmem:[#allocation6 + $0x90] sm:$0xff]  ;;  %v514_v9 = vld [vmem:[#allocation6 + $0x20] sm:$0xff]  ;;  %v513_v11 = vld [vmem:[#allocation6 + $0x18] sm:$0xff]  ;;  %vm522_vm2 = vcmask 228352   ;;  %vm952_vm3 = vcmask 1045504   ;;  %vm9999_vm4 = vmmov 0  }
  0xa1   : > { %s8539_s15 = sshll.u32 %s501_s29, 5  ;;  %568 = vmatprep.subr.mxu1 %v517_v5  ;;  %793 = vmatprep.subr.mxu0 %v738_v6  ;;  %v735_v10 = vld [vmem:[#allocation6 + $0x80] sm:$0xff]  ;;  %v734_v12 = vld [vmem:[#allocation6 + $0x78] sm:$0xff]  ;;  %v511_v13 = vld [vmem:[#allocation6 + $0x8] sm:$0xff]  ;;  %vm1160_vm5 = vcmask 1044480   ;;  %s10000_s14 = smov 96  }
  0xa2   : > { %s504_s1 = scalar_lea.vmem %s11845_s0, %s8539_s15  ;;  %569 = vmatpush1.msra.mxu1 %v516_v7  ;;  %794 = vmatpush1.msra.mxu0 %v737_v8  ;;  %v732_v14 = vld [vmem:[#allocation6 + $0x68] sm:$0xff]  ;;  %v510_v15 = vld [vmem:[#allocation6] sm:$0xff]  ;;  %v521_v22 = vld [vmem:[#allocation6 + $0x58] sm:$0xf]  ;;  %vm5472_vm6 = vcmask 261120   ;;  %s10001_s30 = smov 64  }
  0xa3   : > { %570 = vmatprep.subr.mxu1 %v514_v9  ;;  %795 = vmatprep.subr.mxu0 %v735_v10  ;;  %v731_v16 = vld [vmem:[#allocation6 + $0x60] sm:$0xff]  ;;  %v10241_v17 = vld [vmem:[%s504_s1] sm:$0xff]  ;;  %v10243_v18 = vld [vmem:[%s504_s1 + $0x8] sm:$0xff]  ;;  %s10002_s16 = smov 32   ;;  %vm5489_vm7 = vcmask 523520   ;;  %vm5521_vm8 = vcmask 785920  }
  0xa4   : > { %571 = vmatpush1.msra.mxu1 %v513_v11  ;;  %796 = vmatpush1.msra.mxu0 %v734_v12  ;;  %v10245_v19 = vld [vmem:[%s504_s1 + $0x10] sm:$0xff]  ;;  %v745_v20 = vrot.slane %v10241_v17, 1  ;;  %v746_v21 = vrot.slane %v10243_v18, 1  ;;  %v10253_v25 = vld [vmem:[%s504_s1 + $0x18] sm:$0xf]  ;;  %v947_v31 = vld [vmem:[#allocation6 + $0xf8] sm:$0xff] }
  0xa5   : > { %572 = vmatprep.subr.mxu1 %v511_v13  ;;  %797 = vmatprep.subr.mxu0 %v732_v14  ;;  %v748_v23 = vrot.slane %v10245_v19, 1  ;;  %v518_v26 = vld [vmem:[#allocation6 + $0x40] sm:$0xff]  ;;  %v950_v27 = vld [vmem:[#allocation6 + $0x110] sm:$0xf]  ;;  %v750_v29 = vrot.slane %v10253_v25, 1  ;;  %v515_v32 = vld [vmem:[#allocation6 + $0x28] sm:$0xff] }
  0xa6   : > { %573 = vmatpush1.msra.mxu1 %v510_v15  ;;  %798 = vmatpush1.msra.mxu0 %v731_v16  ;;  %v10251_v24 = vsel %vm744_vm1, %v745_v20, %v746_v21  ;;  %v949_v30 = vld [vmem:[#allocation6 + $0x108] sm:$0xf]  ;;  %v946_v33 = vld [vmem:[#allocation6 + $0xf0] sm:$0xff]  ;;  %v944_v35 = vld [vmem:[#allocation6 + $0xe0] sm:$0xff]  ;;  %v953_v38 = vrot.slane %v10241_v17, 2  ;;  %v954_v39 = vrot.slane %v10243_v18, 2 }
  0xa7   : > { %8478 = vmatmul.mubr.msk.f32.vlgmr.msra.gmra.mxu1 %vm522_vm2, %v10241_v17  ;;  %9109 = vmatprep.subr.mxu1 %v11866_v0  ;;  %v10264_v28 = vsel %vm744_vm1, %v746_v21, %v748_v23  ;;  %v10277_v34 = vsel %vm744_vm1, %v748_v23, %v750_v29  ;;  %v943_v36 = vld [vmem:[#allocation6 + $0xd8] sm:$0xff]  ;;  %v512_v37 = vld [vmem:[#allocation6 + $0x10] sm:$0xff]  ;;  %v941_v40 = vld [vmem:[#allocation6 + $0xc8] sm:$0xff]  ;;  %v956_v44 = vrot.slane %v10245_v19, 2  ;;  %v958_v48 = vrot.slane %v10253_v25, 2  ;;  %p11897_p2 = scmp.ne.s32.totalorder %s11872_s27, 0 }
  0xa8   : > { %8487 = vmatmul.mubr.msk.f32.vlgmr.msra.gmra.mxu0 %vm522_vm2, %v10251_v24  ;;  %9110 = vmatpush3.msk.msra.mxu1 %vm532_vm0, %v521_v22  ;;  %v940_v41 = vld [vmem:[#allocation6 + $0xc0] sm:$0xff]  ;;  %v10290_v42 = vsel %vm952_vm3, %v953_v38, %v954_v39  ;;  %v742_v43 = vld [vmem:[#allocation6 + $0xb8] sm:$0xf]  ;;  %v1158_v46 = vld [vmem:[#allocation6 + $0x170] sm:$0xf]  ;;  %v1161_v57 = vrot.slane %v10241_v17, 3 }
  0xa9   : > { %612 = vmatprep.mubr.f32.mxu1 %v11866_v0  ;;  %9111 = vmatprep.subr.mxu1 %v11866_v0  ;;  %v739_v45 = vld [vmem:[#allocation6 + $0xa0] sm:$0xff]  ;;  %v10304_v47 = vsel %vm952_vm3, %v954_v39, %v956_v44  ;;  %v1157_v49 = vld [vmem:[#allocation6 + $0x168] sm:$0xf]  ;;  %v1155_v50 = vld [vmem:[#allocation6 + $0x158] sm:$0xff]  ;;  %v10318_v53 = vsel %vm952_vm3, %v956_v44, %v958_v48  ;;  %v1162_v58 = vrot.slane %v10243_v18, 3  ;;  %v1164_v63 = vrot.slane %v10245_v19, 3 }
  0xaa   : > { %837 = vmatprep.mubr.f32.mxu0 %v11866_v0  ;;  %9112 = vmatpush3.msra.mxu1 %v518_v26  ;;  %v736_v51 = vld [vmem:[#allocation6 + $0x88] sm:$0xff]  ;;  %v1154_v52 = vld [vmem:[#allocation6 + $0x150] sm:$0xff]  ;;  %v1152_v54 = vld [vmem:[#allocation6 + $0x140] sm:$0xff]  ;;  %v1166_v4 = vrot.slane %v10253_v25, 3  ;;  %v1368_v13 = vrot.slane %v10241_v17, 4  ;;  %v1369_v14 = vrot.slane %v10243_v18, 4 }
  0xab   : > { %8479 = vmatmul.mubr.msk.f32.gmra.mxu1 %vm522_vm2, %v10243_v18  ;;  %8494 = vmatprep.subr.msk.mxu0 %vm532_vm0, %v950_v27  ;;  %v1151_v55 = vld [vmem:[#allocation6 + $0x138] sm:$0xff]  ;;  %v733_v56 = vld [vmem:[#allocation6 + $0x70] sm:$0xff]  ;;  %v1149_v59 = vld [vmem:[#allocation6 + $0x128] sm:$0xff]  ;;  %v10331_v61 = vsel %vm1160_vm5, %v1161_v57, %v1162_v58  ;;  %v10345_v3 = vsel %vm1160_vm5, %v1162_v58, %v1164_v63  ;;  %v1371_v20 = vrot.slane %v10245_v19, 4  ;;  %v1373_v22 = vrot.slane %v10253_v25, 4 }
  0xac   : > { %8488 = vmatmul.mubr.msk.f32.gmra.mxu0 %vm522_vm2, %v10264_v28  ;;  %9113 = vmatprep.subr.mxu1 %v11866_v0  ;;  %v1148_v60 = vld [vmem:[#allocation6 + $0x120] sm:$0xff]  ;;  %v951_v62 = vld [vmem:[#allocation6 + $0x118] sm:$0xf]  ;;  %v1366_v2 = vld [vmem:[#allocation6 + $0x1d0] sm:$0xf]  ;;  %v10359_v9 = vsel %vm1160_vm5, %v1164_v63, %v1166_v4  ;;  %vm5535_vm9 = vcmask 1048320  }
  0xad   : > { %8495 = vmatpush1.msk.msra.mxu0 %vm532_vm0, %v949_v30  ;;  %618 = vmatprep.mubr.f32.mxu1 %v11866_v0  ;;  %v948_v1 = vld [vmem:[#allocation6 + $0x100] sm:$0xff]  ;;  %v1365_v5 = vld [vmem:[#allocation6 + $0x1c8] sm:$0xf]  ;;  %v1363_v6 = vld [vmem:[#allocation6 + $0x1b8] sm:$0xff]  ;;  %v10399_v25 = vsel %vm532_vm0, %v1371_v20, %v1373_v22  ;;  %vm5475_vm10 = vcmask 257024   ;;  %vm5857_vm12 = vcmask 523264  }
  0xae   : > { %1001 = vmatprep.subr.mxu0 %v947_v31  ;;  %9114 = vmatpush3.msra.mxu1 %v515_v32  ;;  %v945_v7 = vld [vmem:[#allocation6 + $0xe8] sm:$0xff]  ;;  %v1362_v8 = vld [vmem:[#allocation6 + $0x1b0] sm:$0xff]  ;;  %v1360_v10 = vld [vmem:[#allocation6 + $0x1a0] sm:$0xff]  ;;  %vm5492_vm13 = vcmask 519424   ;;  %vm5524_vm14 = vcmask 781824   ;;  %vm5538_vm15 = vcmask 1044224  }
  0xaf   : > { %843 = vmatprep.mubr.f32.mxu0 %v11866_v0  ;;  %1002 = vmatpush1.msra.mxu0 %v946_v33  ;;  %v1359_v11 = vld [vmem:[#allocation6 + $0x198] sm:$0xff]  ;;  %v942_v12 = vld [vmem:[#allocation6 + $0xd0] sm:$0xff]  ;;  %v1357_v15 = vld [vmem:[#allocation6 + $0x188] sm:$0xff] }
  0xb0   : > { %8480 = vmatmul.mubr.msk.f32.gmra.mxu1 %vm522_vm2, %v10245_v19  ;;  %8489 = vmatmul.mubr.msk.f32.gmra.mxu0 %vm522_vm2, %v10277_v34  ;;  %v1356_v16 = vld [vmem:[#allocation6 + $0x180] sm:$0xff]  ;;  %v1153_v23 = vld [vmem:[#allocation6 + $0x148] sm:$0xff]  ;;  %v1150_v27 = vld [vmem:[#allocation6 + $0x130] sm:$0xff] }
  0xb1   : > { %1003 = vmatprep.subr.mxu0 %v944_v35  ;;  %9115 = vmatprep.subr.mxu1 %v11866_v0  ;;  %v1156_v21 = vld [vmem:[#allocation6 + $0x160] sm:$0xff]  ;;  %v1642_v29 = vld [vmem:[#allocation11 + $0x230] sm:$0xff]  ;;  %v1637_v33 = vld [vmem:[#allocation11 + $0x208] sm:$0xff] }
  0xb2   : > { %1004 = vmatpush1.msra.mxu0 %v943_v36  ;;  %9116 = vmatpush3.msra.mxu1 %v512_v37  ;;  %v1647_v26 = vld [vmem:[#allocation11 + $0x258] sm:$0xff]  ;;  %v1367_v30 = vld [vmem:[#allocation6 + $0x1d8] sm:$0xf]  ;;  %v1633_v35 = vld [vmem:[#allocation11 + $0x1e8] sm:$0xff] }
  0xb3   : > { %1005 = vmatprep.subr.mxu0 %v941_v40  ;;  %9117 = vmatprep.mubr.msk.f32.mxu1 %vm9999_vm4, %v11866_v0  ;;  %v1638_v31 = vld [vmem:[#allocation11 + $0x210] sm:$0xff]  ;;  %v1364_v32 = vld [vmem:[#allocation6 + $0x1c0] sm:$0xff]  ;;  %v1613_v44 = vld [vmem:[#allocation11 + $0x148] sm:$0xff] }
  0xb4   : > { %1006 = vmatpush1.msra.mxu0 %v940_v41  ;;  %1039 = vmatprep.mubr.f32.mxu0 %v11866_v0  ;;  %v1358_v36 = vld [vmem:[#allocation6 + $0x190] sm:$0xff]  ;;  %v1632_v37 = vld [vmem:[#allocation11 + $0x1e0] sm:$0xff]  ;;  %v1627_v39 = vld [vmem:[#allocation11 + $0x1b8] sm:$0xff] }
  0xb5   : > { %9118 = vmatmul.mubr.msk.f32.vlgmr.msra.gmra.mxu1 %vm522_vm2, %v10241_v17  ;;  %9126 = vmatprep.subr.mxu1 %v11866_v0  ;;  %v10372_v17 = vsel %vm532_vm0, %v1368_v13, %v1369_v14  ;;  %v1628_v38 = vld [vmem:[#allocation11 + $0x1c0] sm:$0xff]  ;;  %v1623_v40 = vld [vmem:[#allocation11 + $0x198] sm:$0xff]  ;;  %v1622_v41 = vld [vmem:[#allocation11 + $0x190] sm:$0xff] }
  0xb6   : > { %8496 = vmatmul.mubr.msk.f32.vlgmr.msra.gmra.mxu0 %vm522_vm2, %v10290_v42  ;;  %9127 = vmatpush3.msk.msra.mxu1 %vm532_vm0, %v742_v43  ;;  %v1617_v43 = vld [vmem:[#allocation11 + $0x168] sm:$0xff]  ;;  %v1603_v48 = vld [vmem:[#allocation11 + $0xf8] sm:$0xff]  ;;  %v1582_v57 = vld [vmem:[#allocation11 + $0x50] sm:$0xff] }
  0xb7   : > { %9120 = vmatprep.mubr.msk.f32.mxu1 %vm9999_vm4, %v11866_v0  ;;  %9128 = vmatprep.subr.mxu1 %v11866_v0  ;;  %v1578_v58 = vld [vmem:[#allocation11 + $0x30] sm:$0xff]  ;;  %v1727_v63 = vld [vmem:[#allocation11 + $0x4d8] sm:$0xff]  ;;  %v1717_v4 = vld [vmem:[#allocation11 + $0x488] sm:$0xff] }
  0xb8   : > { %1045 = vmatprep.mubr.f32.mxu0 %v11866_v0  ;;  %9129 = vmatpush3.msra.mxu1 %v739_v45  ;;  %v1612_v45 = vld [vmem:[#allocation11 + $0x140] sm:$0xff]  ;;  %v1693_v13 = vld [vmem:[#allocation11 + $0x3c8] sm:$0xff] }
  0xb9   : > { %9121 = vmatmul.mubr.msk.f32.gmra.mxu1 %vm522_vm2, %v10243_v18  ;;  %8503 = vmatprep.subr.msk.mxu0 %vm532_vm0, %v1158_v46  ;;  %v1159_v18 = vld [vmem:[#allocation6 + $0x178] sm:$0xf]  ;;  %v1608_v46 = vld [vmem:[#allocation11 + $0x120] sm:$0xff]  ;;  %v1677_v22 = vld [vmem:[#allocation11 + $0x348] sm:$0xff] }
  0xba   : > { %8497 = vmatmul.mubr.msk.f32.gmra.mxu0 %vm522_vm2, %v10304_v47  ;;  %9130 = vmatprep.subr.mxu1 %v11866_v0 }
  0xbb   : > { %8504 = vmatpush1.msk.msra.mxu0 %vm532_vm0, %v1157_v49  ;;  %9123 = vmatprep.mubr.msk.f32.mxu1 %vm9999_vm4, %v11866_v0  ;;  %v1602_v49 = vld [vmem:[#allocation11 + $0xf0] sm:$0xff] }
  0xbc   : > { %1209 = vmatprep.subr.mxu0 %v1155_v50  ;;  %9131 = vmatpush3.msra.mxu1 %v736_v51  ;;  %v1598_v50 = vld [vmem:[#allocation11 + $0xd0] sm:$0xff]  ;;  %v1597_v51 = vld [vmem:[#allocation11 + $0xc8] sm:$0xff] }
  0xbd   : > { %1051 = vmatprep.mubr.f32.mxu0 %v11866_v0  ;;  %1210 = vmatpush1.msra.mxu0 %v1154_v52  ;;  %v1593_v52 = vld [vmem:[#allocation11 + $0xa8] sm:$0xff] }
  0xbe   : > { %9124 = vmatmul.mubr.msk.f32.gmra.mxu1 %vm522_vm2, %v10245_v19  ;;  %8498 = vmatmul.mubr.msk.f32.gmra.mxu0 %vm522_vm2, %v10318_v53  ;;  %v10386_v19 = vsel %vm532_vm0, %v1369_v14, %v1371_v20  ;;  %v1692_v14 = vld [vmem:[#allocation11 + $0x3c0] sm:$0xff] }
  0xbf   : > { %1211 = vmatprep.subr.mxu0 %v1152_v54  ;;  %9132 = vmatprep.subr.mxu1 %v11866_v0  ;;  %v1588_v54 = vld [vmem:[#allocation11 + $0x80] sm:$0xff] }
  0xc0   : > { %1212 = vmatpush1.msra.mxu0 %v1151_v55  ;;  %9133 = vmatpush3.msra.mxu1 %v733_v56  ;;  %v1587_v55 = vld [vmem:[#allocation11 + $0x78] sm:$0xff]  ;;  %v1808_v20 = vld [vmem:[#allocation11 + $0x760] sm:$0xff] }
  0xc1   : > { %1213 = vmatprep.subr.mxu0 %v1149_v59  ;;  %9134 = vmatprep.mubr.msk.f32.mxu1 %vm9999_vm4, %v11866_v0  ;;  %v1583_v56 = vld [vmem:[#allocation11 + $0x58] sm:$0xff]  ;;  %v1577_v59 = vld [vmem:[#allocation11 + $0x28] sm:$0xff] }
  0xc2   : > { %1214 = vmatpush1.msra.mxu0 %v1148_v60  ;;  %1247 = vmatprep.mubr.f32.mxu0 %v11866_v0  ;;  %v1573_v60 = vld [vmem:[#allocation11 + $0x8] sm:$0xff] }
  0xc3   : > { %9135 = vmatmul.mubr.msk.f32.vlgmr.msra.gmra.mxu1 %vm522_vm2, %v10251_v24  ;;  %9143 = vmatprep.subr.mxu1 %v11866_v0  ;;  %v1648_v24 = vld [vmem:[#allocation11 + $0x260] sm:$0xff] }
  0xc4   : > { %8505 = vmatmul.mubr.msk.f32.vlgmr.msra.gmra.mxu0 %vm522_vm2, %v10331_v61  ;;  %9144 = vmatpush3.msk.msra.mxu1 %vm532_vm0, %v951_v62  ;;  %v1728_v62 = vld [vmem:[#allocation11 + $0x4e0] sm:$0xff] }
  0xc5   : > { %9137 = vmatprep.mubr.msk.f32.mxu1 %vm9999_vm4, %v11866_v0  ;;  %9145 = vmatprep.subr.mxu1 %v11866_v0 }
  0xc6   : > { %1253 = vmatprep.mubr.f32.mxu0 %v11866_v0  ;;  %9146 = vmatpush3.msra.mxu1 %v948_v1  ;;  %v1723_v1 = vld [vmem:[#allocation11 + $0x4b8] sm:$0xff] }
  0xc7   : > { %9138 = vmatmul.mubr.msk.f32.gmra.mxu1 %vm522_vm2, %v10264_v28  ;;  %8512 = vmatprep.subr.msk.mxu0 %vm532_vm0, %v1366_v2  ;;  %v1643_v28 = vld [vmem:[#allocation11 + $0x238] sm:$0xff]  ;;  %v1722_v2 = vld [vmem:[#allocation11 + $0x4b0] sm:$0xff] }
  0xc8   : > { %8506 = vmatmul.mubr.msk.f32.gmra.mxu0 %vm522_vm2, %v10345_v3  ;;  %9147 = vmatprep.subr.mxu1 %v11866_v0 }
  0xc9   : > { %8513 = vmatpush1.msk.msra.mxu0 %vm532_vm0, %v1365_v5  ;;  %9140 = vmatprep.mubr.msk.f32.mxu1 %vm9999_vm4, %v11866_v0  ;;  %v1713_v5 = vld [vmem:[#allocation11 + $0x468] sm:$0xff] }
  0xca   : > { %1416 = vmatprep.subr.mxu0 %v1363_v6  ;;  %9148 = vmatpush3.msra.mxu1 %v945_v7  ;;  %v1712_v6 = vld [vmem:[#allocation11 + $0x460] sm:$0xff] }
  0xcb   : > { %1259 = vmatprep.mubr.f32.mxu0 %v11866_v0  ;;  %1417 = vmatpush1.msra.mxu0 %v1362_v8  ;;  %v1708_v7 = vld [vmem:[#allocation11 + $0x440] sm:$0xff]  ;;  %v1707_v8 = vld [vmem:[#allocation11 + $0x438] sm:$0xff] }
  0xcc   : > { %9141 = vmatmul.mubr.msk.f32.gmra.mxu1 %vm522_vm2, %v10277_v34  ;;  %8507 = vmatmul.mubr.msk.f32.gmra.mxu0 %vm522_vm2, %v10359_v9  ;;  %v1361_v34 = vld [vmem:[#allocation6 + $0x1a8] sm:$0xff] }
  0xcd   : > { %1418 = vmatprep.subr.mxu0 %v1360_v10  ;;  %9149 = vmatprep.subr.mxu1 %v11866_v0  ;;  %v1702_v10 = vld [vmem:[#allocation11 + $0x410] sm:$0xff] }
  0xce   : > { %1419 = vmatpush1.msra.mxu0 %v1359_v11  ;;  %9150 = vmatpush3.msra.mxu1 %v942_v12  ;;  %v1698_v11 = vld [vmem:[#allocation11 + $0x3f0] sm:$0xff]  ;;  %v1697_v12 = vld [vmem:[#allocation11 + $0x3e8] sm:$0xff] }
  0xcf   : > { %1420 = vmatprep.subr.mxu0 %v1357_v15  ;;  %9151 = vmatprep.mubr.msk.f32.mxu1 %vm9999_vm4, %v11866_v0  ;;  %v1688_v15 = vld [vmem:[#allocation11 + $0x3a0] sm:$0xff] }
  0xd0   : > { %1421 = vmatpush1.msra.mxu0 %v1356_v16  ;;  %1454 = vmatprep.mubr.f32.mxu0 %v11866_v0  ;;  %v1687_v16 = vld [vmem:[#allocation11 + $0x398] sm:$0xff] }
  0xd1   : > { %9152 = vmatmul.mubr.msk.f32.vlgmr.msra.gmra.mxu1 %vm522_vm2, %v10290_v42  ;;  %9160 = vmatprep.subr.mxu1 %v11866_v0  ;;  %v1618_v42 = vld [vmem:[#allocation11 + $0x170] sm:$0xff] }
  0xd2   : > { %8514 = vmatmul.mubr.msk.f32.vlgmr.msra.gmra.mxu0 %vm522_vm2, %v10372_v17  ;;  %9161 = vmatpush3.msk.msra.mxu1 %vm532_vm0, %v1159_v18  ;;  %v1682_v18 = vld [vmem:[#allocation11 + $0x370] sm:$0xff] }
  0xd3   : > { %9154 = vmatprep.mubr.msk.f32.mxu1 %vm9999_vm4, %v11866_v0  ;;  %9162 = vmatprep.subr.mxu1 %v11866_v0 }
  0xd4   : > { %1460 = vmatprep.mubr.f32.mxu0 %v11866_v0  ;;  %9163 = vmatpush3.msra.mxu1 %v1156_v21  ;;  %v1678_v21 = vld [vmem:[#allocation11 + $0x350] sm:$0xff] }
  0xd5   : > { %9155 = vmatmul.mubr.msk.f32.gmra.mxu1 %vm522_vm2, %v10304_v47  ;;  %9164 = vmatprep.subr.mxu1 %v11866_v0  ;;  %v1607_v47 = vld [vmem:[#allocation11 + $0x118] sm:$0xff] }
  0xd6   : > { %8515 = vmatmul.mubr.msk.f32.gmra.mxu0 %vm522_vm2, %v10386_v19  ;;  %9157 = vmatprep.mubr.msk.f32.mxu1 %vm9999_vm4, %v11866_v0 }
  0xd7   : > { %9165 = vmatpush3.msra.mxu1 %v1153_v23  ;;  %1466 = vmatprep.mubr.f32.mxu0 %v11866_v0  ;;  %v1803_v23 = vld [vmem:[#allocation11 + $0x738] sm:$0xff] }
  0xd8   : > { %9166 = vmatprep.subr.mxu1 %v11866_v0  ;;  %1812 = vmatprep.subr.mxu0 %v1648_v24  ;;  %v1673_v24 = vld [vmem:[#allocation11 + $0x328] sm:$0xff] }
  0xd9   : > { %9158 = vmatmul.mubr.msk.f32.gmra.mxu1 %vm522_vm2, %v10318_v53  ;;  %1813 = vmatpush1.msra.mxu0 %v1647_v26  ;;  %v1592_v53 = vld [vmem:[#allocation11 + $0xa0] sm:$0xff]  ;;  %v1802_v26 = vld [vmem:[#allocation11 + $0x730] sm:$0xff] }
  0xda   : > { %8516 = vmatmul.mubr.msk.f32.gmra.mxu0 %vm522_vm2, %v10399_v25  ;;  %9167 = vmatpush3.msra.mxu1 %v1150_v27  ;;  %v1798_v27 = vld [vmem:[#allocation11 + $0x710] sm:$0xff] }
  0xdb   : > { %9168 = vmatprep.mubr.msk.f32.mxu1 %vm9999_vm4, %v11866_v0  ;;  %9177 = vmatprep.subr.mxu1 %v11866_v0 }
  0xdc   : > { %1814 = vmatprep.subr.mxu0 %v1643_v28  ;;  %v1668_v28 = vld [vmem:[#allocation11 + $0x300] sm:$0xff] }
  0xdd   : > { %9169 = vmatmul.mubr.msk.f32.vlgmr.msra.gmra.mxu1 %vm522_vm2, %v10331_v61  ;;  %1815 = vmatpush1.msra.mxu0 %v1642_v29  ;;  %v1572_v61 = vld [vmem:[#allocation11] sm:$0xff]  ;;  %v1797_v29 = vld [vmem:[#allocation11 + $0x708] sm:$0xff] }
  0xde   : > { %9178 = vmatpush3.msk.msra.mxu1 %vm532_vm0, %v1367_v30  ;;  %9171 = vmatprep.mubr.msk.f32.mxu1 %vm9999_vm4, %v11866_v0  ;;  %v1667_v30 = vld [vmem:[#allocation11 + $0x2f8] sm:$0xff] }
  0xdf   : > { %9179 = vmatprep.subr.mxu1 %v11866_v0  ;;  %1816 = vmatprep.subr.mxu0 %v1638_v31  ;;  %v1793_v31 = vld [vmem:[#allocation11 + $0x6e8] sm:$0xff] }
  0xe0   : > { %9180 = vmatpush3.msra.mxu1 %v1364_v32  ;;  %1817 = vmatpush1.msra.mxu0 %v1637_v33  ;;  %v1663_v32 = vld [vmem:[#allocation11 + $0x2d8] sm:$0xff]  ;;  %v1792_v33 = vld [vmem:[#allocation11 + $0x6e0] sm:$0xff] }
  0xe1   : > { %9172 = vmatmul.mubr.msk.f32.gmra.mxu1 %vm522_vm2, %v10345_v3  ;;  %9181 = vmatprep.subr.mxu1 %v11866_v0  ;;  %v1718_v3 = vld [vmem:[#allocation11 + $0x490] sm:$0xff] }
  0xe2   : > { %9174 = vmatprep.mubr.msk.f32.mxu1 %vm9999_vm4, %v11866_v0  ;;  %9182 = vmatpush3.msra.mxu1 %v1361_v34  ;;  %v1662_v34 = vld [vmem:[#allocation11 + $0x2d0] sm:$0xff] }
  0xe3   : > { %9183 = vmatprep.subr.mxu1 %v11866_v0  ;;  %1818 = vmatprep.subr.mxu0 %v1633_v35  ;;  %v1788_v35 = vld [vmem:[#allocation11 + $0x6c0] sm:$0xff] }
  0xe4   : > { %9184 = vmatpush3.msra.mxu1 %v1358_v36  ;;  %1819 = vmatpush1.msra.mxu0 %v1632_v37  ;;  %v1658_v36 = vld [vmem:[#allocation11 + $0x2b0] sm:$0xff]  ;;  %v1787_v37 = vld [vmem:[#allocation11 + $0x6b8] sm:$0xff] }
  0xe5   : > { %9175 = vmatmul.mubr.msk.f32.gmra.mxu1 %vm522_vm2, %v10359_v9  ;;  %1820 = vmatprep.subr.mxu0 %v1628_v38  ;;  %v1703_v9 = vld [vmem:[#allocation11 + $0x418] sm:$0xff]  ;;  %v1657_v38 = vld [vmem:[#allocation11 + $0x2a8] sm:$0xff] }
  0xe6   : > { %9185 = vmatprep.mubr.msk.f32.mxu1 %vm9999_vm4, %v11866_v0  ;;  %1821 = vmatpush1.msra.mxu0 %v1627_v39  ;;  %v1783_v39 = vld [vmem:[#allocation11 + $0x698] sm:$0xff] }
  0xe7   : > { %1822 = vmatprep.subr.mxu0 %v1623_v40  ;;  %1895 = vmatprep.subr.mxu1 %v1808_v20  ;;  %v1653_v40 = vld [vmem:[#allocation11 + $0x288] sm:$0xff]  ;;  %v11864_v20 = vlaneseq }
  0xe8   : > { %1823 = vmatpush1.msra.mxu0 %v1622_v41  ;;  %v1782_v41 = vld [vmem:[#allocation11 + $0x690] sm:$0xff] }
  0xe9   : > { %9186 = vmatmul.mubr.msk.f32.vlgmr.msra.gmra.mxu1 %vm522_vm2, %v10372_v17  ;;  %1824 = vmatprep.subr.mxu0 %v1618_v42  ;;  %v1683_v17 = vld [vmem:[#allocation11 + $0x378] sm:$0xff]  ;;  %v1652_v42 = vld [vmem:[#allocation11 + $0x280] sm:$0xff] }
  0xea   : > { %9188 = vmatprep.mubr.msk.f32.mxu1 %vm9999_vm4, %v11866_v0  ;;  %1825 = vmatpush1.msra.mxu0 %v1617_v43  ;;  %v1778_v43 = vld [vmem:[#allocation11 + $0x670] sm:$0xff] }
  0xeb   : > { %1826 = vmatprep.subr.mxu0 %v1613_v44  ;;  %v1810_v44 = vld [vmem:[#allocation11 + $0x770] sm:$0xff] }
  0xec   : > { %1827 = vmatpush1.msra.mxu0 %v1612_v45  ;;  %v1777_v45 = vld [vmem:[#allocation11 + $0x668] sm:$0xff] }
  0xed   : > { %9189 = vmatmul.mubr.msk.f32.gmra.mxu1 %vm522_vm2, %v10386_v19  ;;  %1828 = vmatprep.subr.mxu0 %v1608_v46  ;;  %v1807_v19 = vld [vmem:[#allocation11 + $0x758] sm:$0xff]  ;;  %v1773_v46 = vld [vmem:[#allocation11 + $0x648] sm:$0xff] }
  0xee   : > { %9191 = vmatprep.mubr.msk.f32.mxu1 %vm9999_vm4, %v11866_v0  ;;  %1829 = vmatpush1.msra.mxu0 %v1607_v47  ;;  %v1772_v47 = vld [vmem:[#allocation11 + $0x640] sm:$0xff] }
  0xef   : > { %1830 = vmatprep.subr.mxu0 %v1603_v48  ;;  %1896 = vmatpush1.msra.mxu1 %v1807_v19  ;;  %v1768_v48 = vld [vmem:[#allocation11 + $0x620] sm:$0xff] }
  0xf0   : > { %1831 = vmatpush1.msra.mxu0 %v1602_v49  ;;  %1897 = vmatprep.subr.mxu1 %v1803_v23  ;;  %v1767_v49 = vld [vmem:[#allocation11 + $0x618] sm:$0xff]  ;;  %v10441_v23 = vshrl.u32 %v11864_v20, 7 }
  0xf1   : > { %9192 = vmatmul.mubr.msk.f32.gmra.mxu1 %vm522_vm2, %v10399_v25  ;;  %1832 = vmatprep.subr.mxu0 %v1598_v50  ;;  %v1672_v25 = vld [vmem:[#allocation11 + $0x320] sm:$0xff]  ;;  %v1763_v50 = vld [vmem:[#allocation11 + $0x5f8] sm:$0xff]  ;;  %vm7850_vm2 = vcmask 1046016  }
  0xf2   : > { %1833 = vmatpush1.msra.mxu0 %v1597_v51  ;;  %1959 = vmatprep.mubr.f32.mxu1 %v11866_v0  ;;  %v1762_v51 = vld [vmem:[#allocation11 + $0x5f0] sm:$0xff] }
  0xf3   : > { %1834 = vmatprep.subr.mxu0 %v1593_v52  ;;  %1898 = vmatpush1.msra.mxu1 %v1802_v26  ;;  %v1758_v52 = vld [vmem:[#allocation11 + $0x5d0] sm:$0xff] }
  0xf4   : > { %1835 = vmatpush1.msra.mxu0 %v1592_v53  ;;  %1899 = vmatprep.subr.mxu1 %v1798_v27  ;;  %v1757_v53 = vld [vmem:[#allocation11 + $0x5c8] sm:$0xff] }
  0xf5   : > { %1836 = vmatprep.subr.mxu0 %v1588_v54  ;;  %1900 = vmatpush1.msra.mxu1 %v1797_v29  ;;  %v1753_v54 = vld [vmem:[#allocation11 + $0x5a8] sm:$0xff]  ;;  %v10448_v29 = vld [vmem:[#allocation9] sm:$0x7] }
  0xf6   : > { %1837 = vmatpush1.msra.mxu0 %v1587_v55  ;;  %1901 = vmatprep.subr.mxu1 %v1793_v31  ;;  %v1752_v55 = vld [vmem:[#allocation11 + $0x5a0] sm:$0xff] }
  0xf7   : > { %1838 = vmatprep.subr.mxu0 %v1583_v56  ;;  %1902 = vmatpush1.msra.mxu1 %v1792_v33  ;;  %v1748_v56 = vld [vmem:[#allocation11 + $0x580] sm:$0xff] }
  0xf8   : > { %1839 = vmatpush1.msra.mxu0 %v1582_v57  ;;  %1903 = vmatprep.subr.mxu1 %v1788_v35  ;;  %v1747_v57 = vld [vmem:[#allocation11 + $0x578] sm:$0xff] }
  0xf9   : > { %1840 = vmatprep.subr.mxu0 %v1578_v58  ;;  %1904 = vmatpush1.msra.mxu1 %v1787_v37  ;;  %v1743_v58 = vld [vmem:[#allocation11 + $0x558] sm:$0xff] }
  0xfa   : > { %1841 = vmatpush1.msra.mxu0 %v1577_v59  ;;  %1905 = vmatprep.subr.mxu1 %v1783_v39  ;;  %v1742_v59 = vld [vmem:[#allocation11 + $0x550] sm:$0xff] }
  0xfb   : > { %1842 = vmatprep.subr.mxu0 %v1573_v60  ;;  %1906 = vmatpush1.msra.mxu1 %v1782_v41  ;;  %v1738_v60 = vld [vmem:[#allocation11 + $0x530] sm:$0xff] }
  0xfc   : > { %1843 = vmatpush1.msra.mxu0 %v1572_v61  ;;  %1907 = vmatprep.subr.mxu1 %v1778_v43  ;;  %v1737_v61 = vld [vmem:[#allocation11 + $0x528] sm:$0xff] }
  0xfd   : > { %1844 = vmatprep.subr.mxu0 %v1728_v62  ;;  %1908 = vmatpush1.msra.mxu1 %v1777_v45  ;;  %v1733_v62 = vld [vmem:[#allocation11 + $0x508] sm:$0xff] }
  0xfe   : > { %1845 = vmatpush2.msra.mxu0 %v1727_v63  ;;  %1909 = vmatprep.subr.mxu1 %v1773_v46  ;;  %v1732_v63 = vld [vmem:[#allocation11 + $0x500] sm:$0xff] }
  0xff   : > { %1846 = vmatprep.subr.mxu0 %v1723_v1  ;;  %1910 = vmatpush1.msra.mxu1 %v1772_v47  ;;  %v1650_v1 = vld [vmem:[#allocation11 + $0x270] sm:$0xff] }
 0x100   : > { %1847 = vmatpush2.msra.mxu0 %v1722_v2  ;;  %1911 = vmatprep.subr.mxu1 %v1768_v48 }
 0x101   : > { %1848 = vmatprep.subr.mxu0 %v1718_v3  ;;  %1912 = vmatpush1.msra.mxu1 %v1767_v49 }
 0x102   : > { %1849 = vmatpush2.msra.mxu0 %v1717_v4  ;;  %1913 = vmatprep.subr.mxu1 %v1763_v50 }
 0x103   : > { %1850 = vmatprep.subr.mxu0 %v1713_v5  ;;  %1914 = vmatpush1.msra.mxu1 %v1762_v51 }
 0x104   : > { %1851 = vmatpush2.msra.mxu0 %v1712_v6  ;;  %1915 = vmatprep.subr.mxu1 %v1758_v52 }
 0x105   : > { %1852 = vmatprep.subr.mxu0 %v1708_v7  ;;  %1916 = vmatpush1.msra.mxu1 %v1757_v53 }
 0x106   : > { %1853 = vmatpush2.msra.mxu0 %v1707_v8  ;;  %1917 = vmatprep.subr.mxu1 %v1753_v54 }
 0x107   : > { %1854 = vmatprep.subr.mxu0 %v1703_v9  ;;  %1918 = vmatpush1.msra.mxu1 %v1752_v55 }
 0x108   : > { %1855 = vmatpush2.msra.mxu0 %v1702_v10  ;;  %1919 = vmatprep.subr.mxu1 %v1748_v56 }
 0x109   : > { %1856 = vmatprep.subr.mxu0 %v1698_v11  ;;  %1920 = vmatpush1.msra.mxu1 %v1747_v57 }
 0x10a   : > { %1857 = vmatpush2.msra.mxu0 %v1697_v12  ;;  %1921 = vmatprep.subr.mxu1 %v1743_v58 }
 0x10b   : > { %1858 = vmatprep.subr.mxu0 %v1693_v13  ;;  %1922 = vmatpush1.msra.mxu1 %v1742_v59 }
 0x10c   : > { %1859 = vmatpush2.msra.mxu0 %v1692_v14  ;;  %1923 = vmatprep.subr.mxu1 %v1738_v60 }
 0x10d   : > { %1860 = vmatprep.subr.mxu0 %v1688_v15  ;;  %1924 = vmatpush1.msra.mxu1 %v1737_v61 }
 0x10e   : > { %1861 = vmatpush2.msra.mxu0 %v1687_v16  ;;  %1925 = vmatprep.subr.mxu1 %v1733_v62 }
 0x10f   : > { %1862 = vmatprep.subr.mxu0 %v1683_v17  ;;  %1926 = vmatpush1.msra.mxu1 %v1732_v63 }
 0x110   : > { %1863 = vmatpush2.msra.mxu0 %v1682_v18  ;;  %1978 = vmatprep.subr.mxu1 %v1650_v1 }
 0x111   : > { %1864 = vmatprep.subr.mxu0 %v1678_v21 }
 0x112   : > { %1865 = vmatpush2.msra.mxu0 %v1677_v22 }
 0x113   : > { %1866 = vmatprep.subr.mxu0 %v1673_v24 }
 0x114   : > { %1867 = vmatpush2.msra.mxu0 %v1672_v25 }
 0x115   : > { %1868 = vmatprep.subr.mxu0 %v1668_v28  ;;  %v10446_v28 = vsub.s32 0, %v10441_v23 }
 0x116   : > { %1869 = vmatpush2.msra.mxu0 %v1667_v30  ;;  %v10451_v30 = vsub.s32 1, %v10441_v23 }
 0x117   : > { %1870 = vmatprep.subr.mxu0 %v1663_v32 }
 0x118   : > { %1871 = vmatpush2.msra.mxu0 %v1662_v34  ;;  %v709_v34 = vrot.slane %v10448_v29, %v10446_v28 }
 0x119   : > { %1872 = vmatprep.subr.mxu0 %v1658_v36  ;;  %v713_v36 = vrot.slane %v10448_v29, %v10451_v30 }
 0x11a   : > { %1873 = vmatpush2.msra.mxu0 %v1657_v38 }
 0x11b   : > { %1874 = vmatprep.subr.mxu0 %v1653_v40 }
 0x11c   : > { %1875 = vmatpush2.msra.mxu0 %v1652_v42 }
 0x11d   : > { %2061 = vmatprep.subr.mxu0 %v1810_v44 }
 0x167   : > { %v608_v2 = vpop.f32.mrf.mxu1 }
 0x168   : > { %v833_v3 = vpop.f32.mrf.mxu0  ;;  %v721_v40 = vadd.f32 %v709_v34, %v608_v2 }
 0x169   : > { %v610_v4 = vpop.f32.mrf.mxu1 }
 0x16a   : > { %v835_v5 = vpop.f32.mrf.mxu0  ;;  %v722_v42 = vadd.f32 %v713_v36, %v610_v4  ;;  %v930_v45 = vadd.f32 %v833_v3, %v721_v40 }
 0x16b   : > { %v614_v6 = vpop.f32.mrf.mxu1 }
 0x16c   : > { %v839_v7 = vpop.f32.mrf.mxu0  ;;  %v724_v46 = vadd.f32 %v709_v34, %v614_v6  ;;  %v931_v49 = vadd.f32 %v835_v5, %v722_v42  ;;  %v1799_v42 = vld [vmem:[#allocation11 + $0x718] sm:$0xff] }
 0x16d   : > { %v616_v8 = vpop.f32.mrf.mxu1 }
 0x16e   : > { %v841_v9 = vpop.f32.mrf.mxu0  ;;  %v725_v50 = vadd.f32 %v713_v36, %v616_v8  ;;  %v933_v54 = vadd.f32 %v839_v7, %v724_v46  ;;  %v1795_v46 = vld [vmem:[#allocation11 + $0x6f8] sm:$0xff] }
 0x170   : > { %v620_v10 = vpop.f32.mrf.mxu1  ;;  %v845_v11 = vpop.f32.mrf.mxu0  ;;  %v934_v58 = vadd.f32 %v841_v9, %v725_v50 }
 0x171   : > { %v727_v55 = vadd.f32 %v709_v34, %v620_v10 }
 0x172   : > { %v622_v12 = vpop.f32.mrf.mxu1  ;;  %v847_v13 = vpop.f32.mrf.mxu0 }
 0x173   : > { %v728_v59 = vadd.f32 %v713_v36, %v622_v12  ;;  %v936_v5 = vadd.f32 %v845_v11, %v727_v55  ;;  %v1805_v11 = vld [vmem:[#allocation11 + $0x748] sm:$0xff] }
 0x175   : > { %v10436_v14 = vpop.f32.mrf.mxu1 }
 0x176   : > { %v1041_v15 = vpop.f32.mrf.mxu0 }
 0x177   : > { %v9119_v16 = vpop.f32.mrf.mxu1  ;;  %v1138_v51 = vadd.f32 %v1041_v15, %v930_v45  ;;  %v937_v15 = vadd.f32 %v847_v13, %v728_v59  ;;  %v1780_v59 = vld [vmem:[#allocation11 + $0x680] sm:$0xff] }
 0x178   : > { %v1043_v17 = vpop.f32.mrf.mxu0 }
 0x179   : > { %v10438_v18 = vpop.f32.mrf.mxu1  ;;  %v1139_v52 = vadd.f32 %v1043_v17, %v931_v49 }
 0x17a   : > { %v1047_v21 = vpop.f32.mrf.mxu0 }
 0x17b   : > { %v9122_v19 = vpop.f32.mrf.mxu1  ;;  %v1141_v62 = vadd.f32 %v1047_v21, %v933_v54  ;;  %v1809_v21 = vld [vmem:[#allocation11 + $0x768] sm:$0xff] }
 0x17c   : > { %v1049_v22 = vpop.f32.mrf.mxu0  ;;  %v1789_v54 = vld [vmem:[#allocation11 + $0x6c8] sm:$0xff] }
 0x17d   : > { %v1142_v2 = vadd.f32 %v1049_v22, %v934_v58 }
 0x17e   : > { %v10443_v24 = vpop.f32.mrf.mxu1  ;;  %v1053_v26 = vpop.f32.mrf.mxu0 }
 0x17f   : > { %v1144_v17 = vadd.f32 %v1053_v26, %v936_v5  ;;  %v1804_v26 = vld [vmem:[#allocation11 + $0x740] sm:$0xff]  ;;  %v1770_v5 = vld [vmem:[#allocation11 + $0x630] sm:$0xff] }
 0x180   : > { %v9125_v25 = vpop.f32.mrf.mxu1  ;;  %v1055_v27 = vpop.f32.mrf.mxu0 }
 0x181   : > { %v1145_v25 = vadd.f32 %v1055_v27, %v937_v15  ;;  %v1800_v27 = vld [vmem:[#allocation11 + $0x720] sm:$0xff]  ;;  %v1769_v15 = vld [vmem:[#allocation11 + $0x628] sm:$0xff] }
 0x183   : > { %v10453_v31 = vpop.f32.mrf.mxu1 }
 0x184   : > { %v1249_v32 = vpop.f32.mrf.mxu0 }
 0x185   : > { %v9136_v33 = vpop.f32.mrf.mxu1  ;;  %v1346_v56 = vadd.f32 %v1249_v32, %v1138_v51  ;;  %v1790_v51 = vld [vmem:[#allocation11 + $0x6d0] sm:$0xff] }
 0x186   : > { %v1251_v35 = vpop.f32.mrf.mxu0  ;;  %v10475_v33 = vsub.s32 2, %v10441_v23 }
 0x187   : > { %v10459_v37 = vpop.f32.mrf.mxu1  ;;  %v1347_v60 = vadd.f32 %v1251_v35, %v1139_v52 }
 0x188   : > { %v1255_v38 = vpop.f32.mrf.mxu0 }
 0x189   : > { %v9139_v39 = vpop.f32.mrf.mxu1  ;;  %v1349_v6 = vadd.f32 %v1255_v38, %v1141_v62 }
 0x18a   : > { %v1257_v41 = vpop.f32.mrf.mxu0 }
 0x18b   : > { %v1350_v16 = vadd.f32 %v1257_v41, %v1142_v2  ;;  %v1774_v2 = vld [vmem:[#allocation11 + $0x650] sm:$0xff] }
 0x18c   : > { %v10461_v43 = vpop.f32.mrf.mxu1  ;;  %v1261_v44 = vpop.f32.mrf.mxu0 }
 0x18d   : > { %v1352_v13 = vadd.f32 %v1261_v44, %v1144_v17 }
 0x18e   : > { %v9142_v47 = vpop.f32.mrf.mxu1  ;;  %v1263_v48 = vpop.f32.mrf.mxu0 }
 0x18f   : > { %v1353_v35 = vadd.f32 %v1263_v48, %v1145_v25  ;;  %v717_v47 = vrot.slane %v10448_v29, %v10475_v33  ;;  %v1794_v48 = vld [vmem:[#allocation11 + $0x6f0] sm:$0xff] }
 0x191   : > { %v10463_v53 = vpop.f32.mrf.mxu1  ;;  %v723_v29 = vadd.f32 %v717_v47, %v10436_v14 }
 0x192   : > { %v1456_v57 = vpop.f32.mrf.mxu0 }
 0x193   : > { %v9153_v61 = vpop.f32.mrf.mxu1  ;;  %v1553_v63 = vadd.f32 %v1456_v57, %v1346_v56  ;;  %v1785_v56 = vld [vmem:[#allocation11 + $0x6a8] sm:$0xff]  ;;  %v1784_v57 = vld [vmem:[#allocation11 + $0x6a0] sm:$0xff] }
 0x194   : > { %v1458_v1 = vpop.f32.mrf.mxu0  ;;  %v1779_v61 = vld [vmem:[#allocation11 + $0x678] sm:$0xff] }
 0x195   : > { %v1554_v3 = vadd.f32 %v1458_v1, %v1347_v60  ;;  %v10465_v4 = vpop.f32.mrf.mxu1  ;;  %v10469_v9 = vmax.f32 %v1553_v63, 0.0  ;;  %v932_v60 = vadd.f32 %v10453_v31, %v723_v29  ;;  %v1775_v63 = vld [vmem:[#allocation11 + $0x658] sm:$0xff]  ;;  %v726_v1 = vadd.f32 %v717_v47, %v10438_v18  ;;  %v1630_v29 = vld [vmem:[#allocation11 + $0x1d0] sm:$0xff] }
 0x196   : > { %v1462_v8 = vpop.f32.mrf.mxu0 }
 0x197   : > { %v10467_v7 = vmax.f32 %v1554_v3, 0.0  ;;  %v9156_v10 = vpop.f32.mrf.mxu1  ;;  %v1556_v12 = vadd.f32 %v1462_v8, %v1349_v6  ;;  %v1140_v14 = vadd.f32 %v10463_v53, %v932_v60  ;;  %v935_v6 = vadd.f32 %v10459_v37, %v726_v1  ;;  %v1764_v53 = vld [vmem:[#allocation11 + $0x600] sm:$0xff]  ;;  %v1625_v60 = vld [vmem:[#allocation11 + $0x1a8] sm:$0xff] }
 0x198   : > { %v1464_v19 = vpop.f32.mrf.mxu0  ;;  %v729_v10 = vadd.f32 %v717_v47, %v10443_v24  ;;  %v1645_v24 = vld [vmem:[#allocation11 + $0x248] sm:$0xff]  ;;  %v1639_v47 = vld [vmem:[#allocation11 + $0x218] sm:$0xff]  ;;  %v1620_v1 = vld [vmem:[#allocation11 + $0x180] sm:$0xff] }
 0x199   : > { %v1557_v32 = vadd.f32 %v1464_v19, %v1350_v16  ;;  %1876 = vmatprep.mubr.f32.mxu0 %v10467_v7  ;;  %v10472_v22 = vpop.f32.mrf.mxu1  ;;  %v10480_v39 = vmax.f32 %v1556_v12, 0.0  ;;  %v1765_v16 = vld [vmem:[#allocation11 + $0x608] sm:$0xff]  ;;  %v1143_v17 = vadd.f32 %v10465_v4, %v935_v6  ;;  %v1760_v19 = vld [vmem:[#allocation11 + $0x5e0] sm:$0xff]  ;;  %v1646_v6 = vld [vmem:[#allocation11 + $0x250] sm:$0xff] }
 0x19a   : > { %v1468_v34 = vpop.f32.mrf.mxu0  ;;  %1877 = vmatmul.mubr.f32.vlgmr.msra.gmra.mxu0 %v10469_v9 }
 0x19b   : > { %v10478_v36 = vmax.f32 %v1557_v32, 0.0  ;;  %2062 = vmatpush1.msra.mxu0 %v1809_v21  ;;  %v9159_v38 = vpop.f32.mrf.mxu1  ;;  %v1559_v40 = vadd.f32 %v1468_v34, %v1352_v13  ;;  %v938_v21 = vadd.f32 %v10461_v43, %v729_v10  ;;  %v1759_v32 = vld [vmem:[#allocation11 + $0x5d8] sm:$0xff]  ;;  %v1609_v10 = vld [vmem:[#allocation11 + $0x128] sm:$0xff] }
 0x19c   : > { %2063 = vmatprep.subr.mxu0 %v1805_v11  ;;  %v1470_v41 = vpop.f32.mrf.mxu0  ;;  %v1649_v11 = vld [vmem:[#allocation11 + $0x268] sm:$0xff]  ;;  %v1755_v34 = vld [vmem:[#allocation11 + $0x5b8] sm:$0xff]  ;;  %v1644_v38 = vld [vmem:[#allocation11 + $0x240] sm:$0xff] }
 0x19d   : > { %v1560_v45 = vadd.f32 %v1470_v41, %v1353_v35  ;;  %2064 = vmatpush1.msra.mxu0 %v1804_v26  ;;  %1882 = vmatprep.mubr.f32.mxu0 %v10478_v36  ;;  %v1332_v44 = vpop.f32.mrf.mxu1  ;;  %v10488_v52 = vmax.f32 %v1559_v40, 0.0  ;;  %v1146_v4 = vadd.f32 %v10472_v22, %v938_v21  ;;  %v1754_v35 = vld [vmem:[#allocation11 + $0x5b0] sm:$0xff]  ;;  %v1600_v21 = vld [vmem:[#allocation11 + $0xe0] sm:$0xff] }
 0x19e   : > { %2065 = vmatprep.subr.mxu0 %v1800_v27  ;;  %1883 = vmatmul.mubr.f32.gmra.mxu0 %v10480_v39  ;;  %v1348_v8 = vadd.f32 %v1332_v44, %v1140_v14  ;;  %v1750_v27 = vld [vmem:[#allocation11 + $0x590] sm:$0xff]  ;;  %v1745_v44 = vld [vmem:[#allocation11 + $0x568] sm:$0xff]  ;;  %v1651_v14 = vld [vmem:[#allocation11 + $0x278] sm:$0xff] }
 0x19f   : > { %v10486_v49 = vmax.f32 %v1560_v45, 0.0  ;;  %2066 = vmatpush1.msra.mxu0 %v1799_v42  ;;  %v9170_v50 = vpop.f32.mrf.mxu1  ;;  %v1640_v42 = vld [vmem:[#allocation11 + $0x220] sm:$0xff]  ;;  %v1749_v45 = vld [vmem:[#allocation11 + $0x588] sm:$0xff] }
 0x1a0   : > { %2067 = vmatprep.subr.mxu0 %v1795_v46  ;;  %v1635_v50 = vld [vmem:[#allocation11 + $0x1f8] sm:$0xff] }
 0x1a1   : > { %2068 = vmatpush1.msra.mxu0 %v1794_v48  ;;  %1888 = vmatprep.mubr.f32.mxu0 %v10486_v49  ;;  %v1337_v55 = vpop.f32.mrf.mxu1  ;;  %v1744_v48 = vld [vmem:[#allocation11 + $0x560] sm:$0xff] }
 0x1a2   : > { %2069 = vmatprep.subr.mxu0 %v1790_v51  ;;  %1889 = vmatmul.mubr.f32.gmra.mxu0 %v10488_v52  ;;  %v1351_v25 = vadd.f32 %v1337_v55, %v1143_v17  ;;  %v1740_v51 = vld [vmem:[#allocation11 + $0x540] sm:$0xff]  ;;  %v1634_v55 = vld [vmem:[#allocation11 + $0x1f0] sm:$0xff] }
 0x1a3   : > { %2070 = vmatpush1.msra.mxu0 %v1789_v54  ;;  %v9173_v58 = vpop.f32.mrf.mxu1  ;;  %2125 = vmatprep.mubr.f32.mxu0 %v11866_v0  ;;  %v1716_v17 = vld [vmem:[#allocation11 + $0x480] sm:$0xff] }
 0x1a4   : > { %2071 = vmatprep.subr.mxu0 %v1785_v56  ;;  %v1735_v58 = vld [vmem:[#allocation11 + $0x518] sm:$0xff] }
 0x1a5   : > { %2072 = vmatpush1.msra.mxu0 %v1784_v57  ;;  %v1342_v62 = vpop.f32.mrf.mxu1  ;;  %v1739_v57 = vld [vmem:[#allocation11 + $0x538] sm:$0xff] }
 0x1a6   : > { %2073 = vmatprep.subr.mxu0 %v1780_v59  ;;  %v1354_v40 = vadd.f32 %v1342_v62, %v1146_v4  ;;  %v1629_v59 = vld [vmem:[#allocation11 + $0x1c8] sm:$0xff]  ;;  %v1624_v62 = vld [vmem:[#allocation11 + $0x1a0] sm:$0xff] }
 0x1a7   : > { %2074 = vmatpush1.msra.mxu0 %v1779_v61  ;;  %v9176_v3 = vpop.f32.mrf.mxu1  ;;  %v1734_v61 = vld [vmem:[#allocation11 + $0x510] sm:$0xff]  ;;  %v1701_v4 = vld [vmem:[#allocation11 + $0x408] sm:$0xff] }
 0x1a8   : > { %2075 = vmatprep.subr.mxu0 %v1775_v63  ;;  %v1731_v63 = vld [vmem:[#allocation11 + $0x4f8] sm:$0xff]  ;;  %v1726_v3 = vld [vmem:[#allocation11 + $0x4d0] sm:$0xff] }
 0x1a9   : > { %2076 = vmatpush1.msra.mxu0 %v1774_v2  ;;  %v1539_v31 = vpop.f32.mrf.mxu1  ;;  %v1619_v2 = vld [vmem:[#allocation11 + $0x178] sm:$0xff] }
 0x1aa   : > { %2077 = vmatprep.subr.mxu0 %v1770_v5  ;;  %v1555_v18 = vadd.f32 %v1539_v31, %v1348_v8  ;;  %v1615_v5 = vld [vmem:[#allocation11 + $0x158] sm:$0xff]  ;;  %v1614_v8 = vld [vmem:[#allocation11 + $0x150] sm:$0xff] }
 0x1ab   : > { %2078 = vmatpush1.msra.mxu0 %v1769_v15  ;;  %v9187_v12 = vpop.f32.mrf.mxu1  ;;  %v1721_v15 = vld [vmem:[#allocation11 + $0x4a8] sm:$0xff]  ;;  %v1610_v31 = vld [vmem:[#allocation11 + $0x130] sm:$0xff] }
 0x1ac   : > { %v10501_v37 = vmax.f32 %v1555_v18, 0.0  ;;  %2079 = vmatprep.subr.mxu0 %v1765_v16  ;;  %v1641_v16 = vld [vmem:[#allocation11 + $0x228] sm:$0xff]  ;;  %v1604_v12 = vld [vmem:[#allocation11 + $0x100] sm:$0xff] }
 0x1ad   : > { %2080 = vmatpush1.msra.mxu0 %v1764_v53  ;;  %v1544_v13 = vpop.f32.mrf.mxu1  ;;  %v1605_v18 = vld [vmem:[#allocation11 + $0x108] sm:$0xff]  ;;  %v1636_v53 = vld [vmem:[#allocation11 + $0x200] sm:$0xff] }
 0x1ae   : > { %2081 = vmatprep.subr.mxu0 %v1760_v19  ;;  %v1558_v26 = vadd.f32 %v1544_v13, %v1351_v25  ;;  %1960 = vmatmul.mubr.f32.vlgmr.msra.gmra.mxu1 %v10501_v37  ;;  %v1711_v19 = vld [vmem:[#allocation11 + $0x458] sm:$0xff] }
 0x1af   : > { %2082 = vmatpush1.msra.mxu0 %v1759_v32  ;;  %1979 = vmatpush1.msra.mxu1 %v1649_v11  ;;  %v9190_v43 = vpop.f32.mrf.mxu1  ;;  %v1631_v25 = vld [vmem:[#allocation11 + $0x1d8] sm:$0xff]  ;;  %v1706_v11 = vld [vmem:[#allocation11 + $0x430] sm:$0xff] }
 0x1b0   : > { %v10505_v41 = vmax.f32 %v1558_v26, 0.0  ;;  %2083 = vmatprep.subr.mxu0 %v1755_v34  ;;  %1980 = vmatprep.subr.mxu1 %v1645_v24  ;;  %v1599_v32 = vld [vmem:[#allocation11 + $0xd8] sm:$0xff]  ;;  %v1626_v34 = vld [vmem:[#allocation11 + $0x1b0] sm:$0xff]  ;;  %v1696_v43 = vld [vmem:[#allocation11 + $0x3e0] sm:$0xff] }
 0x1b1   : > { %2084 = vmatpush1.msra.mxu0 %v1754_v35  ;;  %1981 = vmatpush1.msra.mxu1 %v1644_v38  ;;  %v1549_v22 = vpop.f32.mrf.mxu1  ;;  %v1595_v13 = vld [vmem:[#allocation11 + $0xb8] sm:$0xff]  ;;  %v1594_v24 = vld [vmem:[#allocation11 + $0xb0] sm:$0xff]  ;;  %v1621_v35 = vld [vmem:[#allocation11 + $0x188] sm:$0xff] }
 0x1b2   : > { %2085 = vmatprep.subr.mxu0 %v1750_v27  ;;  %v1561_v46 = vadd.f32 %v1549_v22, %v1354_v40  ;;  %1965 = vmatprep.mubr.f32.mxu1 %v11866_v0  ;;  %v1590_v26 = vld [vmem:[#allocation11 + $0x90] sm:$0xff]  ;;  %v1589_v38 = vld [vmem:[#allocation11 + $0x88] sm:$0xff]  ;;  %v1616_v40 = vld [vmem:[#allocation11 + $0x160] sm:$0xff] }
 0x1b3   : > { %1982 = vmatprep.subr.mxu1 %v1640_v42  ;;  %2086 = vmatpush1.msra.mxu0 %v1749_v45  ;;  %v9193_v54 = vpop.f32.mrf.mxu1  ;;  %v1585_v27 = vld [vmem:[#allocation11 + $0x68] sm:$0xff]  ;;  %v1584_v42 = vld [vmem:[#allocation11 + $0x60] sm:$0xff]  ;;  %v1691_v45 = vld [vmem:[#allocation11 + $0x3b8] sm:$0xff] }
 0x1b4   : > { %1966 = vmatmul.mubr.f32.gmra.mxu1 %v10505_v41  ;;  %2087 = vmatprep.subr.mxu0 %v1745_v44  ;;  %v10509_v56 = vmax.f32 %v1561_v46, 0.0  ;;  %v1580_v22 = vld [vmem:[#allocation11 + $0x40] sm:$0xff]  ;;  %v1611_v44 = vld [vmem:[#allocation11 + $0x138] sm:$0xff]  ;;  %v1681_v54 = vld [vmem:[#allocation11 + $0x368] sm:$0xff] }
 0x1b5   : > { %1983 = vmatpush1.msra.mxu1 %v1639_v47  ;;  %2088 = vmatpush1.msra.mxu0 %v1744_v48  ;;  %v1579_v46 = vld [vmem:[#allocation11 + $0x38] sm:$0xff]  ;;  %v1686_v47 = vld [vmem:[#allocation11 + $0x390] sm:$0xff] }
 0x1b6   : > { %1984 = vmatprep.subr.mxu1 %v1635_v50  ;;  %2089 = vmatprep.subr.mxu0 %v1740_v51  ;;  %v1575_v48 = vld [vmem:[#allocation11 + $0x18] sm:$0xff]  ;;  %v1606_v50 = vld [vmem:[#allocation11 + $0x110] sm:$0xff] }
 0x1b7   : > { %1985 = vmatpush1.msra.mxu1 %v1634_v55  ;;  %1971 = vmatprep.mubr.f32.mxu1 %v11866_v0  ;;  %v1574_v51 = vld [vmem:[#allocation11 + $0x10] sm:$0xff] }
 0x1b8   : > { %1986 = vmatprep.subr.mxu1 %v1630_v29  ;;  %2090 = vmatpush1.msra.mxu0 %v1739_v57  ;;  %v1730_v55 = vld [vmem:[#allocation11 + $0x4f0] sm:$0xff]  ;;  %v1601_v29 = vld [vmem:[#allocation11 + $0xe8] sm:$0xff] }
 0x1b9   : > { %1972 = vmatmul.mubr.f32.gmra.mxu1 %v10509_v56  ;;  %2091 = vmatprep.subr.mxu0 %v1735_v58  ;;  %v1729_v57 = vld [vmem:[#allocation11 + $0x4e8] sm:$0xff]  ;;  %v1676_v58 = vld [vmem:[#allocation11 + $0x340] sm:$0xff] }
 0x1ba   : > { %1987 = vmatpush1.msra.mxu1 %v1629_v59  ;;  %2042 = vmatprep.mubr.f32.mxu1 %v10467_v7  ;;  %v1725_v59 = vld [vmem:[#allocation11 + $0x4c8] sm:$0xff] }
 0x1bb   : > { %1988 = vmatprep.subr.mxu1 %v1625_v60  ;;  %2092 = vmatpush1.msra.mxu0 %v1734_v61  ;;  %v1596_v60 = vld [vmem:[#allocation11 + $0xc0] sm:$0xff] }
 0x1bc   : > { %1989 = vmatpush1.msra.mxu1 %v1624_v62  ;;  %2126 = vmatmul.mubr.f32.vlgmr.msra.gmra.mxu0 %v10501_v37  ;;  %v1724_v61 = vld [vmem:[#allocation11 + $0x4c0] sm:$0xff]  ;;  %v1671_v62 = vld [vmem:[#allocation11 + $0x318] sm:$0xff] }
 0x1bd   : > { %8575 = vmatprep.subr.mxu0 %v1731_v63  ;;  %1990 = vmatprep.subr.mxu1 %v1620_v1  ;;  %v1720_v63 = vld [vmem:[#allocation11 + $0x4a0] sm:$0xff]  ;;  %v1591_v1 = vld [vmem:[#allocation11 + $0x98] sm:$0xff] }
 0x1be   : > { %8576 = vmatpush3.msra.mxu0 %v1651_v14  ;;  %1991 = vmatpush1.msra.mxu1 %v1619_v2  ;;  %v1719_v14 = vld [vmem:[#allocation11 + $0x498] sm:$0xff]  ;;  %v1666_v2 = vld [vmem:[#allocation11 + $0x2f0] sm:$0xff] }
 0x1bf   : > { %8577 = vmatprep.subr.mxu0 %v1726_v3  ;;  %1992 = vmatprep.subr.mxu1 %v1615_v5  ;;  %v1715_v3 = vld [vmem:[#allocation11 + $0x478] sm:$0xff]  ;;  %v1586_v5 = vld [vmem:[#allocation11 + $0x70] sm:$0xff] }
 0x1c0   : > { %2131 = vmatprep.mubr.f32.mxu0 %v11866_v0  ;;  %8578 = vmatpush3.msra.mxu0 %v1646_v6  ;;  %v1714_v6 = vld [vmem:[#allocation11 + $0x470] sm:$0xff] }
 0x1c1   : > { %1993 = vmatpush1.msra.mxu1 %v1614_v8  ;;  %2132 = vmatmul.mubr.f32.gmra.mxu0 %v10505_v41  ;;  %v1661_v8 = vld [vmem:[#allocation11 + $0x2c8] sm:$0xff] }
 0x1c2   : > { %8579 = vmatprep.subr.mxu0 %v1721_v15  ;;  %1994 = vmatprep.subr.mxu1 %v1610_v31  ;;  %v1710_v15 = vld [vmem:[#allocation11 + $0x450] sm:$0xff]  ;;  %v1581_v31 = vld [vmem:[#allocation11 + $0x48] sm:$0xff] }
 0x1c3   : > { %8580 = vmatpush3.msra.mxu0 %v1641_v16  ;;  %1995 = vmatpush1.msra.mxu1 %v1609_v10  ;;  %v1709_v16 = vld [vmem:[#allocation11 + $0x448] sm:$0xff]  ;;  %v1656_v10 = vld [vmem:[#allocation11 + $0x2a0] sm:$0xff] }
 0x1c4   : > { %8581 = vmatprep.subr.mxu0 %v1716_v17  ;;  %1996 = vmatprep.subr.mxu1 %v1605_v18  ;;  %v1705_v17 = vld [vmem:[#allocation11 + $0x428] sm:$0xff]  ;;  %v1576_v18 = vld [vmem:[#allocation11 + $0x20] sm:$0xff] }
 0x1c5   : > { %2137 = vmatprep.mubr.f32.mxu0 %v11866_v0  ;;  %8582 = vmatpush3.msra.mxu0 %v1636_v53  ;;  %v1704_v53 = vld [vmem:[#allocation11 + $0x420] sm:$0xff] }
 0x1c6   : > { %1997 = vmatpush1.msra.mxu1 %v1604_v12  ;;  %2138 = vmatmul.mubr.f32.gmra.mxu0 %v10509_v56  ;;  %v2422_v12 = vld [vmem:[#allocation11 + $0x9e0] sm:$0xff] }
 0x1c7   : > { %8583 = vmatprep.subr.mxu0 %v1711_v19  ;;  %1998 = vmatprep.subr.mxu1 %v1600_v21  ;;  %v1700_v19 = vld [vmem:[#allocation11 + $0x400] sm:$0xff]  ;;  %v2421_v21 = vld [vmem:[#allocation11 + $0x9d8] sm:$0xff] }
 0x1c8   : > { %8584 = vmatpush3.msra.mxu0 %v1631_v25  ;;  %2208 = vmatprep.mubr.f32.mxu0 %v10467_v7  ;;  %v1699_v25 = vld [vmem:[#allocation11 + $0x3f8] sm:$0xff] }
 0x1c9   : > { %1999 = vmatpush1.msra.mxu1 %v1599_v32  ;;  %8585 = vmatprep.subr.mxu0 %v1706_v11  ;;  %v2417_v32 = vld [vmem:[#allocation11 + $0x9b8] sm:$0xff] }
 0x1ca   : > { %2000 = vmatprep.subr.mxu1 %v1595_v13  ;;  %8586 = vmatpush3.msra.mxu0 %v1626_v34  ;;  %v1695_v11 = vld [vmem:[#allocation11 + $0x3d8] sm:$0xff]  ;;  %v2416_v13 = vld [vmem:[#allocation11 + $0x9b0] sm:$0xff] }
 0x1cb   : > { %2001 = vmatpush1.msra.mxu1 %v1594_v24  ;;  %8587 = vmatprep.subr.mxu0 %v1701_v4  ;;  %v1694_v34 = vld [vmem:[#allocation11 + $0x3d0] sm:$0xff] }
 0x1cc   : > { %2002 = vmatprep.subr.mxu1 %v1590_v26  ;;  %8588 = vmatpush3.msra.mxu0 %v1621_v35  ;;  %v2412_v24 = vld [vmem:[#allocation11 + $0x990] sm:$0xff]  ;;  %v2411_v26 = vld [vmem:[#allocation11 + $0x988] sm:$0xff] }
 0x1cd   : > { %2003 = vmatpush1.msra.mxu1 %v1589_v38  ;;  %8589 = vmatprep.subr.mxu0 %v1696_v43  ;;  %v1690_v4 = vld [vmem:[#allocation11 + $0x3b0] sm:$0xff]  ;;  %v1689_v35 = vld [vmem:[#allocation11 + $0x3a8] sm:$0xff] }
 0x1ce   : > { %2004 = vmatprep.subr.mxu1 %v1585_v27  ;;  %8590 = vmatpush3.msra.mxu0 %v1616_v40  ;;  %v2407_v38 = vld [vmem:[#allocation11 + $0x968] sm:$0xff]  ;;  %v2406_v27 = vld [vmem:[#allocation11 + $0x960] sm:$0xff] }
 0x1cf   : > { %2005 = vmatpush1.msra.mxu1 %v1584_v42  ;;  %8591 = vmatprep.subr.mxu0 %v1691_v45  ;;  %v1685_v43 = vld [vmem:[#allocation11 + $0x388] sm:$0xff]  ;;  %v1684_v40 = vld [vmem:[#allocation11 + $0x380] sm:$0xff]  ;;  %v2599_v42 = vrot.slane %v10478_v36, 1 }
 0x1d0   : > { %2006 = vmatprep.subr.mxu1 %v1580_v22  ;;  %8592 = vmatpush3.msra.mxu0 %v1611_v44  ;;  %v2402_v45 = vld [vmem:[#allocation11 + $0x940] sm:$0xff]  ;;  %v2401_v44 = vld [vmem:[#allocation11 + $0x938] sm:$0xff] }
 0x1d1   : > { %2007 = vmatpush1.msra.mxu1 %v1579_v46  ;;  %8593 = vmatprep.subr.mxu0 %v1686_v47  ;;  %v1680_v22 = vld [vmem:[#allocation11 + $0x360] sm:$0xff]  ;;  %v2598_v46 = vrot.slane %v10467_v7, 1  ;;  %v1679_v47 = vld [vmem:[#allocation11 + $0x358] sm:$0xff] }
 0x1d2   : > { %2008 = vmatprep.subr.mxu1 %v1575_v48  ;;  %8594 = vmatpush3.msra.mxu0 %v1606_v50  ;;  %v2397_v48 = vld [vmem:[#allocation11 + $0x918] sm:$0xff] }
 0x1d3   : > { %2009 = vmatpush1.msra.mxu1 %v1574_v51  ;;  %8595 = vmatprep.subr.mxu0 %v1681_v54  ;;  %v10530_v50 = vsel %vm744_vm1, %v2598_v46, %v2599_v42  ;;  %v1675_v51 = vld [vmem:[#allocation11 + $0x338] sm:$0xff]  ;;  %v2396_v54 = vld [vmem:[#allocation11 + $0x910] sm:$0xff]  ;;  %v2491_v46 = vld [vmem:[#allocation11 + $0xc08] sm:$0xff] }
 0x1d4   : > { %2010 = vmatprep.subr.mxu1 %v1730_v55  ;;  %8596 = vmatpush3.msra.mxu0 %v1601_v29  ;;  %v1674_v55 = vld [vmem:[#allocation11 + $0x330] sm:$0xff] }
 0x1d5   : > { %2011 = vmatpush2.msra.mxu1 %v1729_v57  ;;  %8597 = vmatprep.subr.mxu0 %v1676_v58  ;;  %v2392_v29 = vld [vmem:[#allocation11 + $0x8f0] sm:$0xff]  ;;  %v2391_v58 = vld [vmem:[#allocation11 + $0x8e8] sm:$0xff] }
 0x1d6   : > { %2012 = vmatprep.subr.mxu1 %v1725_v59  ;;  %8598 = vmatpush3.msra.mxu0 %v1596_v60  ;;  %v1670_v57 = vld [vmem:[#allocation11 + $0x310] sm:$0xff]  ;;  %v1669_v59 = vld [vmem:[#allocation11 + $0x308] sm:$0xff] }
 0x1d7   : > { %2013 = vmatpush2.msra.mxu1 %v1724_v61  ;;  %8599 = vmatprep.subr.mxu0 %v1671_v62  ;;  %v2387_v60 = vld [vmem:[#allocation11 + $0x8c8] sm:$0xff]  ;;  %v2386_v62 = vld [vmem:[#allocation11 + $0x8c0] sm:$0xff] }
 0x1d8   : > { %2014 = vmatprep.subr.mxu1 %v1720_v63  ;;  %8600 = vmatpush3.msra.mxu0 %v1591_v1  ;;  %v1665_v61 = vld [vmem:[#allocation11 + $0x2e8] sm:$0xff]  ;;  %v1664_v63 = vld [vmem:[#allocation11 + $0x2e0] sm:$0xff] }
 0x1d9   : > { %2015 = vmatpush2.msra.mxu1 %v1719_v14  ;;  %8601 = vmatprep.subr.mxu0 %v1666_v2  ;;  %v2382_v1 = vld [vmem:[#allocation11 + $0x8a0] sm:$0xff]  ;;  %v2381_v2 = vld [vmem:[#allocation11 + $0x898] sm:$0xff] }
 0x1da   : > { %2016 = vmatprep.subr.mxu1 %v1715_v3  ;;  %8602 = vmatpush3.msra.mxu0 %v1586_v5  ;;  %v1660_v14 = vld [vmem:[#allocation11 + $0x2c0] sm:$0xff]  ;;  %v1659_v3 = vld [vmem:[#allocation11 + $0x2b8] sm:$0xff] }
 0x1db   : > { %2017 = vmatpush2.msra.mxu1 %v1714_v6  ;;  %8603 = vmatprep.subr.mxu0 %v1661_v8  ;;  %v2377_v5 = vld [vmem:[#allocation11 + $0x878] sm:$0xff]  ;;  %v2376_v8 = vld [vmem:[#allocation11 + $0x870] sm:$0xff] }
 0x1dc   : > { %2018 = vmatprep.subr.mxu1 %v1710_v15  ;;  %8604 = vmatpush3.msra.mxu0 %v1581_v31  ;;  %v1655_v6 = vld [vmem:[#allocation11 + $0x298] sm:$0xff]  ;;  %v1654_v15 = vld [vmem:[#allocation11 + $0x290] sm:$0xff] }
 0x1dd   : > { %2019 = vmatpush2.msra.mxu1 %v1709_v16  ;;  %8605 = vmatprep.subr.mxu0 %v1656_v10  ;;  %v2372_v31 = vld [vmem:[#allocation11 + $0x850] sm:$0xff]  ;;  %v2371_v16 = vld [vmem:[#allocation11 + $0x848] sm:$0xff]  ;;  %v1811_v10 = vld [vmem:[#allocation11 + $0x778] sm:$0xff] }
 0x1de   : > { %2020 = vmatprep.subr.mxu1 %v1705_v17  ;;  %8606 = vmatpush3.msra.mxu0 %v1576_v18  ;;  %v2367_v17 = vld [vmem:[#allocation11 + $0x828] sm:$0xff]  ;;  %v2366_v18 = vld [vmem:[#allocation11 + $0x820] sm:$0xff] }
 0x1df   : > { %2021 = vmatpush2.msra.mxu1 %v1704_v53  ;;  %2209 = vmatmul.mubr.f32.vlgmr.msra.gmra.mxu0 %v10469_v9  ;;  %v1806_v53 = vld [vmem:[#allocation11 + $0x750] sm:$0xff] }
 0x1e0   : > { %2619 = vmatprep.subr.mxu0 %v2422_v12  ;;  %2022 = vmatprep.subr.mxu1 %v1700_v19  ;;  %v2362_v12 = vld [vmem:[#allocation11 + $0x800] sm:$0xff]  ;;  %v2361_v19 = vld [vmem:[#allocation11 + $0x7f8] sm:$0xff] }
 0x1e1   : > { %2213 = vmatprep.mubr.f32.mxu0 %v10478_v36  ;;  %2620 = vmatpush1.msra.mxu0 %v2421_v21  ;;  %v1801_v21 = vld [vmem:[#allocation11 + $0x728] sm:$0xff] }
 0x1e2   : > { %2023 = vmatpush2.msra.mxu1 %v1699_v25  ;;  %2621 = vmatprep.subr.mxu0 %v2417_v32  ;;  %v2357_v25 = vld [vmem:[#allocation11 + $0x7d8] sm:$0xff]  ;;  %v2356_v32 = vld [vmem:[#allocation11 + $0x7d0] sm:$0xff] }
 0x1e3   : > { %2024 = vmatprep.subr.mxu1 %v1695_v11  ;;  %2622 = vmatpush1.msra.mxu0 %v2416_v13  ;;  %v1796_v11 = vld [vmem:[#allocation11 + $0x700] sm:$0xff]  ;;  %v2352_v13 = vld [vmem:[#allocation11 + $0x7b0] sm:$0xff] }
 0x1e4   : > { %2025 = vmatpush2.msra.mxu1 %v1694_v34  ;;  %2214 = vmatmul.mubr.f32.gmra.mxu0 %v10480_v39  ;;  %v2351_v34 = vld [vmem:[#allocation11 + $0x7a8] sm:$0xff] }
 0x1e5   : > { %2623 = vmatprep.subr.mxu0 %v2412_v24  ;;  %2026 = vmatprep.subr.mxu1 %v1690_v4  ;;  %v1791_v24 = vld [vmem:[#allocation11 + $0x6d8] sm:$0xff]  ;;  %v2347_v4 = vld [vmem:[#allocation11 + $0x788] sm:$0xff] }
 0x1e6   : > { %2218 = vmatprep.mubr.f32.mxu0 %v10486_v49  ;;  %2624 = vmatpush1.msra.mxu0 %v2411_v26  ;;  %v2346_v26 = vld [vmem:[#allocation11 + $0x780] sm:$0xff] }
 0x1e7   : > { %2027 = vmatpush2.msra.mxu1 %v1689_v35  ;;  %2625 = vmatprep.subr.mxu0 %v2407_v38  ;;  %v1786_v35 = vld [vmem:[#allocation11 + $0x6b0] sm:$0xff]  ;;  %v2502_v38 = vld [vmem:[#allocation11 + $0xc60] sm:$0xff] }
 0x1e8   : > { %2028 = vmatprep.subr.mxu1 %v1685_v43  ;;  %2626 = vmatpush1.msra.mxu0 %v2406_v27  ;;  %v2501_v43 = vld [vmem:[#allocation11 + $0xc58] sm:$0xff]  ;;  %v1781_v27 = vld [vmem:[#allocation11 + $0x688] sm:$0xff] }
 0x1e9   : > { %2029 = vmatpush2.msra.mxu1 %v1684_v40  ;;  %2219 = vmatmul.mubr.f32.gmra.mxu0 %v10488_v52  ;;  %v2497_v40 = vld [vmem:[#allocation11 + $0xc38] sm:$0xff] }
 0x1ea   : > { %2627 = vmatprep.subr.mxu0 %v2402_v45  ;;  %2030 = vmatprep.subr.mxu1 %v1680_v22  ;;  %v2496_v45 = vld [vmem:[#allocation11 + $0xc30] sm:$0xff]  ;;  %v1776_v22 = vld [vmem:[#allocation11 + $0x660] sm:$0xff] }
 0x1eb   : > { %2628 = vmatpush1.msra.mxu0 %v2401_v44  ;;  %2683 = vmatprep.mubr.f32.mxu0 %v10530_v50  ;;  %v2492_v44 = vld [vmem:[#allocation11 + $0xc10] sm:$0xff] }
 0x1ec   : > { %2031 = vmatpush2.msra.mxu1 %v1679_v47  ;;  %2629 = vmatprep.subr.mxu0 %v2397_v48  ;;  %v1771_v47 = vld [vmem:[#allocation11 + $0x638] sm:$0xff]  ;;  %v2487_v48 = vld [vmem:[#allocation11 + $0xbe8] sm:$0xff] }
 0x1ed   : > { %2032 = vmatprep.subr.mxu1 %v1675_v51  ;;  %2630 = vmatpush1.msra.mxu0 %v2396_v54  ;;  %v2486_v51 = vld [vmem:[#allocation11 + $0xbe0] sm:$0xff]  ;;  %v1766_v54 = vld [vmem:[#allocation11 + $0x610] sm:$0xff] }
 0x1ee   : > { %2033 = vmatpush2.msra.mxu1 %v1674_v55  ;;  %2631 = vmatprep.subr.mxu0 %v2392_v29  ;;  %v2482_v55 = vld [vmem:[#allocation11 + $0xbc0] sm:$0xff]  ;;  %v2481_v29 = vld [vmem:[#allocation11 + $0xbb8] sm:$0xff] }
 0x1ef   : > { %2034 = vmatprep.subr.mxu1 %v1670_v57  ;;  %2632 = vmatpush1.msra.mxu0 %v2391_v58  ;;  %v1761_v57 = vld [vmem:[#allocation11 + $0x5e8] sm:$0xff]  ;;  %v2477_v58 = vld [vmem:[#allocation11 + $0xb98] sm:$0xff] }
 0x1f0   : > { %2035 = vmatpush2.msra.mxu1 %v1669_v59  ;;  %2633 = vmatprep.subr.mxu0 %v2387_v60  ;;  %v2476_v59 = vld [vmem:[#allocation11 + $0xb90] sm:$0xff]  ;;  %v1756_v60 = vld [vmem:[#allocation11 + $0x5c0] sm:$0xff] }
 0x1f1   : > { %2036 = vmatprep.subr.mxu1 %v1665_v61  ;;  %2634 = vmatpush1.msra.mxu0 %v2386_v62  ;;  %v2472_v61 = vld [vmem:[#allocation11 + $0xb70] sm:$0xff]  ;;  %v2471_v62 = vld [vmem:[#allocation11 + $0xb68] sm:$0xff] }
 0x1f2   : > { %2037 = vmatpush2.msra.mxu1 %v1664_v63  ;;  %2635 = vmatprep.subr.mxu0 %v2382_v1  ;;  %v1751_v63 = vld [vmem:[#allocation11 + $0x598] sm:$0xff]  ;;  %v2467_v1 = vld [vmem:[#allocation11 + $0xb48] sm:$0xff] }
 0x1f3   : > { %2038 = vmatprep.subr.mxu1 %v1660_v14  ;;  %2636 = vmatpush1.msra.mxu0 %v2381_v2  ;;  %v2466_v14 = vld [vmem:[#allocation11 + $0xb40] sm:$0xff]  ;;  %v1746_v2 = vld [vmem:[#allocation11 + $0x570] sm:$0xff] }
 0x1f4   : > { %2039 = vmatpush2.msra.mxu1 %v1659_v3  ;;  %2637 = vmatprep.subr.mxu0 %v2377_v5  ;;  %v2462_v3 = vld [vmem:[#allocation11 + $0xb20] sm:$0xff]  ;;  %v2461_v5 = vld [vmem:[#allocation11 + $0xb18] sm:$0xff] }
 0x1f5   : > { %2040 = vmatprep.subr.mxu1 %v1655_v6  ;;  %2638 = vmatpush1.msra.mxu0 %v2376_v8  ;;  %v1741_v6 = vld [vmem:[#allocation11 + $0x548] sm:$0xff]  ;;  %v2457_v8 = vld [vmem:[#allocation11 + $0xaf8] sm:$0xff] }
 0x1f6   : > { %2041 = vmatpush2.msra.mxu1 %v1654_v15  ;;  %2639 = vmatprep.subr.mxu0 %v2372_v31  ;;  %v2456_v15 = vld [vmem:[#allocation11 + $0xaf0] sm:$0xff]  ;;  %v1736_v31 = vld [vmem:[#allocation11 + $0x520] sm:$0xff] }
 0x1f7   : > { %2043 = vmatmul.mubr.f32.vlgmr.msra.gmra.mxu1 %v10469_v9  ;;  %9194 = vmatprep.subr.mxu1 %v11866_v0 }
 0x1f8   : > { %2640 = vmatpush1.msra.mxu0 %v2371_v16  ;;  %2048 = vmatprep.mubr.f32.mxu1 %v10478_v36  ;;  %v2452_v16 = vld [vmem:[#allocation11 + $0xad0] sm:$0xff] }
 0x1f9   : > { %9195 = vmatpush3.msra.mxu1 %v1811_v10  ;;  %2641 = vmatprep.subr.mxu0 %v2367_v17  ;;  %v2451_v10 = vld [vmem:[#allocation11 + $0xac8] sm:$0xff]  ;;  %v2582_v17 = vld [vmem:[#allocation11 + $0xee0] sm:$0xff] }
 0x1fa   : > { %9196 = vmatprep.subr.mxu1 %v11866_v0  ;;  %2642 = vmatpush1.msra.mxu0 %v2366_v18  ;;  %v2447_v18 = vld [vmem:[#allocation11 + $0xaa8] sm:$0xff] }
 0x1fb   : > { %9197 = vmatpush3.msra.mxu1 %v1806_v53  ;;  %2643 = vmatprep.subr.mxu0 %v2362_v12  ;;  %v2581_v53 = vld [vmem:[#allocation11 + $0xed8] sm:$0xff]  ;;  %v2446_v12 = vld [vmem:[#allocation11 + $0xaa0] sm:$0xff] }
 0x1fc   : > { %2049 = vmatmul.mubr.f32.gmra.mxu1 %v10480_v39  ;;  %9198 = vmatprep.subr.mxu1 %v11866_v0 }
 0x1fd   : > { %2644 = vmatpush1.msra.mxu0 %v2361_v19  ;;  %2054 = vmatprep.mubr.f32.mxu1 %v10486_v49  ;;  %v2577_v19 = vld [vmem:[#allocation11 + $0xeb8] sm:$0xff] }
 0x1fe   : > { %9199 = vmatpush3.msra.mxu1 %v1801_v21  ;;  %2645 = vmatprep.subr.mxu0 %v2357_v25  ;;  %v2442_v21 = vld [vmem:[#allocation11 + $0xa80] sm:$0xff]  ;;  %v2576_v25 = vld [vmem:[#allocation11 + $0xeb0] sm:$0xff] }
 0x1ff   : > { %9200 = vmatprep.subr.mxu1 %v11866_v0  ;;  %2646 = vmatpush1.msra.mxu0 %v2356_v32  ;;  %v2441_v32 = vld [vmem:[#allocation11 + $0xa78] sm:$0xff] }
 0x200   : > { %9201 = vmatpush3.msra.mxu1 %v1796_v11  ;;  %2647 = vmatprep.subr.mxu0 %v2352_v13  ;;  %v2572_v11 = vld [vmem:[#allocation11 + $0xe90] sm:$0xff]  ;;  %v2437_v13 = vld [vmem:[#allocation11 + $0xa58] sm:$0xff] }
 0x201   : > { %2055 = vmatmul.mubr.f32.gmra.mxu1 %v10488_v52  ;;  %9202 = vmatprep.subr.mxu1 %v11866_v0 }
 0x202   : > { %2648 = vmatpush1.msra.mxu0 %v2351_v34  ;;  %9203 = vmatpush3.msra.mxu1 %v1791_v24  ;;  %v2571_v34 = vld [vmem:[#allocation11 + $0xe88] sm:$0xff]  ;;  %v2436_v24 = vld [vmem:[#allocation11 + $0xa50] sm:$0xff] }
 0x203   : > { %2649 = vmatprep.subr.mxu0 %v2347_v4  ;;  %9204 = vmatprep.subr.mxu1 %v11866_v0  ;;  %v2567_v4 = vld [vmem:[#allocation11 + $0xe68] sm:$0xff] }
 0x204   : > { %2650 = vmatpush1.msra.mxu0 %v2346_v26  ;;  %9205 = vmatpush3.msra.mxu1 %v1786_v35  ;;  %v2432_v26 = vld [vmem:[#allocation11 + $0xa30] sm:$0xff]  ;;  %v2566_v35 = vld [vmem:[#allocation11 + $0xe60] sm:$0xff] }
 0x205   : > { %2651 = vmatprep.subr.mxu0 %v2502_v38  ;;  %9206 = vmatprep.subr.mxu1 %v11866_v0  ;;  %v2431_v38 = vld [vmem:[#allocation11 + $0xa28] sm:$0xff] }
 0x206   : > { %2652 = vmatpush2.msra.mxu0 %v2501_v43  ;;  %9207 = vmatpush3.msra.mxu1 %v1781_v27  ;;  %v2562_v43 = vld [vmem:[#allocation11 + $0xe40] sm:$0xff]  ;;  %v2427_v27 = vld [vmem:[#allocation11 + $0xa08] sm:$0xff] }
 0x207   : > { %2653 = vmatprep.subr.mxu0 %v2497_v40  ;;  %9208 = vmatprep.subr.mxu1 %v11866_v0  ;;  %v2596_v40 = vrot.slane %v10480_v39, 1 }
 0x208   : > { %2654 = vmatpush2.msra.mxu0 %v2496_v45  ;;  %9209 = vmatpush3.msra.mxu1 %v1776_v22  ;;  %v2561_v45 = vld [vmem:[#allocation11 + $0xe38] sm:$0xff]  ;;  %v2426_v22 = vld [vmem:[#allocation11 + $0xa00] sm:$0xff] }
 0x209   : > { %2655 = vmatprep.subr.mxu0 %v2492_v44  ;;  %9210 = vmatprep.subr.mxu1 %v11866_v0  ;;  %v2557_v44 = vld [vmem:[#allocation11 + $0xe18] sm:$0xff] }
 0x20a   : > { %2656 = vmatpush2.msra.mxu0 %v2491_v46  ;;  %9211 = vmatpush3.msra.mxu1 %v1771_v47  ;;  %v2595_v46 = vrot.slane %v10469_v9, 1  ;;  %v10566_v47 = vrot.slane %v10486_v49, 1 }
 0x20b   : > { %2657 = vmatprep.subr.mxu0 %v2487_v48  ;;  %9212 = vmatprep.subr.mxu1 %v11866_v0  ;;  %v2556_v48 = vld [vmem:[#allocation11 + $0xe10] sm:$0xff] }
 0x20c   : > { %2658 = vmatpush2.msra.mxu0 %v2486_v51  ;;  %9213 = vmatpush3.msra.mxu1 %v1766_v54  ;;  %v2584_v51 = vld [vmem:[#allocation11 + $0xef0] sm:$0xff]  ;;  %v10569_v54 = vsel %vm744_vm1, %v2595_v46, %v2596_v40  ;;  %v2534_v46 = vld [vmem:[#allocation11 + $0xd60] sm:$0xff] }
 0x20d   : > { %2659 = vmatprep.subr.mxu0 %v2482_v55  ;;  %9214 = vmatprep.subr.mxu1 %v11866_v0  ;;  %v2552_v55 = vld [vmem:[#allocation11 + $0xdf0] sm:$0xff] }
 0x20e   : > { %2660 = vmatpush2.msra.mxu0 %v2481_v29  ;;  %9215 = vmatpush3.msra.mxu1 %v1761_v57  ;;  %v2583_v29 = vld [vmem:[#allocation11 + $0xee8] sm:$0xff] }
 0x20f   : > { %2661 = vmatprep.subr.mxu0 %v2477_v58  ;;  %9216 = vmatprep.subr.mxu1 %v11866_v0  ;;  %v2551_v57 = vld [vmem:[#allocation11 + $0xde8] sm:$0xff]  ;;  %v10576_v58 = vsel %vm744_vm1, %v2599_v42, %v10566_v47 }
 0x210   : > { %2662 = vmatpush2.msra.mxu0 %v2476_v59  ;;  %9217 = vmatpush3.msra.mxu1 %v1756_v60  ;;  %v2579_v59 = vld [vmem:[#allocation11 + $0xec8] sm:$0xff] }
 0x211   : > { %2663 = vmatprep.subr.mxu0 %v2472_v61  ;;  %9218 = vmatprep.subr.mxu1 %v11866_v0  ;;  %v2547_v60 = vld [vmem:[#allocation11 + $0xdc8] sm:$0xff]  ;;  %v10579_v61 = vrot.slane %v10488_v52, 1 }
 0x212   : > { %2664 = vmatpush2.msra.mxu0 %v2471_v62  ;;  %9219 = vmatpush3.msra.mxu1 %v1751_v63  ;;  %v2578_v62 = vld [vmem:[#allocation11 + $0xec0] sm:$0xff] }
 0x213   : > { %2665 = vmatprep.subr.mxu0 %v2467_v1  ;;  %9220 = vmatprep.subr.mxu1 %v11866_v0  ;;  %v2546_v63 = vld [vmem:[#allocation11 + $0xdc0] sm:$0xff]  ;;  %v10584_v42 = vsel %vm744_vm1, %v2596_v40, %v10579_v61  ;;  %v2507_v40 = vld [vmem:[#allocation11 + $0xc88] sm:$0xff] }
 0x214   : > { %2666 = vmatpush2.msra.mxu0 %v2466_v14  ;;  %9221 = vmatpush3.msra.mxu1 %v1746_v2  ;;  %v2574_v1 = vld [vmem:[#allocation11 + $0xea0] sm:$0xff]  ;;  %v2573_v2 = vld [vmem:[#allocation11 + $0xe98] sm:$0xff] }
 0x215   : > { %2667 = vmatprep.subr.mxu0 %v2462_v3  ;;  %9222 = vmatprep.subr.mxu1 %v11866_v0  ;;  %v2542_v14 = vld [vmem:[#allocation11 + $0xda0] sm:$0xff]  ;;  %v2541_v3 = vld [vmem:[#allocation11 + $0xd98] sm:$0xff] }
 0x216   : > { %2668 = vmatpush2.msra.mxu0 %v2461_v5  ;;  %9223 = vmatpush3.msra.mxu1 %v1741_v6  ;;  %v2569_v5 = vld [vmem:[#allocation11 + $0xe78] sm:$0xff] }
 0x217   : > { %2669 = vmatprep.subr.mxu0 %v2457_v8  ;;  %9224 = vmatprep.subr.mxu1 %v11866_v0  ;;  %v2537_v6 = vld [vmem:[#allocation11 + $0xd78] sm:$0xff]  ;;  %v2568_v8 = vld [vmem:[#allocation11 + $0xe70] sm:$0xff] }
 0x218   : > { %2670 = vmatpush2.msra.mxu0 %v2456_v15  ;;  %9225 = vmatpush3.msra.mxu1 %v1736_v31  ;;  %v2536_v15 = vld [vmem:[#allocation11 + $0xd70] sm:$0xff] }
 0x219   : > { %9226 = vmatprep.mubr.msk.f32.mxu1 %vm9999_vm4, %v11866_v0  ;;  %2671 = vmatprep.subr.mxu0 %v2452_v16  ;;  %v2564_v31 = vld [vmem:[#allocation11 + $0xe50] sm:$0xff] }
 0x21a   : > { %9227 = vmatmul.mubr.f32.vlgmr.msra.gmra.mxu1 %v10501_v37  ;;  %2672 = vmatpush2.msra.mxu0 %v2451_v10  ;;  %v2532_v16 = vld [vmem:[#allocation11 + $0xd50] sm:$0xff]  ;;  %v2563_v10 = vld [vmem:[#allocation11 + $0xe48] sm:$0xff] }
 0x21b   : > { %2702 = vmatprep.subr.mxu1 %v2582_v17  ;;  %2673 = vmatprep.subr.mxu0 %v2447_v18  ;;  %v2531_v17 = vld [vmem:[#allocation11 + $0xd48] sm:$0xff] }
 0x21c   : > { %2703 = vmatpush1.msra.mxu1 %v2581_v53  ;;  %2674 = vmatpush2.msra.mxu0 %v2446_v12  ;;  %v2559_v18 = vld [vmem:[#allocation11 + $0xe28] sm:$0xff]  ;;  %v2558_v12 = vld [vmem:[#allocation11 + $0xe20] sm:$0xff] }
 0x21d   : > { %2704 = vmatprep.subr.mxu1 %v2577_v19  ;;  %9229 = vmatprep.mubr.msk.f32.mxu1 %vm9999_vm4, %v11866_v0  ;;  %v2527_v53 = vld [vmem:[#allocation11 + $0xd28] sm:$0xff]  ;;  %v2526_v19 = vld [vmem:[#allocation11 + $0xd20] sm:$0xff] }
 0x21e   : > { %2675 = vmatprep.subr.mxu0 %v2442_v21  ;;  %2705 = vmatpush1.msra.mxu1 %v2576_v25  ;;  %v2554_v21 = vld [vmem:[#allocation11 + $0xe00] sm:$0xff] }
 0x21f   : > { %9230 = vmatmul.mubr.f32.gmra.mxu1 %v10505_v41  ;;  %2676 = vmatpush2.msra.mxu0 %v2441_v32  ;;  %v2522_v25 = vld [vmem:[#allocation11 + $0xd00] sm:$0xff]  ;;  %v2553_v32 = vld [vmem:[#allocation11 + $0xdf8] sm:$0xff] }
 0x220   : > { %2706 = vmatprep.subr.mxu1 %v2572_v11  ;;  %2677 = vmatprep.subr.mxu0 %v2437_v13  ;;  %v2521_v11 = vld [vmem:[#allocation11 + $0xcf8] sm:$0xff] }
 0x221   : > { %2707 = vmatpush1.msra.mxu1 %v2571_v34  ;;  %2678 = vmatpush2.msra.mxu0 %v2436_v24  ;;  %v2549_v13 = vld [vmem:[#allocation11 + $0xdd8] sm:$0xff]  ;;  %v2548_v24 = vld [vmem:[#allocation11 + $0xdd0] sm:$0xff] }
 0x222   : > { %2708 = vmatprep.subr.mxu1 %v2567_v4  ;;  %9232 = vmatprep.mubr.msk.f32.mxu1 %vm9999_vm4, %v11866_v0  ;;  %v2517_v34 = vld [vmem:[#allocation11 + $0xcd8] sm:$0xff]  ;;  %v2516_v4 = vld [vmem:[#allocation11 + $0xcd0] sm:$0xff] }
 0x223   : > { %2679 = vmatprep.subr.mxu0 %v2432_v26  ;;  %2709 = vmatpush1.msra.mxu1 %v2566_v35  ;;  %v2544_v26 = vld [vmem:[#allocation11 + $0xdb0] sm:$0xff] }
 0x224   : > { %9233 = vmatmul.mubr.f32.gmra.mxu1 %v10509_v56  ;;  %2680 = vmatpush2.msra.mxu0 %v2431_v38  ;;  %v2512_v35 = vld [vmem:[#allocation11 + $0xcb0] sm:$0xff]  ;;  %v2543_v38 = vld [vmem:[#allocation11 + $0xda8] sm:$0xff] }
 0x225   : > { %2710 = vmatprep.subr.mxu1 %v2562_v43  ;;  %2681 = vmatprep.subr.mxu0 %v2427_v27  ;;  %v2511_v43 = vld [vmem:[#allocation11 + $0xca8] sm:$0xff] }
 0x226   : > { %2711 = vmatpush1.msra.mxu1 %v2561_v45  ;;  %2682 = vmatpush2.msra.mxu0 %v2426_v22  ;;  %v2539_v27 = vld [vmem:[#allocation11 + $0xd88] sm:$0xff]  ;;  %v2538_v45 = vld [vmem:[#allocation11 + $0xd80] sm:$0xff]  ;;  %v2602_v22 = vrot.slane %v10505_v41, 1 }
 0x227   : > { %2712 = vmatprep.subr.mxu1 %v2557_v44  ;;  %2684 = vmatmul.mubr.f32.vlgmr.msra.gmra.mxu0 %v10569_v54  ;;  %v2506_v44 = vld [vmem:[#allocation11 + $0xc80] sm:$0xff] }
 0x228   : > { %2713 = vmatpush1.msra.mxu1 %v2556_v48  ;;  %2868 = vmatprep.subr.mxu0 %v2584_v51  ;;  %v2601_v48 = vrot.slane %v10501_v37, 1  ;;  %v2424_v51 = vld [vmem:[#allocation11 + $0x9f0] sm:$0xff] }
 0x229   : > { %2689 = vmatprep.mubr.f32.mxu0 %v10576_v58  ;;  %2714 = vmatprep.subr.mxu1 %v2552_v55  ;;  %v2533_v55 = vld [vmem:[#allocation11 + $0xd58] sm:$0xff] }
 0x22a   : > { %2869 = vmatpush1.msra.mxu0 %v2583_v29  ;;  %2715 = vmatpush1.msra.mxu1 %v2551_v57  ;;  %v10593_v29 = vsel %vm744_vm1, %v2601_v48, %v2602_v22  ;;  %v2423_v57 = vld [vmem:[#allocation11 + $0x9e8] sm:$0xff]  ;;  %v2485_v48 = vld [vmem:[#allocation11 + $0xbd8] sm:$0xff] }
 0x22b   : > { %2870 = vmatprep.subr.mxu0 %v2579_v59  ;;  %2716 = vmatprep.subr.mxu1 %v2547_v60  ;;  %v2529_v59 = vld [vmem:[#allocation11 + $0xd38] sm:$0xff]  ;;  %v2419_v60 = vld [vmem:[#allocation11 + $0x9c8] sm:$0xff] }
 0x22c   : > { %2871 = vmatpush1.msra.mxu0 %v2578_v62  ;;  %2717 = vmatpush1.msra.mxu1 %v2546_v63  ;;  %v2528_v62 = vld [vmem:[#allocation11 + $0xd30] sm:$0xff]  ;;  %v10597_v63 = vrot.slane %v10509_v56, 1 }
 0x22d   : > { %2690 = vmatmul.mubr.f32.gmra.mxu0 %v10584_v42  ;;  %2872 = vmatprep.subr.mxu0 %v2574_v1  ;;  %v2418_v1 = vld [vmem:[#allocation11 + $0x9c0] sm:$0xff] }
 0x22e   : > { %2695 = vmatprep.mubr.f32.mxu0 %v10566_v47  ;;  %2718 = vmatprep.subr.mxu1 %v2542_v14  ;;  %v2524_v14 = vld [vmem:[#allocation11 + $0xd10] sm:$0xff] }
 0x22f   : > { %2873 = vmatpush1.msra.mxu0 %v2573_v2  ;;  %2719 = vmatpush1.msra.mxu1 %v2541_v3  ;;  %v2414_v2 = vld [vmem:[#allocation11 + $0x9a0] sm:$0xff]  ;;  %v2523_v3 = vld [vmem:[#allocation11 + $0xd08] sm:$0xff] }
 0x230   : > { %2874 = vmatprep.subr.mxu0 %v2569_v5  ;;  %2720 = vmatprep.subr.mxu1 %v2537_v6  ;;  %v10602_v5 = vsel %vm744_vm1, %v2602_v22, %v10597_v63  ;;  %v2413_v6 = vld [vmem:[#allocation11 + $0x998] sm:$0xff]  ;;  %v2379_v22 = vld [vmem:[#allocation11 + $0x888] sm:$0xff]  ;;  %vm7839_vm1 = vcmask 521216  }
 0x231   : > { %2875 = vmatpush1.msra.mxu0 %v2568_v8  ;;  %2721 = vmatpush1.msra.mxu1 %v2536_v15  ;;  %v2519_v8 = vld [vmem:[#allocation11 + $0xce8] sm:$0xff]  ;;  %v2409_v15 = vld [vmem:[#allocation11 + $0x978] sm:$0xff] }
 0x232   : > { %2696 = vmatmul.mubr.f32.gmra.mxu0 %v10579_v61  ;;  %2876 = vmatprep.subr.mxu0 %v2564_v31  ;;  %v2518_v31 = vld [vmem:[#allocation11 + $0xce0] sm:$0xff] }
 0x233   : > { %2722 = vmatprep.subr.mxu1 %v2532_v16  ;;  %2877 = vmatpush1.msra.mxu0 %v2563_v10  ;;  %v2408_v16 = vld [vmem:[#allocation11 + $0x970] sm:$0xff]  ;;  %v2514_v10 = vld [vmem:[#allocation11 + $0xcc0] sm:$0xff] }
 0x234   : > { %2723 = vmatpush1.msra.mxu1 %v2531_v17  ;;  %2878 = vmatprep.subr.mxu0 %v2559_v18  ;;  %v2404_v17 = vld [vmem:[#allocation11 + $0x950] sm:$0xff]  ;;  %v2513_v18 = vld [vmem:[#allocation11 + $0xcb8] sm:$0xff] }
 0x235   : > { %2724 = vmatprep.subr.mxu1 %v2527_v53  ;;  %2879 = vmatpush1.msra.mxu0 %v2558_v12  ;;  %v2403_v53 = vld [vmem:[#allocation11 + $0x948] sm:$0xff]  ;;  %v2509_v12 = vld [vmem:[#allocation11 + $0xc98] sm:$0xff] }
 0x236   : > { %2725 = vmatpush1.msra.mxu1 %v2526_v19  ;;  %2880 = vmatprep.subr.mxu0 %v2554_v21  ;;  %v2399_v19 = vld [vmem:[#allocation11 + $0x928] sm:$0xff]  ;;  %v2508_v21 = vld [vmem:[#allocation11 + $0xc90] sm:$0xff] }
 0x237   : > { %2726 = vmatprep.subr.mxu1 %v2522_v25  ;;  %2881 = vmatpush1.msra.mxu0 %v2553_v32  ;;  %v2398_v25 = vld [vmem:[#allocation11 + $0x920] sm:$0xff]  ;;  %v2505_v32 = vld [vmem:[#allocation11 + $0xc78] sm:$0xff] }
 0x238   : > { %2727 = vmatpush1.msra.mxu1 %v2521_v11  ;;  %2882 = vmatprep.subr.mxu0 %v2549_v13  ;;  %v2394_v11 = vld [vmem:[#allocation11 + $0x900] sm:$0xff]  ;;  %v2425_v13 = vld [vmem:[#allocation11 + $0x9f8] sm:$0xff] }
 0x239   : > { %2728 = vmatprep.subr.mxu1 %v2517_v34  ;;  %2883 = vmatpush1.msra.mxu0 %v2548_v24  ;;  %v2393_v34 = vld [vmem:[#allocation11 + $0x8f8] sm:$0xff]  ;;  %v2500_v24 = vld [vmem:[#allocation11 + $0xc50] sm:$0xff] }
 0x23a   : > { %2729 = vmatpush1.msra.mxu1 %v2516_v4  ;;  %2884 = vmatprep.subr.mxu0 %v2544_v26  ;;  %v2389_v4 = vld [vmem:[#allocation11 + $0x8d8] sm:$0xff]  ;;  %v2420_v26 = vld [vmem:[#allocation11 + $0x9d0] sm:$0xff] }
 0x23b   : > { %2730 = vmatprep.subr.mxu1 %v2512_v35  ;;  %2885 = vmatpush1.msra.mxu0 %v2543_v38  ;;  %v2388_v35 = vld [vmem:[#allocation11 + $0x8d0] sm:$0xff]  ;;  %v2495_v38 = vld [vmem:[#allocation11 + $0xc28] sm:$0xff] }
 0x23c   : > { %2731 = vmatpush1.msra.mxu1 %v2511_v43  ;;  %2886 = vmatprep.subr.mxu0 %v2539_v27  ;;  %v2384_v43 = vld [vmem:[#allocation11 + $0x8b0] sm:$0xff]  ;;  %v2415_v27 = vld [vmem:[#allocation11 + $0x9a8] sm:$0xff] }
 0x23d   : > { %2732 = vmatprep.subr.mxu1 %v2507_v40  ;;  %2887 = vmatpush1.msra.mxu0 %v2538_v45  ;;  %v2383_v40 = vld [vmem:[#allocation11 + $0x8a8] sm:$0xff]  ;;  %v2490_v45 = vld [vmem:[#allocation11 + $0xc00] sm:$0xff] }
 0x23e   : > { %2733 = vmatpush1.msra.mxu1 %v2506_v44  ;;  %2766 = vmatprep.mubr.f32.mxu1 %v11866_v0  ;;  %v2410_v44 = vld [vmem:[#allocation11 + $0x980] sm:$0xff] }
 0x23f   : > { %2888 = vmatprep.subr.mxu0 %v2534_v46  ;;  %2767 = vmatmul.mubr.f32.vlgmr.msra.gmra.mxu1 %v10593_v29  ;;  %v2378_v46 = vld [vmem:[#allocation11 + $0x880] sm:$0xff] }
 0x240   : > { %2785 = vmatprep.subr.mxu1 %v2424_v51  ;;  %2889 = vmatpush1.msra.mxu0 %v2533_v55  ;;  %v2374_v51 = vld [vmem:[#allocation11 + $0x860] sm:$0xff]  ;;  %v2405_v55 = vld [vmem:[#allocation11 + $0x958] sm:$0xff] }
 0x241   : > { %2786 = vmatpush1.msra.mxu1 %v2423_v57  ;;  %2890 = vmatprep.subr.mxu0 %v2529_v59  ;;  %v2373_v57 = vld [vmem:[#allocation11 + $0x858] sm:$0xff]  ;;  %v2480_v59 = vld [vmem:[#allocation11 + $0xbb0] sm:$0xff] }
 0x242   : > { %2787 = vmatprep.subr.mxu1 %v2419_v60  ;;  %2891 = vmatpush1.msra.mxu0 %v2528_v62  ;;  %v2369_v60 = vld [vmem:[#allocation11 + $0x838] sm:$0xff]  ;;  %v2400_v62 = vld [vmem:[#allocation11 + $0x930] sm:$0xff] }
 0x243   : > { %2772 = vmatprep.mubr.f32.mxu1 %v11866_v0  ;;  %2788 = vmatpush1.msra.mxu1 %v2418_v1  ;;  %v2368_v1 = vld [vmem:[#allocation11 + $0x830] sm:$0xff] }
 0x244   : > { %2892 = vmatprep.subr.mxu0 %v2524_v14  ;;  %2773 = vmatmul.mubr.f32.gmra.mxu1 %v10602_v5  ;;  %v2475_v14 = vld [vmem:[#allocation11 + $0xb88] sm:$0xff] }
 0x245   : > { %2789 = vmatprep.subr.mxu1 %v2414_v2  ;;  %2893 = vmatpush1.msra.mxu0 %v2523_v3  ;;  %v2364_v2 = vld [vmem:[#allocation11 + $0x810] sm:$0xff]  ;;  %v2395_v3 = vld [vmem:[#allocation11 + $0x908] sm:$0xff] }
 0x246   : > { %2790 = vmatpush1.msra.mxu1 %v2413_v6  ;;  %2894 = vmatprep.subr.mxu0 %v2519_v8  ;;  %v2363_v6 = vld [vmem:[#allocation11 + $0x808] sm:$0xff]  ;;  %v2470_v8 = vld [vmem:[#allocation11 + $0xb60] sm:$0xff] }
 0x247   : > { %2791 = vmatprep.subr.mxu1 %v2409_v15  ;;  %2895 = vmatpush1.msra.mxu0 %v2518_v31  ;;  %v2359_v15 = vld [vmem:[#allocation11 + $0x7e8] sm:$0xff]  ;;  %v2390_v31 = vld [vmem:[#allocation11 + $0x8e0] sm:$0xff] }
 0x248   : > { %2778 = vmatprep.mubr.f32.mxu1 %v11866_v0  ;;  %2792 = vmatpush1.msra.mxu1 %v2408_v16  ;;  %v2358_v16 = vld [vmem:[#allocation11 + $0x7e0] sm:$0xff] }
 0x249   : > { %2896 = vmatprep.subr.mxu0 %v2514_v10  ;;  %2779 = vmatmul.mubr.f32.gmra.mxu1 %v10597_v63  ;;  %v2465_v10 = vld [vmem:[#allocation11 + $0xb38] sm:$0xff] }
 0x24a   : > { %2793 = vmatprep.subr.mxu1 %v2404_v17  ;;  %2897 = vmatpush1.msra.mxu0 %v2513_v18  ;;  %v2385_v17 = vld [vmem:[#allocation11 + $0x8b8] sm:$0xff] }
 0x24b   : > { %2794 = vmatpush1.msra.mxu1 %v2403_v53  ;;  %2849 = vmatprep.mubr.f32.mxu1 %v10530_v50  ;;  %v2353_v18 = vld [vmem:[#allocation11 + $0x7b8] sm:$0xff]  ;;  %v2460_v53 = vld [vmem:[#allocation11 + $0xb10] sm:$0xff] }
 0x24c   : > { %2898 = vmatprep.subr.mxu0 %v2509_v12  ;;  %2795 = vmatprep.subr.mxu1 %v2399_v19  ;;  %v2349_v12 = vld [vmem:[#allocation11 + $0x798] sm:$0xff]  ;;  %v2380_v19 = vld [vmem:[#allocation11 + $0x890] sm:$0xff] }
 0x24d   : > { %2899 = vmatpush1.msra.mxu0 %v2508_v21  ;;  %2932 = vmatprep.mubr.f32.mxu0 %v11866_v0  ;;  %v2348_v21 = vld [vmem:[#allocation11 + $0x790] sm:$0xff] }
 0x24e   : > { %2796 = vmatpush1.msra.mxu1 %v2398_v25  ;;  %2933 = vmatmul.mubr.f32.vlgmr.msra.gmra.mxu0 %v10593_v29  ;;  %v2455_v25 = vld [vmem:[#allocation11 + $0xae8] sm:$0xff] }
 0x24f   : > { %8635 = vmatprep.subr.mxu0 %v2505_v32  ;;  %2797 = vmatprep.subr.mxu1 %v2394_v11  ;;  %v2504_v32 = vld [vmem:[#allocation11 + $0xc70] sm:$0xff]  ;;  %v2375_v11 = vld [vmem:[#allocation11 + $0x868] sm:$0xff] }
 0x250   : > { %8636 = vmatpush3.msra.mxu0 %v2425_v13  ;;  %2798 = vmatpush1.msra.mxu1 %v2393_v34  ;;  %v2503_v13 = vld [vmem:[#allocation11 + $0xc68] sm:$0xff]  ;;  %v2450_v34 = vld [vmem:[#allocation11 + $0xac0] sm:$0xff] }
 0x251   : > { %8637 = vmatprep.subr.mxu0 %v2500_v24  ;;  %2799 = vmatprep.subr.mxu1 %v2389_v4  ;;  %v2499_v24 = vld [vmem:[#allocation11 + $0xc48] sm:$0xff]  ;;  %v2370_v4 = vld [vmem:[#allocation11 + $0x840] sm:$0xff] }
 0x252   : > { %2938 = vmatprep.mubr.f32.mxu0 %v11866_v0  ;;  %8638 = vmatpush3.msra.mxu0 %v2420_v26  ;;  %v2498_v26 = vld [vmem:[#allocation11 + $0xc40] sm:$0xff] }
 0x253   : > { %2800 = vmatpush1.msra.mxu1 %v2388_v35  ;;  %2939 = vmatmul.mubr.f32.gmra.mxu0 %v10602_v5  ;;  %v2445_v35 = vld [vmem:[#allocation11 + $0xa98] sm:$0xff] }
 0x254   : > { %8639 = vmatprep.subr.mxu0 %v2495_v38  ;;  %2801 = vmatprep.subr.mxu1 %v2384_v43  ;;  %v2494_v38 = vld [vmem:[#allocation11 + $0xc20] sm:$0xff]  ;;  %v2365_v43 = vld [vmem:[#allocation11 + $0x818] sm:$0xff] }
 0x255   : > { %8640 = vmatpush3.msra.mxu0 %v2415_v27  ;;  %2802 = vmatpush1.msra.mxu1 %v2383_v40  ;;  %v2493_v40 = vld [vmem:[#allocation11 + $0xc18] sm:$0xff] }
 0x256   : > { %8641 = vmatprep.subr.mxu0 %v2490_v45  ;;  %2803 = vmatprep.subr.mxu1 %v2379_v22  ;;  %v2440_v45 = vld [vmem:[#allocation11 + $0xa70] sm:$0xff]  ;;  %v2489_v22 = vld [vmem:[#allocation11 + $0xbf8] sm:$0xff] }
 0x257   : > { %2944 = vmatprep.mubr.f32.mxu0 %v11866_v0  ;;  %8642 = vmatpush3.msra.mxu0 %v2410_v44  ;;  %v2360_v44 = vld [vmem:[#allocation11 + $0x7f0] sm:$0xff] }
 0x258   : > { %2804 = vmatpush1.msra.mxu1 %v2378_v46  ;;  %2945 = vmatmul.mubr.f32.gmra.mxu0 %v10597_v63  ;;  %v2488_v46 = vld [vmem:[#allocation11 + $0xbf0] sm:$0xff] }
 0x259   : > { %8643 = vmatprep.subr.mxu0 %v2485_v48  ;;  %2805 = vmatprep.subr.mxu1 %v2374_v51  ;;  %v2435_v48 = vld [vmem:[#allocation11 + $0xa48] sm:$0xff]  ;;  %v2484_v51 = vld [vmem:[#allocation11 + $0xbd0] sm:$0xff] }
 0x25a   : > { %8644 = vmatpush3.msra.mxu0 %v2405_v55  ;;  %3015 = vmatprep.mubr.f32.mxu0 %v10530_v50  ;;  %v2354_v50 = vld [vmem:[#allocation11 + $0x7c0] sm:$0xff]  ;;  %v1878_v27 = vpop.f32.mrf.mxu0  ;;  %v2355_v55 = vld [vmem:[#allocation11 + $0x7c8] sm:$0xff] }
 0x25b   : > { %2806 = vmatpush1.msra.mxu1 %v2373_v57  ;;  %8645 = vmatprep.subr.mxu0 %v2480_v59  ;;  %v2483_v59 = vld [vmem:[#allocation11 + $0xbc8] sm:$0xff] }
 0x25c   : > { %2807 = vmatprep.subr.mxu1 %v2369_v60  ;;  %8646 = vmatpush3.msra.mxu0 %v2400_v62  ;;  %v10615_v57 = vpop.f32.mrf.mxu0  ;;  %v2430_v60 = vld [vmem:[#allocation11 + $0xa20] sm:$0xff]  ;;  %v2479_v62 = vld [vmem:[#allocation11 + $0xba8] sm:$0xff] }
 0x25d   : > { %2808 = vmatpush1.msra.mxu1 %v2368_v1  ;;  %8647 = vmatprep.subr.mxu0 %v2475_v14  ;;  %v2350_v1 = vld [vmem:[#allocation11 + $0x7a0] sm:$0xff] }
 0x25e   : > { %2809 = vmatprep.subr.mxu1 %v2364_v2  ;;  %8648 = vmatpush3.msra.mxu0 %v2395_v3  ;;  %v2478_v14 = vld [vmem:[#allocation11 + $0xba0] sm:$0xff] }
 0x25f   : > { %2810 = vmatpush1.msra.mxu1 %v2363_v6  ;;  %8649 = vmatprep.subr.mxu0 %v2470_v8  ;;  %v3203_v3 = vld [vmem:[#allocation11 + $0x1160] sm:$0xff]  ;;  %v1884_v8 = vpop.f32.mrf.mxu0 }
 0x260   : > { %2811 = vmatprep.subr.mxu1 %v2359_v15  ;;  %8650 = vmatpush3.msra.mxu0 %v2390_v31  ;;  %v2474_v6 = vld [vmem:[#allocation11 + $0xb80] sm:$0xff]  ;;  %v3202_v31 = vld [vmem:[#allocation11 + $0x1158] sm:$0xff] }
 0x261   : > { %2812 = vmatpush1.msra.mxu1 %v2358_v16  ;;  %8651 = vmatprep.subr.mxu0 %v2465_v10  ;;  %v2473_v10 = vld [vmem:[#allocation11 + $0xb78] sm:$0xff] }
 0x262   : > { %2813 = vmatprep.subr.mxu1 %v2354_v50  ;;  %8652 = vmatpush3.msra.mxu0 %v2385_v17  ;;  %v3198_v50 = vld [vmem:[#allocation11 + $0x1138] sm:$0xff] }
 0x263   : > { %2814 = vmatpush1.msra.mxu1 %v2353_v18  ;;  %8653 = vmatprep.subr.mxu0 %v2460_v53  ;;  %v2469_v17 = vld [vmem:[#allocation11 + $0xb58] sm:$0xff]  ;;  %v3197_v18 = vld [vmem:[#allocation11 + $0x1130] sm:$0xff] }
 0x264   : > { %2815 = vmatprep.subr.mxu1 %v2349_v12  ;;  %8654 = vmatpush3.msra.mxu0 %v2380_v19  ;;  %v2468_v53 = vld [vmem:[#allocation11 + $0xb50] sm:$0xff]  ;;  %v10623_v12 = vpop.f32.mrf.mxu0 }
 0x265   : > { %2816 = vmatpush1.msra.mxu1 %v2348_v21  ;;  %8655 = vmatprep.subr.mxu0 %v2455_v25  ;;  %v3193_v19 = vld [vmem:[#allocation11 + $0x1110] sm:$0xff] }
 0x266   : > { %2817 = vmatprep.subr.mxu1 %v2504_v32  ;;  %8656 = vmatpush3.msra.mxu0 %v2375_v11  ;;  %v2464_v21 = vld [vmem:[#allocation11 + $0xb30] sm:$0xff]  ;;  %v3192_v32 = vld [vmem:[#allocation11 + $0x1108] sm:$0xff] }
 0x267   : > { %2818 = vmatpush2.msra.mxu1 %v2503_v13  ;;  %8657 = vmatprep.subr.mxu0 %v2450_v34  ;;  %v2463_v13 = vld [vmem:[#allocation11 + $0xb28] sm:$0xff] }
 0x268   : > { %2819 = vmatprep.subr.mxu1 %v2499_v24  ;;  %8658 = vmatpush3.msra.mxu0 %v2370_v4  ;;  %v3188_v34 = vld [vmem:[#allocation11 + $0x10e8] sm:$0xff] }
 0x269   : > { %2820 = vmatpush2.msra.mxu1 %v2498_v26  ;;  %8659 = vmatprep.subr.mxu0 %v2445_v35  ;;  %v2459_v4 = vld [vmem:[#allocation11 + $0xb08] sm:$0xff]  ;;  %v3187_v26 = vld [vmem:[#allocation11 + $0x10e0] sm:$0xff]  ;;  %v1890_v35 = vpop.f32.mrf.mxu0 }
 0x26a   : > { %2821 = vmatprep.subr.mxu1 %v2494_v38  ;;  %8660 = vmatpush3.msra.mxu0 %v2365_v43  ;;  %v3371_v38 = vrot.slane %v10478_v36, 2  ;;  %v10631_v43 = vld [vmem:[#allocation12] sm:$0x1f] }
 0x26b   : > { %2822 = vmatpush2.msra.mxu1 %v2493_v40  ;;  %8661 = vmatprep.subr.mxu0 %v2440_v45  ;;  %v3183_v40 = vld [vmem:[#allocation11 + $0x10c0] sm:$0xff] }
 0x26c   : > { %2823 = vmatprep.subr.mxu1 %v2489_v22  ;;  %8662 = vmatpush3.msra.mxu0 %v2360_v44  ;;  %v2454_v45 = vld [vmem:[#allocation11 + $0xae0] sm:$0xff]  ;;  %v3370_v22 = vrot.slane %v10467_v7, 2 }
 0x26d   : > { %2824 = vmatpush2.msra.mxu1 %v2488_v46  ;;  %8663 = vmatprep.subr.mxu0 %v2435_v48  ;;  %v3182_v46 = vld [vmem:[#allocation11 + $0x10b8] sm:$0xff]  ;;  %v10637_v48 = vrot.slane %v10631_v43, %v10446_v28 }
 0x26e   : > { %2825 = vmatprep.subr.mxu1 %v2484_v51  ;;  %8664 = vmatpush3.msra.mxu0 %v2355_v55  ;;  %v1961_v2 = vpop.f32.mrf.mxu1  ;;  %v10643_v55 = vsel %vm952_vm3, %v3370_v22, %v3371_v38  ;;  %v3153_v22 = vld [vmem:[#allocation11 + $0xfd0] sm:$0xff] }
 0x26f   : > { %2826 = vmatpush2.msra.mxu1 %v2483_v59  ;;  %8665 = vmatprep.subr.mxu0 %v2430_v60  ;;  %v10617_v15 = vadd.f32 %v1961_v2, %v1878_v27  ;;  %v2458_v27 = vld [vmem:[#allocation11 + $0xb00] sm:$0xff]  ;;  %v2453_v59 = vld [vmem:[#allocation11 + $0xad8] sm:$0xff]  ;;  %v3177_v2 = vld [vmem:[#allocation11 + $0x1090] sm:$0xff] }
 0x270   : > { %2827 = vmatprep.subr.mxu1 %v2479_v62  ;;  %8666 = vmatpush3.msra.mxu0 %v2350_v1  ;;  %v10619_v16 = vpop.f32.mrf.mxu1  ;;  %v3178_v60 = vld [vmem:[#allocation11 + $0x1098] sm:$0xff]  ;;  %v1892_v62 = vpop.f32.mrf.mxu0 }
 0x271   : > { %2828 = vmatpush2.msra.mxu1 %v2478_v14  ;;  %3016 = vmatmul.mubr.f32.vlgmr.msra.gmra.mxu0 %v10569_v54  ;;  %v2449_v14 = vld [vmem:[#allocation11 + $0xab8] sm:$0xff] }
 0x272   : > { %3391 = vmatprep.subr.mxu0 %v3203_v3  ;;  %2829 = vmatprep.subr.mxu1 %v2474_v6  ;;  %v10647_v3 = vrot.slane %v10631_v43, %v10451_v30 }
 0x273   : > { %3020 = vmatprep.mubr.f32.mxu0 %v10576_v58  ;;  %3392 = vmatpush1.msra.mxu0 %v3202_v31  ;;  %v2448_v31 = vld [vmem:[#allocation11 + $0xab0] sm:$0xff] }
 0x274   : > { %2830 = vmatpush2.msra.mxu1 %v2473_v10  ;;  %3393 = vmatprep.subr.mxu0 %v3198_v50  ;;  %v1967_v25 = vpop.f32.mrf.mxu1  ;;  %v3173_v10 = vld [vmem:[#allocation11 + $0x1070] sm:$0xff] }
 0x275   : > { %2831 = vmatprep.subr.mxu1 %v2469_v17  ;;  %3394 = vmatpush1.msra.mxu0 %v3197_v18  ;;  %v10625_v11 = vadd.f32 %v1967_v25, %v1884_v8  ;;  %v2444_v50 = vld [vmem:[#allocation11 + $0xa90] sm:$0xff]  ;;  %v3172_v17 = vld [vmem:[#allocation11 + $0x1068] sm:$0xff]  ;;  %v3167_v25 = vld [vmem:[#allocation11 + $0x1040] sm:$0xff] }
 0x276   : > { %2832 = vmatpush2.msra.mxu1 %v2468_v53  ;;  %3021 = vmatmul.mubr.f32.gmra.mxu0 %v10584_v42  ;;  %v10628_v24 = vpop.f32.mrf.mxu1  ;;  %v2443_v53 = vld [vmem:[#allocation11 + $0xa88] sm:$0xff] }
 0x277   : > { %3395 = vmatprep.subr.mxu0 %v3193_v19  ;;  %2833 = vmatprep.subr.mxu1 %v2464_v21  ;;  %v3168_v19 = vld [vmem:[#allocation11 + $0x1048] sm:$0xff] }
 0x278   : > { %3025 = vmatprep.mubr.f32.mxu0 %v10566_v47  ;;  %3396 = vmatpush1.msra.mxu0 %v3192_v32  ;;  %v2439_v21 = vld [vmem:[#allocation11 + $0xa68] sm:$0xff]  ;;  %v2438_v32 = vld [vmem:[#allocation11 + $0xa60] sm:$0xff] }
 0x279   : > { %2834 = vmatpush2.msra.mxu1 %v2463_v13  ;;  %3397 = vmatprep.subr.mxu0 %v3188_v34  ;;  %v1973_v44 = vpop.f32.mrf.mxu1  ;;  %v3163_v13 = vld [vmem:[#allocation11 + $0x1020] sm:$0xff] }
 0x27a   : > { %2835 = vmatprep.subr.mxu1 %v2459_v4  ;;  %3398 = vmatpush1.msra.mxu0 %v3187_v26  ;;  %v1974_v51 = vadd.f32 %v1973_v44, %v1890_v35  ;;  %v2434_v34 = vld [vmem:[#allocation11 + $0xa40] sm:$0xff]  ;;  %v3162_v4 = vld [vmem:[#allocation11 + $0x1018] sm:$0xff]  ;;  %v3152_v44 = vld [vmem:[#allocation11 + $0xfc8] sm:$0xff] }
 0x27b   : > { %2836 = vmatpush2.msra.mxu1 %v2458_v27  ;;  %3026 = vmatmul.mubr.f32.gmra.mxu0 %v10579_v61  ;;  %v1975_v1 = vpop.f32.mrf.mxu1  ;;  %v2433_v26 = vld [vmem:[#allocation11 + $0xa38] sm:$0xff] }
 0x27c   : > { %3399 = vmatprep.subr.mxu0 %v3183_v40  ;;  %2837 = vmatprep.subr.mxu1 %v2454_v45  ;;  %v10650_v6 = vadd.f32 %v10637_v48, %v1974_v51  ;;  %v1976_v8 = vadd.f32 %v1975_v1, %v1892_v62  ;;  %v3158_v35 = vld [vmem:[#allocation11 + $0xff8] sm:$0xff]  ;;  %v3157_v40 = vld [vmem:[#allocation11 + $0xff0] sm:$0xff]  ;;  %v3148_v51 = vld [vmem:[#allocation11 + $0xfa8] sm:$0xff] }
 0x27d   : > { %3400 = vmatpush1.msra.mxu0 %v3182_v46  ;;  %3455 = vmatprep.mubr.f32.mxu0 %v10643_v55  ;;  %v2429_v27 = vld [vmem:[#allocation11 + $0xa18] sm:$0xff]  ;;  %v2428_v45 = vld [vmem:[#allocation11 + $0xa10] sm:$0xff]  ;;  %v3143_v1 = vld [vmem:[#allocation11 + $0xf80] sm:$0xff] }
 0x27e   : > { %2838 = vmatpush2.msra.mxu1 %v2453_v59  ;;  %3401 = vmatprep.subr.mxu0 %v3178_v60  ;;  %v10654_v18 = vadd.f32 %v10647_v3, %v1976_v8  ;;  %v2585_v46 = vld [vmem:[#allocation11 + $0xef8] sm:$0xff]  ;;  %v3147_v59 = vld [vmem:[#allocation11 + $0xfa0] sm:$0xff]  ;;  %v10658_v60 = vpop.f32.mrf.mxu0  ;;  %v2580_v62 = vld [vmem:[#allocation11 + $0xed0] sm:$0xff] }
 0x27f   : > { %2839 = vmatprep.subr.mxu1 %v2449_v14  ;;  %3402 = vmatpush1.msra.mxu0 %v3177_v2  ;;  %v3142_v14 = vld [vmem:[#allocation11 + $0xf78] sm:$0xff]  ;;  %v2575_v2 = vld [vmem:[#allocation11 + $0xea8] sm:$0xff] }
 0x280   : > { %2840 = vmatpush2.msra.mxu1 %v2448_v31  ;;  %3403 = vmatprep.subr.mxu0 %v3173_v10  ;;  %v10662_v8 = vpop.f32.mrf.mxu0  ;;  %v3137_v31 = vld [vmem:[#allocation11 + $0xf50] sm:$0xff] }
 0x281   : > { %2841 = vmatprep.subr.mxu1 %v2444_v50  ;;  %3404 = vmatpush1.msra.mxu0 %v3172_v17  ;;  %v3133_v10 = vld [vmem:[#allocation11 + $0xf30] sm:$0xff]  ;;  %v3132_v50 = vld [vmem:[#allocation11 + $0xf28] sm:$0xff]  ;;  %v2565_v17 = vld [vmem:[#allocation11 + $0xe58] sm:$0xff] }
 0x282   : > { %2842 = vmatpush2.msra.mxu1 %v2443_v53  ;;  %3405 = vmatprep.subr.mxu0 %v3168_v19  ;;  %v10668_v53 = vpop.f32.mrf.mxu0  ;;  %v3127_v19 = vld [vmem:[#allocation11 + $0xf00] sm:$0xff] }
 0x283   : > { %2843 = vmatprep.subr.mxu1 %v2439_v21  ;;  %3406 = vmatpush1.msra.mxu0 %v3167_v25  ;;  %v3283_v21 = vld [vmem:[#allocation11 + $0x13e0] sm:$0xff]  ;;  %v3282_v25 = vld [vmem:[#allocation11 + $0x13d8] sm:$0xff] }
 0x284   : > { %2844 = vmatpush2.msra.mxu1 %v2438_v32  ;;  %3407 = vmatprep.subr.mxu0 %v3163_v13  ;;  %v2555_v32 = vld [vmem:[#allocation11 + $0xe08] sm:$0xff]  ;;  %v10673_v13 = vpop.f32.mrf.mxu0 }
 0x285   : > { %2845 = vmatprep.subr.mxu1 %v2434_v34  ;;  %3408 = vmatpush1.msra.mxu0 %v3162_v4  ;;  %v3278_v34 = vld [vmem:[#allocation11 + $0x13b8] sm:$0xff]  ;;  %v2550_v4 = vld [vmem:[#allocation11 + $0xde0] sm:$0xff] }
 0x286   : > { %2846 = vmatpush2.msra.mxu1 %v2433_v26  ;;  %3409 = vmatprep.subr.mxu0 %v3158_v35  ;;  %v3273_v26 = vld [vmem:[#allocation11 + $0x1390] sm:$0xff]  ;;  %v3272_v35 = vld [vmem:[#allocation11 + $0x1388] sm:$0xff] }
 0x287   : > { %2847 = vmatprep.subr.mxu1 %v2429_v27  ;;  %3410 = vmatpush1.msra.mxu0 %v3157_v40  ;;  %v2545_v27 = vld [vmem:[#allocation11 + $0xdb8] sm:$0xff]  ;;  %v10677_v40 = vpop.f32.mrf.mxu0 }
 0x288   : > { %2848 = vmatpush2.msra.mxu1 %v2428_v45  ;;  %3411 = vmatprep.subr.mxu0 %v3153_v22  ;;  %v3268_v45 = vld [vmem:[#allocation11 + $0x1368] sm:$0xff]  ;;  %v3267_v22 = vld [vmem:[#allocation11 + $0x1360] sm:$0xff] }
 0x289   : > { %2850 = vmatmul.mubr.f32.vlgmr.msra.gmra.mxu1 %v10569_v54  ;;  %9235 = vmatprep.subr.mxu1 %v11866_v0  ;;  %v3138_v54 = vld [vmem:[#allocation11 + $0xf58] sm:$0xff] }
 0x28a   : > { %3412 = vmatpush1.msra.mxu0 %v3152_v44  ;;  %2855 = vmatprep.mubr.f32.mxu1 %v10576_v58  ;;  %v2570_v58 = vld [vmem:[#allocation11 + $0xe80] sm:$0xff]  ;;  %v2540_v44 = vld [vmem:[#allocation11 + $0xd90] sm:$0xff] }
 0x28b   : > { %9236 = vmatpush3.msra.mxu1 %v2585_v46  ;;  %3413 = vmatprep.subr.mxu0 %v3148_v51  ;;  %v3263_v46 = vld [vmem:[#allocation11 + $0x1340] sm:$0xff]  ;;  %v3262_v51 = vld [vmem:[#allocation11 + $0x1338] sm:$0xff] }
 0x28c   : > { %9237 = vmatprep.subr.mxu1 %v11866_v0  ;;  %3414 = vmatpush1.msra.mxu0 %v3147_v59  ;;  %v10681_v59 = vpop.f32.mrf.mxu0 }
 0x28d   : > { %9238 = vmatpush3.msra.mxu1 %v2580_v62  ;;  %3415 = vmatprep.subr.mxu0 %v3143_v1  ;;  %v2535_v62 = vld [vmem:[#allocation11 + $0xd68] sm:$0xff]  ;;  %v3258_v1 = vld [vmem:[#allocation11 + $0x1318] sm:$0xff] }
 0x28e   : > { %2856 = vmatmul.mubr.f32.gmra.mxu1 %v10584_v42  ;;  %9239 = vmatprep.subr.mxu1 %v11866_v0  ;;  %v3128_v42 = vld [vmem:[#allocation11 + $0xf08] sm:$0xff] }
 0x28f   : > { %3416 = vmatpush1.msra.mxu0 %v3142_v14  ;;  %2861 = vmatprep.mubr.f32.mxu1 %v10566_v47  ;;  %v2560_v47 = vld [vmem:[#allocation11 + $0xe30] sm:$0xff] }
 0x290   : > { %9240 = vmatpush3.msra.mxu1 %v2575_v2  ;;  %3417 = vmatprep.subr.mxu0 %v3138_v54  ;;  %v3257_v14 = vld [vmem:[#allocation11 + $0x1310] sm:$0xff]  ;;  %v2530_v2 = vld [vmem:[#allocation11 + $0xd40] sm:$0xff] }
 0x291   : > { %9241 = vmatprep.subr.mxu1 %v11866_v0  ;;  %3418 = vmatpush1.msra.mxu0 %v3137_v31  ;;  %v3253_v31 = vld [vmem:[#allocation11 + $0x12f0] sm:$0xff] }
 0x292   : > { %9242 = vmatpush3.msra.mxu1 %v2570_v58  ;;  %3419 = vmatprep.subr.mxu0 %v3133_v10  ;;  %v3252_v58 = vld [vmem:[#allocation11 + $0x12e8] sm:$0xff]  ;;  %v2525_v10 = vld [vmem:[#allocation11 + $0xd18] sm:$0xff] }
 0x293   : > { %2862 = vmatmul.mubr.f32.gmra.mxu1 %v10579_v61  ;;  %9243 = vmatprep.subr.mxu1 %v11866_v0  ;;  %v3277_v61 = vld [vmem:[#allocation11 + $0x13b0] sm:$0xff] }
 0x294   : > { %3420 = vmatpush1.msra.mxu0 %v3132_v50  ;;  %9244 = vmatpush3.msra.mxu1 %v2565_v17  ;;  %v3248_v17 = vld [vmem:[#allocation11 + $0x12c8] sm:$0xff] }
 0x295   : > { %3421 = vmatprep.subr.mxu0 %v3128_v42  ;;  %9245 = vmatprep.subr.mxu1 %v11866_v0 }
 0x296   : > { %3422 = vmatpush1.msra.mxu0 %v3127_v19  ;;  %9246 = vmatpush3.msra.mxu1 %v2560_v47  ;;  %v3247_v19 = vld [vmem:[#allocation11 + $0x12c0] sm:$0xff]  ;;  %v2520_v47 = vld [vmem:[#allocation11 + $0xcf0] sm:$0xff] }
 0x297   : > { %3423 = vmatprep.subr.mxu0 %v3283_v21  ;;  %9247 = vmatprep.subr.mxu1 %v11866_v0  ;;  %v3243_v21 = vld [vmem:[#allocation11 + $0x12a0] sm:$0xff] }
 0x298   : > { %3424 = vmatpush2.msra.mxu0 %v3282_v25  ;;  %9248 = vmatpush3.msra.mxu1 %v2555_v32  ;;  %v3242_v32 = vld [vmem:[#allocation11 + $0x1298] sm:$0xff] }
 0x299   : > { %3425 = vmatprep.subr.mxu0 %v3278_v34  ;;  %9249 = vmatprep.subr.mxu1 %v11866_v0  ;;  %v2515_v34 = vld [vmem:[#allocation11 + $0xcc8] sm:$0xff] }
 0x29a   : > { %3426 = vmatpush2.msra.mxu0 %v3277_v61  ;;  %9250 = vmatpush3.msra.mxu1 %v2550_v4  ;;  %v3238_v61 = vld [vmem:[#allocation11 + $0x1278] sm:$0xff] }
 0x29b   : > { %3427 = vmatprep.subr.mxu0 %v3273_v26  ;;  %9251 = vmatprep.subr.mxu1 %v11866_v0  ;;  %v3237_v26 = vld [vmem:[#allocation11 + $0x1270] sm:$0xff] }
 0x29c   : > { %3428 = vmatpush2.msra.mxu0 %v3272_v35  ;;  %9252 = vmatpush3.msra.mxu1 %v2545_v27  ;;  %v2510_v35 = vld [vmem:[#allocation11 + $0xca0] sm:$0xff] }
 0x29d   : > { %3429 = vmatprep.subr.mxu0 %v3268_v45  ;;  %9253 = vmatprep.subr.mxu1 %v11866_v0  ;;  %v3233_v45 = vld [vmem:[#allocation11 + $0x1250] sm:$0xff] }
 0x29e   : > { %3430 = vmatpush2.msra.mxu0 %v3267_v22  ;;  %9254 = vmatpush3.msra.mxu1 %v2540_v44  ;;  %v3232_v22 = vld [vmem:[#allocation11 + $0x1248] sm:$0xff] }
 0x29f   : > { %3431 = vmatprep.subr.mxu0 %v3263_v46  ;;  %9255 = vmatprep.subr.mxu1 %v11866_v0  ;;  %v8607_v54 = vpop.f32.mrf.mxu0  ;;  %v3363_v46 = vld [vmem:[#allocation11 + $0x1660] sm:$0xff] }
 0x2a0   : > { %3432 = vmatpush2.msra.mxu0 %v3262_v51  ;;  %9256 = vmatpush3.msra.mxu1 %v2535_v62  ;;  %v3228_v51 = vld [vmem:[#allocation11 + $0x1228] sm:$0xff]  ;;  %v3362_v62 = vld [vmem:[#allocation11 + $0x1658] sm:$0xff] }
 0x2a1   : > { %3433 = vmatprep.subr.mxu0 %v3258_v1  ;;  %9257 = vmatprep.subr.mxu1 %v11866_v0  ;;  %v8608_v50 = vpop.f32.mrf.mxu0  ;;  %v3227_v1 = vld [vmem:[#allocation11 + $0x1220] sm:$0xff] }
 0x2a2   : > { %3434 = vmatpush2.msra.mxu0 %v3257_v14  ;;  %9258 = vmatpush3.msra.mxu1 %v2530_v2  ;;  %v10685_v42 = vadd.f32 %v8608_v50, %v8607_v54  ;;  %v3358_v2 = vld [vmem:[#allocation11 + $0x1638] sm:$0xff]  ;;  %v3353_v50 = vld [vmem:[#allocation11 + $0x1610] sm:$0xff] }
 0x2a3   : > { %3435 = vmatprep.subr.mxu0 %v3253_v31  ;;  %9259 = vmatprep.subr.mxu1 %v11866_v0  ;;  %v3223_v31 = vld [vmem:[#allocation11 + $0x1200] sm:$0xff] }
 0x2a4   : > { %3436 = vmatpush2.msra.mxu0 %v3252_v58  ;;  %9260 = vmatpush3.msra.mxu1 %v2525_v10  ;;  %v8610_v25 = vpop.f32.mrf.mxu0  ;;  %v3357_v58 = vld [vmem:[#allocation11 + $0x1630] sm:$0xff]  ;;  %v3222_v10 = vld [vmem:[#allocation11 + $0x11f8] sm:$0xff] }
 0x2a5   : > { %3437 = vmatprep.subr.mxu0 %v3248_v17  ;;  %9261 = vmatprep.subr.mxu1 %v11866_v0  ;;  %v3218_v17 = vld [vmem:[#allocation11 + $0x11d8] sm:$0xff] }
 0x2a6   : > { %3438 = vmatpush2.msra.mxu0 %v3247_v19  ;;  %9262 = vmatpush3.msra.mxu1 %v2520_v47  ;;  %v8611_v4 = vpop.f32.mrf.mxu0  ;;  %v3217_v19 = vld [vmem:[#allocation11 + $0x11d0] sm:$0xff]  ;;  %v3348_v47 = vld [vmem:[#allocation11 + $0x15e8] sm:$0xff] }
 0x2a7   : > { %3439 = vmatprep.subr.mxu0 %v3243_v21  ;;  %9263 = vmatprep.subr.mxu1 %v11866_v0  ;;  %v10690_v27 = vadd.f32 %v8611_v4, %v8610_v25  ;;  %v3213_v21 = vld [vmem:[#allocation11 + $0x11b0] sm:$0xff]  ;;  %v3347_v25 = vld [vmem:[#allocation11 + $0x15e0] sm:$0xff]  ;;  %v3368_v4 = vrot.slane %v10480_v39, 2 }
 0x2a8   : > { %3440 = vmatpush2.msra.mxu0 %v3242_v32  ;;  %9264 = vmatpush3.msra.mxu1 %v2515_v34  ;;  %v3212_v32 = vld [vmem:[#allocation11 + $0x11a8] sm:$0xff]  ;;  %v3343_v34 = vld [vmem:[#allocation11 + $0x15c0] sm:$0xff] }
 0x2a9   : > { %3441 = vmatprep.subr.mxu0 %v3238_v61  ;;  %9265 = vmatprep.subr.mxu1 %v11866_v0  ;;  %v8613_v44 = vpop.f32.mrf.mxu0  ;;  %v3208_v61 = vld [vmem:[#allocation11 + $0x1188] sm:$0xff] }
 0x2aa   : > { %3442 = vmatpush2.msra.mxu0 %v3237_v26  ;;  %9266 = vmatpush3.msra.mxu1 %v2510_v35  ;;  %v3207_v26 = vld [vmem:[#allocation11 + $0x1180] sm:$0xff]  ;;  %v3338_v35 = vld [vmem:[#allocation11 + $0x1598] sm:$0xff] }
 0x2ab   : > { %9267 = vmatprep.mubr.msk.f32.mxu1 %vm9999_vm4, %v11866_v0  ;;  %3443 = vmatprep.subr.mxu0 %v3233_v45  ;;  %v8614_v14 = vpop.f32.mrf.mxu0  ;;  %v3367_v45 = vrot.slane %v10469_v9, 2 }
 0x2ac   : > { %9268 = vmatmul.mubr.f32.vlgmr.msra.gmra.mxu1 %v10593_v29  ;;  %3444 = vmatpush2.msra.mxu0 %v3232_v22  ;;  %v10696_v54 = vadd.f32 %v8614_v14, %v8613_v44  ;;  %v3352_v29 = vld [vmem:[#allocation11 + $0x1608] sm:$0xff]  ;;  %v10707_v22 = vrot.slane %v10486_v49, 2  ;;  %v3337_v44 = vld [vmem:[#allocation11 + $0x1590] sm:$0xff] }
 0x2ad   : > { %3474 = vmatprep.subr.mxu1 %v3363_v46  ;;  %3445 = vmatprep.subr.mxu0 %v3228_v51  ;;  %v3365_v46 = vld [vmem:[#allocation11 + $0x1670] sm:$0xff]  ;;  %v3364_v14 = vld [vmem:[#allocation11 + $0x1668] sm:$0xff] }
 0x2ae   : > { %3475 = vmatpush1.msra.mxu1 %v3362_v62  ;;  %3446 = vmatpush2.msra.mxu0 %v3227_v1  ;;  %v10710_v62 = vsel %vm952_vm3, %v3367_v45, %v3368_v4  ;;  %v3333_v1 = vld [vmem:[#allocation11 + $0x1570] sm:$0xff]  ;;  %v2319_v45 = vsub.s32 3, %v10441_v23 }
 0x2af   : > { %3476 = vmatprep.subr.mxu1 %v3358_v2  ;;  %9270 = vmatprep.mubr.msk.f32.mxu1 %vm9999_vm4, %v11866_v0  ;;  %v3332_v2 = vld [vmem:[#allocation11 + $0x1568] sm:$0xff] }
 0x2b0   : > { %3447 = vmatprep.subr.mxu0 %v3223_v31  ;;  %3477 = vmatpush1.msra.mxu1 %v3357_v58  ;;  %v10722_v58 = vsel %vm952_vm3, %v3371_v38, %v10707_v22 }
 0x2b1   : > { %9271 = vmatmul.mubr.f32.gmra.mxu1 %v10602_v5  ;;  %3448 = vmatpush2.msra.mxu0 %v3222_v10  ;;  %v3342_v5 = vld [vmem:[#allocation11 + $0x15b8] sm:$0xff]  ;;  %v3360_v10 = vld [vmem:[#allocation11 + $0x1648] sm:$0xff] }
 0x2b2   : > { %3478 = vmatprep.subr.mxu1 %v3353_v50  ;;  %3449 = vmatprep.subr.mxu0 %v3218_v17  ;;  %v3328_v50 = vld [vmem:[#allocation11 + $0x1548] sm:$0xff]  ;;  %v3359_v17 = vld [vmem:[#allocation11 + $0x1640] sm:$0xff] }
 0x2b3   : > { %3479 = vmatpush1.msra.mxu1 %v3352_v29  ;;  %3450 = vmatpush2.msra.mxu0 %v3217_v19  ;;  %v3327_v29 = vld [vmem:[#allocation11 + $0x1540] sm:$0xff] }
 0x2b4   : > { %3480 = vmatprep.subr.mxu1 %v3348_v47  ;;  %9273 = vmatprep.mubr.msk.f32.mxu1 %vm9999_vm4, %v11866_v0  ;;  %v3355_v19 = vld [vmem:[#allocation11 + $0x1620] sm:$0xff] }
 0x2b5   : > { %3451 = vmatprep.subr.mxu0 %v3213_v21  ;;  %3481 = vmatpush1.msra.mxu1 %v3347_v25  ;;  %v3323_v21 = vld [vmem:[#allocation11 + $0x1520] sm:$0xff] }
 0x2b6   : > { %9274 = vmatmul.mubr.f32.gmra.mxu1 %v10597_v63  ;;  %3452 = vmatpush2.msra.mxu0 %v3212_v32  ;;  %v3354_v32 = vld [vmem:[#allocation11 + $0x1618] sm:$0xff] }
 0x2b7   : > { %3482 = vmatprep.subr.mxu1 %v3343_v34  ;;  %3453 = vmatprep.subr.mxu0 %v3208_v61  ;;  %v2044_v51 = vpop.f32.mrf.mxu1  ;;  %v3322_v34 = vld [vmem:[#allocation11 + $0x1518] sm:$0xff] }
 0x2b8   : > { %3483 = vmatpush1.msra.mxu1 %v3342_v5  ;;  %3454 = vmatpush2.msra.mxu0 %v3207_v26  ;;  %v10713_v63 = vadd.f32 %v10658_v60, %v2044_v51  ;;  %v10725_v60 = vrot.slane %v10488_v52, 2  ;;  %v3350_v5 = vld [vmem:[#allocation11 + $0x15f8] sm:$0xff]  ;;  %v3344_v51 = vld [vmem:[#allocation11 + $0x15c8] sm:$0xff] }
 0x2b9   : > { %3484 = vmatprep.subr.mxu1 %v3338_v35  ;;  %3456 = vmatmul.mubr.f32.vlgmr.msra.gmra.mxu0 %v10710_v62  ;;  %v10716_v31 = vpop.f32.mrf.mxu1  ;;  %v3318_v26 = vld [vmem:[#allocation11 + $0x14f8] sm:$0xff]  ;;  %v3317_v35 = vld [vmem:[#allocation11 + $0x14f0] sm:$0xff] }
 0x2ba   : > { %3485 = vmatpush1.msra.mxu1 %v3337_v44  ;;  %3640 = vmatprep.subr.mxu0 %v3365_v46  ;;  %v10733_v25 = vsel %vm952_vm3, %v3368_v4, %v10725_v60  ;;  %v3345_v4 = vld [vmem:[#allocation11 + $0x15d0] sm:$0xff] }
 0x2bb   : > { %3461 = vmatprep.mubr.f32.mxu0 %v10722_v58  ;;  %3486 = vmatprep.subr.mxu1 %v3333_v1  ;;  %v3313_v46 = vld [vmem:[#allocation11 + $0x14d0] sm:$0xff]  ;;  %v10742_v1 = vrot.slane %v10631_v43, %v10475_v33 }
 0x2bc   : > { %3641 = vmatpush1.msra.mxu0 %v3364_v14  ;;  %3487 = vmatpush1.msra.mxu1 %v3332_v2  ;;  %v2050_v47 = vpop.f32.mrf.mxu1  ;;  %v3312_v2 = vld [vmem:[#allocation11 + $0x14c8] sm:$0xff] }
 0x2bd   : > { %3642 = vmatprep.subr.mxu0 %v3360_v10  ;;  %3488 = vmatprep.subr.mxu1 %v3328_v50  ;;  %v10729_v38 = vadd.f32 %v10668_v53, %v2050_v47  ;;  %v3349_v53 = vld [vmem:[#allocation11 + $0x15f0] sm:$0xff]  ;;  %v3340_v10 = vld [vmem:[#allocation11 + $0x15a8] sm:$0xff] }
 0x2be   : > { %3643 = vmatpush1.msra.mxu0 %v3359_v17  ;;  %3489 = vmatpush1.msra.mxu1 %v3327_v29  ;;  %v10735_v61 = vpop.f32.mrf.mxu1  ;;  %v3308_v17 = vld [vmem:[#allocation11 + $0x14a8] sm:$0xff]  ;;  %v3339_v29 = vld [vmem:[#allocation11 + $0x15a0] sm:$0xff] }
 0x2bf   : > { %3462 = vmatmul.mubr.f32.gmra.mxu0 %v10733_v25  ;;  %3644 = vmatprep.subr.mxu0 %v3355_v19  ;;  %v10747_v19 = vrot.slane %v10631_v43, %v2319_v45  ;;  %v3298_v45 = vld [vmem:[#allocation11 + $0x1458] sm:$0xff] }
 0x2c0   : > { %3467 = vmatprep.mubr.f32.mxu0 %v10707_v22  ;;  %3490 = vmatprep.subr.mxu1 %v3323_v21 }
 0x2c1   : > { %3645 = vmatpush1.msra.mxu0 %v3354_v32  ;;  %3491 = vmatpush1.msra.mxu1 %v3322_v34  ;;  %v2056_v44 = vpop.f32.mrf.mxu1  ;;  %v3335_v32 = vld [vmem:[#allocation11 + $0x1580] sm:$0xff] }
 0x2c2   : > { %3646 = vmatprep.subr.mxu0 %v3350_v5  ;;  %3492 = vmatprep.subr.mxu1 %v3318_v26  ;;  %v2140_v14 = vadd.f32 %v10677_v40, %v2056_v44  ;;  %v3307_v40 = vld [vmem:[#allocation11 + $0x14a0] sm:$0xff]  ;;  %v3334_v5 = vld [vmem:[#allocation11 + $0x1578] sm:$0xff]  ;;  %v3325_v44 = vld [vmem:[#allocation11 + $0x1530] sm:$0xff] }
 0x2c3   : > { %3647 = vmatpush1.msra.mxu0 %v3349_v53  ;;  %3493 = vmatpush1.msra.mxu1 %v3317_v35  ;;  %v2058_v50 = vpop.f32.mrf.mxu1  ;;  %v3303_v34 = vld [vmem:[#allocation11 + $0x1480] sm:$0xff]  ;;  %v3302_v53 = vld [vmem:[#allocation11 + $0x1478] sm:$0xff] }
 0x2c4   : > { %3468 = vmatmul.mubr.f32.gmra.mxu0 %v10725_v60  ;;  %3648 = vmatprep.subr.mxu0 %v3345_v4  ;;  %v10750_v47 = vadd.f32 %v10742_v1, %v2140_v14  ;;  %v2142_v21 = vadd.f32 %v10681_v59, %v2058_v50  ;;  %v3330_v35 = vld [vmem:[#allocation11 + $0x1558] sm:$0xff]  ;;  %v3329_v4 = vld [vmem:[#allocation11 + $0x1550] sm:$0xff]  ;;  %v3292_v14 = vld [vmem:[#allocation11 + $0x1428] sm:$0xff] }
 0x2c5   : > { %3494 = vmatprep.subr.mxu1 %v3313_v46  ;;  %3649 = vmatpush1.msra.mxu0 %v3344_v51  ;;  %v3297_v59 = vld [vmem:[#allocation11 + $0x1450] sm:$0xff]  ;;  %v3324_v51 = vld [vmem:[#allocation11 + $0x1528] sm:$0xff]  ;;  %v3319_v50 = vld [vmem:[#allocation11 + $0x1500] sm:$0xff] }
 0x2c6   : > { %3495 = vmatpush1.msra.mxu1 %v3312_v2  ;;  %3650 = vmatprep.subr.mxu0 %v3340_v10  ;;  %v10754_v26 = vadd.f32 %v10747_v19, %v2142_v21  ;;  %v3293_v46 = vld [vmem:[#allocation11 + $0x1430] sm:$0xff]  ;;  %v3320_v2 = vld [vmem:[#allocation11 + $0x1508] sm:$0xff]  ;;  %v3315_v21 = vld [vmem:[#allocation11 + $0x14e0] sm:$0xff] }
 0x2c7   : > { %3496 = vmatprep.subr.mxu1 %v3308_v17  ;;  %3651 = vmatpush1.msra.mxu0 %v3339_v29  ;;  %v3288_v10 = vld [vmem:[#allocation11 + $0x1408] sm:$0xff]  ;;  %v3374_v17 = vrot.slane %v10505_v41, 2  ;;  %v3287_v29 = vld [vmem:[#allocation11 + $0x1400] sm:$0xff] }
 0x2c8   : > { %3497 = vmatpush1.msra.mxu1 %v3307_v40  ;;  %3652 = vmatprep.subr.mxu0 %v3335_v32  ;;  %v3373_v40 = vrot.slane %v10501_v37, 2  ;;  %v3205_v32 = vld [vmem:[#allocation11 + $0x1170] sm:$0xff] }
 0x2c9   : > { %3498 = vmatprep.subr.mxu1 %v3303_v34  ;;  %3653 = vmatpush1.msra.mxu0 %v3334_v5  ;;  %v3314_v34 = vld [vmem:[#allocation11 + $0x14d8] sm:$0xff] }
 0x2ca   : > { %3499 = vmatpush1.msra.mxu1 %v3302_v53  ;;  %3654 = vmatprep.subr.mxu0 %v3330_v35  ;;  %v10760_v5 = vsel %vm952_vm3, %v3373_v40, %v3374_v17  ;;  %v3204_v53 = vld [vmem:[#allocation11 + $0x1168] sm:$0xff]  ;;  %v3310_v35 = vld [vmem:[#allocation11 + $0x14b8] sm:$0xff]  ;;  %v3189_v40 = vld [vmem:[#allocation11 + $0x10f0] sm:$0xff] }
 0x2cb   : > { %3500 = vmatprep.subr.mxu1 %v3298_v45  ;;  %3655 = vmatpush1.msra.mxu0 %v3329_v4  ;;  %v3200_v45 = vld [vmem:[#allocation11 + $0x1148] sm:$0xff]  ;;  %v3309_v4 = vld [vmem:[#allocation11 + $0x14b0] sm:$0xff] }
 0x2cc   : > { %3501 = vmatpush1.msra.mxu1 %v3297_v59  ;;  %3656 = vmatprep.subr.mxu0 %v3325_v44  ;;  %v10764_v59 = vrot.slane %v10509_v56, 2  ;;  %v3199_v44 = vld [vmem:[#allocation11 + $0x1140] sm:$0xff] }
 0x2cd   : > { %3502 = vmatprep.subr.mxu1 %v3293_v46  ;;  %3657 = vmatpush1.msra.mxu0 %v3324_v51  ;;  %v3305_v46 = vld [vmem:[#allocation11 + $0x1490] sm:$0xff]  ;;  %v3195_v51 = vld [vmem:[#allocation11 + $0x1120] sm:$0xff] }
 0x2ce   : > { %3503 = vmatpush1.msra.mxu1 %v3292_v14  ;;  %3658 = vmatprep.subr.mxu0 %v3320_v2  ;;  %v3304_v14 = vld [vmem:[#allocation11 + $0x1488] sm:$0xff]  ;;  %v10769_v2 = vsel %vm952_vm3, %v3374_v17, %v10764_v59 }
 0x2cf   : > { %3504 = vmatprep.subr.mxu1 %v3288_v10  ;;  %3659 = vmatpush1.msra.mxu0 %v3319_v50  ;;  %v3194_v10 = vld [vmem:[#allocation11 + $0x1118] sm:$0xff]  ;;  %v3300_v50 = vld [vmem:[#allocation11 + $0x1468] sm:$0xff] }
 0x2d0   : > { %3505 = vmatpush1.msra.mxu1 %v3287_v29  ;;  %3538 = vmatprep.mubr.f32.mxu1 %v11866_v0  ;;  %v3190_v29 = vld [vmem:[#allocation11 + $0x10f8] sm:$0xff]  ;;  %v3184_v17 = vld [vmem:[#allocation11 + $0x10c8] sm:$0xff] }
 0x2d1   : > { %3660 = vmatprep.subr.mxu0 %v3315_v21  ;;  %3539 = vmatmul.mubr.f32.vlgmr.msra.gmra.mxu1 %v10760_v5  ;;  %v3299_v21 = vld [vmem:[#allocation11 + $0x1460] sm:$0xff] }
 0x2d2   : > { %3557 = vmatprep.subr.mxu1 %v3205_v32  ;;  %3661 = vmatpush1.msra.mxu0 %v3314_v34  ;;  %v3295_v32 = vld [vmem:[#allocation11 + $0x1440] sm:$0xff]  ;;  %v3185_v34 = vld [vmem:[#allocation11 + $0x10d0] sm:$0xff] }
 0x2d3   : > { %3558 = vmatpush1.msra.mxu1 %v3204_v53  ;;  %3662 = vmatprep.subr.mxu0 %v3310_v35  ;;  %v3294_v53 = vld [vmem:[#allocation11 + $0x1438] sm:$0xff] }
 0x2d4   : > { %3559 = vmatprep.subr.mxu1 %v3200_v45  ;;  %3663 = vmatpush1.msra.mxu0 %v3309_v4  ;;  %v3290_v45 = vld [vmem:[#allocation11 + $0x1418] sm:$0xff]  ;;  %v3180_v4 = vld [vmem:[#allocation11 + $0x10a8] sm:$0xff] }
 0x2d5   : > { %3544 = vmatprep.mubr.f32.mxu1 %v11866_v0  ;;  %3560 = vmatpush1.msra.mxu1 %v3199_v44 }
 0x2d6   : > { %3664 = vmatprep.subr.mxu0 %v3305_v46  ;;  %3545 = vmatmul.mubr.f32.gmra.mxu1 %v10769_v2  ;;  %v3289_v46 = vld [vmem:[#allocation11 + $0x1410] sm:$0xff] }
 0x2d7   : > { %3561 = vmatprep.subr.mxu1 %v3195_v51  ;;  %3665 = vmatpush1.msra.mxu0 %v3304_v14  ;;  %v3179_v14 = vld [vmem:[#allocation11 + $0x10a0] sm:$0xff] }
 0x2d8   : > { %3562 = vmatpush1.msra.mxu1 %v3194_v10  ;;  %3666 = vmatprep.subr.mxu0 %v3300_v50  ;;  %v3286_v10 = vld [vmem:[#allocation11 + $0x13f8] sm:$0xff]  ;;  %v3175_v50 = vld [vmem:[#allocation11 + $0x1080] sm:$0xff] }
 0x2d9   : > { %3563 = vmatprep.subr.mxu1 %v3190_v29  ;;  %3667 = vmatpush1.msra.mxu0 %v3299_v21  ;;  %v3206_v29 = vld [vmem:[#allocation11 + $0x1178] sm:$0xff] }
 0x2da   : > { %3550 = vmatprep.mubr.f32.mxu1 %v11866_v0  ;;  %3564 = vmatpush1.msra.mxu1 %v3189_v40  ;;  %v2290_v35 = vpop.f32.mrf.mxu1  ;;  %v3174_v21 = vld [vmem:[#allocation11 + $0x1078] sm:$0xff] }
 0x2db   : > { %3668 = vmatprep.subr.mxu0 %v3295_v32  ;;  %3551 = vmatmul.mubr.f32.gmra.mxu1 %v10764_v59  ;;  %v10775_v44 = vadd.f32 %v10685_v42, %v2290_v35  ;;  %v3281_v42 = vld [vmem:[#allocation11 + $0x13d0] sm:$0xff]  ;;  %v3170_v32 = vld [vmem:[#allocation11 + $0x1058] sm:$0xff] }
 0x2dc   : > { %3565 = vmatprep.subr.mxu1 %v3185_v34  ;;  %3669 = vmatpush1.msra.mxu0 %v3294_v53  ;;  %v9228_v51 = vpop.f32.mrf.mxu1  ;;  %v3201_v53 = vld [vmem:[#allocation11 + $0x1150] sm:$0xff] }
 0x2dd   : > { %3566 = vmatpush1.msra.mxu1 %v3184_v17  ;;  %3621 = vmatprep.mubr.f32.mxu1 %v10643_v55  ;;  %v11863_v17 = vsub.s32 4, %v10441_v23  ;;  %v3196_v51 = vld [vmem:[#allocation11 + $0x1128] sm:$0xff] }
 0x2de   : > { %3670 = vmatprep.subr.mxu0 %v3290_v45  ;;  %3567 = vmatprep.subr.mxu1 %v3180_v4  ;;  %v3169_v45 = vld [vmem:[#allocation11 + $0x1050] sm:$0xff]  ;;  %v3276_v4 = vld [vmem:[#allocation11 + $0x13a8] sm:$0xff] }
 0x2df   : > { %3671 = vmatpush1.msra.mxu0 %v3289_v46  ;;  %3704 = vmatprep.mubr.f32.mxu0 %v11866_v0  ;;  %v2295_v40 = vpop.f32.mrf.mxu1  ;;  %v3165_v46 = vld [vmem:[#allocation11 + $0x1030] sm:$0xff] }
 0x2e0   : > { %3568 = vmatpush1.msra.mxu1 %v3179_v14  ;;  %3705 = vmatmul.mubr.f32.vlgmr.msra.gmra.mxu0 %v10760_v5  ;;  %v10781_v34 = vadd.f32 %v10690_v27, %v2295_v40  ;;  %v3164_v14 = vld [vmem:[#allocation11 + $0x1028] sm:$0xff]  ;;  %v3191_v40 = vld [vmem:[#allocation11 + $0x1100] sm:$0xff] }
 0x2e1   : > { %8695 = vmatprep.subr.mxu0 %v3286_v10  ;;  %3569 = vmatprep.subr.mxu1 %v3175_v50  ;;  %v9231_v35 = vpop.f32.mrf.mxu1  ;;  %v3271_v10 = vld [vmem:[#allocation11 + $0x1380] sm:$0xff]  ;;  %v3160_v50 = vld [vmem:[#allocation11 + $0x1008] sm:$0xff] }
 0x2e2   : > { %8696 = vmatpush3.msra.mxu0 %v3206_v29  ;;  %3570 = vmatpush1.msra.mxu1 %v3174_v21  ;;  %v10789_v29 = vrot.slane %v10631_v43, %v11863_v17  ;;  %v3266_v35 = vld [vmem:[#allocation11 + $0x1358] sm:$0xff]  ;;  %v3269_v17 = vld [vmem:[#allocation11 + $0x1370] sm:$0xff] }
 0x2e3   : > { %8697 = vmatprep.subr.mxu0 %v3281_v42  ;;  %3571 = vmatprep.subr.mxu1 %v3170_v32  ;;  %v3159_v32 = vld [vmem:[#allocation11 + $0x1000] sm:$0xff]  ;;  %v3186_v43 = vld [vmem:[#allocation11 + $0x10d8] sm:$0xff] }
 0x2e4   : > { %3710 = vmatprep.mubr.f32.mxu0 %v11866_v0  ;;  %8698 = vmatpush3.msra.mxu0 %v3201_v53  ;;  %v2300_v27 = vpop.f32.mrf.mxu1 }
 0x2e5   : > { %3572 = vmatpush1.msra.mxu1 %v3169_v45  ;;  %3711 = vmatmul.mubr.f32.gmra.mxu0 %v10769_v2  ;;  %v2301_v21 = vadd.f32 %v10696_v54, %v2300_v27  ;;  %v3155_v45 = vld [vmem:[#allocation11 + $0xfe0] sm:$0xff]  ;;  %v3154_v54 = vld [vmem:[#allocation11 + $0xfd8] sm:$0xff]  ;;  %v3256_v27 = vld [vmem:[#allocation11 + $0x1308] sm:$0xff] }
 0x2e6   : > { %8699 = vmatprep.subr.mxu0 %v3276_v4  ;;  %3573 = vmatprep.subr.mxu1 %v3165_v46  ;;  %v9234_v42 = vpop.f32.mrf.mxu1  ;;  %v3261_v4 = vld [vmem:[#allocation11 + $0x1330] sm:$0xff]  ;;  %v3150_v46 = vld [vmem:[#allocation11 + $0xfb8] sm:$0xff] }
 0x2e7   : > { %8700 = vmatpush3.msra.mxu0 %v3196_v51  ;;  %3574 = vmatpush1.msra.mxu1 %v3164_v14  ;;  %v10793_v53 = vadd.f32 %v10789_v29, %v2301_v21  ;;  %v3181_v51 = vld [vmem:[#allocation11 + $0x10b0] sm:$0xff]  ;;  %v3144_v21 = vld [vmem:[#allocation11 + $0xf88] sm:$0xff] }
 0x2e8   : > { %8701 = vmatprep.subr.mxu0 %v3271_v10  ;;  %3575 = vmatprep.subr.mxu1 %v3160_v50  ;;  %v3149_v14 = vld [vmem:[#allocation11 + $0xfb0] sm:$0xff]  ;;  %v3176_v50 = vld [vmem:[#allocation11 + $0x1088] sm:$0xff] }
 0x2e9   : > { %3716 = vmatprep.mubr.f32.mxu0 %v11866_v0  ;;  %8702 = vmatpush3.msra.mxu0 %v3191_v40  ;;  %v3145_v10 = vld [vmem:[#allocation11 + $0xf90] sm:$0xff]  ;;  %v3251_v40 = vld [vmem:[#allocation11 + $0x12e0] sm:$0xff]  ;;  %v3140_v42 = vld [vmem:[#allocation11 + $0xf68] sm:$0xff] }
 0x2ea   : > { %3576 = vmatpush1.msra.mxu1 %v3159_v32  ;;  %3717 = vmatmul.mubr.f32.gmra.mxu0 %v10764_v59  ;;  %v3171_v32 = vld [vmem:[#allocation11 + $0x1060] sm:$0xff] }
 0x2eb   : > { %8703 = vmatprep.subr.mxu0 %v3266_v35  ;;  %3577 = vmatprep.subr.mxu1 %v3155_v45  ;;  %v3139_v35 = vld [vmem:[#allocation11 + $0xf60] sm:$0xff]  ;;  %v3246_v45 = vld [vmem:[#allocation11 + $0x12b8] sm:$0xff] }
 0x2ec   : > { %8704 = vmatpush3.msra.mxu0 %v3186_v43  ;;  %3787 = vmatprep.mubr.f32.mxu0 %v10643_v55  ;;  %v3135_v55 = vld [vmem:[#allocation11 + $0xf40] sm:$0xff]  ;;  %v3166_v43 = vld [vmem:[#allocation11 + $0x1038] sm:$0xff] }
 0x2ed   : > { %3578 = vmatpush1.msra.mxu1 %v3154_v54  ;;  %8705 = vmatprep.subr.mxu0 %v3261_v4  ;;  %v3134_v54 = vld [vmem:[#allocation11 + $0xf38] sm:$0xff]  ;;  %v3241_v4 = vld [vmem:[#allocation11 + $0x1290] sm:$0xff] }
 0x2ee   : > { %3579 = vmatprep.subr.mxu1 %v3150_v46  ;;  %8706 = vmatpush3.msra.mxu0 %v3181_v51  ;;  %v3130_v46 = vld [vmem:[#allocation11 + $0xf18] sm:$0xff]  ;;  %v3161_v51 = vld [vmem:[#allocation11 + $0x1010] sm:$0xff] }
 0x2ef   : > { %3580 = vmatpush1.msra.mxu1 %v3149_v14  ;;  %8707 = vmatprep.subr.mxu0 %v3256_v27  ;;  %v3129_v14 = vld [vmem:[#allocation11 + $0xf10] sm:$0xff]  ;;  %v3236_v27 = vld [vmem:[#allocation11 + $0x1268] sm:$0xff] }
 0x2f0   : > { %3581 = vmatprep.subr.mxu1 %v3145_v10  ;;  %8708 = vmatpush3.msra.mxu0 %v3176_v50  ;;  %v3285_v10 = vld [vmem:[#allocation11 + $0x13f0] sm:$0xff]  ;;  %v3156_v50 = vld [vmem:[#allocation11 + $0xfe8] sm:$0xff] }
 0x2f1   : > { %3582 = vmatpush1.msra.mxu1 %v3144_v21  ;;  %8709 = vmatprep.subr.mxu0 %v3251_v40  ;;  %v3284_v21 = vld [vmem:[#allocation11 + $0x13e8] sm:$0xff]  ;;  %v3231_v40 = vld [vmem:[#allocation11 + $0x1240] sm:$0xff] }
 0x2f2   : > { %3583 = vmatprep.subr.mxu1 %v3140_v42  ;;  %8710 = vmatpush3.msra.mxu0 %v3171_v32  ;;  %v3280_v42 = vld [vmem:[#allocation11 + $0x13c8] sm:$0xff]  ;;  %v3151_v32 = vld [vmem:[#allocation11 + $0xfc0] sm:$0xff] }
 0x2f3   : > { %3584 = vmatpush1.msra.mxu1 %v3139_v35  ;;  %8711 = vmatprep.subr.mxu0 %v3246_v45  ;;  %v2685_v35 = vpop.f32.mrf.mxu0  ;;  %v3279_v45 = vld [vmem:[#allocation11 + $0x13c0] sm:$0xff] }
 0x2f4   : > { %3585 = vmatprep.subr.mxu1 %v3135_v55  ;;  %8712 = vmatpush3.msra.mxu0 %v3166_v43  ;;  %v3226_v55 = vld [vmem:[#allocation11 + $0x1218] sm:$0xff]  ;;  %v3275_v43 = vld [vmem:[#allocation11 + $0x13a0] sm:$0xff] }
 0x2f5   : > { %3586 = vmatpush1.msra.mxu1 %v3134_v54  ;;  %8713 = vmatprep.subr.mxu0 %v3241_v4  ;;  %v3146_v54 = vld [vmem:[#allocation11 + $0xf98] sm:$0xff] }
 0x2f6   : > { %3587 = vmatprep.subr.mxu1 %v3130_v46  ;;  %8714 = vmatpush3.msra.mxu0 %v3161_v51  ;;  %v3274_v4 = vld [vmem:[#allocation11 + $0x1398] sm:$0xff]  ;;  %v3221_v46 = vld [vmem:[#allocation11 + $0x11f0] sm:$0xff] }
 0x2f7   : > { %3588 = vmatpush1.msra.mxu1 %v3129_v14  ;;  %8715 = vmatprep.subr.mxu0 %v3236_v27  ;;  %v3270_v51 = vld [vmem:[#allocation11 + $0x1378] sm:$0xff]  ;;  %v3141_v14 = vld [vmem:[#allocation11 + $0xf70] sm:$0xff]  ;;  %v2687_v27 = vpop.f32.mrf.mxu0 }
 0x2f8   : > { %3589 = vmatprep.subr.mxu1 %v3285_v10  ;;  %8716 = vmatpush3.msra.mxu0 %v3156_v50  ;;  %v3216_v10 = vld [vmem:[#allocation11 + $0x11c8] sm:$0xff]  ;;  %v3265_v50 = vld [vmem:[#allocation11 + $0x1350] sm:$0xff] }
 0x2f9   : > { %3590 = vmatpush2.msra.mxu1 %v3284_v21  ;;  %8717 = vmatprep.subr.mxu0 %v3231_v40  ;;  %v3136_v21 = vld [vmem:[#allocation11 + $0xf48] sm:$0xff]  ;;  %v1964_v40 = vadd.f32 %v10619_v16, %v10615_v57  ;;  %v2691_v20 = vpop.f32.mrf.mxu0  ;;  %v3975_v57 = vld [vmem:[#allocation11 + $0x18e0] sm:$0xff] }
 0x2fa   : > { %3591 = vmatprep.subr.mxu1 %v3280_v42  ;;  %8718 = vmatpush3.msra.mxu0 %v3151_v32  ;;  %v3264_v42 = vld [vmem:[#allocation11 + $0x1348] sm:$0xff]  ;;  %v3211_v32 = vld [vmem:[#allocation11 + $0x11a0] sm:$0xff] }
 0x2fb   : > { %3592 = vmatpush2.msra.mxu1 %v3279_v45  ;;  %8719 = vmatprep.subr.mxu0 %v3226_v55  ;;  %v3260_v45 = vld [vmem:[#allocation11 + $0x1328] sm:$0xff]  ;;  %v3131_v55 = vld [vmem:[#allocation11 + $0xf20] sm:$0xff] }
 0x2fc   : > { %3593 = vmatprep.subr.mxu1 %v3275_v43  ;;  %8720 = vmatpush3.msra.mxu0 %v3146_v54  ;;  %v2330_v54 = vadd.f32 %v10637_v48, %v10617_v15  ;;  %v3255_v16 = vld [vmem:[#allocation11 + $0x1300] sm:$0xff]  ;;  %v1970_v15 = vadd.f32 %v10628_v24, %v10623_v12  ;;  %v3249_v12 = vld [vmem:[#allocation11 + $0x12d0] sm:$0xff] }
 0x2fd   : > { %3594 = vmatpush2.msra.mxu1 %v3274_v4  ;;  %8721 = vmatprep.subr.mxu0 %v3221_v46  ;;  %v3259_v4 = vld [vmem:[#allocation11 + $0x1320] sm:$0xff] }
 0x2fe   : > { %3595 = vmatprep.subr.mxu1 %v3270_v51  ;;  %8722 = vmatpush3.msra.mxu0 %v3141_v14  ;;  %v2331_v14 = vadd.f32 %v10647_v3, %v1964_v40 }
 0x2ff   : > { %3596 = vmatpush2.msra.mxu1 %v3269_v17  ;;  %8723 = vmatprep.subr.mxu0 %v3216_v10  ;;  %v2768_v43 = vpop.f32.mrf.mxu1  ;;  %v3974_v17 = vld [vmem:[#allocation11 + $0x18d8] sm:$0xff] }
 0x300   : > { %3597 = vmatprep.subr.mxu1 %v3265_v50  ;;  %8724 = vmatpush3.msra.mxu0 %v3136_v21  ;;  %v2769_v46 = vadd.f32 %v2768_v43, %v2685_v35  ;;  %v3254_v35 = vld [vmem:[#allocation11 + $0x12f8] sm:$0xff]  ;;  %v2693_v21 = vpop.f32.mrf.mxu0  ;;  %v3245_v43 = vld [vmem:[#allocation11 + $0x12b0] sm:$0xff] }
 0x301   : > { %3598 = vmatpush2.msra.mxu1 %v3264_v42  ;;  %8725 = vmatprep.subr.mxu0 %v3211_v32  ;;  %v2770_v51 = vpop.f32.mrf.mxu1  ;;  %v3970_v50 = vld [vmem:[#allocation11 + $0x18b8] sm:$0xff]  ;;  %v3969_v32 = vld [vmem:[#allocation11 + $0x18b0] sm:$0xff] }
 0x302   : > { %3599 = vmatprep.subr.mxu1 %v3260_v45  ;;  %8726 = vmatpush3.msra.mxu0 %v3131_v55  ;;  %v10803_v10 = vadd.f32 %v2769_v46, %v2330_v54  ;;  %v2771_v0 = vadd.f32 %v2770_v51, %v2687_v27  ;;  %v3250_v42 = vld [vmem:[#allocation11 + $0x12d8] sm:$0xff]  ;;  %v2335_v55 = vadd.f32 %v10637_v48, %v10625_v11  ;;  %v3965_v27 = vld [vmem:[#allocation11 + $0x1890] sm:$0xff]  ;;  %v2697_v46 = vpop.f32.mrf.mxu0  ;;  %v3244_v11 = vld [vmem:[#allocation11 + $0x12a8] sm:$0xff] }
 0x303   : > { %3600 = vmatpush2.msra.mxu1 %v3259_v4  ;;  %3788 = vmatmul.mubr.f32.vlgmr.msra.gmra.mxu0 %v10710_v62  ;;  %v2336_v4 = vadd.f32 %v10647_v3, %v1970_v15  ;;  %v3960_v48 = vld [vmem:[#allocation11 + $0x1868] sm:$0xff]  ;;  %v3959_v51 = vld [vmem:[#allocation11 + $0x1860] sm:$0xff]  ;;  %v4143_v15 = vrot.slane %v10478_v36, 3 }
 0x304   : > { %4163 = vmatprep.subr.mxu0 %v3975_v57  ;;  %3601 = vmatprep.subr.mxu1 %v3255_v16  ;;  %v10808_v40 = vadd.f32 %v2771_v0, %v2331_v14  ;;  %v2774_v45 = vpop.f32.mrf.mxu1  ;;  %v3964_v0 = vld [vmem:[#allocation11 + $0x1888] sm:$0xff]  ;;  %v3239_v3 = vld [vmem:[#allocation11 + $0x1280] sm:$0xff] }
 0x305   : > { %3792 = vmatprep.mubr.f32.mxu0 %v10722_v58  ;;  %4164 = vmatpush1.msra.mxu0 %v3974_v17  ;;  %v2775_v24 = vadd.f32 %v2774_v45, %v2691_v20  ;;  %v3240_v20 = vld [vmem:[#allocation11 + $0x1288] sm:$0xff]  ;;  %v3954_v45 = vld [vmem:[#allocation11 + $0x1838] sm:$0xff] }
 0x306   : > { %3602 = vmatpush2.msra.mxu1 %v3254_v35  ;;  %4165 = vmatprep.subr.mxu0 %v3970_v50  ;;  %v2776_v54 = vpop.f32.mrf.mxu1  ;;  %v3955_v50 = vld [vmem:[#allocation11 + $0x1840] sm:$0xff] }
 0x307   : > { %3603 = vmatprep.subr.mxu1 %v3250_v42  ;;  %4166 = vmatpush1.msra.mxu0 %v3969_v32  ;;  %v10814_v57 = vadd.f32 %v2775_v24, %v2335_v55  ;;  %v2777_v16 = vadd.f32 %v2776_v54, %v2693_v21  ;;  %v3235_v21 = vld [vmem:[#allocation11 + $0x1260] sm:$0xff]  ;;  %v2699_v42 = vpop.f32.mrf.mxu0  ;;  %v4142_v55 = vrot.slane %v10467_v7, 3 }
 0x308   : > { %3604 = vmatpush2.msra.mxu1 %v3249_v12  ;;  %3793 = vmatmul.mubr.f32.gmra.mxu0 %v10733_v25 }
 0x309   : > { %4167 = vmatprep.subr.mxu0 %v3965_v27  ;;  %3605 = vmatprep.subr.mxu1 %v3245_v43  ;;  %v10817_v14 = vadd.f32 %v2777_v16, %v2336_v4  ;;  %v2780_v17 = vpop.f32.mrf.mxu1  ;;  %v3234_v27 = vld [vmem:[#allocation11 + $0x1258] sm:$0xff]  ;;  %v10829_v54 = vsel %vm1160_vm5, %v4142_v55, %v4143_v15  ;;  %v3945_v16 = vld [vmem:[#allocation11 + $0x17f0] sm:$0xff] }
 0x30a   : > { %3797 = vmatprep.mubr.f32.mxu0 %v10707_v22  ;;  %4168 = vmatpush1.msra.mxu0 %v3964_v0  ;;  %v2781_v35 = vadd.f32 %v2780_v17, %v2697_v46  ;;  %v3950_v43 = vld [vmem:[#allocation11 + $0x1818] sm:$0xff]  ;;  %v3949_v0 = vld [vmem:[#allocation11 + $0x1810] sm:$0xff]  ;;  %v3220_v17 = vld [vmem:[#allocation11 + $0x11e8] sm:$0xff] }
 0x30b   : > { %3606 = vmatpush2.msra.mxu1 %v3244_v11  ;;  %4169 = vmatprep.subr.mxu0 %v3960_v48  ;;  %v2782_v32 = vpop.f32.mrf.mxu1  ;;  %v3230_v4 = vld [vmem:[#allocation11 + $0x1238] sm:$0xff]  ;;  %v3225_v11 = vld [vmem:[#allocation11 + $0x1210] sm:$0xff]  ;;  %v3944_v48 = vld [vmem:[#allocation11 + $0x17e8] sm:$0xff] }
 0x30c   : > { %3607 = vmatprep.subr.mxu1 %v3240_v20  ;;  %4170 = vmatpush1.msra.mxu0 %v3959_v51  ;;  %v10823_v12 = vadd.f32 %v2781_v35, %v10650_v6  ;;  %v2783_v24 = vadd.f32 %v2782_v32, %v2699_v42  ;;  %v3229_v6 = vld [vmem:[#allocation11 + $0x1230] sm:$0xff]  ;;  %v3224_v20 = vld [vmem:[#allocation11 + $0x1208] sm:$0xff]  ;;  %v3935_v35 = vld [vmem:[#allocation11 + $0x17a0] sm:$0xff] }
 0x30d   : > { %3608 = vmatpush2.msra.mxu1 %v3239_v3  ;;  %3798 = vmatmul.mubr.f32.gmra.mxu0 %v10725_v60  ;;  %v3940_v51 = vld [vmem:[#allocation11 + $0x17c8] sm:$0xff]  ;;  %v3939_v3 = vld [vmem:[#allocation11 + $0x17c0] sm:$0xff]  ;;  %v3214_v42 = vld [vmem:[#allocation11 + $0x11b8] sm:$0xff] }
 0x30e   : > { %4171 = vmatprep.subr.mxu0 %v3955_v50  ;;  %3609 = vmatprep.subr.mxu1 %v3235_v21  ;;  %v10832_v46 = vadd.f32 %v2783_v24, %v10654_v18  ;;  %v3219_v18 = vld [vmem:[#allocation11 + $0x11e0] sm:$0xff]  ;;  %v3934_v21 = vld [vmem:[#allocation11 + $0x1798] sm:$0xff]  ;;  %v3929_v55 = vld [vmem:[#allocation11 + $0x1770] sm:$0xff] }
 0x30f   : > { %4172 = vmatpush1.msra.mxu0 %v3954_v45  ;;  %4227 = vmatprep.mubr.f32.mxu0 %v10829_v54  ;;  %v3215_v50 = vld [vmem:[#allocation11 + $0x11c0] sm:$0xff]  ;;  %v3930_v32 = vld [vmem:[#allocation11 + $0x1778] sm:$0xff]  ;;  %v3209_v24 = vld [vmem:[#allocation11 + $0x1190] sm:$0xff] }
 0x310   : > { %3610 = vmatpush2.msra.mxu1 %v3234_v27  ;;  %4173 = vmatprep.subr.mxu0 %v3950_v43  ;;  %v3210_v45 = vld [vmem:[#allocation11 + $0x1198] sm:$0xff]  ;;  %v3925_v27 = vld [vmem:[#allocation11 + $0x1750] sm:$0xff]  ;;  %v3924_v43 = vld [vmem:[#allocation11 + $0x1748] sm:$0xff] }
 0x311   : > { %3611 = vmatprep.subr.mxu1 %v3230_v4  ;;  %4174 = vmatpush1.msra.mxu0 %v3949_v0  ;;  %v3366_v4 = vld [vmem:[#allocation11 + $0x1678] sm:$0xff]  ;;  %v3920_v0 = vld [vmem:[#allocation11 + $0x1728] sm:$0xff] }
 0x312   : > { %3612 = vmatpush2.msra.mxu1 %v3229_v6  ;;  %4175 = vmatprep.subr.mxu0 %v3945_v16  ;;  %v11892_v6 = vmov 0.0   ;;  %v3919_v16 = vld [vmem:[#allocation11 + $0x1720] sm:$0xff] }
 0x313   : > { %3613 = vmatprep.subr.mxu1 %v3225_v11  ;;  %4176 = vmatpush1.msra.mxu0 %v3944_v48  ;;  %v10837_v11 = vpop.f32.mrf.mxu0  ;;  %v3361_v48 = vld [vmem:[#allocation11 + $0x1650] sm:$0xff] }
 0x314   : > { %3614 = vmatpush2.msra.mxu1 %v3224_v20  ;;  %4177 = vmatprep.subr.mxu0 %v3940_v51  ;;  %v3915_v20 = vld [vmem:[#allocation11 + $0x1700] sm:$0xff]  ;;  %v3914_v51 = vld [vmem:[#allocation11 + $0x16f8] sm:$0xff] }
 0x315   : > { %3615 = vmatprep.subr.mxu1 %v3220_v17  ;;  %4178 = vmatpush1.msra.mxu0 %v3939_v3  ;;  %v3356_v17 = vld [vmem:[#allocation11 + $0x1628] sm:$0xff]  ;;  %v10841_v3 = vpop.f32.mrf.mxu0 }
 0x316   : > { %3616 = vmatpush2.msra.mxu1 %v3219_v18  ;;  %4179 = vmatprep.subr.mxu0 %v3935_v35  ;;  %v3909_v18 = vld [vmem:[#allocation11 + $0x16d0] sm:$0xff] }
 0x317   : > { %3617 = vmatprep.subr.mxu1 %v3215_v50  ;;  %4180 = vmatpush1.msra.mxu0 %v3934_v21  ;;  %v3905_v35 = vld [vmem:[#allocation11 + $0x16b0] sm:$0xff]  ;;  %v3904_v50 = vld [vmem:[#allocation11 + $0x16a8] sm:$0xff]  ;;  %v3346_v21 = vld [vmem:[#allocation11 + $0x15d8] sm:$0xff] }
 0x318   : > { %3618 = vmatpush2.msra.mxu1 %v3214_v42  ;;  %4181 = vmatprep.subr.mxu0 %v3930_v32  ;;  %v10847_v42 = vpop.f32.mrf.mxu0  ;;  %v3899_v32 = vld [vmem:[#allocation11 + $0x1680] sm:$0xff] }
 0x319   : > { %3619 = vmatprep.subr.mxu1 %v3210_v45  ;;  %4182 = vmatpush1.msra.mxu0 %v3929_v55  ;;  %v4055_v45 = vld [vmem:[#allocation11 + $0x1b60] sm:$0xff]  ;;  %v4054_v55 = vld [vmem:[#allocation11 + $0x1b58] sm:$0xff] }
 0x31a   : > { %3620 = vmatpush2.msra.mxu1 %v3209_v24  ;;  %4183 = vmatprep.subr.mxu0 %v3925_v27  ;;  %v3336_v24 = vld [vmem:[#allocation11 + $0x1588] sm:$0xff]  ;;  %v10852_v27 = vpop.f32.mrf.mxu0 }
 0x31b   : > { %3622 = vmatmul.mubr.f32.vlgmr.msra.gmra.mxu1 %v10710_v62  ;;  %9276 = vmatprep.subr.mxu1 %v11892_v6  ;;  %v3910_v62 = vld [vmem:[#allocation11 + $0x16d8] sm:$0xff] }
 0x31c   : > { %4184 = vmatpush1.msra.mxu0 %v3924_v43  ;;  %3627 = vmatprep.mubr.f32.mxu1 %v10722_v58  ;;  %v3351_v58 = vld [vmem:[#allocation11 + $0x1600] sm:$0xff]  ;;  %v4050_v43 = vld [vmem:[#allocation11 + $0x1b38] sm:$0xff] }
 0x31d   : > { %9277 = vmatpush3.msra.mxu1 %v3366_v4  ;;  %4185 = vmatprep.subr.mxu0 %v3920_v0  ;;  %v3331_v4 = vld [vmem:[#allocation11 + $0x1560] sm:$0xff]  ;;  %v4045_v0 = vld [vmem:[#allocation11 + $0x1b10] sm:$0xff] }
 0x31e   : > { %9278 = vmatprep.subr.mxu1 %v11892_v6  ;;  %4186 = vmatpush1.msra.mxu0 %v3919_v16  ;;  %v4044_v16 = vld [vmem:[#allocation11 + $0x1b08] sm:$0xff] }
 0x31f   : > { %9279 = vmatpush3.msra.mxu1 %v3361_v48  ;;  %4187 = vmatprep.subr.mxu0 %v3915_v20  ;;  %v3326_v48 = vld [vmem:[#allocation11 + $0x1538] sm:$0xff]  ;;  %v10856_v20 = vpop.f32.mrf.mxu0 }
 0x320   : > { %3628 = vmatmul.mubr.f32.gmra.mxu1 %v10733_v25  ;;  %9280 = vmatprep.subr.mxu1 %v11892_v6  ;;  %v3900_v25 = vld [vmem:[#allocation11 + $0x1688] sm:$0xff] }
 0x321   : > { %4188 = vmatpush1.msra.mxu0 %v3914_v51  ;;  %3633 = vmatprep.mubr.f32.mxu1 %v10707_v22  ;;  %v3341_v22 = vld [vmem:[#allocation11 + $0x15b0] sm:$0xff]  ;;  %v4040_v51 = vld [vmem:[#allocation11 + $0x1ae8] sm:$0xff] }
 0x322   : > { %9281 = vmatpush3.msra.mxu1 %v3356_v17  ;;  %4189 = vmatprep.subr.mxu0 %v3910_v62  ;;  %v4039_v17 = vld [vmem:[#allocation11 + $0x1ae0] sm:$0xff]  ;;  %v3321_v62 = vld [vmem:[#allocation11 + $0x1510] sm:$0xff] }
 0x323   : > { %9282 = vmatprep.subr.mxu1 %v11892_v6  ;;  %4190 = vmatpush1.msra.mxu0 %v3909_v18  ;;  %v4035_v18 = vld [vmem:[#allocation11 + $0x1ac0] sm:$0xff] }
 0x324   : > { %9283 = vmatpush3.msra.mxu1 %v3351_v58  ;;  %4191 = vmatprep.subr.mxu0 %v3905_v35  ;;  %v4034_v58 = vld [vmem:[#allocation11 + $0x1ab8] sm:$0xff]  ;;  %v10860_v35 = vpop.f32.mrf.mxu0 }
 0x325   : > { %3634 = vmatmul.mubr.f32.gmra.mxu1 %v10725_v60  ;;  %9284 = vmatprep.subr.mxu1 %v11892_v6  ;;  %v4049_v60 = vld [vmem:[#allocation11 + $0x1b30] sm:$0xff] }
 0x326   : > { %4192 = vmatpush1.msra.mxu0 %v3904_v50  ;;  %9285 = vmatpush3.msra.mxu1 %v3346_v21  ;;  %v3316_v50 = vld [vmem:[#allocation11 + $0x14e8] sm:$0xff]  ;;  %v4030_v21 = vld [vmem:[#allocation11 + $0x1a98] sm:$0xff] }
 0x327   : > { %4193 = vmatprep.subr.mxu0 %v3900_v25  ;;  %9286 = vmatprep.subr.mxu1 %v11892_v6  ;;  %v4029_v25 = vld [vmem:[#allocation11 + $0x1a90] sm:$0xff] }
 0x328   : > { %4194 = vmatpush1.msra.mxu0 %v3899_v32  ;;  %9287 = vmatpush3.msra.mxu1 %v3341_v22  ;;  %v3311_v32 = vld [vmem:[#allocation11 + $0x14c0] sm:$0xff] }
 0x329   : > { %4195 = vmatprep.subr.mxu0 %v4055_v45  ;;  %9288 = vmatprep.subr.mxu1 %v11892_v6  ;;  %v4025_v45 = vld [vmem:[#allocation11 + $0x1a70] sm:$0xff] }
 0x32a   : > { %4196 = vmatpush2.msra.mxu0 %v4054_v55  ;;  %9289 = vmatpush3.msra.mxu1 %v3336_v24  ;;  %v4024_v55 = vld [vmem:[#allocation11 + $0x1a68] sm:$0xff]  ;;  %v3306_v24 = vld [vmem:[#allocation11 + $0x1498] sm:$0xff] }
 0x32b   : > { %4197 = vmatprep.subr.mxu0 %v4050_v43  ;;  %9290 = vmatprep.subr.mxu1 %v11892_v6 }
 0x32c   : > { %4198 = vmatpush2.msra.mxu0 %v4049_v60  ;;  %9291 = vmatpush3.msra.mxu1 %v3331_v4  ;;  %v4020_v60 = vld [vmem:[#allocation11 + $0x1a48] sm:$0xff] }
 0x32d   : > { %4199 = vmatprep.subr.mxu0 %v4045_v0  ;;  %9292 = vmatprep.subr.mxu1 %v11892_v6  ;;  %v4019_v0 = vld [vmem:[#allocation11 + $0x1a40] sm:$0xff] }
 0x32e   : > { %4200 = vmatpush2.msra.mxu0 %v4044_v16  ;;  %9293 = vmatpush3.msra.mxu1 %v3326_v48  ;;  %v3301_v16 = vld [vmem:[#allocation11 + $0x1470] sm:$0xff]  ;;  %v4015_v48 = vld [vmem:[#allocation11 + $0x1a20] sm:$0xff] }
 0x32f   : > { %4201 = vmatprep.subr.mxu0 %v4040_v51  ;;  %9294 = vmatprep.subr.mxu1 %v11892_v6 }
 0x330   : > { %4202 = vmatpush2.msra.mxu0 %v4039_v17  ;;  %9295 = vmatpush3.msra.mxu1 %v3321_v62  ;;  %v4014_v17 = vld [vmem:[#allocation11 + $0x1a18] sm:$0xff]  ;;  %v3296_v62 = vld [vmem:[#allocation11 + $0x1448] sm:$0xff] }
 0x331   : > { %4203 = vmatprep.subr.mxu0 %v4035_v18  ;;  %9296 = vmatprep.subr.mxu1 %v11892_v6  ;;  %v8667_v22 = vpop.f32.mrf.mxu0  ;;  %v4010_v18 = vld [vmem:[#allocation11 + $0x19f8] sm:$0xff] }
 0x332   : > { %4204 = vmatpush2.msra.mxu0 %v4034_v58  ;;  %9297 = vmatpush3.msra.mxu1 %v3316_v50  ;;  %v4009_v50 = vld [vmem:[#allocation11 + $0x19f0] sm:$0xff] }
 0x333   : > { %4205 = vmatprep.subr.mxu0 %v4030_v21  ;;  %9298 = vmatprep.subr.mxu1 %v11892_v6  ;;  %v8668_v43 = vpop.f32.mrf.mxu0  ;;  %v3291_v21 = vld [vmem:[#allocation11 + $0x1420] sm:$0xff] }
 0x334   : > { %4206 = vmatpush2.msra.mxu0 %v4029_v25  ;;  %9299 = vmatpush3.msra.mxu1 %v3311_v32  ;;  %v10864_v4 = vadd.f32 %v8668_v43, %v8667_v22  ;;  %v4005_v32 = vld [vmem:[#allocation11 + $0x19d0] sm:$0xff]  ;;  %v4004_v22 = vld [vmem:[#allocation11 + $0x19c8] sm:$0xff]  ;;  %v4134_v43 = vld [vmem:[#allocation11 + $0x1dd8] sm:$0xff] }
 0x335   : > { %4207 = vmatprep.subr.mxu0 %v4025_v45  ;;  %9300 = vmatprep.subr.mxu1 %v11892_v6 }
 0x336   : > { %4208 = vmatpush2.msra.mxu0 %v4024_v55  ;;  %9301 = vmatpush3.msra.mxu1 %v3306_v24  ;;  %v8670_v51 = vpop.f32.mrf.mxu0  ;;  %v4135_v55 = vld [vmem:[#allocation11 + $0x1de0] sm:$0xff]  ;;  %v4000_v24 = vld [vmem:[#allocation11 + $0x19a8] sm:$0xff] }
 0x337   : > { %4209 = vmatprep.subr.mxu0 %v4020_v60  ;;  %9302 = vmatprep.subr.mxu1 %v11892_v6  ;;  %v3999_v60 = vld [vmem:[#allocation11 + $0x19a0] sm:$0xff] }
 0x338   : > { %4210 = vmatpush2.msra.mxu0 %v4019_v0  ;;  %9303 = vmatpush3.msra.mxu1 %v3301_v16  ;;  %v8671_v58 = vpop.f32.mrf.mxu0  ;;  %v4130_v16 = vld [vmem:[#allocation11 + $0x1db8] sm:$0xff] }
 0x339   : > { %4211 = vmatprep.subr.mxu0 %v4015_v48  ;;  %9304 = vmatprep.subr.mxu1 %v11892_v6  ;;  %v10869_v25 = vadd.f32 %v8671_v58, %v8670_v51  ;;  %v3995_v51 = vld [vmem:[#allocation11 + $0x1980] sm:$0xff]  ;;  %v3990_v58 = vld [vmem:[#allocation11 + $0x1958] sm:$0xff] }
 0x33a   : > { %4212 = vmatpush2.msra.mxu0 %v4014_v17  ;;  %9305 = vmatpush3.msra.mxu1 %v3296_v62  ;;  %v4129_v17 = vld [vmem:[#allocation11 + $0x1db0] sm:$0xff]  ;;  %v3994_v62 = vld [vmem:[#allocation11 + $0x1978] sm:$0xff] }
 0x33b   : > { %4213 = vmatprep.subr.mxu0 %v4010_v18  ;;  %9306 = vmatprep.subr.mxu1 %v11892_v6  ;;  %v8673_v45 = vpop.f32.mrf.mxu0  ;;  %v4125_v18 = vld [vmem:[#allocation11 + $0x1d90] sm:$0xff] }
 0x33c   : > { %4214 = vmatpush2.msra.mxu0 %v4009_v50  ;;  %9307 = vmatpush3.msra.mxu1 %v3291_v21  ;;  %v3989_v50 = vld [vmem:[#allocation11 + $0x1950] sm:$0xff]  ;;  %v4120_v21 = vld [vmem:[#allocation11 + $0x1d68] sm:$0xff] }
 0x33d   : > { %9308 = vmatprep.mubr.msk.f32.mxu1 %vm9999_vm4, %v11892_v6  ;;  %4215 = vmatprep.subr.mxu0 %v4005_v32  ;;  %v8674_v0 = vpop.f32.mrf.mxu0  ;;  %v3985_v32 = vld [vmem:[#allocation11 + $0x1930] sm:$0xff] }
 0x33e   : > { %9309 = vmatmul.mubr.f32.vlgmr.msra.gmra.mxu1 %v10760_v5  ;;  %4216 = vmatpush2.msra.mxu0 %v4004_v22  ;;  %v10875_v48 = vadd.f32 %v8674_v0, %v8673_v45  ;;  %v4124_v5 = vld [vmem:[#allocation11 + $0x1d88] sm:$0xff]  ;;  %v4119_v22 = vld [vmem:[#allocation11 + $0x1d60] sm:$0xff]  ;;  %v10884_v0 = vrot.slane %v10486_v49, 3 }
 0x33f   : > { %4246 = vmatprep.subr.mxu1 %v4135_v55  ;;  %4217 = vmatprep.subr.mxu0 %v4000_v24  ;;  %v3984_v45 = vld [vmem:[#allocation11 + $0x1928] sm:$0xff]  ;;  %v4115_v55 = vld [vmem:[#allocation11 + $0x1d40] sm:$0xff] }
 0x340   : > { %4247 = vmatpush1.msra.mxu1 %v4134_v43  ;;  %4218 = vmatpush2.msra.mxu0 %v3999_v60  ;;  %v3980_v24 = vld [vmem:[#allocation11 + $0x1908] sm:$0xff]  ;;  %v4140_v43 = vrot.slane %v10480_v39, 3  ;;  %v3979_v60 = vld [vmem:[#allocation11 + $0x1900] sm:$0xff] }
 0x341   : > { %4248 = vmatprep.subr.mxu1 %v4130_v16  ;;  %9311 = vmatprep.mubr.msk.f32.mxu1 %vm9999_vm4, %v11892_v6  ;;  %v2130_v16 = vadd.f32 %v10662_v8, %v10716_v31  ;;  %v4105_v8 = vld [vmem:[#allocation11 + $0x1cf0] sm:$0xff] }
 0x342   : > { %4219 = vmatprep.subr.mxu0 %v3995_v51  ;;  %4249 = vmatpush1.msra.mxu1 %v4129_v17  ;;  %v4110_v51 = vld [vmem:[#allocation11 + $0x1d18] sm:$0xff]  ;;  %v4139_v17 = vrot.slane %v10469_v9, 3 }
 0x343   : > { %9312 = vmatmul.mubr.f32.gmra.mxu1 %v10769_v2  ;;  %4220 = vmatpush2.msra.mxu0 %v3994_v62  ;;  %v4114_v2 = vld [vmem:[#allocation11 + $0x1d38] sm:$0xff]  ;;  %v4109_v62 = vld [vmem:[#allocation11 + $0x1d10] sm:$0xff] }
 0x344   : > { %4250 = vmatprep.subr.mxu1 %v4125_v18  ;;  %4221 = vmatprep.subr.mxu0 %v3990_v58  ;;  %v4137_v18 = vld [vmem:[#allocation11 + $0x1df0] sm:$0xff] }
 0x345   : > { %4251 = vmatpush1.msra.mxu1 %v4124_v5  ;;  %4222 = vmatpush2.msra.mxu0 %v3989_v50  ;;  %v2332_v5 = vadd.f32 %v10742_v1, %v10713_v63  ;;  %v10893_v50 = vsel %vm1160_vm5, %v4139_v17, %v4140_v43 }
 0x346   : > { %4252 = vmatprep.subr.mxu1 %v4120_v21  ;;  %9314 = vmatprep.mubr.msk.f32.mxu1 %vm9999_vm4, %v11892_v6  ;;  %v4136_v21 = vld [vmem:[#allocation11 + $0x1de8] sm:$0xff] }
 0x347   : > { %4223 = vmatprep.subr.mxu0 %v3985_v32  ;;  %4253 = vmatpush1.msra.mxu1 %v4119_v22  ;;  %v4104_v32 = vld [vmem:[#allocation11 + $0x1ce8] sm:$0xff]  ;;  %v2333_v22 = vadd.f32 %v10747_v19, %v2130_v16  ;;  %v4127_v16 = vld [vmem:[#allocation11 + $0x1da0] sm:$0xff] }
 0x348   : > { %9315 = vmatmul.mubr.f32.gmra.mxu1 %v10764_v59  ;;  %4224 = vmatpush2.msra.mxu0 %v3984_v45  ;;  %v10901_v59 = vsel %vm1160_vm5, %v4143_v15, %v10884_v0  ;;  %v4132_v45 = vld [vmem:[#allocation11 + $0x1dc8] sm:$0xff]  ;;  %v2136_v15 = vadd.f32 %v10673_v13, %v10735_v61  ;;  %v4126_v61 = vld [vmem:[#allocation11 + $0x1d98] sm:$0xff] }
 0x349   : > { %4254 = vmatprep.subr.mxu1 %v4115_v55  ;;  %4225 = vmatprep.subr.mxu0 %v3980_v24  ;;  %v2851_v58 = vpop.f32.mrf.mxu1  ;;  %v4100_v55 = vld [vmem:[#allocation11 + $0x1cc8] sm:$0xff] }
 0x34a   : > { %4255 = vmatpush1.msra.mxu1 %v4114_v2  ;;  %4226 = vmatpush2.msra.mxu0 %v3979_v60  ;;  %v2935_v31 = vadd.f32 %v10837_v11, %v2851_v58  ;;  %v10905_v11 = vrot.slane %v10488_v52, 3  ;;  %v4131_v60 = vld [vmem:[#allocation11 + $0x1dc0] sm:$0xff] }
 0x34b   : > { %4256 = vmatprep.subr.mxu1 %v4110_v51  ;;  %4228 = vmatmul.mubr.f32.vlgmr.msra.gmra.mxu0 %v10893_v50  ;;  %v2853_v63 = vpop.f32.mrf.mxu1  ;;  %v4099_v51 = vld [vmem:[#allocation11 + $0x1cc0] sm:$0xff] }
 0x34c   : > { %4257 = vmatpush1.msra.mxu1 %v4109_v62  ;;  %4412 = vmatprep.subr.mxu0 %v4137_v18  ;;  %v10907_v24 = vadd.f32 %v2935_v31, %v2332_v5  ;;  %v2937_v2 = vadd.f32 %v10841_v3, %v2853_v63  ;;  %v2337_v18 = vadd.f32 %v10742_v1, %v10729_v38  ;;  %v4095_v3 = vld [vmem:[#allocation11 + $0x1ca0] sm:$0xff]  ;;  %v4094_v5 = vld [vmem:[#allocation11 + $0x1c98] sm:$0xff]  ;;  %v4117_v63 = vld [vmem:[#allocation11 + $0x1d50] sm:$0xff] }
 0x34d   : > { %4233 = vmatprep.mubr.f32.mxu0 %v10901_v59  ;;  %4258 = vmatprep.subr.mxu1 %v4105_v8  ;;  %v10920_v13 = vsel %vm1160_vm5, %v4140_v43, %v10905_v11  ;;  %v2338_v31 = vadd.f32 %v10747_v19, %v2136_v15  ;;  %v4122_v38 = vld [vmem:[#allocation11 + $0x1d78] sm:$0xff]  ;;  %v4121_v43 = vld [vmem:[#allocation11 + $0x1d70] sm:$0xff]  ;;  %v4112_v15 = vld [vmem:[#allocation11 + $0x1d28] sm:$0xff] }
 0x34e   : > { %4413 = vmatpush1.msra.mxu0 %v4136_v21  ;;  %4259 = vmatpush1.msra.mxu1 %v4104_v32  ;;  %v10913_v17 = vadd.f32 %v2937_v2, %v2333_v22  ;;  %v2857_v62 = vpop.f32.mrf.mxu1  ;;  %v4090_v1 = vld [vmem:[#allocation11 + $0x1c78] sm:$0xff]  ;;  %v4089_v32 = vld [vmem:[#allocation11 + $0x1c70] sm:$0xff] }
 0x34f   : > { %4414 = vmatprep.subr.mxu0 %v4132_v45  ;;  %4260 = vmatprep.subr.mxu1 %v4100_v55  ;;  %v2941_v58 = vadd.f32 %v10847_v42, %v2857_v62  ;;  %v4085_v45 = vld [vmem:[#allocation11 + $0x1c50] sm:$0xff]  ;;  %v4116_v55 = vld [vmem:[#allocation11 + $0x1d48] sm:$0xff] }
 0x350   : > { %4415 = vmatpush1.msra.mxu0 %v4131_v60  ;;  %4261 = vmatpush1.msra.mxu1 %v4099_v51  ;;  %v2859_v8 = vpop.f32.mrf.mxu1  ;;  %v4080_v51 = vld [vmem:[#allocation11 + $0x1c28] sm:$0xff] }
 0x351   : > { %4234 = vmatmul.mubr.f32.gmra.mxu0 %v10920_v13  ;;  %4416 = vmatprep.subr.mxu0 %v4127_v16  ;;  %v10924_v21 = vadd.f32 %v2941_v58, %v2337_v18  ;;  %v2943_v42 = vadd.f32 %v10852_v27, %v2859_v8  ;;  %v4084_v27 = vld [vmem:[#allocation11 + $0x1c48] sm:$0xff]  ;;  %v4111_v16 = vld [vmem:[#allocation11 + $0x1d20] sm:$0xff]  ;;  %v4074_v8 = vld [vmem:[#allocation11 + $0x1bf8] sm:$0xff] }
 0x352   : > { %4239 = vmatprep.mubr.f32.mxu0 %v10884_v0  ;;  %4262 = vmatprep.subr.mxu1 %v4095_v3  ;;  %v4079_v3 = vld [vmem:[#allocation11 + $0x1c20] sm:$0xff] }
 0x353   : > { %4417 = vmatpush1.msra.mxu0 %v4126_v61  ;;  %4263 = vmatpush1.msra.mxu1 %v4094_v5  ;;  %v10928_v22 = vadd.f32 %v2943_v42, %v2338_v31  ;;  %v2863_v19 = vpop.f32.mrf.mxu1  ;;  %v4107_v58 = vld [vmem:[#allocation11 + $0x1d00] sm:$0xff]  ;;  %v4106_v61 = vld [vmem:[#allocation11 + $0x1cf8] sm:$0xff]  ;;  %v4065_v42 = vld [vmem:[#allocation11 + $0x1bb0] sm:$0xff] }
 0x354   : > { %4418 = vmatprep.subr.mxu0 %v4122_v38  ;;  %4264 = vmatprep.subr.mxu1 %v4090_v1  ;;  %v2947_v2 = vadd.f32 %v10856_v20, %v2863_v19  ;;  %v4075_v20 = vld [vmem:[#allocation11 + $0x1c00] sm:$0xff]  ;;  %v4102_v31 = vld [vmem:[#allocation11 + $0x1cd8] sm:$0xff]  ;;  %v4101_v38 = vld [vmem:[#allocation11 + $0x1cd0] sm:$0xff] }
 0x355   : > { %4419 = vmatpush1.msra.mxu0 %v4121_v43  ;;  %4265 = vmatpush1.msra.mxu1 %v4089_v32  ;;  %v2865_v60 = vpop.f32.mrf.mxu1  ;;  %v4097_v1 = vld [vmem:[#allocation11 + $0x1cb0] sm:$0xff]  ;;  %v4096_v43 = vld [vmem:[#allocation11 + $0x1ca8] sm:$0xff]  ;;  %v4091_v19 = vld [vmem:[#allocation11 + $0x1c80] sm:$0xff] }
 0x356   : > { %4240 = vmatmul.mubr.f32.gmra.mxu0 %v10905_v11  ;;  %4420 = vmatprep.subr.mxu0 %v4117_v63  ;;  %v10933_v62 = vadd.f32 %v2947_v2, %v10750_v47  ;;  %v2949_v18 = vadd.f32 %v10860_v35, %v2865_v60  ;;  %v4070_v47 = vld [vmem:[#allocation11 + $0x1bd8] sm:$0xff]  ;;  %v4069_v35 = vld [vmem:[#allocation11 + $0x1bd0] sm:$0xff]  ;;  %v4092_v32 = vld [vmem:[#allocation11 + $0x1c88] sm:$0xff] }
 0x357   : > { %4266 = vmatprep.subr.mxu1 %v4085_v45  ;;  %4421 = vmatpush1.msra.mxu0 %v4116_v55  ;;  %v4060_v63 = vld [vmem:[#allocation11 + $0x1b88] sm:$0xff]  ;;  %v4146_v45 = vrot.slane %v10505_v41, 3  ;;  %v4059_v55 = vld [vmem:[#allocation11 + $0x1b80] sm:$0xff]  ;;  %v4086_v60 = vld [vmem:[#allocation11 + $0x1c58] sm:$0xff] }
 0x358   : > { %4267 = vmatpush1.msra.mxu1 %v4084_v27  ;;  %4422 = vmatprep.subr.mxu0 %v4112_v15  ;;  %v10937_v5 = vadd.f32 %v2949_v18, %v10754_v26  ;;  %v4064_v26 = vld [vmem:[#allocation11 + $0x1ba8] sm:$0xff]  ;;  %v4087_v2 = vld [vmem:[#allocation11 + $0x1c60] sm:$0xff]  ;;  %v4145_v27 = vrot.slane %v10501_v37, 3  ;;  %v3977_v15 = vld [vmem:[#allocation11 + $0x18f0] sm:$0xff] }
 0x359   : > { %4268 = vmatprep.subr.mxu1 %v4080_v51  ;;  %4423 = vmatpush1.msra.mxu0 %v4111_v16  ;;  %v3976_v16 = vld [vmem:[#allocation11 + $0x18e8] sm:$0xff]  ;;  %v4082_v18 = vld [vmem:[#allocation11 + $0x1c38] sm:$0xff] }
 0x35a   : > { %4269 = vmatpush1.msra.mxu1 %v4079_v3  ;;  %4424 = vmatprep.subr.mxu0 %v4107_v58  ;;  %v10943_v51 = vsel %vm1160_vm5, %v4145_v27, %v4146_v45  ;;  %v3972_v3 = vld [vmem:[#allocation11 + $0x18c8] sm:$0xff]  ;;  %v4081_v58 = vld [vmem:[#allocation11 + $0x1c30] sm:$0xff]  ;;  %v4062_v27 = vld [vmem:[#allocation11 + $0x1b98] sm:$0xff] }
 0x35b   : > { %4270 = vmatprep.subr.mxu1 %v4075_v20  ;;  %4425 = vmatpush1.msra.mxu0 %v4106_v61  ;;  %v10947_v20 = vrot.slane %v10509_v56, 3  ;;  %v3971_v61 = vld [vmem:[#allocation11 + $0x18c0] sm:$0xff] }
 0x35c   : > { %4271 = vmatpush1.msra.mxu1 %v4074_v8  ;;  %4426 = vmatprep.subr.mxu0 %v4102_v31  ;;  %v4077_v8 = vld [vmem:[#allocation11 + $0x1c10] sm:$0xff]  ;;  %v3967_v31 = vld [vmem:[#allocation11 + $0x18a0] sm:$0xff] }
 0x35d   : > { %4272 = vmatprep.subr.mxu1 %v4070_v47  ;;  %4427 = vmatpush1.msra.mxu0 %v4101_v38  ;;  %v4076_v47 = vld [vmem:[#allocation11 + $0x1c08] sm:$0xff]  ;;  %v10952_v38 = vsel %vm1160_vm5, %v4146_v45, %v10947_v20 }
 0x35e   : > { %4273 = vmatpush1.msra.mxu1 %v4069_v35  ;;  %4428 = vmatprep.subr.mxu0 %v4097_v1  ;;  %v3966_v35 = vld [vmem:[#allocation11 + $0x1898] sm:$0xff]  ;;  %v4072_v1 = vld [vmem:[#allocation11 + $0x1be8] sm:$0xff] }
 0x35f   : > { %4274 = vmatprep.subr.mxu1 %v4065_v42  ;;  %4429 = vmatpush1.msra.mxu0 %v4096_v43  ;;  %v3962_v42 = vld [vmem:[#allocation11 + $0x1878] sm:$0xff]  ;;  %v4071_v43 = vld [vmem:[#allocation11 + $0x1be0] sm:$0xff]  ;;  %v3956_v45 = vld [vmem:[#allocation11 + $0x1848] sm:$0xff] }
 0x360   : > { %4275 = vmatpush1.msra.mxu1 %v4064_v26  ;;  %4430 = vmatprep.subr.mxu0 %v4092_v32  ;;  %v3961_v26 = vld [vmem:[#allocation11 + $0x1870] sm:$0xff]  ;;  %v4067_v32 = vld [vmem:[#allocation11 + $0x1bc0] sm:$0xff] }
 0x361   : > { %4276 = vmatprep.subr.mxu1 %v4060_v63  ;;  %4431 = vmatpush1.msra.mxu0 %v4091_v19  ;;  %v3957_v63 = vld [vmem:[#allocation11 + $0x1850] sm:$0xff]  ;;  %v4066_v19 = vld [vmem:[#allocation11 + $0x1bb8] sm:$0xff] }
 0x362   : > { %4277 = vmatpush1.msra.mxu1 %v4059_v55  ;;  %4310 = vmatprep.mubr.f32.mxu1 %v11892_v6 }
 0x363   : > { %4432 = vmatprep.subr.mxu0 %v4087_v2  ;;  %4311 = vmatmul.mubr.f32.vlgmr.msra.gmra.mxu1 %v10943_v51  ;;  %v2334_v2 = vadd.f32 %v10789_v29, %v10775_v44  ;;  %v4058_v44 = vld [vmem:[#allocation11 + $0x1b78] sm:$0xff] }
 0x364   : > { %4329 = vmatprep.subr.mxu1 %v3977_v15  ;;  %4433 = vmatpush1.msra.mxu0 %v4086_v60  ;;  %v3952_v15 = vld [vmem:[#allocation11 + $0x1828] sm:$0xff] }
 0x365   : > { %4330 = vmatpush1.msra.mxu1 %v3976_v16  ;;  %4434 = vmatprep.subr.mxu0 %v4082_v18  ;;  %v4061_v16 = vld [vmem:[#allocation11 + $0x1b90] sm:$0xff] }
 0x366   : > { %4331 = vmatprep.subr.mxu1 %v3972_v3  ;;  %4435 = vmatpush1.msra.mxu0 %v4081_v58  ;;  %v3951_v3 = vld [vmem:[#allocation11 + $0x1820] sm:$0xff] }
 0x367   : > { %4316 = vmatprep.mubr.f32.mxu1 %v11892_v6  ;;  %4332 = vmatpush1.msra.mxu1 %v3971_v61  ;;  %v3947_v61 = vld [vmem:[#allocation11 + $0x1800] sm:$0xff] }
 0x368   : > { %4436 = vmatprep.subr.mxu0 %v4077_v8  ;;  %4317 = vmatmul.mubr.f32.gmra.mxu1 %v10952_v38  ;;  %v3978_v8 = vld [vmem:[#allocation11 + $0x18f8] sm:$0xff] }
 0x369   : > { %4333 = vmatprep.subr.mxu1 %v3967_v31  ;;  %4437 = vmatpush1.msra.mxu0 %v4076_v47  ;;  %v3946_v31 = vld [vmem:[#allocation11 + $0x17f8] sm:$0xff]  ;;  %v2339_v47 = vadd.f32 %v10789_v29, %v10781_v34  ;;  %v3937_v34 = vld [vmem:[#allocation11 + $0x17b0] sm:$0xff]  ;;  %v3968_v29 = vld [vmem:[#allocation11 + $0x18a8] sm:$0xff] }
 0x36a   : > { %4334 = vmatpush1.msra.mxu1 %v3966_v35  ;;  %4438 = vmatprep.subr.mxu0 %v4072_v1  ;;  %v4053_v35 = vld [vmem:[#allocation11 + $0x1b50] sm:$0xff]  ;;  %v3942_v1 = vld [vmem:[#allocation11 + $0x17d8] sm:$0xff] }
 0x36b   : > { %4335 = vmatprep.subr.mxu1 %v3962_v42  ;;  %4439 = vmatpush1.msra.mxu0 %v4071_v43  ;;  %v3973_v43 = vld [vmem:[#allocation11 + $0x18d0] sm:$0xff] }
 0x36c   : > { %4322 = vmatprep.mubr.f32.mxu1 %v11892_v6  ;;  %4336 = vmatpush1.msra.mxu1 %v3961_v26  ;;  %v3097_v55 = vpop.f32.mrf.mxu1 }
 0x36d   : > { %4440 = vmatprep.subr.mxu0 %v4067_v32  ;;  %4323 = vmatmul.mubr.f32.gmra.mxu1 %v10947_v20  ;;  %v3098_v60 = vadd.f32 %v10864_v4, %v3097_v55  ;;  %v3941_v32 = vld [vmem:[#allocation11 + $0x17d0] sm:$0xff] }
 0x36e   : > { %4337 = vmatprep.subr.mxu1 %v3957_v63  ;;  %4441 = vmatpush1.msra.mxu0 %v4066_v19  ;;  %v9269_v18 = vpop.f32.mrf.mxu1  ;;  %v4048_v19 = vld [vmem:[#allocation11 + $0x1b28] sm:$0xff] }
 0x36f   : > { %4338 = vmatpush1.msra.mxu1 %v3956_v45  ;;  %4393 = vmatprep.mubr.f32.mxu1 %v10829_v54  ;;  %v10961_v58 = vadd.f32 %v3098_v60, %v2334_v2  ;;  %v3936_v45 = vld [vmem:[#allocation11 + $0x17a8] sm:$0xff] }
 0x370   : > { %4442 = vmatprep.subr.mxu0 %v4062_v27  ;;  %4339 = vmatprep.subr.mxu1 %v3952_v15  ;;  %v3932_v2 = vld [vmem:[#allocation11 + $0x1788] sm:$0xff]  ;;  %v3963_v15 = vld [vmem:[#allocation11 + $0x1880] sm:$0xff] }
 0x371   : > { %4443 = vmatpush1.msra.mxu0 %v4061_v16  ;;  %4476 = vmatprep.mubr.f32.mxu0 %v11892_v6  ;;  %v3102_v4 = vpop.f32.mrf.mxu1  ;;  %v3931_v16 = vld [vmem:[#allocation11 + $0x1780] sm:$0xff] }
 0x372   : > { %4340 = vmatpush1.msra.mxu1 %v3951_v3  ;;  %4477 = vmatmul.mubr.f32.vlgmr.msra.gmra.mxu0 %v10943_v51  ;;  %v3103_v42 = vadd.f32 %v10869_v25, %v3102_v4  ;;  %v4043_v25 = vld [vmem:[#allocation11 + $0x1b00] sm:$0xff]  ;;  %v4038_v3 = vld [vmem:[#allocation11 + $0x1ad8] sm:$0xff]  ;;  %v3953_v4 = vld [vmem:[#allocation11 + $0x1830] sm:$0xff] }
 0x373   : > { %8755 = vmatprep.subr.mxu0 %v4058_v44  ;;  %4341 = vmatprep.subr.mxu1 %v3947_v61  ;;  %v9272_v26 = vpop.f32.mrf.mxu1  ;;  %v3927_v44 = vld [vmem:[#allocation11 + $0x1760] sm:$0xff]  ;;  %v3958_v61 = vld [vmem:[#allocation11 + $0x1858] sm:$0xff] }
 0x374   : > { %8756 = vmatpush3.msra.mxu0 %v3978_v8  ;;  %4342 = vmatpush1.msra.mxu1 %v3946_v31  ;;  %v10968_v63 = vadd.f32 %v3103_v42, %v2339_v47  ;;  %v4033_v8 = vld [vmem:[#allocation11 + $0x1ab0] sm:$0xff]  ;;  %v3922_v31 = vld [vmem:[#allocation11 + $0x1738] sm:$0xff]  ;;  %v4028_v47 = vld [vmem:[#allocation11 + $0x1a88] sm:$0xff] }
 0x375   : > { %8757 = vmatprep.subr.mxu0 %v4053_v35  ;;  %4343 = vmatprep.subr.mxu1 %v3942_v1  ;;  %v3917_v35 = vld [vmem:[#allocation11 + $0x1710] sm:$0xff]  ;;  %v3948_v1 = vld [vmem:[#allocation11 + $0x1808] sm:$0xff] }
 0x376   : > { %4482 = vmatprep.mubr.f32.mxu0 %v11892_v6  ;;  %8758 = vmatpush3.msra.mxu0 %v3973_v43  ;;  %v3107_v55 = vpop.f32.mrf.mxu1  ;;  %v3916_v42 = vld [vmem:[#allocation11 + $0x1708] sm:$0xff]  ;;  %v4023_v43 = vld [vmem:[#allocation11 + $0x1a60] sm:$0xff] }
 0x377   : > { %4344 = vmatpush1.msra.mxu1 %v3941_v32  ;;  %4483 = vmatmul.mubr.f32.gmra.mxu0 %v10952_v38  ;;  %v3108_v27 = vadd.f32 %v10875_v48, %v3107_v55  ;;  %v3926_v48 = vld [vmem:[#allocation11 + $0x1758] sm:$0xff]  ;;  %v3912_v26 = vld [vmem:[#allocation11 + $0x16e8] sm:$0xff]  ;;  %v3943_v32 = vld [vmem:[#allocation11 + $0x17e0] sm:$0xff] }
 0x378   : > { %8759 = vmatprep.subr.mxu0 %v4048_v19  ;;  %4345 = vmatprep.subr.mxu1 %v3937_v34  ;;  %v9275_v60 = vpop.f32.mrf.mxu1  ;;  %v3911_v19 = vld [vmem:[#allocation11 + $0x16e0] sm:$0xff]  ;;  %v4018_v34 = vld [vmem:[#allocation11 + $0x1a38] sm:$0xff]  ;;  %v4013_v55 = vld [vmem:[#allocation11 + $0x1a10] sm:$0xff] }
 0x379   : > { %8760 = vmatpush3.msra.mxu0 %v3968_v29  ;;  %4346 = vmatpush1.msra.mxu1 %v3936_v45  ;;  %v10974_v18 = vadd.f32 %v3108_v27, %v10793_v53  ;;  %v3921_v53 = vld [vmem:[#allocation11 + $0x1730] sm:$0xff]  ;;  %v3938_v29 = vld [vmem:[#allocation11 + $0x17b8] sm:$0xff] }
 0x37a   : > { %8761 = vmatprep.subr.mxu0 %v4043_v25  ;;  %4347 = vmatprep.subr.mxu1 %v3932_v2  ;;  %v3906_v45 = vld [vmem:[#allocation11 + $0x16b8] sm:$0xff]  ;;  %v3933_v2 = vld [vmem:[#allocation11 + $0x1790] sm:$0xff] }
 0x37b   : > { %4488 = vmatprep.mubr.f32.mxu0 %v11892_v6  ;;  %8762 = vmatpush3.msra.mxu0 %v3963_v15  ;;  %v3902_v25 = vld [vmem:[#allocation11 + $0x1698] sm:$0xff]  ;;  %v3901_v27 = vld [vmem:[#allocation11 + $0x1690] sm:$0xff]  ;;  %v4008_v15 = vld [vmem:[#allocation11 + $0x19e8] sm:$0xff] }
 0x37c   : > { %4348 = vmatpush1.msra.mxu1 %v3931_v16  ;;  %4489 = vmatmul.mubr.f32.gmra.mxu0 %v10947_v20  ;;  %v4057_v60 = vld [vmem:[#allocation11 + $0x1b70] sm:$0xff]  ;;  %v3928_v16 = vld [vmem:[#allocation11 + $0x1768] sm:$0xff] }
 0x37d   : > { %8763 = vmatprep.subr.mxu0 %v4038_v3  ;;  %4349 = vmatprep.subr.mxu1 %v3927_v44  ;;  %v4056_v3 = vld [vmem:[#allocation11 + $0x1b68] sm:$0xff]  ;;  %v4003_v44 = vld [vmem:[#allocation11 + $0x19c0] sm:$0xff] }
 0x37e   : > { %8764 = vmatpush3.msra.mxu0 %v3958_v61  ;;  %4559 = vmatprep.mubr.f32.mxu0 %v10829_v54  ;;  %v3907_v54 = vld [vmem:[#allocation11 + $0x16c0] sm:$0xff]  ;;  %v4052_v61 = vld [vmem:[#allocation11 + $0x1b48] sm:$0xff] }
 0x37f   : > { %4350 = vmatpush1.msra.mxu1 %v3926_v48  ;;  %8765 = vmatprep.subr.mxu0 %v4033_v8  ;;  %v3923_v48 = vld [vmem:[#allocation11 + $0x1740] sm:$0xff]  ;;  %v3457_v8 = vpop.f32.mrf.mxu0 }
 0x380   : > { %4351 = vmatprep.subr.mxu1 %v3922_v31  ;;  %8766 = vmatpush3.msra.mxu0 %v3953_v4  ;;  %v4051_v31 = vld [vmem:[#allocation11 + $0x1b40] sm:$0xff]  ;;  %v3998_v4 = vld [vmem:[#allocation11 + $0x1998] sm:$0xff] }
 0x381   : > { %4352 = vmatpush1.msra.mxu1 %v3921_v53  ;;  %8767 = vmatprep.subr.mxu0 %v4028_v47  ;;  %v4047_v53 = vld [vmem:[#allocation11 + $0x1b20] sm:$0xff]  ;;  %v3918_v47 = vld [vmem:[#allocation11 + $0x1718] sm:$0xff] }
 0x382   : > { %4353 = vmatprep.subr.mxu1 %v3917_v35  ;;  %8768 = vmatpush3.msra.mxu0 %v3948_v1  ;;  %v4046_v35 = vld [vmem:[#allocation11 + $0x1b18] sm:$0xff]  ;;  %v3993_v1 = vld [vmem:[#allocation11 + $0x1970] sm:$0xff] }
 0x383   : > { %4354 = vmatpush1.msra.mxu1 %v3916_v42  ;;  %8769 = vmatprep.subr.mxu0 %v4023_v43  ;;  %v4042_v42 = vld [vmem:[#allocation11 + $0x1af8] sm:$0xff]  ;;  %v3913_v43 = vld [vmem:[#allocation11 + $0x16f0] sm:$0xff] }
 0x384   : > { %4355 = vmatprep.subr.mxu1 %v3912_v26  ;;  %8770 = vmatpush3.msra.mxu0 %v3943_v32  ;;  %v3459_v26 = vpop.f32.mrf.mxu0  ;;  %v4041_v32 = vld [vmem:[#allocation11 + $0x1af0] sm:$0xff] }
 0x385   : > { %4356 = vmatpush1.msra.mxu1 %v3911_v19  ;;  %8771 = vmatprep.subr.mxu0 %v4018_v34  ;;  %v3988_v19 = vld [vmem:[#allocation11 + $0x1948] sm:$0xff]  ;;  %v4037_v34 = vld [vmem:[#allocation11 + $0x1ad0] sm:$0xff] }
 0x386   : > { %4357 = vmatprep.subr.mxu1 %v3907_v54  ;;  %8772 = vmatpush3.msra.mxu0 %v3938_v29  ;;  %v3908_v54 = vld [vmem:[#allocation11 + $0x16c8] sm:$0xff] }
 0x387   : > { %4358 = vmatpush1.msra.mxu1 %v3906_v45  ;;  %8773 = vmatprep.subr.mxu0 %v4013_v55  ;;  %v4036_v29 = vld [vmem:[#allocation11 + $0x1ac8] sm:$0xff]  ;;  %v3983_v45 = vld [vmem:[#allocation11 + $0x1920] sm:$0xff] }
 0x388   : > { %4359 = vmatprep.subr.mxu1 %v3902_v25  ;;  %8774 = vmatpush3.msra.mxu0 %v3933_v2  ;;  %v4032_v55 = vld [vmem:[#allocation11 + $0x1aa8] sm:$0xff]  ;;  %v3903_v25 = vld [vmem:[#allocation11 + $0x16a0] sm:$0xff]  ;;  %v3463_v2 = vpop.f32.mrf.mxu0 }
 0x389   : > { %4360 = vmatpush1.msra.mxu1 %v3901_v27  ;;  %8775 = vmatprep.subr.mxu0 %v4008_v15  ;;  %v4031_v15 = vld [vmem:[#allocation11 + $0x1aa0] sm:$0xff] }
 0x38a   : > { %4361 = vmatprep.subr.mxu1 %v4057_v60  ;;  %8776 = vmatpush3.msra.mxu0 %v3928_v16  ;;  %v4747_v16 = vld [vmem:[#allocation11 + $0x2060] sm:$0xff] }
 0x38b   : > { %4362 = vmatpush2.msra.mxu1 %v4056_v3  ;;  %8777 = vmatprep.subr.mxu0 %v4003_v44  ;;  %v4027_v3 = vld [vmem:[#allocation11 + $0x1a80] sm:$0xff] }
 0x38c   : > { %4363 = vmatprep.subr.mxu1 %v4052_v61  ;;  %8778 = vmatpush3.msra.mxu0 %v3923_v48  ;;  %v4746_v61 = vld [vmem:[#allocation11 + $0x2058] sm:$0xff] }
 0x38d   : > { %4364 = vmatpush2.msra.mxu1 %v4051_v31  ;;  %8779 = vmatprep.subr.mxu0 %v3998_v4  ;;  %v4026_v4 = vld [vmem:[#allocation11 + $0x1a78] sm:$0xff] }
 0x38e   : > { %4365 = vmatprep.subr.mxu1 %v4047_v53  ;;  %8780 = vmatpush3.msra.mxu0 %v3918_v47  ;;  %v4742_v53 = vld [vmem:[#allocation11 + $0x2038] sm:$0xff]  ;;  %v3465_v47 = vpop.f32.mrf.mxu0 }
 0x38f   : > { %4366 = vmatpush2.msra.mxu1 %v4046_v35  ;;  %8781 = vmatprep.subr.mxu0 %v3993_v1  ;;  %v4741_v35 = vld [vmem:[#allocation11 + $0x2030] sm:$0xff] }
 0x390   : > { %4367 = vmatprep.subr.mxu1 %v4042_v42  ;;  %8782 = vmatpush3.msra.mxu0 %v3913_v43 }
 0x391   : > { %4368 = vmatpush2.msra.mxu1 %v4041_v32  ;;  %8783 = vmatprep.subr.mxu0 %v3988_v19  ;;  %v3540_v27 = vpop.f32.mrf.mxu1  ;;  %v4017_v32 = vld [vmem:[#allocation11 + $0x1a30] sm:$0xff] }
 0x392   : > { %4369 = vmatprep.subr.mxu1 %v4037_v34  ;;  %8784 = vmatpush3.msra.mxu0 %v3908_v54  ;;  %v3541_v60 = vadd.f32 %v3540_v27, %v3457_v8  ;;  %v4022_v8 = vld [vmem:[#allocation11 + $0x1a58] sm:$0xff]  ;;  %v4736_v34 = vld [vmem:[#allocation11 + $0x2008] sm:$0xff]  ;;  %v3469_v54 = vpop.f32.mrf.mxu0 }
 0x393   : > { %4370 = vmatpush2.msra.mxu1 %v4036_v29  ;;  %8785 = vmatprep.subr.mxu0 %v3983_v45  ;;  %v3542_v44 = vpop.f32.mrf.mxu1  ;;  %v4016_v45 = vld [vmem:[#allocation11 + $0x1a28] sm:$0xff] }
 0x394   : > { %4371 = vmatprep.subr.mxu1 %v4032_v55  ;;  %8786 = vmatpush3.msra.mxu0 %v3903_v25  ;;  %v10980_v48 = vadd.f32 %v3541_v60, %v10803_v10  ;;  %v3543_v31 = vadd.f32 %v3542_v44, %v3459_v26  ;;  %v4021_v10 = vld [vmem:[#allocation11 + $0x1a50] sm:$0xff]  ;;  %v4732_v55 = vld [vmem:[#allocation11 + $0x1fe8] sm:$0xff]  ;;  %v4011_v60 = vld [vmem:[#allocation11 + $0x1a00] sm:$0xff] }
 0x395   : > { %4372 = vmatpush2.msra.mxu1 %v4031_v15  ;;  %4560 = vmatmul.mubr.f32.vlgmr.msra.gmra.mxu0 %v10893_v50  ;;  %v4737_v26 = vld [vmem:[#allocation11 + $0x2010] sm:$0xff]  ;;  %v4012_v25 = vld [vmem:[#allocation11 + $0x1a08] sm:$0xff]  ;;  %v4007_v44 = vld [vmem:[#allocation11 + $0x19e0] sm:$0xff] }
 0x396   : > { %4935 = vmatprep.subr.mxu0 %v4747_v16  ;;  %4373 = vmatprep.subr.mxu1 %v4027_v3  ;;  %v10984_v1 = vadd.f32 %v3543_v31, %v10808_v40  ;;  %v3546_v42 = vpop.f32.mrf.mxu1  ;;  %v4727_v3 = vld [vmem:[#allocation11 + $0x1fc0] sm:$0xff] }
 0x397   : > { %4564 = vmatprep.mubr.f32.mxu0 %v10901_v59  ;;  %4936 = vmatpush1.msra.mxu0 %v4746_v61  ;;  %v3547_v43 = vadd.f32 %v3546_v42, %v3463_v2  ;;  %v4731_v2 = vld [vmem:[#allocation11 + $0x1fe0] sm:$0xff]  ;;  %v3471_v61 = vpop.f32.mrf.mxu0 }
 0x398   : > { %4374 = vmatpush2.msra.mxu1 %v4026_v4  ;;  %4937 = vmatprep.subr.mxu0 %v4742_v53  ;;  %v3548_v19 = vpop.f32.mrf.mxu1  ;;  %v4726_v4 = vld [vmem:[#allocation11 + $0x1fb8] sm:$0xff] }
 0x399   : > { %4375 = vmatprep.subr.mxu1 %v4022_v8  ;;  %4938 = vmatpush1.msra.mxu0 %v4741_v35  ;;  %v10988_v29 = vadd.f32 %v3547_v43, %v10814_v57  ;;  %v3549_v40 = vadd.f32 %v3548_v19, %v3465_v47  ;;  %v4915_v57 = vrot.slane %v10478_v36, 4  ;;  %v4006_v8 = vld [vmem:[#allocation11 + $0x19d8] sm:$0xff]  ;;  %v4721_v43 = vld [vmem:[#allocation11 + $0x1f90] sm:$0xff]  ;;  %v4716_v19 = vld [vmem:[#allocation11 + $0x1f68] sm:$0xff] }
 0x39a   : > { %4376 = vmatpush2.msra.mxu1 %v4021_v10  ;;  %4565 = vmatmul.mubr.f32.gmra.mxu0 %v10920_v13  ;;  %v4722_v35 = vld [vmem:[#allocation11 + $0x1f98] sm:$0xff]  ;;  %v4899_v36 = vld [vmem:[#allocation11 + $0x2520] sm:$0xff] }
 0x39b   : > { %4939 = vmatprep.subr.mxu0 %v4737_v26  ;;  %4377 = vmatprep.subr.mxu1 %v4017_v32  ;;  %v10992_v27 = vadd.f32 %v3549_v40, %v10817_v14  ;;  %v3552_v15 = vpop.f32.mrf.mxu1  ;;  %v4914_v14 = vrot.slane %v10467_v7, 4  ;;  %v4002_v10 = vld [vmem:[#allocation11 + $0x19b8] sm:$0xff]  ;;  %v4717_v26 = vld [vmem:[#allocation11 + $0x1f70] sm:$0xff]  ;;  %v3992_v40 = vld [vmem:[#allocation11 + $0x1968] sm:$0xff] }
 0x39c   : > { %4569 = vmatprep.mubr.f32.mxu0 %v10884_v0  ;;  %4940 = vmatpush1.msra.mxu0 %v4736_v34  ;;  %v3553_v16 = vadd.f32 %v3552_v15, %v3469_v54  ;;  %v3997_v32 = vld [vmem:[#allocation11 + $0x1990] sm:$0xff]  ;;  %v3996_v34 = vld [vmem:[#allocation11 + $0x1988] sm:$0xff]  ;;  %v3986_v15 = vld [vmem:[#allocation11 + $0x1938] sm:$0xff] }
 0x39d   : > { %4378 = vmatpush2.msra.mxu1 %v4016_v45  ;;  %4941 = vmatprep.subr.mxu0 %v4732_v55  ;;  %v3554_v31 = vpop.f32.mrf.mxu1  ;;  %v11004_v42 = vsel %vm532_vm0, %v4914_v14, %v4915_v57  ;;  %v4712_v54 = vld [vmem:[#allocation11 + $0x1f48] sm:$0xff]  ;;  %v4711_v45 = vld [vmem:[#allocation11 + $0x1f40] sm:$0xff] }
 0x39e   : > { %4379 = vmatprep.subr.mxu1 %v4012_v25  ;;  %4942 = vmatpush1.msra.mxu0 %v4731_v2  ;;  %v10998_v53 = vadd.f32 %v3553_v16, %v10823_v12  ;;  %v3555_v47 = vadd.f32 %v3554_v31, %v3471_v61  ;;  %v4001_v12 = vld [vmem:[#allocation11 + $0x19b0] sm:$0xff]  ;;  %v4707_v55 = vld [vmem:[#allocation11 + $0x1f20] sm:$0xff]  ;;  %v4706_v2 = vld [vmem:[#allocation11 + $0x1f18] sm:$0xff] }
 0x39f   : > { %4380 = vmatpush2.msra.mxu1 %v4011_v60  ;;  %4570 = vmatmul.mubr.f32.gmra.mxu0 %v10905_v11  ;;  %v3987_v25 = vld [vmem:[#allocation11 + $0x1940] sm:$0xff]  ;;  %v4702_v60 = vld [vmem:[#allocation11 + $0x1ef8] sm:$0xff]  ;;  %v4697_v61 = vld [vmem:[#allocation11 + $0x1ed0] sm:$0xff] }
 0x3a0   : > { %4943 = vmatprep.subr.mxu0 %v4727_v3  ;;  %4381 = vmatprep.subr.mxu1 %v4007_v44  ;;  %v11007_v7 = vadd.f32 %v3555_v47, %v10832_v46  ;;  %v3991_v46 = vld [vmem:[#allocation11 + $0x1960] sm:$0xff]  ;;  %v3982_v16 = vld [vmem:[#allocation11 + $0x1918] sm:$0xff]  ;;  %v4701_v3 = vld [vmem:[#allocation11 + $0x1ef0] sm:$0xff] }
 0x3a1   : > { %4944 = vmatpush1.msra.mxu0 %v4726_v4  ;;  %4999 = vmatprep.mubr.f32.mxu0 %v11004_v42  ;;  %v3981_v44 = vld [vmem:[#allocation11 + $0x1910] sm:$0xff]  ;;  %v4696_v31 = vld [vmem:[#allocation11 + $0x1ec8] sm:$0xff]  ;;  %v4138_v4 = vld [vmem:[#allocation11 + $0x1df8] sm:$0xff] }
 0x3a2   : > { %4382 = vmatpush2.msra.mxu1 %v4006_v8  ;;  %4945 = vmatprep.subr.mxu0 %v4722_v35  ;;  %v4692_v14 = vld [vmem:[#allocation11 + $0x1ea8] sm:$0xff]  ;;  %v4691_v47 = vld [vmem:[#allocation11 + $0x1ea0] sm:$0xff]  ;;  %v11012_v8 = vpop.f32.mrf.mxu0  ;;  %v4133_v35 = vld [vmem:[#allocation11 + $0x1dd0] sm:$0xff] }
 0x3a3   : > { %4383 = vmatprep.subr.mxu1 %v4002_v10  ;;  %4946 = vmatpush1.msra.mxu0 %v4721_v43  ;;  %v4687_v10 = vld [vmem:[#allocation11 + $0x1e80] sm:$0xff]  ;;  %v4686_v43 = vld [vmem:[#allocation11 + $0x1e78] sm:$0xff] }
 0x3a4   : > { %4384 = vmatpush2.msra.mxu1 %v4001_v12  ;;  %4947 = vmatprep.subr.mxu0 %v4717_v26  ;;  %v4128_v12 = vld [vmem:[#allocation11 + $0x1da8] sm:$0xff]  ;;  %v11016_v26 = vpop.f32.mrf.mxu0 }
 0x3a5   : > { %4385 = vmatprep.subr.mxu1 %v3997_v32  ;;  %4948 = vmatpush1.msra.mxu0 %v4716_v19  ;;  %v4681_v32 = vld [vmem:[#allocation11 + $0x1e50] sm:$0xff] }
 0x3a6   : > { %4386 = vmatpush2.msra.mxu1 %v3996_v34  ;;  %4949 = vmatprep.subr.mxu0 %v4712_v54  ;;  %v4677_v19 = vld [vmem:[#allocation11 + $0x1e30] sm:$0xff]  ;;  %v4676_v34 = vld [vmem:[#allocation11 + $0x1e28] sm:$0xff]  ;;  %v4118_v54 = vld [vmem:[#allocation11 + $0x1d58] sm:$0xff] }
 0x3a7   : > { %4387 = vmatprep.subr.mxu1 %v3992_v40  ;;  %4950 = vmatpush1.msra.mxu0 %v4711_v45  ;;  %v11022_v40 = vpop.f32.mrf.mxu0  ;;  %v4671_v45 = vld [vmem:[#allocation11 + $0x1e00] sm:$0xff] }
 0x3a8   : > { %4388 = vmatpush2.msra.mxu1 %v3991_v46  ;;  %4951 = vmatprep.subr.mxu0 %v4707_v55  ;;  %v4827_v46 = vld [vmem:[#allocation11 + $0x22e0] sm:$0xff]  ;;  %v4826_v55 = vld [vmem:[#allocation11 + $0x22d8] sm:$0xff] }
 0x3a9   : > { %4389 = vmatprep.subr.mxu1 %v3987_v25  ;;  %4952 = vmatpush1.msra.mxu0 %v4706_v2  ;;  %v4108_v25 = vld [vmem:[#allocation11 + $0x1d08] sm:$0xff]  ;;  %v11027_v2 = vpop.f32.mrf.mxu0 }
 0x3aa   : > { %4390 = vmatpush2.msra.mxu1 %v3986_v15  ;;  %4953 = vmatprep.subr.mxu0 %v4702_v60  ;;  %v4822_v15 = vld [vmem:[#allocation11 + $0x22b8] sm:$0xff]  ;;  %v4103_v60 = vld [vmem:[#allocation11 + $0x1ce0] sm:$0xff] }
 0x3ab   : > { %4391 = vmatprep.subr.mxu1 %v3982_v16  ;;  %4954 = vmatpush1.msra.mxu0 %v4701_v3  ;;  %v4817_v16 = vld [vmem:[#allocation11 + $0x2290] sm:$0xff]  ;;  %v4816_v3 = vld [vmem:[#allocation11 + $0x2288] sm:$0xff] }
 0x3ac   : > { %4392 = vmatpush2.msra.mxu1 %v3981_v44  ;;  %4955 = vmatprep.subr.mxu0 %v4697_v61  ;;  %v4098_v44 = vld [vmem:[#allocation11 + $0x1cb8] sm:$0xff]  ;;  %v11031_v61 = vpop.f32.mrf.mxu0 }
 0x3ad   : > { %4394 = vmatmul.mubr.f32.vlgmr.msra.gmra.mxu1 %v10893_v50  ;;  %9317 = vmatprep.subr.mxu1 %v11892_v6  ;;  %v4682_v50 = vld [vmem:[#allocation11 + $0x1e58] sm:$0xff] }
 0x3ae   : > { %4956 = vmatpush1.msra.mxu0 %v4696_v31  ;;  %4399 = vmatprep.mubr.f32.mxu1 %v10901_v59  ;;  %v4123_v59 = vld [vmem:[#allocation11 + $0x1d80] sm:$0xff]  ;;  %v4812_v31 = vld [vmem:[#allocation11 + $0x2268] sm:$0xff] }
 0x3af   : > { %9318 = vmatpush3.msra.mxu1 %v4138_v4  ;;  %4957 = vmatprep.subr.mxu0 %v4692_v14  ;;  %v4811_v4 = vld [vmem:[#allocation11 + $0x2260] sm:$0xff]  ;;  %v4093_v14 = vld [vmem:[#allocation11 + $0x1c90] sm:$0xff] }
 0x3b0   : > { %9319 = vmatprep.subr.mxu1 %v11892_v6  ;;  %4958 = vmatpush1.msra.mxu0 %v4691_v47  ;;  %v4807_v47 = vld [vmem:[#allocation11 + $0x2240] sm:$0xff] }
 0x3b1   : > { %9320 = vmatpush3.msra.mxu1 %v4133_v35  ;;  %4959 = vmatprep.subr.mxu0 %v4687_v10  ;;  %v4806_v35 = vld [vmem:[#allocation11 + $0x2238] sm:$0xff]  ;;  %v11035_v10 = vpop.f32.mrf.mxu0 }
 0x3b2   : > { %4400 = vmatmul.mubr.f32.gmra.mxu1 %v10920_v13  ;;  %9321 = vmatprep.subr.mxu1 %v11892_v6  ;;  %v4672_v13 = vld [vmem:[#allocation11 + $0x1e08] sm:$0xff] }
 0x3b3   : > { %4960 = vmatpush1.msra.mxu0 %v4686_v43  ;;  %4405 = vmatprep.mubr.f32.mxu1 %v10884_v0  ;;  %v4113_v0 = vld [vmem:[#allocation11 + $0x1d30] sm:$0xff]  ;;  %v4088_v43 = vld [vmem:[#allocation11 + $0x1c68] sm:$0xff] }
 0x3b4   : > { %9322 = vmatpush3.msra.mxu1 %v4128_v12  ;;  %4961 = vmatprep.subr.mxu0 %v4682_v50  ;;  %v4802_v12 = vld [vmem:[#allocation11 + $0x2218] sm:$0xff]  ;;  %v4801_v50 = vld [vmem:[#allocation11 + $0x2210] sm:$0xff] }
 0x3b5   : > { %9323 = vmatprep.subr.mxu1 %v11892_v6  ;;  %4962 = vmatpush1.msra.mxu0 %v4681_v32  ;;  %v4083_v32 = vld [vmem:[#allocation11 + $0x1c40] sm:$0xff] }
 0x3b6   : > { %9324 = vmatpush3.msra.mxu1 %v4123_v59  ;;  %4963 = vmatprep.subr.mxu0 %v4677_v19  ;;  %v4797_v19 = vld [vmem:[#allocation11 + $0x21f0] sm:$0xff] }
 0x3b7   : > { %4406 = vmatmul.mubr.f32.gmra.mxu1 %v10905_v11  ;;  %9325 = vmatprep.subr.mxu1 %v11892_v6  ;;  %v4821_v11 = vld [vmem:[#allocation11 + $0x22b0] sm:$0xff] }
 0x3b8   : > { %4964 = vmatpush1.msra.mxu0 %v4676_v34  ;;  %9326 = vmatpush3.msra.mxu1 %v4118_v54  ;;  %v4796_v34 = vld [vmem:[#allocation11 + $0x21e8] sm:$0xff]  ;;  %v4078_v54 = vld [vmem:[#allocation11 + $0x1c18] sm:$0xff] }
 0x3b9   : > { %4965 = vmatprep.subr.mxu0 %v4672_v13  ;;  %9327 = vmatprep.subr.mxu1 %v11892_v6 }
 0x3ba   : > { %4966 = vmatpush1.msra.mxu0 %v4671_v45  ;;  %9328 = vmatpush3.msra.mxu1 %v4113_v0  ;;  %v4792_v45 = vld [vmem:[#allocation11 + $0x21c8] sm:$0xff] }
 0x3bb   : > { %4967 = vmatprep.subr.mxu0 %v4827_v46  ;;  %9329 = vmatprep.subr.mxu1 %v11892_v6  ;;  %v4791_v46 = vld [vmem:[#allocation11 + $0x21c0] sm:$0xff] }
 0x3bc   : > { %4968 = vmatpush2.msra.mxu0 %v4826_v55  ;;  %9330 = vmatpush3.msra.mxu1 %v4108_v25  ;;  %v4073_v55 = vld [vmem:[#allocation11 + $0x1bf0] sm:$0xff]  ;;  %v4787_v25 = vld [vmem:[#allocation11 + $0x21a0] sm:$0xff] }
 0x3bd   : > { %4969 = vmatprep.subr.mxu0 %v4822_v15  ;;  %9331 = vmatprep.subr.mxu1 %v11892_v6 }
 0x3be   : > { %4970 = vmatpush2.msra.mxu0 %v4821_v11  ;;  %9332 = vmatpush3.msra.mxu1 %v4103_v60  ;;  %v4786_v11 = vld [vmem:[#allocation11 + $0x2198] sm:$0xff]  ;;  %v4068_v60 = vld [vmem:[#allocation11 + $0x1bc8] sm:$0xff] }
 0x3bf   : > { %4971 = vmatprep.subr.mxu0 %v4817_v16  ;;  %9333 = vmatprep.subr.mxu1 %v11892_v6  ;;  %v4782_v16 = vld [vmem:[#allocation11 + $0x2178] sm:$0xff] }
 0x3c0   : > { %4972 = vmatpush2.msra.mxu0 %v4816_v3  ;;  %9334 = vmatpush3.msra.mxu1 %v4098_v44  ;;  %v4781_v44 = vld [vmem:[#allocation11 + $0x2170] sm:$0xff] }
 0x3c1   : > { %4973 = vmatprep.subr.mxu0 %v4812_v31  ;;  %9335 = vmatprep.subr.mxu1 %v11892_v6  ;;  %v4063_v31 = vld [vmem:[#allocation11 + $0x1ba0] sm:$0xff] }
 0x3c2   : > { %4974 = vmatpush2.msra.mxu0 %v4811_v4  ;;  %9336 = vmatpush3.msra.mxu1 %v4093_v14  ;;  %v4777_v14 = vld [vmem:[#allocation11 + $0x2150] sm:$0xff] }
 0x3c3   : > { %4975 = vmatprep.subr.mxu0 %v4807_v47  ;;  %9337 = vmatprep.subr.mxu1 %v11892_v6  ;;  %v8727_v59 = vpop.f32.mrf.mxu0  ;;  %v4776_v47 = vld [vmem:[#allocation11 + $0x2148] sm:$0xff] }
 0x3c4   : > { %4976 = vmatpush2.msra.mxu0 %v4806_v35  ;;  %9338 = vmatpush3.msra.mxu1 %v4088_v43  ;;  %v4907_v43 = vld [vmem:[#allocation11 + $0x2560] sm:$0xff] }
 0x3c5   : > { %4977 = vmatprep.subr.mxu0 %v4802_v12  ;;  %9339 = vmatprep.subr.mxu1 %v11892_v6  ;;  %v8728_v13 = vpop.f32.mrf.mxu0  ;;  %v4772_v12 = vld [vmem:[#allocation11 + $0x2128] sm:$0xff] }
 0x3c6   : > { %4978 = vmatpush2.msra.mxu0 %v4801_v50  ;;  %9340 = vmatpush3.msra.mxu1 %v4083_v32  ;;  %v11039_v0 = vadd.f32 %v8728_v13, %v8727_v59  ;;  %v4906_v50 = vld [vmem:[#allocation11 + $0x2558] sm:$0xff]  ;;  %v4771_v32 = vld [vmem:[#allocation11 + $0x2120] sm:$0xff]  ;;  %v4901_v13 = vld [vmem:[#allocation11 + $0x2530] sm:$0xff] }
 0x3c7   : > { %4979 = vmatprep.subr.mxu0 %v4797_v19  ;;  %9341 = vmatprep.subr.mxu1 %v11892_v6  ;;  %v4902_v19 = vld [vmem:[#allocation11 + $0x2538] sm:$0xff] }
 0x3c8   : > { %4980 = vmatpush2.msra.mxu0 %v4796_v34  ;;  %9342 = vmatpush3.msra.mxu1 %v4078_v54  ;;  %v8730_v15 = vpop.f32.mrf.mxu0  ;;  %v4767_v54 = vld [vmem:[#allocation11 + $0x2100] sm:$0xff] }
 0x3c9   : > { %4981 = vmatprep.subr.mxu0 %v4792_v45  ;;  %9343 = vmatprep.subr.mxu1 %v11892_v6  ;;  %v4766_v45 = vld [vmem:[#allocation11 + $0x20f8] sm:$0xff] }
 0x3ca   : > { %4982 = vmatpush2.msra.mxu0 %v4791_v46  ;;  %9344 = vmatpush3.msra.mxu1 %v4073_v55  ;;  %v8731_v3 = vpop.f32.mrf.mxu0  ;;  %v4897_v46 = vld [vmem:[#allocation11 + $0x2510] sm:$0xff]  ;;  %v4762_v55 = vld [vmem:[#allocation11 + $0x20d8] sm:$0xff] }
 0x3cb   : > { %4983 = vmatprep.subr.mxu0 %v4787_v25  ;;  %9345 = vmatprep.subr.mxu1 %v11892_v6  ;;  %v11044_v4 = vadd.f32 %v8731_v3, %v8730_v15  ;;  %v4761_v25 = vld [vmem:[#allocation11 + $0x20d0] sm:$0xff]  ;;  %v4892_v15 = vld [vmem:[#allocation11 + $0x24e8] sm:$0xff]  ;;  %v4887_v3 = vld [vmem:[#allocation11 + $0x24c0] sm:$0xff] }
 0x3cc   : > { %4984 = vmatpush2.msra.mxu0 %v4786_v11  ;;  %9346 = vmatpush3.msra.mxu1 %v4068_v60  ;;  %v4757_v11 = vld [vmem:[#allocation11 + $0x20b0] sm:$0xff]  ;;  %v4891_v60 = vld [vmem:[#allocation11 + $0x24e0] sm:$0xff] }
 0x3cd   : > { %4985 = vmatprep.subr.mxu0 %v4782_v16  ;;  %9347 = vmatprep.subr.mxu1 %v11892_v6  ;;  %v8733_v35 = vpop.f32.mrf.mxu0  ;;  %v4756_v16 = vld [vmem:[#allocation11 + $0x20a8] sm:$0xff] }
 0x3ce   : > { %4986 = vmatpush2.msra.mxu0 %v4781_v44  ;;  %9348 = vmatpush3.msra.mxu1 %v4063_v31  ;;  %v4752_v44 = vld [vmem:[#allocation11 + $0x2088] sm:$0xff]  ;;  %v4912_v31 = vrot.slane %v10480_v39, 4 }
 0x3cf   : > { %9349 = vmatprep.mubr.msk.f32.mxu1 %vm9999_vm4, %v11892_v6  ;;  %4987 = vmatprep.subr.mxu0 %v4777_v14  ;;  %v8734_v59 = vpop.f32.mrf.mxu0  ;;  %v4751_v14 = vld [vmem:[#allocation11 + $0x2080] sm:$0xff] }
 0x3d0   : > { %9350 = vmatmul.mubr.f32.vlgmr.msra.gmra.mxu1 %v10943_v51  ;;  %4988 = vmatpush2.msra.mxu0 %v4776_v47  ;;  %v11050_v34 = vadd.f32 %v8734_v59, %v8733_v35  ;;  %v4896_v51 = vld [vmem:[#allocation11 + $0x2508] sm:$0xff]  ;;  %v4882_v47 = vld [vmem:[#allocation11 + $0x2498] sm:$0xff]  ;;  %v4911_v35 = vrot.slane %v10469_v9, 4  ;;  %v4877_v59 = vld [vmem:[#allocation11 + $0x2470] sm:$0xff] }
 0x3d1   : > { %5018 = vmatprep.subr.mxu1 %v4907_v43  ;;  %4989 = vmatprep.subr.mxu0 %v4772_v12  ;;  %v11061_v43 = vrot.slane %v10486_v49, 4  ;;  %v4881_v12 = vld [vmem:[#allocation11 + $0x2490] sm:$0xff]  ;;  %v4908_v9 = vld [vmem:[#allocation11 + $0x2568] sm:$0xff] }
 0x3d2   : > { %5019 = vmatpush1.msra.mxu1 %v4906_v50  ;;  %4990 = vmatpush2.msra.mxu0 %v4771_v32  ;;  %v4909_v50 = vld [vmem:[#allocation11 + $0x2570] sm:$0xff]  ;;  %v11064_v39 = vsel %vm532_vm0, %v4911_v35, %v4912_v31 }
 0x3d3   : > { %5020 = vmatprep.subr.mxu1 %v4902_v19  ;;  %9352 = vmatprep.mubr.msk.f32.mxu1 %vm9999_vm4, %v11892_v6  ;;  %v4876_v19 = vld [vmem:[#allocation11 + $0x2468] sm:$0xff] }
 0x3d4   : > { %4991 = vmatprep.subr.mxu0 %v4767_v54  ;;  %5021 = vmatpush1.msra.mxu1 %v4901_v13  ;;  %v11072_v54 = vsel %vm532_vm0, %v4915_v57, %v11061_v43  ;;  %v4904_v13 = vld [vmem:[#allocation11 + $0x2548] sm:$0xff] }
 0x3d5   : > { %9353 = vmatmul.mubr.f32.gmra.mxu1 %v10952_v38  ;;  %4992 = vmatpush2.msra.mxu0 %v4766_v45  ;;  %v4886_v38 = vld [vmem:[#allocation11 + $0x24b8] sm:$0xff]  ;;  %v4872_v45 = vld [vmem:[#allocation11 + $0x2448] sm:$0xff] }
 0x3d6   : > { %5022 = vmatprep.subr.mxu1 %v4897_v46  ;;  %4993 = vmatprep.subr.mxu0 %v4762_v55  ;;  %v11075_v46 = vrot.slane %v10488_v52, 4  ;;  %v4867_v52 = vld [vmem:[#allocation11 + $0x2420] sm:$0xff] }
 0x3d7   : > { %5023 = vmatpush1.msra.mxu1 %v4896_v51  ;;  %4994 = vmatpush2.msra.mxu0 %v4761_v25  ;;  %v4903_v51 = vld [vmem:[#allocation11 + $0x2540] sm:$0xff] }
 0x3d8   : > { %5024 = vmatprep.subr.mxu1 %v4892_v15  ;;  %9355 = vmatprep.mubr.msk.f32.mxu1 %vm9999_vm4, %v11892_v6  ;;  %v4871_v25 = vld [vmem:[#allocation11 + $0x2440] sm:$0xff] }
 0x3d9   : > { %4995 = vmatprep.subr.mxu0 %v4757_v11  ;;  %5025 = vmatpush1.msra.mxu1 %v4891_v60  ;;  %v4898_v11 = vld [vmem:[#allocation11 + $0x2518] sm:$0xff] }
 0x3da   : > { %9356 = vmatmul.mubr.f32.gmra.mxu1 %v10947_v20  ;;  %4996 = vmatpush2.msra.mxu0 %v4756_v16  ;;  %v4866_v60 = vld [vmem:[#allocation11 + $0x2418] sm:$0xff] }
 0x3db   : > { %5026 = vmatprep.subr.mxu1 %v4887_v3  ;;  %4997 = vmatprep.subr.mxu0 %v4752_v44  ;;  %v3623_v32 = vpop.f32.mrf.mxu1  ;;  %v4862_v3 = vld [vmem:[#allocation11 + $0x23f8] sm:$0xff] }
 0x3dc   : > { %5027 = vmatpush1.msra.mxu1 %v4886_v38  ;;  %4998 = vmatpush2.msra.mxu0 %v4751_v14  ;;  %v3707_v20 = vadd.f32 %v11012_v8, %v3623_v32  ;;  %v4889_v14 = vld [vmem:[#allocation11 + $0x24d0] sm:$0xff]  ;;  %v4884_v32 = vld [vmem:[#allocation11 + $0x24a8] sm:$0xff] }
 0x3dd   : > { %5028 = vmatprep.subr.mxu1 %v4882_v47  ;;  %5000 = vmatmul.mubr.f32.vlgmr.msra.gmra.mxu0 %v11064_v39  ;;  %v3625_v49 = vpop.f32.mrf.mxu1 }
 0x3de   : > { %5029 = vmatpush1.msra.mxu1 %v4881_v12  ;;  %5184 = vmatprep.subr.mxu0 %v4909_v50  ;;  %v11078_v8 = vadd.f32 %v3707_v20, %v10907_v24  ;;  %v3709_v55 = vadd.f32 %v11016_v26, %v3625_v49  ;;  %v11088_v26 = vsel %vm532_vm0, %v4912_v31, %v11075_v46  ;;  %v4861_v31 = vld [vmem:[#allocation11 + $0x23f0] sm:$0xff]  ;;  %v4888_v50 = vld [vmem:[#allocation11 + $0x24c8] sm:$0xff]  ;;  %v4851_v49 = vld [vmem:[#allocation11 + $0x23a0] sm:$0xff] }
 0x3df   : > { %5005 = vmatprep.mubr.f32.mxu0 %v11072_v54  ;;  %5030 = vmatprep.subr.mxu1 %v4877_v59  ;;  %v4857_v12 = vld [vmem:[#allocation11 + $0x23d0] sm:$0xff]  ;;  %v4852_v20 = vld [vmem:[#allocation11 + $0x23a8] sm:$0xff] }
 0x3e0   : > { %5185 = vmatpush1.msra.mxu0 %v4908_v9  ;;  %5031 = vmatpush1.msra.mxu1 %v4876_v19  ;;  %v11083_v57 = vadd.f32 %v3709_v55, %v10913_v17  ;;  %v3629_v15 = vpop.f32.mrf.mxu1  ;;  %v4894_v17 = vld [vmem:[#allocation11 + $0x24f8] sm:$0xff]  ;;  %v4883_v9 = vld [vmem:[#allocation11 + $0x24a0] sm:$0xff] }
 0x3e1   : > { %5186 = vmatprep.subr.mxu0 %v4904_v13  ;;  %5032 = vmatprep.subr.mxu1 %v4872_v45  ;;  %v3713_v24 = vadd.f32 %v11022_v40, %v3629_v15  ;;  %v4893_v40 = vld [vmem:[#allocation11 + $0x24f0] sm:$0xff]  ;;  %v4879_v13 = vld [vmem:[#allocation11 + $0x2480] sm:$0xff]  ;;  %v4878_v45 = vld [vmem:[#allocation11 + $0x2478] sm:$0xff] }
 0x3e2   : > { %5187 = vmatpush1.msra.mxu0 %v4903_v51  ;;  %5033 = vmatpush1.msra.mxu1 %v4871_v25  ;;  %v3631_v16 = vpop.f32.mrf.mxu1  ;;  %v4846_v51 = vld [vmem:[#allocation11 + $0x2378] sm:$0xff]  ;;  %v4869_v15 = vld [vmem:[#allocation11 + $0x2430] sm:$0xff] }
 0x3e3   : > { %5006 = vmatmul.mubr.f32.gmra.mxu0 %v11088_v26  ;;  %5188 = vmatprep.subr.mxu0 %v4899_v36  ;;  %v11092_v44 = vadd.f32 %v3713_v24, %v10924_v21  ;;  %v3715_v38 = vadd.f32 %v11027_v2, %v3631_v16  ;;  %v4856_v2 = vld [vmem:[#allocation11 + $0x23c8] sm:$0xff]  ;;  %v4874_v25 = vld [vmem:[#allocation11 + $0x2458] sm:$0xff]  ;;  %v4873_v36 = vld [vmem:[#allocation11 + $0x2450] sm:$0xff] }
 0x3e4   : > { %5011 = vmatprep.mubr.f32.mxu0 %v11061_v43  ;;  %5034 = vmatprep.subr.mxu1 %v4867_v52  ;;  %v4837_v52 = vld [vmem:[#allocation11 + $0x2330] sm:$0xff]  ;;  %v4868_v24 = vld [vmem:[#allocation11 + $0x2428] sm:$0xff]  ;;  %v4863_v16 = vld [vmem:[#allocation11 + $0x2400] sm:$0xff] }
 0x3e5   : > { %5189 = vmatpush1.msra.mxu0 %v4898_v11  ;;  %5035 = vmatpush1.msra.mxu1 %v4866_v60  ;;  %v11097_v47 = vadd.f32 %v3715_v38, %v10928_v22  ;;  %v3635_v35 = vpop.f32.mrf.mxu1  ;;  %v4864_v11 = vld [vmem:[#allocation11 + $0x2408] sm:$0xff]  ;;  %v4859_v38 = vld [vmem:[#allocation11 + $0x23e0] sm:$0xff] }
 0x3e6   : > { %5190 = vmatprep.subr.mxu0 %v4894_v17  ;;  %5036 = vmatprep.subr.mxu1 %v4862_v3  ;;  %v3719_v21 = vadd.f32 %v11031_v61, %v3635_v35  ;;  %v4847_v61 = vld [vmem:[#allocation11 + $0x2380] sm:$0xff]  ;;  %v4832_v60 = vld [vmem:[#allocation11 + $0x2308] sm:$0xff]  ;;  %v4918_v17 = vrot.slane %v10505_v41, 4  ;;  %v4854_v41 = vld [vmem:[#allocation11 + $0x23b8] sm:$0xff] }
 0x3e7   : > { %5191 = vmatpush1.msra.mxu0 %v4893_v40  ;;  %5037 = vmatpush1.msra.mxu1 %v4861_v31  ;;  %v3637_v59 = vpop.f32.mrf.mxu1  ;;  %v4831_v3 = vld [vmem:[#allocation11 + $0x2300] sm:$0xff]  ;;  %v4917_v40 = vrot.slane %v10501_v37, 4  ;;  %v4749_v31 = vld [vmem:[#allocation11 + $0x2070] sm:$0xff] }
 0x3e8   : > { %5012 = vmatmul.mubr.f32.gmra.mxu0 %v11075_v46  ;;  %5192 = vmatprep.subr.mxu0 %v4889_v14  ;;  %v11102_v22 = vadd.f32 %v3719_v21, %v10933_v62  ;;  %v3721_v19 = vadd.f32 %v11035_v10, %v3637_v59  ;;  %v4842_v62 = vld [vmem:[#allocation11 + $0x2358] sm:$0xff]  ;;  %v4841_v10 = vld [vmem:[#allocation11 + $0x2350] sm:$0xff]  ;;  %v4743_v37 = vld [vmem:[#allocation11 + $0x2040] sm:$0xff] }
 0x3e9   : > { %5038 = vmatprep.subr.mxu1 %v4857_v12  ;;  %5193 = vmatpush1.msra.mxu0 %v4888_v50  ;;  %v4858_v14 = vld [vmem:[#allocation11 + $0x23d8] sm:$0xff]  ;;  %v11112_v35 = vsel %vm532_vm0, %v4917_v40, %v4918_v17  ;;  %v4748_v12 = vld [vmem:[#allocation11 + $0x2068] sm:$0xff]  ;;  %v4853_v21 = vld [vmem:[#allocation11 + $0x23b0] sm:$0xff] }
 0x3ea   : > { %5039 = vmatpush1.msra.mxu1 %v4856_v2  ;;  %5194 = vmatprep.subr.mxu0 %v4884_v32  ;;  %v11106_v55 = vadd.f32 %v3721_v19, %v10937_v5  ;;  %v4836_v5 = vld [vmem:[#allocation11 + $0x2328] sm:$0xff]  ;;  %v11116_v2 = vrot.slane %v10509_v56, 4  ;;  %v4849_v32 = vld [vmem:[#allocation11 + $0x2390] sm:$0xff]  ;;  %v4739_v59 = vld [vmem:[#allocation11 + $0x2020] sm:$0xff] }
 0x3eb   : > { %5040 = vmatprep.subr.mxu1 %v4852_v20  ;;  %5195 = vmatpush1.msra.mxu0 %v4883_v9  ;;  %v4744_v50 = vld [vmem:[#allocation11 + $0x2048] sm:$0xff]  ;;  %v4738_v19 = vld [vmem:[#allocation11 + $0x2018] sm:$0xff]  ;;  %v4825_v40 = vld [vmem:[#allocation11 + $0x22d0] sm:$0xff] }
 0x3ec   : > { %5041 = vmatpush1.msra.mxu1 %v4851_v49  ;;  %5196 = vmatprep.subr.mxu0 %v4879_v13  ;;  %v4848_v20 = vld [vmem:[#allocation11 + $0x2388] sm:$0xff]  ;;  %v11121_v9 = vsel %vm532_vm0, %v4918_v17, %v11116_v2  ;;  %v4734_v49 = vld [vmem:[#allocation11 + $0x1ff8] sm:$0xff]  ;;  %v4843_v13 = vld [vmem:[#allocation11 + $0x2360] sm:$0xff] }
 0x3ed   : > { %5042 = vmatprep.subr.mxu1 %v4847_v61  ;;  %5197 = vmatpush1.msra.mxu0 %v4878_v45  ;;  %v4844_v56 = vld [vmem:[#allocation11 + $0x2368] sm:$0xff]  ;;  %v4733_v61 = vld [vmem:[#allocation11 + $0x1ff0] sm:$0xff]  ;;  %v4839_v45 = vld [vmem:[#allocation11 + $0x2340] sm:$0xff] }
 0x3ee   : > { %5043 = vmatpush1.msra.mxu1 %v4846_v51  ;;  %5198 = vmatprep.subr.mxu0 %v4874_v25  ;;  %v4729_v51 = vld [vmem:[#allocation11 + $0x1fd0] sm:$0xff]  ;;  %v4838_v25 = vld [vmem:[#allocation11 + $0x2338] sm:$0xff]  ;;  %v4719_v17 = vld [vmem:[#allocation11 + $0x1f80] sm:$0xff] }
 0x3ef   : > { %5044 = vmatprep.subr.mxu1 %v4842_v62  ;;  %5199 = vmatpush1.msra.mxu0 %v4873_v36  ;;  %v4728_v62 = vld [vmem:[#allocation11 + $0x1fc8] sm:$0xff] }
 0x3f0   : > { %5045 = vmatpush1.msra.mxu1 %v4841_v10  ;;  %5200 = vmatprep.subr.mxu0 %v4869_v15  ;;  %v4834_v10 = vld [vmem:[#allocation11 + $0x2318] sm:$0xff]  ;;  %v4724_v15 = vld [vmem:[#allocation11 + $0x1fa8] sm:$0xff] }
 0x3f1   : > { %5046 = vmatprep.subr.mxu1 %v4837_v52  ;;  %5201 = vmatpush1.msra.mxu0 %v4868_v24  ;;  %v4833_v24 = vld [vmem:[#allocation11 + $0x2310] sm:$0xff] }
 0x3f2   : > { %5047 = vmatpush1.msra.mxu1 %v4836_v5  ;;  %5202 = vmatprep.subr.mxu0 %v4864_v11  ;;  %v4723_v11 = vld [vmem:[#allocation11 + $0x1fa0] sm:$0xff] }
 0x3f3   : > { %5048 = vmatprep.subr.mxu1 %v4832_v60  ;;  %5203 = vmatpush1.msra.mxu0 %v4863_v16  ;;  %v4830_v16 = vld [vmem:[#allocation11 + $0x22f8] sm:$0xff] }
 0x3f4   : > { %5049 = vmatpush1.msra.mxu1 %v4831_v3  ;;  %5082 = vmatprep.mubr.f32.mxu1 %v11892_v6  ;;  %v4750_v3 = vld [vmem:[#allocation11 + $0x2078] sm:$0xff] }
 0x3f5   : > { %5204 = vmatprep.subr.mxu0 %v4859_v38  ;;  %5083 = vmatmul.mubr.f32.vlgmr.msra.gmra.mxu1 %v11112_v35 }
 0x3f6   : > { %5101 = vmatprep.subr.mxu1 %v4749_v31  ;;  %5205 = vmatpush1.msra.mxu0 %v4858_v14  ;;  %v4714_v31 = vld [vmem:[#allocation11 + $0x1f58] sm:$0xff] }
 0x3f7   : > { %5102 = vmatpush1.msra.mxu1 %v4748_v12  ;;  %5206 = vmatprep.subr.mxu0 %v4854_v41  ;;  %v4713_v41 = vld [vmem:[#allocation11 + $0x1f50] sm:$0xff] }
 0x3f8   : > { %5103 = vmatprep.subr.mxu1 %v4744_v50  ;;  %5207 = vmatpush1.msra.mxu0 %v4853_v21  ;;  %v4820_v21 = vld [vmem:[#allocation11 + $0x22a8] sm:$0xff] }
 0x3f9   : > { %5088 = vmatprep.mubr.f32.mxu1 %v11892_v6  ;;  %5104 = vmatpush1.msra.mxu1 %v4743_v37  ;;  %v4709_v37 = vld [vmem:[#allocation11 + $0x1f30] sm:$0xff] }
 0x3fa   : > { %5208 = vmatprep.subr.mxu0 %v4849_v32  ;;  %5089 = vmatmul.mubr.f32.gmra.mxu1 %v11121_v9  ;;  %v4740_v32 = vld [vmem:[#allocation11 + $0x2028] sm:$0xff] }
 0x3fb   : > { %5105 = vmatprep.subr.mxu1 %v4739_v59  ;;  %5209 = vmatpush1.msra.mxu0 %v4848_v20  ;;  %v4708_v59 = vld [vmem:[#allocation11 + $0x1f28] sm:$0xff]  ;;  %v4815_v20 = vld [vmem:[#allocation11 + $0x2280] sm:$0xff] }
 0x3fc   : > { %5106 = vmatpush1.msra.mxu1 %v4738_v19  ;;  %5210 = vmatprep.subr.mxu0 %v4844_v56  ;;  %v4704_v19 = vld [vmem:[#allocation11 + $0x1f08] sm:$0xff] }
 0x3fd   : > { %5107 = vmatprep.subr.mxu1 %v4734_v49  ;;  %5211 = vmatpush1.msra.mxu0 %v4843_v13  ;;  %v4703_v13 = vld [vmem:[#allocation11 + $0x1f00] sm:$0xff] }
 0x3fe   : > { %5094 = vmatprep.mubr.f32.mxu1 %v11892_v6  ;;  %5108 = vmatpush1.msra.mxu1 %v4733_v61  ;;  %v3869_v36 = vpop.f32.mrf.mxu1 }
 0x3ff   : > { %5212 = vmatprep.subr.mxu0 %v4839_v45  ;;  %5095 = vmatmul.mubr.f32.gmra.mxu1 %v11116_v2  ;;  %v3870_v52 = vadd.f32 %v11039_v0, %v3869_v36  ;;  %v4718_v0 = vld [vmem:[#allocation11 + $0x1f78] sm:$0xff] }
 0x400   : > { %5109 = vmatprep.subr.mxu1 %v4729_v51  ;;  %5213 = vmatpush1.msra.mxu0 %v4838_v25  ;;  %v9310_v5 = vpop.f32.mrf.mxu1  ;;  %v4810_v45 = vld [vmem:[#allocation11 + $0x2258] sm:$0xff]  ;;  %v4699_v51 = vld [vmem:[#allocation11 + $0x1ee0] sm:$0xff] }
 0x401   : > { %5110 = vmatpush1.msra.mxu1 %v4728_v62  ;;  %5165 = vmatprep.mubr.f32.mxu1 %v11004_v42  ;;  %v11129_v60 = vadd.f32 %v3870_v52, %v10961_v58  ;;  %v4745_v58 = vld [vmem:[#allocation11 + $0x2050] sm:$0xff]  ;;  %v4730_v25 = vld [vmem:[#allocation11 + $0x1fd8] sm:$0xff]  ;;  %v4688_v5 = vld [vmem:[#allocation11 + $0x1e88] sm:$0xff] }
 0x402   : > { %5214 = vmatprep.subr.mxu0 %v4834_v10  ;;  %5111 = vmatprep.subr.mxu1 %v4724_v15  ;;  %v4805_v62 = vld [vmem:[#allocation11 + $0x2230] sm:$0xff]  ;;  %v4694_v36 = vld [vmem:[#allocation11 + $0x1eb8] sm:$0xff]  ;;  %v4800_v15 = vld [vmem:[#allocation11 + $0x2208] sm:$0xff] }
 0x403   : > { %5215 = vmatpush1.msra.mxu0 %v4833_v24  ;;  %5248 = vmatprep.mubr.f32.mxu0 %v11892_v6  ;;  %v3874_v38 = vpop.f32.mrf.mxu1  ;;  %v4725_v10 = vld [vmem:[#allocation11 + $0x1fb0] sm:$0xff]  ;;  %v4720_v24 = vld [vmem:[#allocation11 + $0x1f88] sm:$0xff] }
 0x404   : > { %5112 = vmatpush1.msra.mxu1 %v4723_v11  ;;  %5249 = vmatmul.mubr.f32.vlgmr.msra.gmra.mxu0 %v11112_v35  ;;  %v3875_v14 = vadd.f32 %v11044_v4, %v3874_v38  ;;  %v4689_v52 = vld [vmem:[#allocation11 + $0x1e90] sm:$0xff]  ;;  %v4795_v11 = vld [vmem:[#allocation11 + $0x21e0] sm:$0xff]  ;;  %v4710_v38 = vld [vmem:[#allocation11 + $0x1f38] sm:$0xff] }
 0x405   : > { %8815 = vmatprep.subr.mxu0 %v4830_v16  ;;  %5113 = vmatprep.subr.mxu1 %v4719_v17  ;;  %v9313_v12 = vpop.f32.mrf.mxu1  ;;  %v4684_v16 = vld [vmem:[#allocation11 + $0x1e68] sm:$0xff]  ;;  %v4715_v17 = vld [vmem:[#allocation11 + $0x1f60] sm:$0xff] }
 0x406   : > { %8816 = vmatpush3.msra.mxu0 %v4750_v3  ;;  %5114 = vmatpush1.msra.mxu1 %v4718_v0  ;;  %v11135_v50 = vadd.f32 %v3875_v14, %v10968_v63  ;;  %v4735_v63 = vld [vmem:[#allocation11 + $0x2000] sm:$0xff]  ;;  %v4790_v0 = vld [vmem:[#allocation11 + $0x21b8] sm:$0xff]  ;;  %v4673_v12 = vld [vmem:[#allocation11 + $0x1e10] sm:$0xff] }
 0x407   : > { %8817 = vmatprep.subr.mxu0 %v4825_v40  ;;  %5115 = vmatprep.subr.mxu1 %v4714_v31  ;;  %v4683_v3 = vld [vmem:[#allocation11 + $0x1e60] sm:$0xff]  ;;  %v4678_v40 = vld [vmem:[#allocation11 + $0x1e38] sm:$0xff]  ;;  %v4785_v31 = vld [vmem:[#allocation11 + $0x2190] sm:$0xff] }
 0x408   : > { %5254 = vmatprep.mubr.f32.mxu0 %v11892_v6  ;;  %8818 = vmatpush3.msra.mxu0 %v4745_v58  ;;  %v3879_v4 = vpop.f32.mrf.mxu1  ;;  %v4674_v14 = vld [vmem:[#allocation11 + $0x1e18] sm:$0xff]  ;;  %v4705_v58 = vld [vmem:[#allocation11 + $0x1f10] sm:$0xff] }
 0x409   : > { %5116 = vmatpush1.msra.mxu1 %v4713_v41  ;;  %5255 = vmatmul.mubr.f32.gmra.mxu0 %v11121_v9  ;;  %v3880_v56 = vadd.f32 %v11050_v34, %v3879_v4  ;;  %v4698_v34 = vld [vmem:[#allocation11 + $0x1ed8] sm:$0xff]  ;;  %v4780_v41 = vld [vmem:[#allocation11 + $0x2168] sm:$0xff] }
 0x40a   : > { %8819 = vmatprep.subr.mxu0 %v4820_v21  ;;  %5117 = vmatprep.subr.mxu1 %v4709_v37  ;;  %v9316_v49 = vpop.f32.mrf.mxu1  ;;  %v4829_v21 = vld [vmem:[#allocation11 + $0x22f0] sm:$0xff]  ;;  %v4700_v37 = vld [vmem:[#allocation11 + $0x1ee8] sm:$0xff] }
 0x40b   : > { %8820 = vmatpush3.msra.mxu0 %v4740_v32  ;;  %5118 = vmatpush1.msra.mxu1 %v4708_v59  ;;  %v11141_v61 = vadd.f32 %v3880_v56, %v10974_v18  ;;  %v4693_v18 = vld [vmem:[#allocation11 + $0x1eb0] sm:$0xff]  ;;  %v4828_v32 = vld [vmem:[#allocation11 + $0x22e8] sm:$0xff]  ;;  %v4775_v59 = vld [vmem:[#allocation11 + $0x2140] sm:$0xff] }
 0x40c   : > { %8821 = vmatprep.subr.mxu0 %v4815_v20  ;;  %5119 = vmatprep.subr.mxu1 %v4704_v19  ;;  %v4824_v4 = vld [vmem:[#allocation11 + $0x22c8] sm:$0xff]  ;;  %v4695_v20 = vld [vmem:[#allocation11 + $0x1ec0] sm:$0xff]  ;;  %v11146_v19 = vpop.f32.mrf.mxu0 }
 0x40d   : > { %5260 = vmatprep.mubr.f32.mxu0 %v11892_v6  ;;  %8822 = vmatpush3.msra.mxu0 %v4735_v63  ;;  %v4823_v56 = vld [vmem:[#allocation11 + $0x22c0] sm:$0xff]  ;;  %v4770_v63 = vld [vmem:[#allocation11 + $0x2118] sm:$0xff] }
 0x40e   : > { %5120 = vmatpush1.msra.mxu1 %v4703_v13  ;;  %5261 = vmatmul.mubr.f32.gmra.mxu0 %v11116_v2  ;;  %v4819_v49 = vld [vmem:[#allocation11 + $0x22a0] sm:$0xff]  ;;  %v4690_v13 = vld [vmem:[#allocation11 + $0x1e98] sm:$0xff] }
 0x40f   : > { %8823 = vmatprep.subr.mxu0 %v4810_v45  ;;  %5121 = vmatprep.subr.mxu1 %v4699_v51  ;;  %v4818_v45 = vld [vmem:[#allocation11 + $0x2298] sm:$0xff]  ;;  %v4765_v51 = vld [vmem:[#allocation11 + $0x20f0] sm:$0xff] }
 0x410   : > { %8824 = vmatpush3.msra.mxu0 %v4730_v25  ;;  %5331 = vmatprep.mubr.f32.mxu0 %v11004_v42  ;;  %v4679_v42 = vld [vmem:[#allocation11 + $0x1e40] sm:$0xff]  ;;  %v4814_v25 = vld [vmem:[#allocation11 + $0x2278] sm:$0xff] }
 0x411   : > { %5122 = vmatpush1.msra.mxu1 %v4698_v34  ;;  %8825 = vmatprep.subr.mxu0 %v4805_v62  ;;  %v4685_v34 = vld [vmem:[#allocation11 + $0x1e70] sm:$0xff]  ;;  %v11148_v62 = vpop.f32.mrf.mxu0 }
 0x412   : > { %5123 = vmatprep.subr.mxu1 %v4694_v36  ;;  %8826 = vmatpush3.msra.mxu0 %v4725_v10  ;;  %v4813_v36 = vld [vmem:[#allocation11 + $0x2270] sm:$0xff]  ;;  %v4760_v10 = vld [vmem:[#allocation11 + $0x20c8] sm:$0xff] }
 0x413   : > { %5124 = vmatpush1.msra.mxu1 %v4693_v18  ;;  %8827 = vmatprep.subr.mxu0 %v4800_v15  ;;  %v4809_v18 = vld [vmem:[#allocation11 + $0x2250] sm:$0xff]  ;;  %v4680_v15 = vld [vmem:[#allocation11 + $0x1e48] sm:$0xff] }
 0x414   : > { %5125 = vmatprep.subr.mxu1 %v4689_v52  ;;  %8828 = vmatpush3.msra.mxu0 %v4720_v24  ;;  %v4808_v52 = vld [vmem:[#allocation11 + $0x2248] sm:$0xff]  ;;  %v4755_v24 = vld [vmem:[#allocation11 + $0x20a0] sm:$0xff] }
 0x415   : > { %5126 = vmatpush1.msra.mxu1 %v4688_v5  ;;  %8829 = vmatprep.subr.mxu0 %v4795_v11  ;;  %v4804_v5 = vld [vmem:[#allocation11 + $0x2228] sm:$0xff]  ;;  %v4675_v11 = vld [vmem:[#allocation11 + $0x1e20] sm:$0xff] }
 0x416   : > { %5127 = vmatprep.subr.mxu1 %v4684_v16  ;;  %8830 = vmatpush3.msra.mxu0 %v4715_v17  ;;  %v11150_v16 = vpop.f32.mrf.mxu0 }
 0x417   : > { %5128 = vmatpush1.msra.mxu1 %v4683_v3  ;;  %8831 = vmatprep.subr.mxu0 %v4790_v0  ;;  %v4803_v3 = vld [vmem:[#allocation11 + $0x2220] sm:$0xff] }
 0x418   : > { %5129 = vmatprep.subr.mxu1 %v4679_v42  ;;  %8832 = vmatpush3.msra.mxu0 %v4710_v38  ;;  %v4799_v0 = vld [vmem:[#allocation11 + $0x2200] sm:$0xff]  ;;  %v4798_v38 = vld [vmem:[#allocation11 + $0x21f8] sm:$0xff] }
 0x419   : > { %5130 = vmatpush1.msra.mxu1 %v4678_v40  ;;  %8833 = vmatprep.subr.mxu0 %v4785_v31  ;;  %v4794_v40 = vld [vmem:[#allocation11 + $0x21d8] sm:$0xff]  ;;  %v11157_v31 = vpop.f32.mrf.mxu0 }
 0x41a   : > { %5131 = vmatprep.subr.mxu1 %v4674_v14  ;;  %8834 = vmatpush3.msra.mxu0 %v4705_v58  ;;  %v4793_v14 = vld [vmem:[#allocation11 + $0x21d0] sm:$0xff] }
 0x41b   : > { %5132 = vmatpush1.msra.mxu1 %v4673_v12  ;;  %8835 = vmatprep.subr.mxu0 %v4780_v41  ;;  %v4789_v12 = vld [vmem:[#allocation11 + $0x21b0] sm:$0xff]  ;;  %v4788_v41 = vld [vmem:[#allocation11 + $0x21a8] sm:$0xff] }
 0x41c   : > { %5133 = vmatprep.subr.mxu1 %v4829_v21  ;;  %8836 = vmatpush3.msra.mxu0 %v4700_v37  ;;  %v4784_v37 = vld [vmem:[#allocation11 + $0x2188] sm:$0xff] }
 0x41d   : > { %5134 = vmatpush2.msra.mxu1 %v4828_v32  ;;  %8837 = vmatprep.subr.mxu0 %v4775_v59  ;;  %v4241_v32 = vpop.f32.mrf.mxu0  ;;  %v4783_v59 = vld [vmem:[#allocation11 + $0x2180] sm:$0xff] }
 0x41e   : > { %5135 = vmatprep.subr.mxu1 %v4824_v4  ;;  %8838 = vmatpush3.msra.mxu0 %v4695_v20  ;;  %v4779_v4 = vld [vmem:[#allocation11 + $0x2160] sm:$0xff] }
 0x41f   : > { %5136 = vmatpush2.msra.mxu1 %v4823_v56  ;;  %8839 = vmatprep.subr.mxu0 %v4770_v63  ;;  %v4778_v56 = vld [vmem:[#allocation11 + $0x2158] sm:$0xff] }
 0x420   : > { %5137 = vmatprep.subr.mxu1 %v4819_v49  ;;  %8840 = vmatpush3.msra.mxu0 %v4690_v13  ;;  %v4243_v49 = vpop.f32.mrf.mxu0  ;;  %v4774_v13 = vld [vmem:[#allocation11 + $0x2138] sm:$0xff] }
 0x421   : > { %5138 = vmatpush2.msra.mxu1 %v4818_v45  ;;  %8841 = vmatprep.subr.mxu0 %v4765_v51  ;;  %v4773_v51 = vld [vmem:[#allocation11 + $0x2130] sm:$0xff] }
 0x422   : > { %5139 = vmatprep.subr.mxu1 %v4814_v25  ;;  %8842 = vmatpush3.msra.mxu0 %v4685_v34 }
 0x423   : > { %5140 = vmatpush2.msra.mxu1 %v4813_v36  ;;  %8843 = vmatprep.subr.mxu0 %v4760_v10  ;;  %v11152_v17 = vpop.f32.mrf.mxu1  ;;  %v4769_v36 = vld [vmem:[#allocation11 + $0x2110] sm:$0xff]  ;;  %v4768_v10 = vld [vmem:[#allocation11 + $0x2108] sm:$0xff] }
 0x424   : > { %5141 = vmatprep.subr.mxu1 %v4809_v18  ;;  %8844 = vmatpush3.msra.mxu0 %v4680_v15  ;;  %v4764_v15 = vld [vmem:[#allocation11 + $0x20e8] sm:$0xff] }
 0x425   : > { %5142 = vmatpush2.msra.mxu1 %v4808_v52  ;;  %8845 = vmatprep.subr.mxu0 %v4755_v24  ;;  %v11154_v42 = vpop.f32.mrf.mxu1  ;;  %v4763_v52 = vld [vmem:[#allocation11 + $0x20e0] sm:$0xff] }
 0x426   : > { %5143 = vmatprep.subr.mxu1 %v4804_v5  ;;  %8846 = vmatpush3.msra.mxu0 %v4675_v11  ;;  %v4759_v24 = vld [vmem:[#allocation11 + $0x20c0] sm:$0xff]  ;;  %v4758_v5 = vld [vmem:[#allocation11 + $0x20b8] sm:$0xff] }
 0x427   : > { %5144 = vmatpush2.msra.mxu1 %v4803_v3  ;;  %5332 = vmatmul.mubr.f32.vlgmr.msra.gmra.mxu0 %v11064_v39  ;;  %v4754_v11 = vld [vmem:[#allocation11 + $0x2098] sm:$0xff] }
 0x428   : > { %5145 = vmatprep.subr.mxu1 %v4799_v0  ;;  %5336 = vmatprep.mubr.f32.mxu0 %v11072_v54  ;;  %v11160_v58 = vpop.f32.mrf.mxu1  ;;  %v4910_v3 = vld [vmem:[#allocation11 + $0x2578] sm:$0xff]  ;;  %v4900_v0 = vld [vmem:[#allocation11 + $0x2528] sm:$0xff] }
 0x429   : > { %5146 = vmatpush2.msra.mxu1 %v4798_v38 }
 0x42a   : > { %5147 = vmatprep.subr.mxu1 %v4794_v40  ;;  %v11162_v21 = vpop.f32.mrf.mxu1  ;;  %v4895_v40 = vld [vmem:[#allocation11 + $0x2500] sm:$0xff] }
 0x42b   : > { %5148 = vmatpush2.msra.mxu1 %v4793_v14  ;;  %5337 = vmatmul.mubr.f32.gmra.mxu0 %v11088_v26  ;;  %v4885_v14 = vld [vmem:[#allocation11 + $0x24b0] sm:$0xff] }
 0x42c   : > { %5149 = vmatprep.subr.mxu1 %v4789_v12  ;;  %5341 = vmatprep.mubr.f32.mxu0 %v11061_v43  ;;  %v4875_v12 = vld [vmem:[#allocation11 + $0x2460] sm:$0xff] }
 0x42d   : > { %5150 = vmatpush2.msra.mxu1 %v4788_v41  ;;  %v4324_v20 = vpop.f32.mrf.mxu1  ;;  %v4870_v41 = vld [vmem:[#allocation11 + $0x2438] sm:$0xff] }
 0x42e   : > { %5151 = vmatprep.subr.mxu1 %v4784_v37  ;;  %v4325_v63 = vadd.f32 %v4324_v20, %v4241_v32  ;;  %v4865_v37 = vld [vmem:[#allocation11 + $0x2410] sm:$0xff]  ;;  %v4860_v32 = vld [vmem:[#allocation11 + $0x23e8] sm:$0xff]  ;;  %v4850_v20 = vld [vmem:[#allocation11 + $0x2398] sm:$0xff] }
 0x42f   : > { %5152 = vmatpush2.msra.mxu1 %v4783_v59  ;;  %5342 = vmatmul.mubr.f32.gmra.mxu0 %v11075_v46  ;;  %v4326_v45 = vpop.f32.mrf.mxu1 }
 0x430   : > { %5153 = vmatprep.subr.mxu1 %v4779_v4  ;;  %v11168_v25 = vadd.f32 %v4325_v63, %v10998_v53  ;;  %v4327_v34 = vadd.f32 %v4326_v45, %v4243_v49  ;;  %v4753_v53 = vld [vmem:[#allocation11 + $0x2090] sm:$0xff]  ;;  %v4855_v4 = vld [vmem:[#allocation11 + $0x23c0] sm:$0xff] }
 0x431   : > { %5154 = vmatpush2.msra.mxu1 %v4778_v56  ;;  %v4845_v63 = vld [vmem:[#allocation11 + $0x2370] sm:$0xff] }
 0x432   : > { %5155 = vmatprep.subr.mxu1 %v4774_v13  ;;  %v11171_v18 = vadd.f32 %v4327_v34, %v11007_v7  ;;  %v4905_v7 = vld [vmem:[#allocation11 + $0x2550] sm:$0xff]  ;;  %v11177_v38 = vpop.f32.mrf.mxu0  ;;  %v4840_v13 = vld [vmem:[#allocation11 + $0x2348] sm:$0xff] }
 0x433   : > { %5156 = vmatpush2.msra.mxu1 %v4773_v51  ;;  %v4835_v51 = vld [vmem:[#allocation11 + $0x2320] sm:$0xff] }
 0x434   : > { %5157 = vmatprep.subr.mxu1 %v4769_v36 }
 0x435   : > { %5158 = vmatpush2.msra.mxu1 %v4768_v10 }
 0x436   : > { %5159 = vmatprep.subr.mxu1 %v4764_v15 }
 0x437   : > { %5160 = vmatpush2.msra.mxu1 %v4763_v52 }
 0x438   : > { %5161 = vmatprep.subr.mxu1 %v4759_v24 }
 0x439   : > { %5162 = vmatpush2.msra.mxu1 %v4758_v5 }
 0x43a   : > { %5163 = vmatprep.subr.mxu1 %v4754_v11 }
 0x43b   : > { %5164 = vmatpush2.msra.mxu1 %v4753_v53 }
 0x43c   : > { %5166 = vmatmul.mubr.f32.vlgmr.msra.gmra.mxu1 %v11064_v39  ;;  %9358 = vmatprep.subr.mxu1 %v11892_v6  ;;  %v4890_v39 = vld [vmem:[#allocation11 + $0x24d8] sm:$0xff] }
 0x43d   : > { %5171 = vmatprep.mubr.f32.mxu1 %v11072_v54  ;;  %9359 = vmatpush3.msra.mxu1 %v4910_v3  ;;  %v4480_v54 = vpop.f32.mrf.mxu0 }
 0x43e   : > { %9360 = vmatprep.subr.mxu1 %v11892_v6 }
 0x43f   : > { %9361 = vmatpush3.msra.mxu1 %v4905_v7 }
 0x440   : > { %5172 = vmatmul.mubr.f32.gmra.mxu1 %v11088_v26  ;;  %9362 = vmatprep.subr.mxu1 %v11892_v6  ;;  %v4880_v26 = vld [vmem:[#allocation11 + $0x2488] sm:$0xff] }
 0x441   : > { %5177 = vmatprep.mubr.f32.mxu1 %v11061_v43  ;;  %9363 = vmatpush3.msra.mxu1 %v4900_v0  ;;  %v4484_v43 = vpop.f32.mrf.mxu0 }
 0x442   : > { %9364 = vmatprep.subr.mxu1 %v11892_v6 }
 0x443   : > { %9365 = vmatpush3.msra.mxu1 %v4895_v40 }
 0x444   : > { %5178 = vmatmul.mubr.f32.gmra.mxu1 %v11075_v46  ;;  %9366 = vmatprep.subr.mxu1 %v11892_v6  ;;  %v4486_v46 = vpop.f32.mrf.mxu0 }
 0x445   : > { %9367 = vmatpush3.msra.mxu1 %v4890_v39  ;;  %9390 = vmatprep.mubr.msk.f32.mxu1 %vm9999_vm4, %v11892_v6 }
 0x446   : > { %9368 = vmatprep.subr.mxu1 %v11892_v6  ;;  %v4490_v59 = vpop.f32.mrf.mxu0 }
 0x447   : > { %9369 = vmatpush3.msra.mxu1 %v4885_v14 }
 0x448   : > { %9370 = vmatprep.subr.mxu1 %v11892_v6  ;;  %v4492_v56 = vpop.f32.mrf.mxu0 }
 0x449   : > { %9371 = vmatpush3.msra.mxu1 %v4880_v26 }
 0x44a   : > { %9372 = vmatprep.subr.mxu1 %v11892_v6 }
 0x44b   : > { %9373 = vmatpush3.msra.mxu1 %v4875_v12 }
 0x44c   : > { %9374 = vmatprep.subr.mxu1 %v11892_v6 }
 0x44d   : > { %9375 = vmatpush3.msra.mxu1 %v4870_v41 }
 0x44e   : > { %9376 = vmatprep.subr.mxu1 %v11892_v6 }
 0x44f   : > { %9377 = vmatpush3.msra.mxu1 %v4865_v37 }
 0x450   : > { %9378 = vmatprep.subr.mxu1 %v11892_v6 }
 0x451   : > { %9379 = vmatpush3.msra.mxu1 %v4860_v32 }
 0x452   : > { %9380 = vmatprep.subr.mxu1 %v11892_v6 }
 0x453   : > { %9381 = vmatpush3.msra.mxu1 %v4855_v4 }
 0x454   : > { %9382 = vmatprep.subr.mxu1 %v11892_v6 }
 0x455   : > { %9383 = vmatpush3.msra.mxu1 %v4850_v20  ;;  %v8787_v49 = vpop.f32.mrf.mxu0 }
 0x456   : > { %9384 = vmatprep.subr.mxu1 %v11892_v6 }
 0x457   : > { %9385 = vmatpush3.msra.mxu1 %v4845_v63  ;;  %v8788_v45 = vpop.f32.mrf.mxu0 }
 0x458   : > { %9386 = vmatprep.subr.mxu1 %v11892_v6  ;;  %v8789_v34 = vadd.f32 %v8788_v45, %v8787_v49 }
 0x459   : > { %9387 = vmatpush3.msra.mxu1 %v4840_v13  ;;  %v4313_v13 = vadd.f32 %v11152_v17, %v11146_v19  ;;  %v4321_v19 = vadd.f32 %v11162_v21, %v11157_v31 }
 0x45a   : > { %9388 = vmatprep.subr.mxu1 %v11892_v6  ;;  %v8790_v36 = vpop.f32.mrf.mxu0 }
 0x45b   : > { %9389 = vmatpush3.msra.mxu1 %v4835_v51 }
 0x45c   : > { %9391 = vmatmul.mubr.f32.vlgmr.msra.gmra.mxu1 %v11112_v35  ;;  %v8791_v10 = vpop.f32.mrf.mxu0 }
 0x45d   : > { %9393 = vmatprep.mubr.msk.f32.mxu1 %vm9999_vm4, %v11892_v6  ;;  %v8792_v15 = vadd.f32 %v8791_v10, %v8790_v36 }
 0x45f   : > { %v8793_v52 = vpop.f32.mrf.mxu0 }
 0x460   : > { %9394 = vmatmul.mubr.f32.gmra.mxu1 %v11121_v9 }
 0x461   : > { %9396 = vmatprep.mubr.msk.f32.mxu1 %vm9999_vm4, %v11892_v6  ;;  %v8794_v24 = vpop.f32.mrf.mxu0 }
 0x462   : > { %v8795_v5 = vadd.f32 %v8794_v24, %v8793_v52 }
 0x464   : > { %9397 = vmatmul.mubr.f32.gmra.mxu1 %v11116_v2 }
 0x465   : > { %5996 = vmatprep.mubr.f32.mxu1 %v11892_v6 }
 0x46d   : > { %v4395_v11 = vpop.f32.mrf.mxu1 }
 0x46e   : > { %v4479_v35 = vadd.f32 %v11177_v38, %v4395_v11 }
 0x46f   : > { %v4397_v53 = vpop.f32.mrf.mxu1 }
 0x470   : > { %v11208_v3 = vadd.f32 %v4479_v35, %v11078_v8  ;;  %v4481_v7 = vadd.f32 %v4480_v54, %v4397_v53 }
 0x472   : > { %v11211_v0 = vadd.f32 %v4481_v7, %v11083_v57  ;;  %v4401_v9 = vpop.f32.mrf.mxu1 }
 0x473   : > { %v4485_v40 = vadd.f32 %v4484_v43, %v4401_v9 }
 0x474   : > { %v4403_v39 = vpop.f32.mrf.mxu1 }
 0x475   : > { %v11214_v14 = vadd.f32 %v4485_v40, %v11092_v44  ;;  %v4487_v2 = vadd.f32 %v4486_v46, %v4403_v39 }
 0x477   : > { %v11217_v26 = vadd.f32 %v4487_v2, %v11097_v47  ;;  %v4407_v12 = vpop.f32.mrf.mxu1 }
 0x478   : > { %v4491_v38 = vadd.f32 %v4490_v59, %v4407_v12 }
 0x479   : > { %v4409_v41 = vpop.f32.mrf.mxu1 }
 0x47a   : > { %v11220_v8 = vadd.f32 %v4491_v38, %v11102_v22  ;;  %v4493_v54 = vadd.f32 %v4492_v56, %v4409_v41 }
 0x47c   : > { %v11223_v57 = vadd.f32 %v4493_v54, %v11106_v55 }
 0x490   : > { %v4641_v37 = vpop.f32.mrf.mxu1 }
 0x491   : > { %v4642_v43 = vadd.f32 %v8789_v34, %v4641_v37  ;;  %v4655_v34 = vadd.f32 %v4313_v13, %v10980_v48 }
 0x492   : > { %v9351_v32 = vpop.f32.mrf.mxu1 }
 0x493   : > { %v11226_v44 = vadd.f32 %v4642_v43, %v11129_v60  ;;  %v4315_v60 = vadd.f32 %v11154_v42, %v11148_v62 }
 0x495   : > { %v4646_v46 = vpop.f32.mrf.mxu1  ;;  %v4656_v10 = vadd.f32 %v4315_v60, %v10984_v1  ;;  %v4661_v1 = vadd.f32 %v4321_v19, %v10992_v27 }
 0x496   : > { %v4647_v4 = vadd.f32 %v8792_v15, %v4646_v46 }
 0x497   : > { %v9354_v47 = vpop.f32.mrf.mxu1 }
 0x498   : > { %v11229_v20 = vadd.f32 %v4647_v4, %v11135_v50 }
 0x49a   : > { %v4651_v59 = vpop.f32.mrf.mxu1 }
 0x49b   : > { %v4652_v63 = vadd.f32 %v8795_v5, %v4651_v59 }
 0x49c   : > { %v9357_v22 = vpop.f32.mrf.mxu1 }
 0x49d   : > { %v11232_v56 = vadd.f32 %v4652_v63, %v11141_v61  ;;  %v5001_v55 = vpop.f32.mrf.mxu0  ;;  %v4319_v61 = vadd.f32 %v11160_v58, %v11150_v16 }
 0x49f   : > { %v5003_v49 = vpop.f32.mrf.mxu0  ;;  %v4660_v5 = vadd.f32 %v4319_v61, %v10988_v29 }
 0x4a3   : > { %v5007_v45 = vpop.f32.mrf.mxu0 }
 0x4a5   : > { %v5009_v17 = vpop.f32.mrf.mxu0 }
 0x4a8   : > { %v5013_v16 = vpop.f32.mrf.mxu0 }
 0x4aa   : > { %v5015_v29 = vpop.f32.mrf.mxu0 }
 0x4b5   : > { %v5084_v51 = vpop.f32.mrf.mxu1 }
 0x4b6   : > { %v5085_v50 = vadd.f32 %v5084_v51, %v5001_v55 }
 0x4b7   : > { %v5086_v36 = vpop.f32.mrf.mxu1 }
 0x4b8   : > { %v5087_v15 = vadd.f32 %v5086_v36, %v5003_v49  ;;  %v11242_v52 = vadd.f32 %v5085_v50, %v4655_v34 }
 0x4ba   : > { %v11246_v24 = vadd.f32 %v5087_v15, %v4656_v10  ;;  %v5090_v62 = vpop.f32.mrf.mxu1  ;;  %v5442_v42 = vmax.f32 %v11242_v52, 0.0 }
 0x4bb   : > { %v5091_v48 = vadd.f32 %v5090_v62, %v5007_v45 }
 0x4bc   : > { %v5092_v11 = vpop.f32.mrf.mxu1  ;;  %5460 = vrot.lane.b32.xlu0 %v5442_v42, %s10000_s14  ;;  %v5443_v31 = vmax.f32 %v11246_v24, 0.0  ;;  %v5774_v24 = vld [vmem:[#allocation14 + $0x128] sm:$0xff] }
 0x4bd   : > { %v5093_v58 = vadd.f32 %v5092_v11, %v5009_v17  ;;  %v11255_v21 = vadd.f32 %v5091_v48, %v4660_v5 }
 0x4bf   : > { %v5096_v35 = vpop.f32.mrf.mxu1  ;;  %v11257_v53 = vadd.f32 %v5093_v58, %v4661_v1  ;;  %v5447_v27 = vmax.f32 %v11255_v21, 0.0  ;;  %v5771_v21 = vld [vmem:[#allocation14 + $0x110] sm:$0xff] }
 0x4c0   : > { %v5097_v7 = vadd.f32 %v5096_v35, %v5013_v16  ;;  %5497 = vrot.lane.b32.xlu0 %v5443_v31, %s10000_s14 }
 0x4c1   : > { %v5098_v9 = vpop.f32.mrf.mxu1  ;;  %v5448_v40 = vmax.f32 %v11257_v53, 0.0  ;;  %v5762_v53 = vld [vmem:[#allocation14 + $0xc8] sm:$0xff] }
 0x4c2   : > { %v11265_v39 = vadd.f32 %v5097_v7, %v11168_v25  ;;  %v5099_v2 = vadd.f32 %v5098_v9, %v5015_v29 }
 0x4c3   : > { %5499 = vrot.lane.b32.xlu1 %v5448_v40, %s10000_s14 }
 0x4c4   : > { %v11271_v12 = vadd.f32 %v5099_v2, %v11171_v18  ;;  %5462 = vrot.lane.b32.xlu0 %v5447_v27, %s10000_s14  ;;  %v5250_v38 = vpop.f32.mrf.mxu0 }
 0x4c6   : > { %v5252_v41 = vpop.f32.mrf.mxu0 }
 0x4c9   : > { %v5256_v54 = vpop.f32.mrf.mxu0 }
 0x4cb   : > { %v5258_v32 = vpop.f32.mrf.mxu0 }
 0x4ce   : > { %v5262_v22 = vpop.f32.mrf.mxu0 }
 0x4d0   : > { %v5264_v34 = vpop.f32.mrf.mxu0 }
 0x4e7   : > { %v8847_v61 = vpop.f32.mrf.mxu0 }
 0x4e9   : > { %v8848_v15 = vpop.f32.mrf.mxu0 }
 0x4eb   : > { %v8850_v19 = vpop.f32.mrf.mxu0 }
 0x4ed   : > { %v8851_v17 = vpop.f32.mrf.mxu0 }
 0x4ee   : > { %v8852_v1 = vadd.f32 %v8851_v17, %v8850_v19  ;;  %v5756_v19 = vld [vmem:[#allocation14 + $0x98] sm:$0xff]  ;;  %v5755_v17 = vld [vmem:[#allocation14 + $0x90] sm:$0xff] }
 0x4ef   : > { %v8853_v62 = vpop.f32.mrf.mxu0 }
 0x4f1   : > { %v8854_v58 = vpop.f32.mrf.mxu0 }
 0x4f2   : > { %v8855_v9 = vadd.f32 %v8854_v58, %v8853_v62  ;;  %v5752_v62 = vld [vmem:[#allocation14 + $0x78] sm:$0xff]  ;;  %v5749_v58 = vld [vmem:[#allocation14 + $0x60] sm:$0xff] }
 0x4fc   : > { %v5167_v37 = vpop.f32.mrf.mxu1 }
 0x4fd   : > { %v5251_v43 = vadd.f32 %v5250_v38, %v5167_v37 }
 0x4fe   : > { %v5169_v25 = vpop.f32.mrf.mxu1 }
 0x4ff   : > { %v11277_v46 = vadd.f32 %v5251_v43, %v11208_v3  ;;  %v5253_v4 = vadd.f32 %v5252_v41, %v5169_v25 }
 0x500   : > { %v5173_v47 = vpop.f32.mrf.mxu1 }
 0x501   : > { %v5444_v59 = vmax.f32 %v11277_v46, 0.0  ;;  %v11281_v18 = vadd.f32 %v5253_v4, %v11211_v0  ;;  %v5257_v63 = vadd.f32 %v5256_v54, %v5173_v47  ;;  %v5783_v4 = vld [vmem:[#allocation14 + $0x170] sm:$0xff]  ;;  %v5780_v47 = vld [vmem:[#allocation14 + $0x158] sm:$0xff] }
 0x502   : > { %v5175_v55 = vpop.f32.mrf.mxu1  ;;  %5861 = vmatprep.subr.mxu0 %v5783_v4  ;;  %v5822_v4 = vld [vmem:[#allocation14 + $0x2a8] sm:$0xff] }
 0x503   : > { %v5445_v49 = vmax.f32 %v11281_v18, 0.0  ;;  %v11285_v13 = vadd.f32 %v5257_v63, %v11214_v14  ;;  %v5259_v60 = vadd.f32 %v5258_v32, %v5175_v55  ;;  %5543 = vrot.lane.b32.xlu1 %v5444_v59, %s10000_s14  ;;  %v5779_v63 = vld [vmem:[#allocation14 + $0x150] sm:$0xff] }
 0x504   : > { %v5179_v3 = vpop.f32.mrf.mxu1 }
 0x505   : > { %v5449_v45 = vmax.f32 %v11285_v13, 0.0  ;;  %v11292_v51 = vadd.f32 %v5259_v60, %v11217_v26  ;;  %v5263_v0 = vadd.f32 %v5262_v22, %v5179_v3  ;;  %5576 = vrot.lane.b32.xlu0 %v5445_v49, %s10000_s14  ;;  %v5776_v60 = vld [vmem:[#allocation14 + $0x138] sm:$0xff]  ;;  %v5737_v13 = vld [vmem:[#allocation14] sm:$0xff] }
 0x506   : > { %v5181_v50 = vpop.f32.mrf.mxu1 }
 0x507   : > { %v11298_v14 = vadd.f32 %v5263_v0, %v11220_v8  ;;  %v5265_v36 = vadd.f32 %v5264_v34, %v5181_v50  ;;  %5545 = vrot.lane.b32.xlu1 %v5449_v45, %s10000_s14  ;;  %v5450_v10 = vmax.f32 %v11292_v51, 0.0  ;;  %v8849_v8 = vadd.f32 %v8848_v15, %v8847_v61  ;;  %v5768_v0 = vld [vmem:[#allocation14 + $0xf8] sm:$0xff]  ;;  %v5767_v34 = vld [vmem:[#allocation14 + $0xf0] sm:$0xff]  ;;  %v5765_v50 = vld [vmem:[#allocation14 + $0xe0] sm:$0xff] }
 0x508   : > { %v5759_v61 = vld [vmem:[#allocation14 + $0xb0] sm:$0xff]  ;;  %v5758_v15 = vld [vmem:[#allocation14 + $0xa8] sm:$0xff]  ;;  %v5825_v51 = vld [vmem:[#allocation14 + $0x2c0] sm:$0xff] }
 0x509   : > { %v11305_v26 = vadd.f32 %v5265_v36, %v11223_v57  ;;  %v5764_v36 = vld [vmem:[#allocation14 + $0xd8] sm:$0xff] }
 0x50b   : > { %5578 = vrot.lane.b32.xlu1 %v5450_v10, %s10000_s14 }
 0x51c   : > { %v5413_v48 = vpop.f32.mrf.mxu1 }
 0x51d   : > { %v5414_v5 = vadd.f32 %v8849_v8, %v5413_v48  ;;  %v5753_v8 = vld [vmem:[#allocation14 + $0x80] sm:$0xff] }
 0x51e   : > { %v9392_v11 = vpop.f32.mrf.mxu1 }
 0x51f   : > { %v11311_v16 = vadd.f32 %v5414_v5, %v11226_v44  ;;  %v5750_v11 = vld [vmem:[#allocation14 + $0x68] sm:$0xff] }
 0x520   : > { %v5418_v57 = vpop.f32.mrf.mxu1 }
 0x521   : > { %v5446_v35 = vmax.f32 %v11311_v16, 0.0  ;;  %v5419_v7 = vadd.f32 %v8852_v1, %v5418_v57  ;;  %v5747_v57 = vld [vmem:[#allocation14 + $0x50] sm:$0xff]  ;;  %v5798_v16 = vld [vmem:[#allocation14 + $0x1e8] sm:$0xff] }
 0x522   : > { %v9395_v29 = vpop.f32.mrf.mxu1 }
 0x523   : > { %v11315_v2 = vadd.f32 %v5419_v7, %v11229_v20  ;;  %5618 = vrot.lane.b32.xlu0 %v5446_v35, %s10000_s14  ;;  %v5746_v7 = vld [vmem:[#allocation14 + $0x48] sm:$0xff]  ;;  %v5744_v29 = vld [vmem:[#allocation14 + $0x38] sm:$0xff] }
 0x524   : > { %v5423_v38 = vpop.f32.mrf.mxu1 }
 0x525   : > { %v5451_v41 = vmax.f32 %v11315_v2, 0.0  ;;  %v5424_v54 = vadd.f32 %v8855_v9, %v5423_v38  ;;  %v5792_v2 = vld [vmem:[#allocation14 + $0x1b8] sm:$0xff] }
 0x526   : > { %v9398_v44 = vpop.f32.mrf.mxu1 }
 0x527   : > { %v11322_v37 = vadd.f32 %v5424_v54, %v11232_v56  ;;  %5620 = vrot.lane.b32.xlu1 %v5451_v41, %s10000_s14  ;;  %v5782_v56 = vld [vmem:[#allocation14 + $0x168] sm:$0xff]  ;;  %v5741_v54 = vld [vmem:[#allocation14 + $0x20] sm:$0xff]  ;;  %v5740_v44 = vld [vmem:[#allocation14 + $0x18] sm:$0xff] }
 0x528   : > { %5862 = vmatpush1.msra.mxu0 %v5782_v56  ;;  %v5821_v56 = vld [vmem:[#allocation14 + $0x2a0] sm:$0xff] }
 0x529   : > { %5863 = vmatprep.subr.mxu0 %v5780_v47  ;;  %v5819_v47 = vld [vmem:[#allocation14 + $0x290] sm:$0xff] }
 0x52a   : > { %5864 = vmatpush1.msra.mxu0 %v5779_v63  ;;  %v5818_v63 = vld [vmem:[#allocation14 + $0x288] sm:$0xff] }
 0x52e   : > { %v5461_v43 = vpop.permute.xlu0 %5460 }
 0x52f   : > { %v5469_v20 = vmax.f32 %v5442_v42, %v5461_v43  ;;  %v5777_v42 = vld [vmem:[#allocation14 + $0x140] sm:$0xff] }
 0x530   : > { %5865 = vmatprep.subr.mxu0 %v5777_v42  ;;  %v5813_v42 = vld [vmem:[#allocation14 + $0x260] sm:$0xff] }
 0x531   : > { %5473 = vst.msk [vmem:[#allocation2] sm:$0xff] %vm5472_vm6, %v5469_v20  ;;  %5480 = vrot.lane.b32.xlu0 %v5469_v20, %s10000_s14  ;;  %5866 = vmatpush1.msra.mxu0 %v5776_v60  ;;  %v5830_v20 = vld [vmem:[#allocation14 + $0x2e8] sm:$0xff] }
 0x532   : > { %v5498_v32 = vpop.permute.xlu0 %5497  ;;  %5867 = vmatprep.subr.mxu0 %v5774_v24  ;;  %v5810_v60 = vld [vmem:[#allocation14 + $0x248] sm:$0xff]  ;;  %v5809_v24 = vld [vmem:[#allocation14 + $0x240] sm:$0xff] }
 0x533   : > { %v5506_v25 = vmax.f32 %v5443_v31, %v5498_v32  ;;  %v5773_v31 = vld [vmem:[#allocation14 + $0x120] sm:$0xff]  ;;  %v5828_v32 = vld [vmem:[#allocation14 + $0x2d8] sm:$0xff] }
 0x534   : > { %5868 = vmatpush1.msra.mxu0 %v5773_v31  ;;  %v5855_v31 = vld [vmem:[#allocation14 + $0x3b0] sm:$0xff] }
 0x535   : > { %5512 = vrot.lane.b32.xlu0 %v5506_v25, %s10001_s30  ;;  %v5500_v55 = vpop.permute.xlu1 %5499  ;;  %5869 = vmatprep.subr.mxu0 %v5771_v21  ;;  %v5854_v21 = vld [vmem:[#allocation14 + $0x3a8] sm:$0xff] }
 0x536   : > { %v5463_v22 = vpop.permute.xlu0 %5462  ;;  %v5507_v3 = vmax.f32 %v5448_v40, %v5500_v55  ;;  %v5761_v40 = vld [vmem:[#allocation14 + $0xc0] sm:$0xff]  ;;  %v5812_v55 = vld [vmem:[#allocation14 + $0x258] sm:$0xff]  ;;  %5948 = vmatprep.subr.mxu1 %v5855_v31 }
 0x537   : > { %v5470_v52 = vmax.f32 %v5447_v27, %v5463_v22  ;;  %v5770_v27 = vld [vmem:[#allocation14 + $0x108] sm:$0xff]  ;;  %v5816_v22 = vld [vmem:[#allocation14 + $0x278] sm:$0xff]  ;;  %5949 = vmatpush1.msra.mxu1 %v5854_v21 }
 0x538   : > { %5870 = vmatpush1.msra.mxu0 %v5770_v27  ;;  %v5806_v27 = vld [vmem:[#allocation14 + $0x228] sm:$0xff] }
 0x539   : > { %5474 = vst.msk [vmem:[#allocation2 + $0x18] sm:$0xff] %vm5472_vm6, %v5470_v52  ;;  %5526 = vrot.lane.b32.xlu0 %v5506_v25, %s10002_s16  ;;  %5482 = vrot.lane.b32.xlu1 %v5470_v52, %s10000_s14  ;;  %v5827_v25 = vld [vmem:[#allocation14 + $0x2d0] sm:$0xff] }
 0x53a   : > { %5871 = vmatprep.subr.mxu0 %v5768_v0  ;;  %v5815_v52 = vld [vmem:[#allocation14 + $0x270] sm:$0xff]  ;;  %v5852_v0 = vld [vmem:[#allocation14 + $0x398] sm:$0xff] }
 0x53b   : > { %5872 = vmatpush1.msra.mxu0 %v5767_v34  ;;  %5950 = vmatprep.subr.mxu1 %v5852_v0 }
 0x53c   : > { %5873 = vmatprep.subr.mxu0 %v5765_v50  ;;  %v5804_v50 = vld [vmem:[#allocation14 + $0x218] sm:$0xff] }
 0x53d   : > { %5514 = vrot.lane.b32.xlu1 %v5507_v3, %s10001_s30  ;;  %5874 = vmatpush1.msra.mxu0 %v5764_v36  ;;  %v5851_v36 = vld [vmem:[#allocation14 + $0x390] sm:$0xff] }
 0x53e   : > { %5875 = vmatprep.subr.mxu0 %v5762_v53  ;;  %5951 = vmatpush1.msra.mxu1 %v5851_v36 }
 0x53f   : > { %5876 = vmatpush1.msra.mxu0 %v5761_v40  ;;  %v5803_v40 = vld [vmem:[#allocation14 + $0x210] sm:$0xff] }
 0x540   : > { %5877 = vmatprep.subr.mxu0 %v5759_v61  ;;  %v5849_v61 = vld [vmem:[#allocation14 + $0x380] sm:$0xff] }
 0x541   : > { %5528 = vrot.lane.b32.xlu1 %v5507_v3, %s10002_s16  ;;  %5878 = vmatpush1.msra.mxu0 %v5758_v15  ;;  %v5807_v3 = vld [vmem:[#allocation14 + $0x230] sm:$0xff]  ;;  %v5801_v15 = vld [vmem:[#allocation14 + $0x200] sm:$0xff] }
 0x542   : > { %5879 = vmatprep.subr.mxu0 %v5756_v19  ;;  %5952 = vmatprep.subr.mxu1 %v5849_v61  ;;  %v5848_v19 = vld [vmem:[#allocation14 + $0x378] sm:$0xff] }
 0x543   : > { %5880 = vmatpush1.msra.mxu0 %v5755_v17  ;;  %v5800_v17 = vld [vmem:[#allocation14 + $0x1f8] sm:$0xff]  ;;  %5953 = vmatpush1.msra.mxu1 %v5848_v19 }
 0x544   : > { %5881 = vmatprep.subr.mxu0 %v5753_v8  ;;  %v5846_v8 = vld [vmem:[#allocation14 + $0x368] sm:$0xff] }
 0x545   : > { %5882 = vmatpush1.msra.mxu0 %v5752_v62  ;;  %5954 = vmatprep.subr.mxu1 %v5846_v8 }
 0x546   : > { %5883 = vmatprep.subr.mxu0 %v5750_v11  ;;  %v5797_v11 = vld [vmem:[#allocation14 + $0x1e0] sm:$0xff] }
 0x547   : > { %5884 = vmatpush1.msra.mxu0 %v5749_v58  ;;  %v5795_v58 = vld [vmem:[#allocation14 + $0x1d0] sm:$0xff] }
 0x548   : > { %5885 = vmatprep.subr.mxu0 %v5747_v57  ;;  %v5842_v57 = vld [vmem:[#allocation14 + $0x348] sm:$0xff] }
 0x549   : > { %5886 = vmatpush1.msra.mxu0 %v5746_v7  ;;  %v5794_v7 = vld [vmem:[#allocation14 + $0x1c8] sm:$0xff] }
 0x54a   : > { %5887 = vmatprep.subr.mxu0 %v5744_v29  ;;  %v5840_v29 = vld [vmem:[#allocation14 + $0x338] sm:$0xff] }
 0x575   : > { %v5544_v48 = vpop.permute.xlu1 %5543 }
 0x576   : > { %v5552_v5 = vmax.f32 %v5444_v59, %v5544_v48  ;;  %v5743_v59 = vld [vmem:[#allocation14 + $0x30] sm:$0xff]  ;;  %v5452_v48 = vmax.f32 %v11265_v39, 0.0 }
 0x577   : > { %v5577_v1 = vpop.permute.xlu0 %5576  ;;  %5888 = vmatpush1.msra.mxu0 %v5743_v59  ;;  %v5837_v59 = vld [vmem:[#allocation14 + $0x320] sm:$0xff] }
 0x578   : > { %5555 = vst.msk [vmem:[#allocation2 + $0x8] sm:$0xff] %vm5472_vm6, %v5552_v5  ;;  %5561 = vrot.lane.b32.xlu0 %v5552_v5, %s10000_s14  ;;  %v5585_v38 = vmax.f32 %v5445_v49, %v5577_v1  ;;  %5889 = vmatprep.subr.mxu0 %v5741_v54  ;;  %v5738_v49 = vld [vmem:[#allocation14 + $0x8] sm:$0xff]  ;;  %v5843_v1 = vld [vmem:[#allocation14 + $0x350] sm:$0xff]  ;;  %v5789_v54 = vld [vmem:[#allocation14 + $0x1a0] sm:$0xff] }
 0x579   : > { %v5546_v9 = vpop.permute.xlu1 %5545  ;;  %5890 = vmatpush1.msra.mxu0 %v5740_v44  ;;  %v5836_v44 = vld [vmem:[#allocation14 + $0x318] sm:$0xff] }
 0x57a   : > { %v5553_v46 = vmax.f32 %v5449_v45, %v5546_v9  ;;  %v5831_v45 = vld [vmem:[#allocation14 + $0x2f0] sm:$0xff]  ;;  %5891 = vmatprep.subr.mxu0 %v5738_v49  ;;  %v5454_v9 = vmax.f32 %v11298_v14, 0.0  ;;  %v5456_v49 = vmax.f32 %v11322_v37, 0.0  ;;  %v5784_v37 = vld [vmem:[#allocation14 + $0x178] sm:$0xff] }
 0x57b   : > { %5892 = vmatpush1.msra.mxu0 %v5737_v13  ;;  %v5834_v13 = vld [vmem:[#allocation14 + $0x308] sm:$0xff] }
 0x57c   : > { %5556 = vst.msk [vmem:[#allocation2 + $0x20] sm:$0xff] %vm5472_vm6, %v5553_v46  ;;  %5563 = vrot.lane.b32.xlu1 %v5553_v46, %s10000_s14  ;;  %5591 = vrot.lane.b32.xlu0 %v5585_v38, %s10001_s30  ;;  %v5791_v46 = vld [vmem:[#allocation14 + $0x1b0] sm:$0xff] }
 0x57d   : > { %v5579_v43 = vpop.permute.xlu1 %5578  ;;  %5893 = vmatprep.subr.mxu0 %v5831_v45  ;;  %v5786_v45 = vld [vmem:[#allocation14 + $0x188] sm:$0xff] }
 0x57e   : > { %v5586_v18 = vmax.f32 %v5450_v10, %v5579_v43  ;;  %5894 = vmatpush2.msra.mxu0 %v5830_v20  ;;  %v5824_v10 = vld [vmem:[#allocation14 + $0x2b8] sm:$0xff] }
 0x57f   : > { %5895 = vmatprep.subr.mxu0 %v5828_v32  ;;  %v5788_v43 = vld [vmem:[#allocation14 + $0x198] sm:$0xff]  ;;  %v5833_v32 = vld [vmem:[#allocation14 + $0x300] sm:$0xff] }
 0x580   : > { %5593 = vrot.lane.b32.xlu1 %v5586_v18, %s10001_s30  ;;  %5603 = vrot.lane.b32.xlu0 %v5585_v38, %s10002_s16  ;;  %v5839_v38 = vld [vmem:[#allocation14 + $0x330] sm:$0xff] }
 0x581   : > { %5896 = vmatpush2.msra.mxu0 %v5827_v25  ;;  %v5785_v25 = vld [vmem:[#allocation14 + $0x180] sm:$0xff] }
 0x582   : > { %5897 = vmatprep.subr.mxu0 %v5825_v51  ;;  %v5832_v51 = vld [vmem:[#allocation14 + $0x2f8] sm:$0xff] }
 0x583   : > { %5898 = vmatpush2.msra.mxu0 %v5824_v10  ;;  %v6209_v10 = vld [vmem:[#allocation14 + $0x530] sm:$0xff] }
 0x584   : > { %5605 = vrot.lane.b32.xlu1 %v5586_v18, %s10002_s16  ;;  %5899 = vmatprep.subr.mxu0 %v5822_v4  ;;  %v5455_v18 = vmax.f32 %v11305_v26, 0.0 }
 0x585   : > { %5900 = vmatpush2.msra.mxu0 %v5821_v56 }
 0x586   : > { %5901 = vmatprep.subr.mxu0 %v5819_v47 }
 0x587   : > { %5902 = vmatpush2.msra.mxu0 %v5818_v63 }
 0x588   : > { %5903 = vmatprep.subr.mxu0 %v5816_v22 }
 0x589   : > { %5904 = vmatpush2.msra.mxu0 %v5815_v52 }
 0x58a   : > { %5905 = vmatprep.subr.mxu0 %v5813_v42 }
 0x58b   : > { %5906 = vmatpush2.msra.mxu0 %v5812_v55 }
 0x58c   : > { %5907 = vmatprep.subr.mxu0 %v5810_v60 }
 0x58d   : > { %5908 = vmatpush2.msra.mxu0 %v5809_v24 }
 0x58e   : > { %5909 = vmatprep.subr.mxu0 %v5807_v3 }
 0x58f   : > { %5910 = vmatpush2.msra.mxu0 %v5806_v27 }
 0x590   : > { %5911 = vmatprep.subr.mxu0 %v5804_v50  ;;  %v6686_v50 = vld [vmem:[#allocation14 + $0xae0] sm:$0xff] }
 0x591   : > { %5912 = vmatpush2.msra.mxu0 %v5803_v40 }
 0x592   : > { %5913 = vmatprep.subr.mxu0 %v5801_v15 }
 0x593   : > { %5914 = vmatpush2.msra.mxu0 %v5800_v17 }
 0x594   : > { %5915 = vmatprep.subr.mxu0 %v5798_v16 }
 0x595   : > { %v5619_v34 = vpop.permute.xlu0 %5618  ;;  %5916 = vmatpush2.msra.mxu0 %v5797_v11 }
 0x596   : > { %v5627_v53 = vmax.f32 %v5446_v35, %v5619_v34  ;;  %v5845_v35 = vld [vmem:[#allocation14 + $0x360] sm:$0xff]  ;;  %5917 = vmatprep.subr.mxu0 %v5795_v58  ;;  %v11893_v34 = vlaneseq }
 0x597   : > { %5955 = vmatpush1.msra.mxu1 %v5845_v35  ;;  %5918 = vmatpush2.msra.mxu0 %v5794_v7 }
 0x598   : > { %5630 = vst.msk [vmem:[#allocation2 + $0x10] sm:$0xff] %vm5472_vm6, %v5627_v53  ;;  %5636 = vrot.lane.b32.xlu0 %v5627_v53, %s10000_s14  ;;  %5956 = vmatprep.subr.mxu1 %v5843_v1  ;;  %vm11404_vm11 = vcmp.lt.s32.totalorder %v11893_v34, 320  ;;  %vm7862_vm3 = vcmp.lt.s32.totalorder %v11893_v34, 192  ;;  %v11896_v34 = vsub.s32 4, %v10441_v23 }
 0x599   : > { %v5621_v62 = vpop.permute.xlu1 %5620  ;;  %5957 = vmatpush1.msra.mxu1 %v5842_v57  ;;  %5919 = vmatprep.subr.mxu0 %v5792_v2 }
 0x59a   : > { %v5628_v5 = vmax.f32 %v5451_v41, %v5621_v62  ;;  %v5453_v41 = vmax.f32 %v11271_v12, 0.0  ;;  %5958 = vmatprep.subr.mxu1 %v5840_v29  ;;  %5920 = vmatpush2.msra.mxu0 %v5791_v46 }
 0x59b   : > { %5959 = vmatpush1.msra.mxu1 %v5839_v38  ;;  %5921 = vmatprep.subr.mxu0 %v5789_v54 }
 0x59c   : > { %5631 = vst.msk [vmem:[#allocation2 + $0x28] sm:$0xff] %vm5472_vm6, %v5628_v5  ;;  %5638 = vrot.lane.b32.xlu1 %v5628_v5, %s10000_s14  ;;  %5464 = vrot.lane.b32.xlu0 %v5452_v48, %s10000_s14 }
 0x59d   : > { %5960 = vmatprep.subr.mxu1 %v5837_v59  ;;  %5922 = vmatpush2.msra.mxu0 %v5788_v43 }
 0x59e   : > { %5961 = vmatpush1.msra.mxu1 %v5836_v44  ;;  %5923 = vmatprep.subr.mxu0 %v5786_v45 }
 0x59f   : > { %5962 = vmatprep.subr.mxu1 %v5834_v13  ;;  %5924 = vmatpush2.msra.mxu0 %v5785_v25 }
 0x5a0   : > { %5547 = vrot.lane.b32.xlu1 %v5454_v9, %s10000_s14  ;;  %5501 = vrot.lane.b32.xlu0 %v5453_v41, %s10000_s14 }
 0x5a1   : > { %5963 = vmatpush1.msra.mxu1 %v5833_v32  ;;  %6292 = vmatprep.subr.mxu0 %v6209_v10  ;;  %v5781_v32 = vld [vmem:[#allocation14 + $0x160] sm:$0xff]  ;;  %v5826_v10 = vld [vmem:[#allocation14 + $0x2c8] sm:$0xff] }
 0x5a2   : > { %8875 = vmatprep.subr.mxu1 %v5832_v51  ;;  %v6206_v51 = vld [vmem:[#allocation14 + $0x518] sm:$0xff] }
 0x5a3   : > { %v5481_v20 = vpop.permute.xlu0 %5480 }
 0x5a4   : > { %5580 = vrot.lane.b32.xlu1 %v5455_v18, %s10000_s14  ;;  %5622 = vrot.lane.b32.xlu0 %v5456_v49, %s10000_s14  ;;  %5490 = vst.msk [vmem:[#allocation2] sm:$0xff] %vm5489_vm7, %v5481_v20  ;;  %v6208_v20 = vld [vmem:[#allocation14 + $0x528] sm:$0xff] }
 0x5a7   : > { %v5513_v4 = vpop.permute.xlu0 %5512 }
 0x5a8   : > { %5522 = vst.msk [vmem:[#allocation2] sm:$0xff] %vm5521_vm8, %v5513_v4  ;;  %v6205_v4 = vld [vmem:[#allocation14 + $0x510] sm:$0xff] }
 0x5ab   : > { %v5483_v56 = vpop.permute.xlu1 %5482  ;;  %v5527_v47 = vpop.permute.xlu0 %5526 }
 0x5ac   : > { %5491 = vst.msk [vmem:[#allocation2 + $0x18] sm:$0xff] %vm5489_vm7, %v5483_v56  ;;  %v5778_v56 = vld [vmem:[#allocation14 + $0x148] sm:$0xff] }
 0x5ad   : > { %5536 = vst.msk [vmem:[#allocation2] sm:$0xff] %vm5535_vm9, %v5527_v47  ;;  %v6203_v47 = vld [vmem:[#allocation14 + $0x500] sm:$0xff] }
 0x5af   : > { %v5515_v63 = vpop.permute.xlu1 %5514 }
 0x5b0   : > { %5523 = vst.msk [vmem:[#allocation2 + $0x18] sm:$0xff] %vm5521_vm8, %v5515_v63  ;;  %v5823_v63 = vld [vmem:[#allocation14 + $0x2b0] sm:$0xff] }
 0x5b3   : > { %v5529_v22 = vpop.permute.xlu1 %5528 }
 0x5b4   : > { %5537 = vst.msk [vmem:[#allocation2 + $0x18] sm:$0xff] %vm5535_vm9, %v5529_v22  ;;  %v6202_v22 = vld [vmem:[#allocation14 + $0x4f8] sm:$0xff] }
 0x5ea   : > { %v5562_v52 = vpop.permute.xlu0 %5561 }
 0x5eb   : > { %5570 = vst.msk [vmem:[#allocation2 + $0x8] sm:$0xff] %vm5489_vm7, %v5562_v52  ;;  %v5775_v52 = vld [vmem:[#allocation14 + $0x130] sm:$0xff] }
 0x5ee   : > { %v5564_v42 = vpop.permute.xlu1 %5563  ;;  %v5592_v55 = vpop.permute.xlu0 %5591 }
 0x5ef   : > { %5571 = vst.msk [vmem:[#allocation2 + $0x20] sm:$0xff] %vm5489_vm7, %v5564_v42  ;;  %v6200_v42 = vld [vmem:[#allocation14 + $0x4e8] sm:$0xff] }
 0x5f0   : > { %5600 = vst.msk [vmem:[#allocation2 + $0x8] sm:$0xff] %vm5521_vm8, %v5592_v55  ;;  %v5820_v55 = vld [vmem:[#allocation14 + $0x298] sm:$0xff] }
 0x5f2   : > { %v5594_v60 = vpop.permute.xlu1 %5593  ;;  %v5604_v24 = vpop.permute.xlu0 %5603 }
 0x5f3   : > { %5601 = vst.msk [vmem:[#allocation2 + $0x20] sm:$0xff] %vm5521_vm8, %v5594_v60  ;;  %v6199_v60 = vld [vmem:[#allocation14 + $0x4e0] sm:$0xff] }
 0x5f4   : > { %5612 = vst.msk [vmem:[#allocation2 + $0x8] sm:$0xff] %vm5535_vm9, %v5604_v24  ;;  %v5772_v24 = vld [vmem:[#allocation14 + $0x118] sm:$0xff] }
 0x5f6   : > { %v5606_v31 = vpop.permute.xlu1 %5605 }
 0x5f7   : > { %5613 = vst.msk [vmem:[#allocation2 + $0x20] sm:$0xff] %vm5535_vm9, %v5606_v31  ;;  %v6197_v31 = vld [vmem:[#allocation14 + $0x4d0] sm:$0xff] }
 0x60a   : > { %v5637_v3 = vpop.permute.xlu0 %5636 }
 0x60b   : > { %5645 = vst.msk [vmem:[#allocation2 + $0x10] sm:$0xff] %vm5489_vm7, %v5637_v3  ;;  %v5817_v3 = vld [vmem:[#allocation14 + $0x280] sm:$0xff] }
 0x60e   : > { %v5639_v21 = vpop.permute.xlu1 %5638  ;;  %v5465_v27 = vpop.permute.xlu0 %5464 }
 0x60f   : > { %5646 = vst.msk [vmem:[#allocation2 + $0x28] sm:$0xff] %vm5489_vm7, %v5639_v21  ;;  %v5471_v0 = vmax.f32 %v5452_v48, %v5465_v27  ;;  %v6196_v21 = vld [vmem:[#allocation14 + $0x4c8] sm:$0xff]  ;;  %v5769_v27 = vld [vmem:[#allocation14 + $0x100] sm:$0xff] }
 0x611   : > { %5476 = vst.msk [vmem:[#allocation2 + $0x30] sm:$0xf] %vm5475_vm10, %v5471_v0  ;;  %5484 = vrot.lane.b32.xlu1 %v5471_v0, %s10000_s14  ;;  %v6194_v0 = vld [vmem:[#allocation14 + $0x4b8] sm:$0xff] }
 0x612   : > { %v5648_v36 = vld [vmem:[#allocation2] ss:$8 sm:$0x7]  ;;  %v5650_v53 = vld [vmem:[#allocation2 + $0x1] ss:$8 sm:$0x7]  ;;  %v5548_v40 = vpop.permute.xlu1 %5547  ;;  %v5502_v61 = vpop.permute.xlu0 %5501 }
 0x613   : > { %v5651_v15 = vmax.f32 %v5648_v36, %v5650_v53  ;;  %v5659_v19 = vld [vmem:[#allocation2 + $0x2] ss:$8 sm:$0x7]  ;;  %v5661_v17 = vld [vmem:[#allocation2 + $0x3] ss:$8 sm:$0x7]  ;;  %v5554_v39 = vmax.f32 %v5454_v9, %v5548_v40  ;;  %v5508_v8 = vmax.f32 %v5453_v41, %v5502_v61 }
 0x614   : > { %v5662_v62 = vmax.f32 %v5659_v19, %v5661_v17  ;;  %v5667_v16 = vld [vmem:[#allocation2 + $0x4] ss:$8 sm:$0x7]  ;;  %v5669_v35 = vld [vmem:[#allocation2 + $0x5] ss:$8 sm:$0x7] }
 0x615   : > { %v5670_v48 = vmax.f32 %v5667_v16, %v5669_v35  ;;  %v5675_v5 = vld [vmem:[#allocation2 + $0x6] ss:$8 sm:$0x7]  ;;  %v5677_v11 = vld [vmem:[#allocation2 + $0x7] ss:$8 sm:$0x7]  ;;  %5565 = vrot.lane.b32.xlu0 %v5554_v39, %s10000_s14  ;;  %5516 = vrot.lane.b32.xlu1 %v5508_v8, %s10001_s30 }
 0x616   : > { %5656 = vst.msk [vmem:[#allocation3] ss:$8 sm:$0x7] %vm11404_vm11, %v5651_v15  ;;  %v5678_v14 = vmax.f32 %v5675_v5, %v5677_v11  ;;  %5664 = vst.msk [vmem:[#allocation3 + $0x1] ss:$8 sm:$0x7] %vm11404_vm11, %v5662_v62  ;;  %v5581_v58 = vpop.permute.xlu1 %5580  ;;  %v5623_v57 = vpop.permute.xlu0 %5622 }
 0x617   : > { %5557 = vst.msk [vmem:[#allocation2 + $0x38] sm:$0xf] %vm5475_vm10, %v5554_v39  ;;  %v5683_v12 = vld [vmem:[#allocation2 + $0x18] ss:$8 sm:$0x7]  ;;  %v5587_v41 = vmax.f32 %v5455_v18, %v5581_v58  ;;  %v5629_v9 = vmax.f32 %v5456_v49, %v5623_v57  ;;  %v6193_v53 = vld [vmem:[#allocation14 + $0x4b0] sm:$0xff] }
 0x618   : > { %v5685_v1 = vld [vmem:[#allocation2 + $0x19] ss:$8 sm:$0x7]  ;;  %5672 = vst.msk [vmem:[#allocation3 + $0x2] ss:$8 sm:$0x7] %vm11404_vm11, %v5670_v48 }
 0x619   : > { %v5686_v7 = vmax.f32 %v5683_v12, %v5685_v1  ;;  %v5691_v29 = vld [vmem:[#allocation2 + $0x1a] ss:$8 sm:$0x7]  ;;  %v5693_v2 = vld [vmem:[#allocation2 + $0x1b] ss:$8 sm:$0x7]  ;;  %5595 = vrot.lane.b32.xlu0 %v5587_v41, %s10001_s30  ;;  %5530 = vrot.lane.b32.xlu1 %v5508_v8, %s10002_s16 }
 0x61a   : > { %5680 = vst.msk [vmem:[#allocation3 + $0x3] ss:$8 sm:$0x7] %vm11404_vm11, %v5678_v14  ;;  %v5694_v38 = vmax.f32 %v5691_v29, %v5693_v2  ;;  %v5699_v46 = vld [vmem:[#allocation2 + $0x1c] ss:$8 sm:$0x7] }
 0x61b   : > { %v5701_v59 = vld [vmem:[#allocation2 + $0x1d] ss:$8 sm:$0x7]  ;;  %v5707_v44 = vld [vmem:[#allocation2 + $0x1e] ss:$8 sm:$0x7] }
 0x61c   : > { %v5702_v54 = vmax.f32 %v5699_v46, %v5701_v59  ;;  %v5709_v43 = vld [vmem:[#allocation2 + $0x1f] ss:$8 sm:$0x7]  ;;  %5688 = vst.msk [vmem:[#allocation3 + $0x4] ss:$8 sm:$0x7] %vm11404_vm11, %v5686_v7 }
 0x61d   : > { %5632 = vst.msk [vmem:[#allocation2 + $0x40] sm:$0xf] %vm5475_vm10, %v5629_v9  ;;  %v5710_v26 = vmax.f32 %v5707_v44, %v5709_v43  ;;  %5607 = vrot.lane.b32.xlu0 %v5587_v41, %s10002_s16  ;;  %5640 = vrot.lane.b32.xlu1 %v5629_v9, %s10000_s14  ;;  %v5829_v18 = vld [vmem:[#allocation14 + $0x2e0] sm:$0xff]  ;;  %v5814_v36 = vld [vmem:[#allocation14 + $0x268] sm:$0xff]  ;;  %v5811_v15 = vld [vmem:[#allocation14 + $0x250] sm:$0xff]  ;;  %s8536_s16 = sshll.u32 %s10085_s21, 4 }
 0x61e   : > { %5696 = vst.msk [vmem:[#allocation3 + $0x5] ss:$8 sm:$0x7] %vm11404_vm11, %v5694_v38  ;;  %5704 = vst.msk [vmem:[#allocation3 + $0x6] ss:$8 sm:$0x7] %vm11404_vm11, %v5702_v54  ;;  %s11810_s26 = scalar_lea.hbm %s11856_s11, %s8536_s16 }
 0x61f   : > { %5712 = vst.msk [vmem:[#allocation3 + $0x7] ss:$8 sm:$0x7] %vm11404_vm11, %v5710_v26  ;;  %v5766_v40 = vld [vmem:[#allocation14 + $0xe8] sm:$0xff]  ;;  %v6191_v61 = vld [vmem:[#allocation14 + $0x4a0] sm:$0xff]  ;;  %v6190_v19 = vld [vmem:[#allocation14 + $0x498] sm:$0xff] }
 0x620   : > { %v5763_v17 = vld [vmem:[#allocation14 + $0xd0] sm:$0xff]  ;;  %v6188_v39 = vld [vmem:[#allocation14 + $0x488] sm:$0xff]  ;;  %v5808_v8 = vld [vmem:[#allocation14 + $0x238] sm:$0xff]  ;;  %s10003_s21 = smov [#allocation21]  }
 0x621   : > { %v6187_v62 = vld [vmem:[#allocation14 + $0x480] sm:$0xff]  ;;  %v5760_v16 = vld [vmem:[#allocation14 + $0xb8] sm:$0xff]  ;;  %v6185_v35 = vld [vmem:[#allocation14 + $0x470] sm:$0xff]  ;;  %s9905_s15 = sshll.u32 %s10003_s21, 4  ;;  %s9906_s15 = int_to_ptr.vmem [resolvable:$false] %s9905_s15 }
 0x622   : > { %v5805_v48 = vld [vmem:[#allocation14 + $0x220] sm:$0xff]  ;;  %v6184_v5 = vld [vmem:[#allocation14 + $0x468] sm:$0xff]  ;;  %v6182_v14 = vld [vmem:[#allocation14 + $0x458] sm:$0xff]  ;;  %s9907_s24 = scalar_lea.vmem %s9906_s15, 32 }
 0x623   : > { %v5757_v11 = vld [vmem:[#allocation14 + $0xa0] sm:$0xff]  ;;  %v5802_v12 = vld [vmem:[#allocation14 + $0x208] sm:$0xff]  ;;  %v6181_v1 = vld [vmem:[#allocation14 + $0x450] sm:$0xff] }
 0x624   : > { %v5754_v58 = vld [vmem:[#allocation14 + $0x88] sm:$0xff]  ;;  %v6179_v57 = vld [vmem:[#allocation14 + $0x440] sm:$0xff]  ;;  %v5799_v7 = vld [vmem:[#allocation14 + $0x1f0] sm:$0xff] }
 0x625   : > { %v6178_v29 = vld [vmem:[#allocation14 + $0x438] sm:$0xff]  ;;  %v5751_v2 = vld [vmem:[#allocation14 + $0x70] sm:$0xff]  ;;  %v6176_v41 = vld [vmem:[#allocation14 + $0x428] sm:$0xff] }
 0x626   : > { %v11442_v49 = vld [vmem:[#allocation3 + $0x8] sm:$0xff]  ;;  %v11444_v13 = vld [vmem:[#allocation3 + $0x10] sm:$0xff]  ;;  %v11446_v45 = vld [vmem:[#allocation3] sm:$0xff] }
 0x627   : > { %5925 = vmatprep.mubr.f32.mxu0 %v11442_v49  ;;  %8521 = vmatmul.mubr.msk.f32.vlgmr.msra.gmra.mxu1 %vm5857_vm12, %v11444_v13  ;;  %v6286_v25 = vrot.slane %v11442_v49, 1  ;;  %v5796_v9 = vld [vmem:[#allocation14 + $0x1d8] sm:$0xff]  ;;  %v6175_v38 = vld [vmem:[#allocation14 + $0x420] sm:$0xff]  ;;  %v6173_v59 = vld [vmem:[#allocation14 + $0x410] sm:$0xff] }
 0x628   : > { %8876 = vmatpush3.msra.mxu1 %v5784_v37  ;;  %5926 = vmatmul.mubr.f32.vlgmr.msra.gmra.mxu0 %v11446_v45  ;;  %v5748_v46 = vld [vmem:[#allocation14 + $0x58] sm:$0xff]  ;;  %v5793_v54 = vld [vmem:[#allocation14 + $0x1c0] sm:$0xff]  ;;  %v6172_v44 = vld [vmem:[#allocation14 + $0x408] sm:$0xff] }
 0x629   : > { %8877 = vmatprep.subr.mxu1 %v5829_v18  ;;  %6067 = vmatprep.mubr.f32.mxu1 %v11442_v49  ;;  %v5745_v43 = vld [vmem:[#allocation14 + $0x40] sm:$0xff]  ;;  %v6170_v26 = vld [vmem:[#allocation14 + $0x3f8] sm:$0xff]  ;;  %v5790_v37 = vld [vmem:[#allocation14 + $0x1a8] sm:$0xff] }
 0x62a   : > { %6293 = vmatpush1.msra.mxu0 %v6208_v20  ;;  %8878 = vmatpush3.msra.mxu1 %v5781_v32  ;;  %v6169_v18 = vld [vmem:[#allocation14 + $0x3f0] sm:$0xff]  ;;  %v5742_v20 = vld [vmem:[#allocation14 + $0x28] sm:$0xff]  ;;  %v6167_v32 = vld [vmem:[#allocation14 + $0x3e0] sm:$0xff] }
 0x62b   : > { %6294 = vmatprep.subr.mxu0 %v6206_v51  ;;  %6356 = vmatprep.mubr.f32.mxu0 %v6286_v25  ;;  %v5787_v51 = vld [vmem:[#allocation14 + $0x190] sm:$0xff] }
 0x62c   : > { %8879 = vmatprep.subr.mxu1 %v5826_v10  ;;  %6295 = vmatpush1.msra.mxu0 %v6205_v4  ;;  %v6166_v10 = vld [vmem:[#allocation14 + $0x3d8] sm:$0xff]  ;;  %v5739_v4 = vld [vmem:[#allocation14 + $0x10] sm:$0xff] }
 0x62d   : > { %8880 = vmatpush3.msra.mxu1 %v5778_v56  ;;  %6296 = vmatprep.subr.mxu0 %v6203_v47  ;;  %v6164_v56 = vld [vmem:[#allocation14 + $0x3c8] sm:$0xff]  ;;  %v6163_v47 = vld [vmem:[#allocation14 + $0x3c0] sm:$0xff] }
 0x62e   : > { %8881 = vmatprep.subr.mxu1 %v5823_v63  ;;  %6297 = vmatpush1.msra.mxu0 %v6202_v22  ;;  %v5856_v63 = vld [vmem:[#allocation14 + $0x3b8] sm:$0xff]  ;;  %v6257_v22 = vld [vmem:[#allocation14 + $0x6b0] sm:$0xff] }
 0x62f   : > { %8882 = vmatpush3.msra.mxu1 %v5775_v52  ;;  %6298 = vmatprep.subr.mxu0 %v6200_v42  ;;  %v6256_v52 = vld [vmem:[#allocation14 + $0x6a8] sm:$0xff]  ;;  %v5853_v42 = vld [vmem:[#allocation14 + $0x3a0] sm:$0xff] }
 0x630   : > { %8883 = vmatprep.subr.mxu1 %v5820_v55  ;;  %6299 = vmatpush1.msra.mxu0 %v6199_v60  ;;  %v6254_v55 = vld [vmem:[#allocation14 + $0x698] sm:$0xff]  ;;  %v6253_v60 = vld [vmem:[#allocation14 + $0x690] sm:$0xff] }
 0x631   : > { %8884 = vmatpush3.msra.mxu1 %v5772_v24  ;;  %6300 = vmatprep.subr.mxu0 %v6197_v31  ;;  %v5850_v24 = vld [vmem:[#allocation14 + $0x388] sm:$0xff]  ;;  %v6251_v31 = vld [vmem:[#allocation14 + $0x680] sm:$0xff] }
 0x632   : > { %8885 = vmatprep.subr.mxu1 %v5817_v3  ;;  %6301 = vmatpush1.msra.mxu0 %v6196_v21  ;;  %v6250_v3 = vld [vmem:[#allocation14 + $0x678] sm:$0xff]  ;;  %v5847_v21 = vld [vmem:[#allocation14 + $0x370] sm:$0xff] }
 0x633   : > { %8886 = vmatpush3.msra.mxu1 %v5769_v27  ;;  %6302 = vmatprep.subr.mxu0 %v6194_v0  ;;  %v6248_v27 = vld [vmem:[#allocation14 + $0x668] sm:$0xff]  ;;  %v6247_v0 = vld [vmem:[#allocation14 + $0x660] sm:$0xff] }
 0x634   : > { %8887 = vmatprep.subr.mxu1 %v5814_v36  ;;  %6303 = vmatpush1.msra.mxu0 %v6193_v53  ;;  %v5844_v36 = vld [vmem:[#allocation14 + $0x358] sm:$0xff]  ;;  %v6245_v53 = vld [vmem:[#allocation14 + $0x650] sm:$0xff] }
 0x635   : > { %8888 = vmatpush3.msra.mxu1 %v5766_v40  ;;  %6304 = vmatprep.subr.mxu0 %v6191_v61  ;;  %v6244_v40 = vld [vmem:[#allocation14 + $0x648] sm:$0xff]  ;;  %v5841_v61 = vld [vmem:[#allocation14 + $0x340] sm:$0xff] }
 0x636   : > { %8889 = vmatprep.subr.mxu1 %v5811_v15  ;;  %6305 = vmatpush1.msra.mxu0 %v6190_v19  ;;  %v6242_v15 = vld [vmem:[#allocation14 + $0x638] sm:$0xff]  ;;  %v6241_v19 = vld [vmem:[#allocation14 + $0x630] sm:$0xff] }
 0x637   : > { %8890 = vmatpush3.msra.mxu1 %v5763_v17  ;;  %6306 = vmatprep.subr.mxu0 %v6188_v39  ;;  %v5838_v17 = vld [vmem:[#allocation14 + $0x328] sm:$0xff]  ;;  %v6239_v39 = vld [vmem:[#allocation14 + $0x620] sm:$0xff] }
 0x638   : > { %8891 = vmatprep.subr.mxu1 %v5808_v8  ;;  %6307 = vmatpush1.msra.mxu0 %v6187_v62  ;;  %v6238_v8 = vld [vmem:[#allocation14 + $0x618] sm:$0xff]  ;;  %v5835_v62 = vld [vmem:[#allocation14 + $0x310] sm:$0xff] }
 0x639   : > { %8892 = vmatpush3.msra.mxu1 %v5760_v16  ;;  %6308 = vmatprep.subr.mxu0 %v6185_v35  ;;  %v6236_v16 = vld [vmem:[#allocation14 + $0x608] sm:$0xff]  ;;  %v6235_v35 = vld [vmem:[#allocation14 + $0x600] sm:$0xff] }
 0x63a   : > { %8893 = vmatprep.subr.mxu1 %v5805_v48  ;;  %6309 = vmatpush1.msra.mxu0 %v6184_v5  ;;  %v6281_v48 = vld [vmem:[#allocation14 + $0x770] sm:$0xff] }
 0x63b   : > { %8894 = vmatpush3.msra.mxu1 %v5757_v11  ;;  %6310 = vmatprep.subr.mxu0 %v6182_v14  ;;  %v6233_v5 = vld [vmem:[#allocation14 + $0x5f0] sm:$0xff]  ;;  %v6280_v11 = vld [vmem:[#allocation14 + $0x768] sm:$0xff] }
 0x63c   : > { %8895 = vmatprep.subr.mxu1 %v5802_v12  ;;  %6311 = vmatpush1.msra.mxu0 %v6181_v1  ;;  %v6232_v14 = vld [vmem:[#allocation14 + $0x5e8] sm:$0xff]  ;;  %v6278_v12 = vld [vmem:[#allocation14 + $0x758] sm:$0xff] }
 0x63d   : > { %8896 = vmatpush3.msra.mxu1 %v5754_v58  ;;  %6312 = vmatprep.subr.mxu0 %v6179_v57  ;;  %v6230_v1 = vld [vmem:[#allocation14 + $0x5d8] sm:$0xff]  ;;  %v6277_v58 = vld [vmem:[#allocation14 + $0x750] sm:$0xff] }
 0x63e   : > { %8897 = vmatprep.subr.mxu1 %v5799_v7  ;;  %6313 = vmatpush1.msra.mxu0 %v6178_v29  ;;  %v6229_v57 = vld [vmem:[#allocation14 + $0x5d0] sm:$0xff]  ;;  %v6275_v7 = vld [vmem:[#allocation14 + $0x740] sm:$0xff] }
 0x63f   : > { %8898 = vmatpush3.msra.mxu1 %v5751_v2  ;;  %6314 = vmatprep.subr.mxu0 %v6176_v41  ;;  %v6227_v29 = vld [vmem:[#allocation14 + $0x5c0] sm:$0xff]  ;;  %v6274_v2 = vld [vmem:[#allocation14 + $0x738] sm:$0xff] }
 0x640   : > { %8899 = vmatprep.subr.mxu1 %v5796_v9  ;;  %6315 = vmatpush1.msra.mxu0 %v6175_v38  ;;  %v6226_v41 = vld [vmem:[#allocation14 + $0x5b8] sm:$0xff]  ;;  %v6272_v9 = vld [vmem:[#allocation14 + $0x728] sm:$0xff] }
 0x641   : > { %8900 = vmatpush3.msra.mxu1 %v5748_v46  ;;  %6316 = vmatprep.subr.mxu0 %v6173_v59  ;;  %v6224_v38 = vld [vmem:[#allocation14 + $0x5a8] sm:$0xff]  ;;  %v6271_v46 = vld [vmem:[#allocation14 + $0x720] sm:$0xff] }
 0x642   : > { %8901 = vmatprep.subr.mxu1 %v5793_v54  ;;  %6317 = vmatpush1.msra.mxu0 %v6172_v44  ;;  %v6223_v59 = vld [vmem:[#allocation14 + $0x5a0] sm:$0xff]  ;;  %v6269_v54 = vld [vmem:[#allocation14 + $0x710] sm:$0xff] }
 0x643   : > { %8902 = vmatpush3.msra.mxu1 %v5745_v43  ;;  %6318 = vmatprep.subr.mxu0 %v6170_v26  ;;  %v6221_v44 = vld [vmem:[#allocation14 + $0x590] sm:$0xff]  ;;  %v6268_v43 = vld [vmem:[#allocation14 + $0x708] sm:$0xff] }
 0x644   : > { %8903 = vmatprep.subr.mxu1 %v5790_v37  ;;  %6319 = vmatpush1.msra.mxu0 %v6169_v18  ;;  %v6220_v26 = vld [vmem:[#allocation14 + $0x588] sm:$0xff]  ;;  %v6266_v37 = vld [vmem:[#allocation14 + $0x6f8] sm:$0xff] }
 0x645   : > { %8904 = vmatpush3.msra.mxu1 %v5742_v20  ;;  %6320 = vmatprep.subr.mxu0 %v6167_v32  ;;  %v6218_v18 = vld [vmem:[#allocation14 + $0x578] sm:$0xff]  ;;  %v6265_v20 = vld [vmem:[#allocation14 + $0x6f0] sm:$0xff] }
 0x646   : > { %8905 = vmatprep.subr.mxu1 %v5787_v51  ;;  %6321 = vmatpush1.msra.mxu0 %v6166_v10  ;;  %v6217_v32 = vld [vmem:[#allocation14 + $0x570] sm:$0xff]  ;;  %v6263_v51 = vld [vmem:[#allocation14 + $0x6e0] sm:$0xff] }
 0x647   : > { %8906 = vmatpush3.msra.mxu1 %v5739_v4  ;;  %6322 = vmatprep.subr.mxu0 %v6164_v56  ;;  %v6215_v10 = vld [vmem:[#allocation14 + $0x560] sm:$0xff]  ;;  %v6262_v4 = vld [vmem:[#allocation14 + $0x6d8] sm:$0xff] }
 0x648   : > { %6068 = vmatmul.mubr.f32.vlgmr.msra.gmra.mxu1 %v11446_v45  ;;  %9399 = vmatprep.subr.mxu1 %v11892_v6  ;;  %v6214_v56 = vld [vmem:[#allocation14 + $0x558] sm:$0xff] }
 0x649   : > { %6323 = vmatpush1.msra.mxu0 %v6163_v47  ;;  %9400 = vmatpush3.msra.mxu1 %v5856_v63  ;;  %v6260_v47 = vld [vmem:[#allocation14 + $0x6c8] sm:$0xff] }
 0x64a   : > { %6324 = vmatprep.subr.mxu0 %v6257_v22  ;;  %9401 = vmatprep.subr.mxu1 %v11892_v6  ;;  %v6212_v63 = vld [vmem:[#allocation14 + $0x548] sm:$0xff]  ;;  %v6259_v22 = vld [vmem:[#allocation14 + $0x6c0] sm:$0xff] }
 0x64b   : > { %6325 = vmatpush2.msra.mxu0 %v6256_v52  ;;  %9402 = vmatpush3.msra.mxu1 %v5853_v42  ;;  %v6211_v52 = vld [vmem:[#allocation14 + $0x540] sm:$0xff]  ;;  %v6287_v42 = vrot.slane %v11444_v13, 1 }
 0x64c   : > { %6326 = vmatprep.subr.mxu0 %v6254_v55  ;;  %9403 = vmatprep.subr.mxu1 %v11892_v6  ;;  %v6258_v55 = vld [vmem:[#allocation14 + $0x6b8] sm:$0xff] }
 0x64d   : > { %6327 = vmatpush2.msra.mxu0 %v6253_v60  ;;  %9404 = vmatpush3.msra.mxu1 %v5850_v24  ;;  %v6285_v60 = vrot.slane %v11446_v45, 1  ;;  %v6210_v24 = vld [vmem:[#allocation14 + $0x538] sm:$0xff] }
 0x64e   : > { %6328 = vmatprep.subr.mxu0 %v6251_v31  ;;  %9405 = vmatprep.subr.mxu1 %v11892_v6  ;;  %v6624_v31 = vld [vmem:[#allocation14 + $0x8f0] sm:$0xff]  ;;  %v6665_v45 = vld [vmem:[#allocation14 + $0xa38] sm:$0xff] }
 0x64f   : > { %6329 = vmatpush2.msra.mxu0 %v6250_v3  ;;  %9406 = vmatpush3.msra.mxu1 %v5847_v21  ;;  %v6255_v3 = vld [vmem:[#allocation14 + $0x6a0] sm:$0xff]  ;;  %v6623_v21 = vld [vmem:[#allocation14 + $0x8e8] sm:$0xff] }
 0x650   : > { %6330 = vmatprep.subr.mxu0 %v6248_v27  ;;  %9407 = vmatprep.subr.mxu1 %v11892_v6  ;;  %v6699_v27 = vrot.slane %v11442_v49, 2  ;;  %v6616_v49 = vld [vmem:[#allocation14 + $0x8b0] sm:$0xff] }
 0x651   : > { %6331 = vmatpush2.msra.mxu0 %v6247_v0  ;;  %9408 = vmatpush3.msra.mxu1 %v5844_v36  ;;  %v6207_v0 = vld [vmem:[#allocation14 + $0x520] sm:$0xff]  ;;  %v6621_v36 = vld [vmem:[#allocation14 + $0x8d8] sm:$0xff] }
 0x652   : > { %6332 = vmatprep.subr.mxu0 %v6245_v53  ;;  %9409 = vmatprep.subr.mxu1 %v11892_v6  ;;  %v6252_v53 = vld [vmem:[#allocation14 + $0x688] sm:$0xff] }
 0x653   : > { %6333 = vmatpush2.msra.mxu0 %v6244_v40  ;;  %9410 = vmatpush3.msra.mxu1 %v5841_v61  ;;  %v6620_v40 = vld [vmem:[#allocation14 + $0x8d0] sm:$0xff]  ;;  %v6204_v61 = vld [vmem:[#allocation14 + $0x508] sm:$0xff] }
 0x654   : > { %6334 = vmatprep.subr.mxu0 %v6242_v15  ;;  %9411 = vmatprep.subr.mxu1 %v11892_v6  ;;  %v6618_v15 = vld [vmem:[#allocation14 + $0x8c0] sm:$0xff] }
 0x655   : > { %6335 = vmatpush2.msra.mxu0 %v6241_v19  ;;  %9412 = vmatpush3.msra.mxu1 %v5838_v17  ;;  %v6249_v19 = vld [vmem:[#allocation14 + $0x670] sm:$0xff]  ;;  %v6617_v17 = vld [vmem:[#allocation14 + $0x8b8] sm:$0xff] }
 0x656   : > { %6336 = vmatprep.subr.mxu0 %v6239_v39  ;;  %9413 = vmatprep.subr.mxu1 %v11892_v6  ;;  %v6615_v39 = vld [vmem:[#allocation14 + $0x8a8] sm:$0xff] }
 0x657   : > { %6337 = vmatpush2.msra.mxu0 %v6238_v8  ;;  %9414 = vmatpush3.msra.mxu1 %v5835_v62  ;;  %v6246_v8 = vld [vmem:[#allocation14 + $0x658] sm:$0xff]  ;;  %v6614_v62 = vld [vmem:[#allocation14 + $0x8a0] sm:$0xff] }
 0x658   : > { %9415 = vmatprep.mubr.msk.f32.mxu1 %vm9999_vm4, %v11892_v6  ;;  %6338 = vmatprep.subr.mxu0 %v6236_v16  ;;  %v6198_v16 = vld [vmem:[#allocation14 + $0x4d8] sm:$0xff] }
 0x659   : > { %9416 = vmatmul.mubr.msk.f32.vlgmr.msra.gmra.mxu1 %vm5857_vm12, %v11444_v13  ;;  %6339 = vmatpush2.msra.mxu0 %v6235_v35  ;;  %v6612_v35 = vld [vmem:[#allocation14 + $0x890] sm:$0xff]  ;;  %v6641_v13 = vld [vmem:[#allocation14 + $0x978] sm:$0xff] }
 0x65a   : > { %6379 = vmatprep.subr.mxu1 %v6281_v48  ;;  %6340 = vmatprep.subr.mxu0 %v6233_v5  ;;  %v6243_v48 = vld [vmem:[#allocation14 + $0x640] sm:$0xff]  ;;  %v6611_v5 = vld [vmem:[#allocation14 + $0x888] sm:$0xff] }
 0x65b   : > { %6380 = vmatpush1.msra.mxu1 %v6280_v11  ;;  %6341 = vmatpush2.msra.mxu0 %v6232_v14  ;;  %v6195_v11 = vld [vmem:[#allocation14 + $0x4c0] sm:$0xff]  ;;  %v6609_v14 = vld [vmem:[#allocation14 + $0x878] sm:$0xff] }
 0x65c   : > { %6381 = vmatprep.subr.mxu1 %v6278_v12  ;;  %6342 = vmatprep.subr.mxu0 %v6230_v1  ;;  %v6240_v12 = vld [vmem:[#allocation14 + $0x628] sm:$0xff]  ;;  %v6608_v1 = vld [vmem:[#allocation14 + $0x870] sm:$0xff] }
 0x65d   : > { %6382 = vmatpush1.msra.mxu1 %v6277_v58  ;;  %6343 = vmatpush2.msra.mxu0 %v6229_v57  ;;  %v6192_v58 = vld [vmem:[#allocation14 + $0x4a8] sm:$0xff]  ;;  %v6606_v57 = vld [vmem:[#allocation14 + $0x860] sm:$0xff] }
 0x65e   : > { %6383 = vmatprep.subr.mxu1 %v6275_v7  ;;  %6344 = vmatprep.subr.mxu0 %v6227_v29  ;;  %v6237_v7 = vld [vmem:[#allocation14 + $0x610] sm:$0xff]  ;;  %v6605_v29 = vld [vmem:[#allocation14 + $0x858] sm:$0xff] }
 0x65f   : > { %6384 = vmatpush1.msra.mxu1 %v6274_v2  ;;  %6345 = vmatpush2.msra.mxu0 %v6226_v41  ;;  %v6189_v2 = vld [vmem:[#allocation14 + $0x490] sm:$0xff]  ;;  %v6603_v41 = vld [vmem:[#allocation14 + $0x848] sm:$0xff] }
 0x660   : > { %6385 = vmatprep.subr.mxu1 %v6272_v9  ;;  %6346 = vmatprep.subr.mxu0 %v6224_v38  ;;  %v6234_v9 = vld [vmem:[#allocation14 + $0x5f8] sm:$0xff]  ;;  %v6602_v38 = vld [vmem:[#allocation14 + $0x840] sm:$0xff] }
 0x661   : > { %6386 = vmatpush1.msra.mxu1 %v6271_v46  ;;  %6347 = vmatpush2.msra.mxu0 %v6223_v59  ;;  %v6186_v46 = vld [vmem:[#allocation14 + $0x478] sm:$0xff]  ;;  %v6600_v59 = vld [vmem:[#allocation14 + $0x830] sm:$0xff] }
 0x662   : > { %6387 = vmatprep.subr.mxu1 %v6269_v54  ;;  %6348 = vmatprep.subr.mxu0 %v6221_v44  ;;  %v6231_v54 = vld [vmem:[#allocation14 + $0x5e0] sm:$0xff]  ;;  %v6599_v44 = vld [vmem:[#allocation14 + $0x828] sm:$0xff] }
 0x663   : > { %6388 = vmatpush1.msra.mxu1 %v6268_v43  ;;  %6349 = vmatpush2.msra.mxu0 %v6220_v26  ;;  %v6183_v43 = vld [vmem:[#allocation14 + $0x460] sm:$0xff]  ;;  %v6597_v26 = vld [vmem:[#allocation14 + $0x818] sm:$0xff] }
 0x664   : > { %6389 = vmatprep.subr.mxu1 %v6266_v37  ;;  %6350 = vmatprep.subr.mxu0 %v6218_v18  ;;  %v6228_v37 = vld [vmem:[#allocation14 + $0x5c8] sm:$0xff]  ;;  %v6596_v18 = vld [vmem:[#allocation14 + $0x810] sm:$0xff] }
 0x665   : > { %6390 = vmatpush1.msra.mxu1 %v6265_v20  ;;  %6351 = vmatpush2.msra.mxu0 %v6217_v32  ;;  %v6180_v20 = vld [vmem:[#allocation14 + $0x448] sm:$0xff]  ;;  %v6594_v32 = vld [vmem:[#allocation14 + $0x800] sm:$0xff] }
 0x666   : > { %6391 = vmatprep.subr.mxu1 %v6263_v51  ;;  %6352 = vmatprep.subr.mxu0 %v6215_v10  ;;  %v6225_v51 = vld [vmem:[#allocation14 + $0x5b0] sm:$0xff]  ;;  %v6593_v10 = vld [vmem:[#allocation14 + $0x7f8] sm:$0xff] }
 0x667   : > { %6392 = vmatpush1.msra.mxu1 %v6262_v4  ;;  %6353 = vmatpush2.msra.mxu0 %v6214_v56  ;;  %v6177_v4 = vld [vmem:[#allocation14 + $0x430] sm:$0xff]  ;;  %v6591_v56 = vld [vmem:[#allocation14 + $0x7e8] sm:$0xff] }
 0x668   : > { %6393 = vmatprep.subr.mxu1 %v6260_v47  ;;  %6354 = vmatprep.subr.mxu0 %v6212_v63  ;;  %v6222_v47 = vld [vmem:[#allocation14 + $0x598] sm:$0xff]  ;;  %v6590_v63 = vld [vmem:[#allocation14 + $0x7e0] sm:$0xff] }
 0x669   : > { %6394 = vmatpush1.msra.mxu1 %v6259_v22  ;;  %6427 = vmatprep.mubr.f32.mxu1 %v11892_v6  ;;  %v6174_v22 = vld [vmem:[#allocation14 + $0x418] sm:$0xff] }
 0x66a   : > { %6355 = vmatpush2.msra.mxu0 %v6211_v52  ;;  %8523 = vmatmul.mubr.msk.f32.vlgmr.msra.gmra.mxu1 %vm5857_vm12, %v6287_v42  ;;  %v6588_v52 = vld [vmem:[#allocation14 + $0x7d0] sm:$0xff] }
 0x66b   : > { %8919 = vmatprep.subr.mxu1 %v6258_v55  ;;  %6357 = vmatmul.mubr.f32.vlgmr.msra.gmra.mxu0 %v6285_v60  ;;  %v6219_v55 = vld [vmem:[#allocation14 + $0x580] sm:$0xff] }
 0x66c   : > { %8920 = vmatpush3.msra.mxu1 %v6210_v24  ;;  %6498 = vmatprep.mubr.f32.mxu1 %v6286_v25  ;;  %v6201_v25 = vld [vmem:[#allocation14 + $0x4f0] sm:$0xff]  ;;  %v6587_v24 = vld [vmem:[#allocation14 + $0x7c8] sm:$0xff] }
 0x66d   : > { %6705 = vmatprep.subr.mxu0 %v6624_v31  ;;  %8921 = vmatprep.subr.mxu1 %v6255_v3  ;;  %v6171_v31 = vld [vmem:[#allocation14 + $0x400] sm:$0xff]  ;;  %v6585_v3 = vld [vmem:[#allocation14 + $0x7b8] sm:$0xff] }
 0x66e   : > { %6706 = vmatpush1.msra.mxu0 %v6623_v21  ;;  %6769 = vmatprep.mubr.f32.mxu0 %v6699_v27  ;;  %v6216_v21 = vld [vmem:[#allocation14 + $0x568] sm:$0xff] }
 0x66f   : > { %8922 = vmatpush3.msra.mxu1 %v6207_v0  ;;  %6707 = vmatprep.subr.mxu0 %v6621_v36  ;;  %v6584_v0 = vld [vmem:[#allocation14 + $0x7b0] sm:$0xff]  ;;  %v6168_v36 = vld [vmem:[#allocation14 + $0x3e8] sm:$0xff] }
 0x670   : > { %8923 = vmatprep.subr.mxu1 %v6252_v53  ;;  %6708 = vmatpush1.msra.mxu0 %v6620_v40  ;;  %v6582_v53 = vld [vmem:[#allocation14 + $0x7a0] sm:$0xff] }
 0x671   : > { %8924 = vmatpush3.msra.mxu1 %v6204_v61  ;;  %6709 = vmatprep.subr.mxu0 %v6618_v15  ;;  %v6213_v61 = vld [vmem:[#allocation14 + $0x550] sm:$0xff]  ;;  %v6581_v15 = vld [vmem:[#allocation14 + $0x798] sm:$0xff] }
 0x672   : > { %8925 = vmatprep.subr.mxu1 %v6249_v19  ;;  %6710 = vmatpush1.msra.mxu0 %v6617_v17  ;;  %v6165_v19 = vld [vmem:[#allocation14 + $0x3d0] sm:$0xff]  ;;  %v6579_v17 = vld [vmem:[#allocation14 + $0x788] sm:$0xff] }
 0x673   : > { %8926 = vmatpush3.msra.mxu1 %v6201_v25  ;;  %6711 = vmatprep.subr.mxu0 %v6615_v39  ;;  %v6578_v25 = vld [vmem:[#allocation14 + $0x780] sm:$0xff]  ;;  %v6282_v39 = vld [vmem:[#allocation14 + $0x778] sm:$0xff] }
 0x674   : > { %8927 = vmatprep.subr.mxu1 %v6246_v8  ;;  %6712 = vmatpush1.msra.mxu0 %v6614_v62 }
 0x675   : > { %8928 = vmatpush3.msra.mxu1 %v6198_v16  ;;  %6713 = vmatprep.subr.mxu0 %v6612_v35  ;;  %v6672_v16 = vld [vmem:[#allocation14 + $0xa70] sm:$0xff]  ;;  %v6671_v35 = vld [vmem:[#allocation14 + $0xa68] sm:$0xff] }
 0x676   : > { %8929 = vmatprep.subr.mxu1 %v6243_v48  ;;  %6714 = vmatpush1.msra.mxu0 %v6611_v5  ;;  %v6279_v48 = vld [vmem:[#allocation14 + $0x760] sm:$0xff]  ;;  %v6669_v5 = vld [vmem:[#allocation14 + $0xa58] sm:$0xff] }
 0x677   : > { %8930 = vmatpush3.msra.mxu1 %v6195_v11  ;;  %6715 = vmatprep.subr.mxu0 %v6609_v14  ;;  %v6668_v11 = vld [vmem:[#allocation14 + $0xa50] sm:$0xff]  ;;  %v6276_v14 = vld [vmem:[#allocation14 + $0x748] sm:$0xff] }
 0x678   : > { %8931 = vmatprep.subr.mxu1 %v6240_v12  ;;  %6716 = vmatpush1.msra.mxu0 %v6608_v1 }
 0x679   : > { %8932 = vmatpush3.msra.mxu1 %v6192_v58  ;;  %6717 = vmatprep.subr.mxu0 %v6606_v57  ;;  %v6666_v58 = vld [vmem:[#allocation14 + $0xa40] sm:$0xff]  ;;  %v6663_v57 = vld [vmem:[#allocation14 + $0xa28] sm:$0xff] }
 0x67a   : > { %8933 = vmatprep.subr.mxu1 %v6237_v7  ;;  %6718 = vmatpush1.msra.mxu0 %v6605_v29  ;;  %v6662_v7 = vld [vmem:[#allocation14 + $0xa20] sm:$0xff]  ;;  %v6270_v29 = vld [vmem:[#allocation14 + $0x718] sm:$0xff] }
 0x67b   : > { %8934 = vmatpush3.msra.mxu1 %v6189_v2  ;;  %6719 = vmatprep.subr.mxu0 %v6603_v41 }
 0x67c   : > { %8935 = vmatprep.subr.mxu1 %v6234_v9  ;;  %6720 = vmatpush1.msra.mxu0 %v6602_v38  ;;  %v6660_v9 = vld [vmem:[#allocation14 + $0xa10] sm:$0xff]  ;;  %v6659_v38 = vld [vmem:[#allocation14 + $0xa08] sm:$0xff] }
 0x67d   : > { %8936 = vmatpush3.msra.mxu1 %v6186_v46  ;;  %6721 = vmatprep.subr.mxu0 %v6600_v59  ;;  %v6267_v46 = vld [vmem:[#allocation14 + $0x700] sm:$0xff]  ;;  %v6657_v59 = vld [vmem:[#allocation14 + $0x9f8] sm:$0xff] }
 0x67e   : > { %8937 = vmatprep.subr.mxu1 %v6231_v54  ;;  %6722 = vmatpush1.msra.mxu0 %v6599_v44  ;;  %v6656_v54 = vld [vmem:[#allocation14 + $0x9f0] sm:$0xff]  ;;  %v6264_v44 = vld [vmem:[#allocation14 + $0x6e8] sm:$0xff] }
 0x67f   : > { %8938 = vmatpush3.msra.mxu1 %v6183_v43  ;;  %6723 = vmatprep.subr.mxu0 %v6597_v26  ;;  %v6654_v43 = vld [vmem:[#allocation14 + $0x9e0] sm:$0xff]  ;;  %v6653_v26 = vld [vmem:[#allocation14 + $0x9d8] sm:$0xff] }
 0x680   : > { %8939 = vmatprep.subr.mxu1 %v6228_v37  ;;  %6724 = vmatpush1.msra.mxu0 %v6596_v18  ;;  %v6261_v37 = vld [vmem:[#allocation14 + $0x6d0] sm:$0xff]  ;;  %v6651_v18 = vld [vmem:[#allocation14 + $0x9c8] sm:$0xff] }
 0x681   : > { %8940 = vmatpush3.msra.mxu1 %v6180_v20  ;;  %6725 = vmatprep.subr.mxu0 %v6594_v32  ;;  %v6650_v20 = vld [vmem:[#allocation14 + $0x9c0] sm:$0xff]  ;;  %v6696_v32 = vld [vmem:[#allocation14 + $0xb30] sm:$0xff] }
 0x682   : > { %8941 = vmatprep.subr.mxu1 %v6225_v51  ;;  %6726 = vmatpush1.msra.mxu0 %v6593_v10  ;;  %v6648_v51 = vld [vmem:[#allocation14 + $0x9b0] sm:$0xff] }
 0x683   : > { %8942 = vmatpush3.msra.mxu1 %v6177_v4  ;;  %6727 = vmatprep.subr.mxu0 %v6591_v56  ;;  %v5485_v40 = vpop.permute.xlu1 %5484 }
 0x684   : > { %8943 = vmatprep.subr.mxu1 %v6222_v47  ;;  %6728 = vmatpush1.msra.mxu0 %v6590_v63  ;;  %5493 = vst.msk [vmem:[#allocation2 + $0x30] sm:$0xf] %vm5492_vm13, %v5485_v40  ;;  %v6639_v40 = vld [vmem:[#allocation14 + $0x968] sm:$0xff] }
 0x685   : > { %8944 = vmatpush3.msra.mxu1 %v6174_v22  ;;  %6729 = vmatprep.subr.mxu0 %v6588_v52  ;;  %v6695_v52 = vld [vmem:[#allocation14 + $0xb28] sm:$0xff] }
 0x686   : > { %8945 = vmatprep.subr.mxu1 %v6219_v55  ;;  %6730 = vmatpush1.msra.mxu0 %v6587_v24  ;;  %v6647_v55 = vld [vmem:[#allocation14 + $0x9a8] sm:$0xff]  ;;  %v6693_v24 = vld [vmem:[#allocation14 + $0xb18] sm:$0xff] }
 0x687   : > { %8946 = vmatpush3.msra.mxu1 %v6171_v31  ;;  %6731 = vmatprep.subr.mxu0 %v6585_v3  ;;  %v5517_v8 = vpop.permute.xlu1 %5516  ;;  %v5566_v62 = vpop.permute.xlu0 %5565  ;;  %v6645_v31 = vld [vmem:[#allocation14 + $0x998] sm:$0xff]  ;;  %v6692_v3 = vld [vmem:[#allocation14 + $0xb10] sm:$0xff] }
 0x688   : > { %8947 = vmatprep.subr.mxu1 %v6216_v21  ;;  %6732 = vmatpush1.msra.mxu0 %v6584_v0  ;;  %5525 = vst.msk [vmem:[#allocation2 + $0x30] sm:$0xf] %vm5524_vm14, %v5517_v8  ;;  %v6644_v21 = vld [vmem:[#allocation14 + $0x990] sm:$0xff]  ;;  %v6690_v0 = vld [vmem:[#allocation14 + $0xb00] sm:$0xff]  ;;  %v6633_v8 = vld [vmem:[#allocation14 + $0x938] sm:$0xff] }
 0x689   : > { %8948 = vmatpush3.msra.mxu1 %v6168_v36  ;;  %6733 = vmatprep.subr.mxu0 %v6582_v53  ;;  %5572 = vst.msk [vmem:[#allocation2 + $0x38] sm:$0xf] %vm5492_vm13, %v5566_v62  ;;  %v6642_v36 = vld [vmem:[#allocation14 + $0x980] sm:$0xff]  ;;  %v6689_v53 = vld [vmem:[#allocation14 + $0xaf8] sm:$0xff] }
 0x68a   : > { %8949 = vmatprep.subr.mxu1 %v6213_v61  ;;  %6734 = vmatpush1.msra.mxu0 %v6581_v15  ;;  %v6638_v61 = vld [vmem:[#allocation14 + $0x960] sm:$0xff]  ;;  %v6684_v15 = vld [vmem:[#allocation14 + $0xad0] sm:$0xff] }
 0x68b   : > { %8950 = vmatpush3.msra.mxu1 %v6165_v19  ;;  %6735 = vmatprep.subr.mxu0 %v6579_v17  ;;  %v5531_v12 = vpop.permute.xlu1 %5530  ;;  %v5596_v1 = vpop.permute.xlu0 %5595  ;;  %v6636_v19 = vld [vmem:[#allocation14 + $0x950] sm:$0xff]  ;;  %v6683_v17 = vld [vmem:[#allocation14 + $0xac8] sm:$0xff] }
 0x68c   : > { %6499 = vmatmul.mubr.f32.vlgmr.msra.gmra.mxu1 %v6285_v60  ;;  %9418 = vmatprep.subr.mxu1 %v11892_v6  ;;  %5539 = vst.msk [vmem:[#allocation2 + $0x30] sm:$0xf] %vm5538_vm15, %v5531_v12  ;;  %v6273_v60 = vld [vmem:[#allocation14 + $0x730] sm:$0xff] }
 0x68d   : > { %6736 = vmatpush1.msra.mxu0 %v6578_v25  ;;  %9419 = vmatpush3.msra.mxu1 %v6282_v39  ;;  %5602 = vst.msk [vmem:[#allocation2 + $0x38] sm:$0xf] %vm5524_vm14, %v5596_v1  ;;  %v6635_v25 = vld [vmem:[#allocation14 + $0x948] sm:$0xff]  ;;  %v6681_v39 = vld [vmem:[#allocation14 + $0xab8] sm:$0xff]  ;;  %v6678_v1 = vld [vmem:[#allocation14 + $0xaa0] sm:$0xff] }
 0x68e   : > { %6737 = vmatprep.subr.mxu0 %v6672_v16  ;;  %9420 = vmatprep.subr.mxu1 %v11892_v6 }
 0x68f   : > { %6738 = vmatpush2.msra.mxu0 %v6671_v35  ;;  %9421 = vmatpush3.msra.mxu1 %v6279_v48  ;;  %v5641_v2 = vpop.permute.xlu1 %5640  ;;  %v5608_v41 = vpop.permute.xlu0 %5607  ;;  %v6680_v48 = vld [vmem:[#allocation14 + $0xab0] sm:$0xff] }
 0x690   : > { %6739 = vmatprep.subr.mxu0 %v6669_v5  ;;  %9422 = vmatprep.subr.mxu1 %v11892_v6  ;;  %5647 = vst.msk [vmem:[#allocation2 + $0x40] sm:$0xf] %vm5492_vm13, %v5641_v2  ;;  %v6632_v5 = vld [vmem:[#allocation14 + $0x930] sm:$0xff] }
 0x691   : > { %6740 = vmatpush2.msra.mxu0 %v6668_v11  ;;  %9423 = vmatpush3.msra.mxu1 %v6276_v14  ;;  %5614 = vst.msk [vmem:[#allocation2 + $0x38] sm:$0xf] %vm5538_vm15, %v5608_v41  ;;  %v9664_v11 = vld [vmem:[#allocation3 + $0x8] sm:$0xff] }
 0x692   : > { %6741 = vmatprep.subr.mxu0 %v6666_v58  ;;  %9424 = vmatprep.subr.mxu1 %v11892_v6  ;;  %v7536_v14 = vrot.slane %v9664_v11, 4  ;;  %v6630_v58 = vld [vmem:[#allocation14 + $0x920] sm:$0xff]  ;;  %v6677_v41 = vld [vmem:[#allocation14 + $0xa98] sm:$0xff] }
 0x693   : > { %6742 = vmatpush2.msra.mxu0 %v6665_v45  ;;  %9425 = vmatpush3.msra.mxu1 %v6273_v60  ;;  %v11515_v45 = vld [vmem:[#allocation3 + $0x10] sm:$0xff] }
 0x694   : > { %6743 = vmatprep.subr.mxu0 %v6663_v57  ;;  %9426 = vmatprep.subr.mxu1 %v11892_v6  ;;  %v7539_v60 = vrot.slane %v11515_v45, 4 }
 0x695   : > { %6744 = vmatpush2.msra.mxu0 %v6662_v7  ;;  %9427 = vmatpush3.msra.mxu1 %v6270_v29  ;;  %v11519_v7 = vld [vmem:[#allocation3] sm:$0xff] }
 0x696   : > { %6745 = vmatprep.subr.mxu0 %v6660_v9  ;;  %9428 = vmatprep.subr.mxu1 %v11892_v6  ;;  %v7533_v29 = vrot.slane %v11519_v7, 4  ;;  %v6629_v9 = vld [vmem:[#allocation14 + $0x918] sm:$0xff] }
 0x697   : > { %6746 = vmatpush2.msra.mxu0 %v6659_v38  ;;  %9429 = vmatpush3.msra.mxu1 %v6267_v46  ;;  %v6675_v38 = vld [vmem:[#allocation14 + $0xa88] sm:$0xff] }
 0x698   : > { %6747 = vmatprep.subr.mxu0 %v6657_v59  ;;  %9430 = vmatprep.subr.mxu1 %v11892_v6  ;;  %v5715_v10 = vld [vmem:[#allocation2 + $0x30] ss:$8 sm:$0x7]  ;;  %v5717_v4 = vld [vmem:[#allocation2 + $0x31] ss:$8 sm:$0x7] }
 0x699   : > { %6748 = vmatpush2.msra.mxu0 %v6656_v54  ;;  %9431 = vmatpush3.msra.mxu1 %v6264_v44  ;;  %v5718_v56 = vmax.f32 %v5715_v10, %v5717_v4  ;;  %v5723_v47 = vld [vmem:[#allocation2 + $0x32] ss:$8 sm:$0x7]  ;;  %v5725_v63 = vld [vmem:[#allocation2 + $0x33] ss:$8 sm:$0x7] }
 0x69a   : > { %6749 = vmatprep.subr.mxu0 %v6654_v43  ;;  %9432 = vmatprep.subr.mxu1 %v11892_v6  ;;  %v5726_v22 = vmax.f32 %v5723_v47, %v5725_v63  ;;  %v6627_v46 = vld [vmem:[#allocation14 + $0x908] sm:$0xff]  ;;  %v6674_v43 = vld [vmem:[#allocation14 + $0xa80] sm:$0xff]  ;;  %v7034_v63 = vld [vmem:[#allocation14 + $0xc98] sm:$0xff] }
 0x69b   : > { %6750 = vmatpush2.msra.mxu0 %v6653_v26  ;;  %9433 = vmatpush3.msra.mxu1 %v6261_v37  ;;  %5720 = vst.msk [vmem:[#allocation3 + $0x18] ss:$8 sm:$0x7] %vm11404_vm11, %v5718_v56  ;;  %v6626_v26 = vld [vmem:[#allocation14 + $0x900] sm:$0xff]  ;;  %v6700_v37 = vrot.slane %v11515_v45, 2  ;;  %v7036_v56 = vld [vmem:[#allocation14 + $0xca8] sm:$0xff] }
 0x69c   : > { %9434 = vmatprep.mubr.msk.f32.mxu1 %vm9999_vm4, %v11892_v6  ;;  %6751 = vmatprep.subr.mxu0 %v6651_v18  ;;  %5728 = vst.msk [vmem:[#allocation3 + $0x19] ss:$8 sm:$0x7] %vm11404_vm11, %v5726_v22  ;;  %v6673_v18 = vld [vmem:[#allocation14 + $0xa78] sm:$0xff]  ;;  %v6670_v10 = vld [vmem:[#allocation14 + $0xa60] sm:$0xff]  ;;  %v6667_v22 = vld [vmem:[#allocation14 + $0xa48] sm:$0xff] }
 0x69d   : > { %9435 = vmatmul.mubr.msk.f32.vlgmr.msra.gmra.mxu1 %vm5857_vm12, %v6287_v42  ;;  %6752 = vmatpush2.msra.mxu0 %v6650_v20  ;;  %v6687_v42 = vld [vmem:[#allocation14 + $0xae8] sm:$0xff]  ;;  %v6698_v20 = vrot.slane %v11519_v7, 2  ;;  %v6622_v47 = vld [vmem:[#allocation14 + $0x8e0] sm:$0xff] }
 0x69e   : > { %6792 = vmatprep.subr.mxu1 %v6696_v32  ;;  %6753 = vmatprep.subr.mxu0 %v6648_v51  ;;  %v6625_v32 = vld [vmem:[#allocation14 + $0x8f8] sm:$0xff]  ;;  %v7037_v51 = vld [vmem:[#allocation14 + $0xcb0] sm:$0xff] }
 0x69f   : > { %6793 = vmatpush1.msra.mxu1 %v6695_v52  ;;  %6754 = vmatpush2.msra.mxu0 %v6647_v55  ;;  %v7117_v52 = vrot.slane %v9664_v11, 3  ;;  %v7033_v55 = vld [vmem:[#allocation14 + $0xc90] sm:$0xff]  ;;  %v6649_v11 = vld [vmem:[#allocation14 + $0x9b8] sm:$0xff] }
 0x6a0   : > { %6794 = vmatprep.subr.mxu1 %v6693_v24  ;;  %6755 = vmatprep.subr.mxu0 %v6645_v31  ;;  %v6619_v24 = vld [vmem:[#allocation14 + $0x8c8] sm:$0xff]  ;;  %v7031_v31 = vld [vmem:[#allocation14 + $0xc80] sm:$0xff] }
 0x6a1   : > { %6795 = vmatpush1.msra.mxu1 %v6692_v3  ;;  %6756 = vmatpush2.msra.mxu0 %v6644_v21  ;;  %v6664_v21 = vld [vmem:[#allocation14 + $0xa30] sm:$0xff] }
 0x6a2   : > { %6796 = vmatprep.subr.mxu1 %v6690_v0  ;;  %6757 = vmatprep.subr.mxu0 %v6642_v36  ;;  %v7030_v0 = vld [vmem:[#allocation14 + $0xc78] sm:$0xff] }
 0x6a3   : > { %6797 = vmatpush1.msra.mxu1 %v6689_v53  ;;  %6758 = vmatpush2.msra.mxu0 %v6641_v13  ;;  %v11508_v62 = vld [vmem:[#allocation3 + $0x20] sm:$0x3]  ;;  %v11510_v16 = vld [vmem:[#allocation3 + $0x28] sm:$0x3]  ;;  %v11512_v35 = vld [vmem:[#allocation3 + $0x18] sm:$0x3] }
 0x6a4   : > { %6798 = vmatprep.subr.mxu1 %v6687_v42  ;;  %6759 = vmatprep.subr.mxu0 %v6639_v40  ;;  %v7537_v12 = vrot.slane %v11508_v62, 4  ;;  %v7540_v57 = vrot.slane %v11510_v16, 4  ;;  %v7534_v2 = vrot.slane %v11512_v35, 4  ;;  %v7118_v4 = vrot.slane %v11508_v62, 3  ;;  %v6661_v36 = vld [vmem:[#allocation14 + $0xa18] sm:$0xff]  ;;  %v7027_v53 = vld [vmem:[#allocation14 + $0xc60] sm:$0xff] }
 0x6a5   : > { %6799 = vmatpush1.msra.mxu1 %v6686_v50  ;;  %6760 = vmatpush2.msra.mxu0 %v6638_v61  ;;  %v6613_v13 = vld [vmem:[#allocation14 + $0x898] sm:$0xff]  ;;  %v7025_v42 = vld [vmem:[#allocation14 + $0xc50] sm:$0xff]  ;;  %v6658_v40 = vld [vmem:[#allocation14 + $0xa00] sm:$0xff] }
 0x6a6   : > { %6800 = vmatprep.subr.mxu1 %v6684_v15  ;;  %6761 = vmatprep.subr.mxu0 %v6636_v19  ;;  %v11524_v59 = vsel %vm532_vm0, %v7536_v14, %v7537_v12  ;;  %v11527_v54 = vsel %vm532_vm0, %v7539_v60, %v7540_v57  ;;  %v11530_v44 = vsel %vm532_vm0, %v7533_v29, %v7534_v2  ;;  %v7024_v50 = vld [vmem:[#allocation14 + $0xc48] sm:$0xff]  ;;  %v6610_v61 = vld [vmem:[#allocation14 + $0x880] sm:$0xff]  ;;  %v7022_v15 = vld [vmem:[#allocation14 + $0xc38] sm:$0xff] }
 0x6a7   : > { %6801 = vmatpush1.msra.mxu1 %v6683_v17  ;;  %6762 = vmatpush2.msra.mxu0 %v6635_v25  ;;  %v11544_v3 = vsel %vm1160_vm5, %v7117_v52, %v7118_v4  ;;  %v6655_v19 = vld [vmem:[#allocation14 + $0x9e8] sm:$0xff]  ;;  %v7021_v17 = vld [vmem:[#allocation14 + $0xc30] sm:$0xff]  ;;  %v7018_v62 = vld [vmem:[#allocation14 + $0xc18] sm:$0xff] }
 0x6a8   : > { %6802 = vmatprep.subr.mxu1 %v6681_v39  ;;  %6763 = vmatprep.subr.mxu0 %v6633_v8  ;;  %v6607_v25 = vld [vmem:[#allocation14 + $0x868] sm:$0xff]  ;;  %v7019_v39 = vld [vmem:[#allocation14 + $0xc20] sm:$0xff]  ;;  %v6652_v8 = vld [vmem:[#allocation14 + $0x9d0] sm:$0xff] }
 0x6a9   : > { %6803 = vmatpush1.msra.mxu1 %v6680_v48  ;;  %6764 = vmatpush2.msra.mxu0 %v6632_v5  ;;  %v6604_v48 = vld [vmem:[#allocation14 + $0x850] sm:$0xff]  ;;  %v7016_v5 = vld [vmem:[#allocation14 + $0xc08] sm:$0xff]  ;;  %v7015_v14 = vld [vmem:[#allocation14 + $0xc00] sm:$0xff] }
 0x6aa   : > { %6804 = vmatprep.subr.mxu1 %v6678_v1  ;;  %6765 = vmatprep.subr.mxu0 %v6630_v58  ;;  %v6601_v12 = vld [vmem:[#allocation14 + $0x838] sm:$0xff]  ;;  %v7013_v1 = vld [vmem:[#allocation14 + $0xbf0] sm:$0xff]  ;;  %v6646_v58 = vld [vmem:[#allocation14 + $0x9a0] sm:$0xff] }
 0x6ab   : > { %6805 = vmatpush1.msra.mxu1 %v6677_v41  ;;  %6766 = vmatpush2.msra.mxu0 %v6629_v9  ;;  %v7012_v60 = vld [vmem:[#allocation14 + $0xbe8] sm:$0xff]  ;;  %v6598_v57 = vld [vmem:[#allocation14 + $0x820] sm:$0xff]  ;;  %v7010_v29 = vld [vmem:[#allocation14 + $0xbd8] sm:$0xff] }
 0x6ac   : > { %6806 = vmatprep.subr.mxu1 %v6675_v38  ;;  %6767 = vmatprep.subr.mxu0 %v6627_v46  ;;  %v6643_v2 = vld [vmem:[#allocation14 + $0x988] sm:$0xff]  ;;  %v7009_v41 = vld [vmem:[#allocation14 + $0xbd0] sm:$0xff]  ;;  %v7007_v38 = vld [vmem:[#allocation14 + $0xbc0] sm:$0xff] }
 0x6ad   : > { %6807 = vmatpush1.msra.mxu1 %v6674_v43  ;;  %6840 = vmatprep.mubr.f32.mxu1 %v11892_v6  ;;  %v6595_v9 = vld [vmem:[#allocation14 + $0x808] sm:$0xff]  ;;  %v6640_v46 = vld [vmem:[#allocation14 + $0x970] sm:$0xff]  ;;  %v7006_v43 = vld [vmem:[#allocation14 + $0xbb8] sm:$0xff] }
 0x6ae   : > { %6768 = vmatpush2.msra.mxu0 %v6626_v26  ;;  %8525 = vmatmul.mubr.msk.f32.vlgmr.msra.gmra.mxu1 %vm5857_vm12, %v6700_v37  ;;  %v6592_v26 = vld [vmem:[#allocation14 + $0x7f0] sm:$0xff]  ;;  %v6631_v52 = vld [vmem:[#allocation14 + $0x928] sm:$0xff] }
 0x6af   : > { %8963 = vmatprep.subr.mxu1 %v6673_v18  ;;  %6770 = vmatmul.mubr.f32.vlgmr.msra.gmra.mxu0 %v6698_v20  ;;  %v7004_v18 = vld [vmem:[#allocation14 + $0xba8] sm:$0xff]  ;;  %v7001_v4 = vld [vmem:[#allocation14 + $0xb90] sm:$0xff] }
 0x6b0   : > { %8964 = vmatpush3.msra.mxu1 %v6625_v32  ;;  %6911 = vmatprep.mubr.f32.mxu1 %v6699_v27  ;;  %v7028_v27 = vld [vmem:[#allocation14 + $0xc68] sm:$0xff]  ;;  %v6637_v32 = vld [vmem:[#allocation14 + $0x958] sm:$0xff] }
 0x6b1   : > { %7127 = vmatprep.subr.mxu0 %v7037_v51  ;;  %8965 = vmatprep.subr.mxu1 %v6670_v10  ;;  %v7003_v51 = vld [vmem:[#allocation14 + $0xba0] sm:$0xff]  ;;  %v6589_v10 = vld [vmem:[#allocation14 + $0x7d8] sm:$0xff] }
 0x6b2   : > { %7128 = vmatpush1.msra.mxu0 %v7036_v56  ;;  %8966 = vmatpush3.msra.mxu1 %v6622_v47  ;;  %v6634_v56 = vld [vmem:[#allocation14 + $0x940] sm:$0xff]  ;;  %v7000_v47 = vld [vmem:[#allocation14 + $0xb88] sm:$0xff] }
 0x6b3   : > { %7129 = vmatprep.subr.mxu0 %v7034_v63  ;;  %8967 = vmatprep.subr.mxu1 %v6667_v22  ;;  %v6586_v63 = vld [vmem:[#allocation14 + $0x7c0] sm:$0xff]  ;;  %v6998_v22 = vld [vmem:[#allocation14 + $0xb78] sm:$0xff] }
 0x6b4   : > { %7130 = vmatpush1.msra.mxu0 %v7033_v55  ;;  %8968 = vmatpush3.msra.mxu1 %v6619_v24  ;;  %v6997_v55 = vld [vmem:[#allocation14 + $0xb70] sm:$0xff]  ;;  %v6583_v24 = vld [vmem:[#allocation14 + $0x7a8] sm:$0xff] }
 0x6b5   : > { %7131 = vmatprep.subr.mxu0 %v7031_v31  ;;  %7191 = vmatprep.mubr.f32.mxu0 %v11544_v3  ;;  %v6995_v31 = vld [vmem:[#allocation14 + $0xb60] sm:$0xff] }
 0x6b6   : > { %8969 = vmatprep.subr.mxu1 %v6664_v21  ;;  %7132 = vmatpush1.msra.mxu0 %v7030_v0  ;;  %v6628_v21 = vld [vmem:[#allocation14 + $0x910] sm:$0xff]  ;;  %v6994_v0 = vld [vmem:[#allocation14 + $0xb58] sm:$0xff] }
 0x6b7   : > { %8970 = vmatpush3.msra.mxu1 %v6616_v49  ;;  %7133 = vmatprep.subr.mxu0 %v7028_v27  ;;  %v6580_v49 = vld [vmem:[#allocation14 + $0x790] sm:$0xff]  ;;  %v6992_v27 = vld [vmem:[#allocation14 + $0xb48] sm:$0xff] }
 0x6b8   : > { %8971 = vmatprep.subr.mxu1 %v6661_v36  ;;  %7134 = vmatpush1.msra.mxu0 %v7027_v53  ;;  %v6991_v36 = vld [vmem:[#allocation14 + $0xb40] sm:$0xff]  ;;  %v6697_v53 = vld [vmem:[#allocation14 + $0xb38] sm:$0xff] }
 0x6b9   : > { %8972 = vmatpush3.msra.mxu1 %v6613_v13  ;;  %7135 = vmatprep.subr.mxu0 %v7025_v42  ;;  %v7085_v13 = vld [vmem:[#allocation14 + $0xe30] sm:$0xff]  ;;  %v7084_v42 = vld [vmem:[#allocation14 + $0xe28] sm:$0xff] }
 0x6ba   : > { %8973 = vmatprep.subr.mxu1 %v6658_v40  ;;  %7136 = vmatpush1.msra.mxu0 %v7024_v50  ;;  %v6694_v40 = vld [vmem:[#allocation14 + $0xb20] sm:$0xff]  ;;  %v7082_v50 = vld [vmem:[#allocation14 + $0xe18] sm:$0xff] }
 0x6bb   : > { %8974 = vmatpush3.msra.mxu1 %v6610_v61  ;;  %7137 = vmatprep.subr.mxu0 %v7022_v15  ;;  %v7081_v61 = vld [vmem:[#allocation14 + $0xe10] sm:$0xff]  ;;  %v6691_v15 = vld [vmem:[#allocation14 + $0xb08] sm:$0xff] }
 0x6bc   : > { %8975 = vmatprep.subr.mxu1 %v6655_v19  ;;  %7138 = vmatpush1.msra.mxu0 %v7021_v17  ;;  %v7079_v19 = vld [vmem:[#allocation14 + $0xe00] sm:$0xff]  ;;  %v7078_v17 = vld [vmem:[#allocation14 + $0xdf8] sm:$0xff] }
 0x6bd   : > { %8976 = vmatpush3.msra.mxu1 %v6607_v25  ;;  %7139 = vmatprep.subr.mxu0 %v7019_v39  ;;  %v7076_v25 = vld [vmem:[#allocation14 + $0xde8] sm:$0xff]  ;;  %v7075_v39 = vld [vmem:[#allocation14 + $0xde0] sm:$0xff] }
 0x6be   : > { %8977 = vmatprep.subr.mxu1 %v6652_v8  ;;  %7140 = vmatpush1.msra.mxu0 %v7018_v62  ;;  %v6685_v8 = vld [vmem:[#allocation14 + $0xad8] sm:$0xff]  ;;  %v7073_v62 = vld [vmem:[#allocation14 + $0xdd0] sm:$0xff] }
 0x6bf   : > { %8978 = vmatpush3.msra.mxu1 %v6604_v48  ;;  %7141 = vmatprep.subr.mxu0 %v7016_v5  ;;  %v7072_v48 = vld [vmem:[#allocation14 + $0xdc8] sm:$0xff]  ;;  %v6682_v5 = vld [vmem:[#allocation14 + $0xac0] sm:$0xff] }
 0x6c0   : > { %8979 = vmatprep.subr.mxu1 %v6649_v11  ;;  %7142 = vmatpush1.msra.mxu0 %v7015_v14  ;;  %v7070_v11 = vld [vmem:[#allocation14 + $0xdb8] sm:$0xff]  ;;  %v7069_v14 = vld [vmem:[#allocation14 + $0xdb0] sm:$0xff] }
 0x6c1   : > { %8980 = vmatpush3.msra.mxu1 %v6601_v12  ;;  %7143 = vmatprep.subr.mxu0 %v7013_v1  ;;  %v6679_v12 = vld [vmem:[#allocation14 + $0xaa8] sm:$0xff]  ;;  %v7067_v1 = vld [vmem:[#allocation14 + $0xda0] sm:$0xff] }
 0x6c2   : > { %8981 = vmatprep.subr.mxu1 %v6646_v58  ;;  %7144 = vmatpush1.msra.mxu0 %v7012_v60  ;;  %v7066_v58 = vld [vmem:[#allocation14 + $0xd98] sm:$0xff]  ;;  %v6676_v60 = vld [vmem:[#allocation14 + $0xa90] sm:$0xff] }
 0x6c3   : > { %8982 = vmatpush3.msra.mxu1 %v6598_v57  ;;  %7145 = vmatprep.subr.mxu0 %v7010_v29  ;;  %v7064_v57 = vld [vmem:[#allocation14 + $0xd88] sm:$0xff]  ;;  %v7063_v29 = vld [vmem:[#allocation14 + $0xd80] sm:$0xff] }
 0x6c4   : > { %8983 = vmatprep.subr.mxu1 %v6643_v2  ;;  %7146 = vmatpush1.msra.mxu0 %v7009_v41  ;;  %v7109_v2 = vld [vmem:[#allocation14 + $0xef0] sm:$0xff] }
 0x6c5   : > { %8984 = vmatpush3.msra.mxu1 %v6595_v9  ;;  %7147 = vmatprep.subr.mxu0 %v7007_v38  ;;  %v7061_v41 = vld [vmem:[#allocation14 + $0xd70] sm:$0xff]  ;;  %v7108_v9 = vld [vmem:[#allocation14 + $0xee8] sm:$0xff] }
 0x6c6   : > { %8985 = vmatprep.subr.mxu1 %v6640_v46  ;;  %7148 = vmatpush1.msra.mxu0 %v7006_v43  ;;  %v7060_v38 = vld [vmem:[#allocation14 + $0xd68] sm:$0xff]  ;;  %v7106_v46 = vld [vmem:[#allocation14 + $0xed8] sm:$0xff] }
 0x6c7   : > { %8986 = vmatpush3.msra.mxu1 %v6592_v26  ;;  %7149 = vmatprep.subr.mxu0 %v7004_v18  ;;  %v7058_v43 = vld [vmem:[#allocation14 + $0xd58] sm:$0xff]  ;;  %v7105_v26 = vld [vmem:[#allocation14 + $0xed0] sm:$0xff] }
 0x6c8   : > { %8987 = vmatprep.subr.mxu1 %v6637_v32  ;;  %7150 = vmatpush1.msra.mxu0 %v7003_v51  ;;  %v7057_v18 = vld [vmem:[#allocation14 + $0xd50] sm:$0xff]  ;;  %v7103_v32 = vld [vmem:[#allocation14 + $0xec0] sm:$0xff] }
 0x6c9   : > { %8988 = vmatpush3.msra.mxu1 %v6589_v10  ;;  %7151 = vmatprep.subr.mxu0 %v7001_v4  ;;  %v7055_v51 = vld [vmem:[#allocation14 + $0xd40] sm:$0xff]  ;;  %v7102_v10 = vld [vmem:[#allocation14 + $0xeb8] sm:$0xff] }
 0x6ca   : > { %8989 = vmatprep.subr.mxu1 %v6634_v56  ;;  %7152 = vmatpush1.msra.mxu0 %v7000_v47  ;;  %v7054_v4 = vld [vmem:[#allocation14 + $0xd38] sm:$0xff]  ;;  %v7100_v56 = vld [vmem:[#allocation14 + $0xea8] sm:$0xff] }
 0x6cb   : > { %8990 = vmatpush3.msra.mxu1 %v6586_v63  ;;  %7153 = vmatprep.subr.mxu0 %v6998_v22  ;;  %v7052_v47 = vld [vmem:[#allocation14 + $0xd28] sm:$0xff]  ;;  %v7051_v63 = vld [vmem:[#allocation14 + $0xd20] sm:$0xff]  ;;  %v7097_v22 = vld [vmem:[#allocation14 + $0xe90] sm:$0xff] }
 0x6cc   : > { %8991 = vmatprep.subr.mxu1 %v6631_v52  ;;  %7154 = vmatpush1.msra.mxu0 %v6997_v55  ;;  %v7049_v52 = vld [vmem:[#allocation14 + $0xd10] sm:$0xff]  ;;  %v7096_v55 = vld [vmem:[#allocation14 + $0xe88] sm:$0xff] }
 0x6cd   : > { %8992 = vmatpush3.msra.mxu1 %v6583_v24  ;;  %7155 = vmatprep.subr.mxu0 %v6995_v31  ;;  %v7048_v24 = vld [vmem:[#allocation14 + $0xd08] sm:$0xff]  ;;  %v7094_v31 = vld [vmem:[#allocation14 + $0xe78] sm:$0xff] }
 0x6ce   : > { %8993 = vmatprep.subr.mxu1 %v6628_v21  ;;  %7156 = vmatpush1.msra.mxu0 %v6994_v0  ;;  %v7046_v21 = vld [vmem:[#allocation14 + $0xcf8] sm:$0xff]  ;;  %v7093_v0 = vld [vmem:[#allocation14 + $0xe70] sm:$0xff] }
 0x6cf   : > { %8994 = vmatpush3.msra.mxu1 %v6580_v49  ;;  %7157 = vmatprep.subr.mxu0 %v6992_v27  ;;  %v7045_v49 = vld [vmem:[#allocation14 + $0xcf0] sm:$0xff]  ;;  %v7091_v27 = vld [vmem:[#allocation14 + $0xe60] sm:$0xff] }
 0x6d0   : > { %6912 = vmatmul.mubr.f32.vlgmr.msra.gmra.mxu1 %v6698_v20  ;;  %9437 = vmatprep.subr.mxu1 %v11892_v6  ;;  %v6688_v20 = vld [vmem:[#allocation14 + $0xaf0] sm:$0xff] }
 0x6d1   : > { %7158 = vmatpush1.msra.mxu0 %v6991_v36  ;;  %9438 = vmatpush3.msra.mxu1 %v6697_v53  ;;  %v7043_v36 = vld [vmem:[#allocation14 + $0xce0] sm:$0xff]  ;;  %v7090_v53 = vld [vmem:[#allocation14 + $0xe58] sm:$0xff] }
 0x6d2   : > { %7159 = vmatprep.subr.mxu0 %v7085_v13  ;;  %9439 = vmatprep.subr.mxu1 %v11892_v6  ;;  %v7042_v13 = vld [vmem:[#allocation14 + $0xcd8] sm:$0xff] }
 0x6d3   : > { %7160 = vmatpush2.msra.mxu0 %v7084_v42  ;;  %9440 = vmatpush3.msra.mxu1 %v6694_v40  ;;  %v7088_v42 = vld [vmem:[#allocation14 + $0xe48] sm:$0xff] }
 0x6d4   : > { %7161 = vmatprep.subr.mxu0 %v7082_v50  ;;  %9441 = vmatprep.subr.mxu1 %v11892_v6  ;;  %v7040_v40 = vld [vmem:[#allocation14 + $0xcc8] sm:$0xff]  ;;  %v7121_v50 = vrot.slane %v11510_v16, 3 }
 0x6d5   : > { %7162 = vmatpush2.msra.mxu0 %v7081_v61  ;;  %9442 = vmatpush3.msra.mxu1 %v6691_v15  ;;  %v7087_v61 = vld [vmem:[#allocation14 + $0xe40] sm:$0xff]  ;;  %v7115_v15 = vrot.slane %v11512_v35, 3 }
 0x6d6   : > { %7163 = vmatprep.subr.mxu0 %v7079_v19  ;;  %9443 = vmatprep.subr.mxu1 %v11892_v6  ;;  %v7039_v19 = vld [vmem:[#allocation14 + $0xcc0] sm:$0xff] }
 0x6d7   : > { %7164 = vmatpush2.msra.mxu0 %v7078_v17  ;;  %9444 = vmatpush3.msra.mxu1 %v6688_v20  ;;  %v7120_v17 = vrot.slane %v11515_v45, 3  ;;  %v7086_v20 = vld [vmem:[#allocation14 + $0xe38] sm:$0xff]  ;;  %v7459_v45 = vld [vmem:[#allocation14 + $0x1070] sm:$0xff] }
 0x6d8   : > { %7165 = vmatprep.subr.mxu0 %v7076_v25  ;;  %9445 = vmatprep.subr.mxu1 %v11892_v6  ;;  %v7114_v25 = vrot.slane %v11519_v7, 3  ;;  %v7458_v7 = vld [vmem:[#allocation14 + $0x1068] sm:$0xff] }
 0x6d9   : > { %7166 = vmatpush2.msra.mxu0 %v7075_v39  ;;  %9446 = vmatpush3.msra.mxu1 %v6685_v8  ;;  %v11568_v16 = vsel %vm1160_vm5, %v7120_v17, %v7121_v50  ;;  %v7038_v39 = vld [vmem:[#allocation14 + $0xcb8] sm:$0xff]  ;;  %v7083_v8 = vld [vmem:[#allocation14 + $0xe20] sm:$0xff]  ;;  %v7005_v50 = vld [vmem:[#allocation14 + $0xbb0] sm:$0xff] }
 0x6da   : > { %7167 = vmatprep.subr.mxu0 %v7073_v62  ;;  %9447 = vmatprep.subr.mxu1 %v11892_v6  ;;  %v11573_v35 = vsel %vm1160_vm5, %v7114_v25, %v7115_v15  ;;  %v7035_v62 = vld [vmem:[#allocation14 + $0xca0] sm:$0xff]  ;;  %v7423_v25 = vld [vmem:[#allocation14 + $0xf50] sm:$0xff] }
 0x6db   : > { %7168 = vmatpush2.msra.mxu0 %v7072_v48  ;;  %9448 = vmatpush3.msra.mxu1 %v6682_v5  ;;  %v7456_v48 = vld [vmem:[#allocation14 + $0x1058] sm:$0xff]  ;;  %v7080_v5 = vld [vmem:[#allocation14 + $0xe08] sm:$0xff]  ;;  %v7425_v17 = vld [vmem:[#allocation14 + $0xf60] sm:$0xff] }
 0x6dc   : > { %7169 = vmatprep.subr.mxu0 %v7070_v11  ;;  %9449 = vmatprep.subr.mxu1 %v11892_v6  ;;  %v7455_v11 = vld [vmem:[#allocation14 + $0x1050] sm:$0xff] }
 0x6dd   : > { %7170 = vmatpush2.msra.mxu0 %v7069_v14  ;;  %9450 = vmatpush3.msra.mxu1 %v6679_v12  ;;  %v7032_v14 = vld [vmem:[#allocation14 + $0xc88] sm:$0xff]  ;;  %v7453_v12 = vld [vmem:[#allocation14 + $0x1040] sm:$0xff] }
 0x6de   : > { %7171 = vmatprep.subr.mxu0 %v7067_v1  ;;  %9451 = vmatprep.subr.mxu1 %v11892_v6  ;;  %v7077_v1 = vld [vmem:[#allocation14 + $0xdf0] sm:$0xff] }
 0x6df   : > { %7172 = vmatpush2.msra.mxu0 %v7066_v58  ;;  %9452 = vmatpush3.msra.mxu1 %v6676_v60  ;;  %v7452_v58 = vld [vmem:[#allocation14 + $0x1038] sm:$0xff]  ;;  %v7029_v60 = vld [vmem:[#allocation14 + $0xc70] sm:$0xff] }
 0x6e0   : > { %9453 = vmatprep.mubr.msk.f32.mxu1 %vm9999_vm4, %v11892_v6  ;;  %7173 = vmatprep.subr.mxu0 %v7064_v57  ;;  %v7450_v57 = vld [vmem:[#allocation14 + $0x1028] sm:$0xff] }
 0x6e1   : > { %9454 = vmatmul.mubr.msk.f32.vlgmr.msra.gmra.mxu1 %vm5857_vm12, %v6700_v37  ;;  %7174 = vmatpush2.msra.mxu0 %v7063_v29  ;;  %v7099_v37 = vld [vmem:[#allocation14 + $0xea0] sm:$0xff] }
 0x6e2   : > { %7214 = vmatprep.subr.mxu1 %v7109_v2  ;;  %7175 = vmatprep.subr.mxu0 %v7061_v41  ;;  %v7449_v29 = vld [vmem:[#allocation14 + $0x1020] sm:$0xff]  ;;  %v7026_v2 = vld [vmem:[#allocation14 + $0xc58] sm:$0xff]  ;;  %v7447_v41 = vld [vmem:[#allocation14 + $0x1010] sm:$0xff] }
 0x6e3   : > { %7215 = vmatpush1.msra.mxu1 %v7108_v9  ;;  %7176 = vmatpush2.msra.mxu0 %v7060_v38  ;;  %v7071_v9 = vld [vmem:[#allocation14 + $0xdc0] sm:$0xff]  ;;  %v7446_v38 = vld [vmem:[#allocation14 + $0x1008] sm:$0xff] }
 0x6e4   : > { %7216 = vmatprep.subr.mxu1 %v7106_v46  ;;  %7177 = vmatprep.subr.mxu0 %v7058_v43  ;;  %v7023_v46 = vld [vmem:[#allocation14 + $0xc40] sm:$0xff]  ;;  %v7444_v43 = vld [vmem:[#allocation14 + $0xff8] sm:$0xff] }
 0x6e5   : > { %7217 = vmatpush1.msra.mxu1 %v7105_v26  ;;  %7178 = vmatpush2.msra.mxu0 %v7057_v18  ;;  %v7068_v26 = vld [vmem:[#allocation14 + $0xda8] sm:$0xff]  ;;  %v7443_v18 = vld [vmem:[#allocation14 + $0xff0] sm:$0xff] }
 0x6e6   : > { %7218 = vmatprep.subr.mxu1 %v7103_v32  ;;  %7179 = vmatprep.subr.mxu0 %v7055_v51  ;;  %v7020_v32 = vld [vmem:[#allocation14 + $0xc28] sm:$0xff]  ;;  %v7441_v51 = vld [vmem:[#allocation14 + $0xfe0] sm:$0xff] }
 0x6e7   : > { %7219 = vmatpush1.msra.mxu1 %v7102_v10  ;;  %7180 = vmatpush2.msra.mxu0 %v7054_v4  ;;  %v7065_v10 = vld [vmem:[#allocation14 + $0xd90] sm:$0xff]  ;;  %v7440_v4 = vld [vmem:[#allocation14 + $0xfd8] sm:$0xff] }
 0x6e8   : > { %7220 = vmatprep.subr.mxu1 %v7100_v56  ;;  %7181 = vmatprep.subr.mxu0 %v7052_v47  ;;  %v7017_v56 = vld [vmem:[#allocation14 + $0xc10] sm:$0xff]  ;;  %v7438_v47 = vld [vmem:[#allocation14 + $0xfc8] sm:$0xff] }
 0x6e9   : > { %7221 = vmatpush1.msra.mxu1 %v7099_v37  ;;  %7182 = vmatpush2.msra.mxu0 %v7051_v63  ;;  %v7062_v37 = vld [vmem:[#allocation14 + $0xd78] sm:$0xff]  ;;  %v7437_v63 = vld [vmem:[#allocation14 + $0xfc0] sm:$0xff] }
 0x6ea   : > { %7222 = vmatprep.subr.mxu1 %v7097_v22  ;;  %7183 = vmatprep.subr.mxu0 %v7049_v52  ;;  %v11578_v22 = vpop.f32.mrf.mxu1  ;;  %v7014_v52 = vld [vmem:[#allocation14 + $0xbf8] sm:$0xff] }
 0x6eb   : > { %7223 = vmatpush1.msra.mxu1 %v7096_v55  ;;  %7184 = vmatpush2.msra.mxu0 %v7048_v24  ;;  %v7435_v55 = vld [vmem:[#allocation14 + $0xfb0] sm:$0xff]  ;;  %v7059_v24 = vld [vmem:[#allocation14 + $0xd60] sm:$0xff] }
 0x6ec   : > { %7224 = vmatprep.subr.mxu1 %v7094_v31  ;;  %7185 = vmatprep.subr.mxu0 %v7046_v21  ;;  %v7434_v31 = vld [vmem:[#allocation14 + $0xfa8] sm:$0xff]  ;;  %v7011_v21 = vld [vmem:[#allocation14 + $0xbe0] sm:$0xff] }
 0x6ed   : > { %7225 = vmatpush1.msra.mxu1 %v7093_v0  ;;  %7186 = vmatpush2.msra.mxu0 %v7045_v49  ;;  %v7432_v0 = vld [vmem:[#allocation14 + $0xf98] sm:$0xff]  ;;  %v7056_v49 = vld [vmem:[#allocation14 + $0xd48] sm:$0xff] }
 0x6ee   : > { %7226 = vmatprep.subr.mxu1 %v7091_v27  ;;  %7187 = vmatprep.subr.mxu0 %v7043_v36  ;;  %v7431_v27 = vld [vmem:[#allocation14 + $0xf90] sm:$0xff]  ;;  %v11580_v36 = vpop.f32.mrf.mxu1 }
 0x6ef   : > { %7227 = vmatpush1.msra.mxu1 %v7090_v53  ;;  %7188 = vmatpush2.msra.mxu0 %v7042_v13  ;;  %v7008_v53 = vld [vmem:[#allocation14 + $0xbc8] sm:$0xff]  ;;  %v7429_v13 = vld [vmem:[#allocation14 + $0xf80] sm:$0xff] }
 0x6f0   : > { %7228 = vmatprep.subr.mxu1 %v7088_v42  ;;  %7189 = vmatprep.subr.mxu0 %v7040_v40  ;;  %v7053_v42 = vld [vmem:[#allocation14 + $0xd30] sm:$0xff]  ;;  %v7428_v40 = vld [vmem:[#allocation14 + $0xf78] sm:$0xff] }
 0x6f1   : > { %7229 = vmatpush1.msra.mxu1 %v7087_v61  ;;  %7262 = vmatprep.mubr.f32.mxu1 %v11892_v6  ;;  %v7426_v61 = vld [vmem:[#allocation14 + $0xf68] sm:$0xff] }
 0x6f2   : > { %7190 = vmatpush2.msra.mxu0 %v7039_v19  ;;  %8527 = vmatmul.mubr.msk.f32.vlgmr.msra.gmra.mxu1 %vm5857_vm12, %v11568_v16  ;;  %v7050_v19 = vld [vmem:[#allocation14 + $0xd18] sm:$0xff] }
 0x6f3   : > { %9007 = vmatprep.subr.mxu1 %v7086_v20  ;;  %7192 = vmatmul.mubr.f32.vlgmr.msra.gmra.mxu0 %v11573_v35  ;;  %v7002_v20 = vld [vmem:[#allocation14 + $0xb98] sm:$0xff] }
 0x6f4   : > { %9008 = vmatpush3.msra.mxu1 %v7038_v39  ;;  %7333 = vmatprep.mubr.f32.mxu1 %v11544_v3  ;;  %v7074_v3 = vld [vmem:[#allocation14 + $0xdd8] sm:$0xff] }
 0x6f5   : > { %7546 = vmatprep.subr.mxu0 %v7459_v45  ;;  %9009 = vmatprep.subr.mxu1 %v7083_v8  ;;  %v7047_v45 = vld [vmem:[#allocation14 + $0xd00] sm:$0xff]  ;;  %v7422_v8 = vld [vmem:[#allocation14 + $0xf48] sm:$0xff] }
 0x6f6   : > { %7547 = vmatpush1.msra.mxu0 %v7458_v7  ;;  %7610 = vmatprep.mubr.f32.mxu0 %v11524_v59 }
 0x6f7   : > { %9010 = vmatpush3.msra.mxu1 %v7035_v62  ;;  %7548 = vmatprep.subr.mxu0 %v7456_v48  ;;  %v6999_v62 = vld [vmem:[#allocation14 + $0xb80] sm:$0xff]  ;;  %v7420_v48 = vld [vmem:[#allocation14 + $0xf38] sm:$0xff] }
 0x6f8   : > { %9011 = vmatprep.subr.mxu1 %v7080_v5  ;;  %7549 = vmatpush1.msra.mxu0 %v7455_v11  ;;  %v7044_v5 = vld [vmem:[#allocation14 + $0xce8] sm:$0xff]  ;;  %v7419_v11 = vld [vmem:[#allocation14 + $0xf30] sm:$0xff] }
 0x6f9   : > { %9012 = vmatpush3.msra.mxu1 %v7032_v14  ;;  %7550 = vmatprep.subr.mxu0 %v7453_v12  ;;  %v6996_v14 = vld [vmem:[#allocation14 + $0xb68] sm:$0xff]  ;;  %v7417_v12 = vld [vmem:[#allocation14 + $0xf20] sm:$0xff] }
 0x6fa   : > { %9013 = vmatprep.subr.mxu1 %v7077_v1  ;;  %7551 = vmatpush1.msra.mxu0 %v7452_v58  ;;  %v7041_v1 = vld [vmem:[#allocation14 + $0xcd0] sm:$0xff]  ;;  %v7416_v58 = vld [vmem:[#allocation14 + $0xf18] sm:$0xff] }
 0x6fb   : > { %9014 = vmatpush3.msra.mxu1 %v7029_v60  ;;  %7552 = vmatprep.subr.mxu0 %v7450_v57  ;;  %v6993_v60 = vld [vmem:[#allocation14 + $0xb50] sm:$0xff]  ;;  %v7414_v57 = vld [vmem:[#allocation14 + $0xf08] sm:$0xff] }
 0x6fc   : > { %9015 = vmatprep.subr.mxu1 %v7074_v3  ;;  %7553 = vmatpush1.msra.mxu0 %v7449_v29  ;;  %v7413_v3 = vld [vmem:[#allocation14 + $0xf00] sm:$0xff]  ;;  %v7110_v29 = vld [vmem:[#allocation14 + $0xef8] sm:$0xff] }
 0x6fd   : > { %9016 = vmatpush3.msra.mxu1 %v7026_v2  ;;  %7554 = vmatprep.subr.mxu0 %v7447_v41  ;;  %v7507_v2 = vld [vmem:[#allocation14 + $0x11f0] sm:$0xff]  ;;  %v7506_v41 = vld [vmem:[#allocation14 + $0x11e8] sm:$0xff] }
 0x6fe   : > { %9017 = vmatprep.subr.mxu1 %v7071_v9  ;;  %7555 = vmatpush1.msra.mxu0 %v7446_v38  ;;  %v7107_v9 = vld [vmem:[#allocation14 + $0xee0] sm:$0xff]  ;;  %v7504_v38 = vld [vmem:[#allocation14 + $0x11d8] sm:$0xff] }
 0x6ff   : > { %9018 = vmatpush3.msra.mxu1 %v7023_v46  ;;  %7556 = vmatprep.subr.mxu0 %v7444_v43  ;;  %v7503_v46 = vld [vmem:[#allocation14 + $0x11d0] sm:$0xff]  ;;  %v7104_v43 = vld [vmem:[#allocation14 + $0xec8] sm:$0xff] }
 0x700   : > { %9019 = vmatprep.subr.mxu1 %v7068_v26  ;;  %7557 = vmatpush1.msra.mxu0 %v7443_v18  ;;  %v7501_v26 = vld [vmem:[#allocation14 + $0x11c0] sm:$0xff]  ;;  %v7500_v18 = vld [vmem:[#allocation14 + $0x11b8] sm:$0xff] }
 0x701   : > { %9020 = vmatpush3.msra.mxu1 %v7020_v32  ;;  %7558 = vmatprep.subr.mxu0 %v7441_v51  ;;  %v7498_v32 = vld [vmem:[#allocation14 + $0x11a8] sm:$0xff] }
 0x702   : > { %9021 = vmatprep.subr.mxu1 %v7065_v10  ;;  %7559 = vmatpush1.msra.mxu0 %v7440_v4  ;;  %v7497_v10 = vld [vmem:[#allocation14 + $0x11a0] sm:$0xff]  ;;  %v7098_v4 = vld [vmem:[#allocation14 + $0xe98] sm:$0xff] }
 0x703   : > { %9022 = vmatpush3.msra.mxu1 %v7017_v56  ;;  %7560 = vmatprep.subr.mxu0 %v7438_v47  ;;  %v7495_v47 = vld [vmem:[#allocation14 + $0x1190] sm:$0xff] }
 0x704   : > { %9023 = vmatprep.subr.mxu1 %v7062_v37  ;;  %7561 = vmatpush1.msra.mxu0 %v7437_v63  ;;  %v7494_v63 = vld [vmem:[#allocation14 + $0x1188] sm:$0xff] }
 0x705   : > { %9024 = vmatpush3.msra.mxu1 %v7014_v52  ;;  %7562 = vmatprep.subr.mxu0 %v7435_v55  ;;  %v7095_v52 = vld [vmem:[#allocation14 + $0xe80] sm:$0xff]  ;;  %v7492_v55 = vld [vmem:[#allocation14 + $0x1178] sm:$0xff] }
 0x706   : > { %9025 = vmatprep.subr.mxu1 %v7059_v24  ;;  %7563 = vmatpush1.msra.mxu0 %v7434_v31  ;;  %v7491_v24 = vld [vmem:[#allocation14 + $0x1170] sm:$0xff]  ;;  %v7092_v31 = vld [vmem:[#allocation14 + $0xe68] sm:$0xff] }
 0x707   : > { %9026 = vmatpush3.msra.mxu1 %v7011_v21  ;;  %7564 = vmatprep.subr.mxu0 %v7432_v0  ;;  %v7489_v21 = vld [vmem:[#allocation14 + $0x1160] sm:$0xff]  ;;  %v7488_v0 = vld [vmem:[#allocation14 + $0x1158] sm:$0xff] }
 0x708   : > { %9027 = vmatprep.subr.mxu1 %v7056_v49  ;;  %7565 = vmatpush1.msra.mxu0 %v7431_v27  ;;  %v8907_v15 = vpop.f32.mrf.mxu1  ;;  %v7089_v49 = vld [vmem:[#allocation14 + $0xe50] sm:$0xff]  ;;  %v7486_v27 = vld [vmem:[#allocation14 + $0x1148] sm:$0xff] }
 0x709   : > { %9028 = vmatpush3.msra.mxu1 %v7008_v53  ;;  %7566 = vmatprep.subr.mxu0 %v7429_v13  ;;  %v7485_v53 = vld [vmem:[#allocation14 + $0x1140] sm:$0xff]  ;;  %v5927_v13 = vpop.f32.mrf.mxu0 }
 0x70a   : > { %9029 = vmatprep.subr.mxu1 %v7053_v42  ;;  %7567 = vmatpush1.msra.mxu0 %v7428_v40  ;;  %v8908_v39 = vpop.f32.mrf.mxu1  ;;  %v7531_v42 = vld [vmem:[#allocation14 + $0x12b0] sm:$0xff] }
 0x70b   : > { %9030 = vmatpush3.msra.mxu1 %v7005_v50  ;;  %7568 = vmatprep.subr.mxu0 %v7426_v61  ;;  %v8909_v7 = vadd.f32 %v8908_v39, %v8907_v15  ;;  %v7483_v40 = vld [vmem:[#allocation14 + $0x1130] sm:$0xff]  ;;  %v7530_v50 = vld [vmem:[#allocation14 + $0x12a8] sm:$0xff]  ;;  %v11595_v15 = vld [vmem:[#allocation15] sm:$0x7]  ;;  %v5929_v39 = vpop.f32.mrf.mxu0 }
 0x70c   : > { %9031 = vmatprep.subr.mxu1 %v7050_v19  ;;  %7569 = vmatpush1.msra.mxu0 %v7425_v17  ;;  %v7482_v61 = vld [vmem:[#allocation14 + $0x1128] sm:$0xff]  ;;  %v7528_v19 = vld [vmem:[#allocation14 + $0x1298] sm:$0xff] }
 0x70d   : > { %9032 = vmatpush3.msra.mxu1 %v7002_v20  ;;  %7570 = vmatprep.subr.mxu0 %v7423_v25  ;;  %v7480_v17 = vld [vmem:[#allocation14 + $0x1118] sm:$0xff]  ;;  %v7527_v20 = vld [vmem:[#allocation14 + $0x1290] sm:$0xff] }
 0x70e   : > { %9033 = vmatprep.subr.mxu1 %v7047_v45  ;;  %7571 = vmatpush1.msra.mxu0 %v7422_v8  ;;  %v7479_v25 = vld [vmem:[#allocation14 + $0x1110] sm:$0xff]  ;;  %v7525_v45 = vld [vmem:[#allocation14 + $0x1280] sm:$0xff] }
 0x70f   : > { %9034 = vmatpush3.msra.mxu1 %v6999_v62  ;;  %7572 = vmatprep.subr.mxu0 %v7420_v48  ;;  %v7477_v8 = vld [vmem:[#allocation14 + $0x1100] sm:$0xff]  ;;  %v6147_v62 = vrot.slane %v11595_v15, %v10446_v28  ;;  %v7476_v48 = vld [vmem:[#allocation14 + $0x10f8] sm:$0xff] }
 0x710   : > { %9035 = vmatprep.subr.mxu1 %v7044_v5  ;;  %7573 = vmatpush1.msra.mxu0 %v7419_v11  ;;  %v7522_v5 = vld [vmem:[#allocation14 + $0x1268] sm:$0xff] }
 0x711   : > { %9036 = vmatpush3.msra.mxu1 %v6996_v14  ;;  %7574 = vmatprep.subr.mxu0 %v7417_v12  ;;  %v7474_v11 = vld [vmem:[#allocation14 + $0x10e8] sm:$0xff]  ;;  %v6001_v14 = vadd.f32 %v11580_v36, %v5929_v39  ;;  %v6151_v12 = vrot.slane %v11595_v15, %v10451_v30  ;;  %v7439_v39 = vld [vmem:[#allocation14 + $0xfd0] sm:$0xff] }
 0x712   : > { %9037 = vmatprep.subr.mxu1 %v7041_v1  ;;  %7575 = vmatpush1.msra.mxu0 %v7416_v58  ;;  %v7521_v1 = vld [vmem:[#allocation14 + $0x1260] sm:$0xff] }
 0x713   : > { %9038 = vmatpush3.msra.mxu1 %v6993_v60  ;;  %7576 = vmatprep.subr.mxu0 %v7414_v57  ;;  %v7519_v60 = vld [vmem:[#allocation14 + $0x1250] sm:$0xff] }
 0x714   : > { %7334 = vmatmul.mubr.f32.vlgmr.msra.gmra.mxu1 %v11573_v35  ;;  %9456 = vmatprep.subr.mxu1 %v11892_v6  ;;  %v7101_v35 = vld [vmem:[#allocation14 + $0xeb0] sm:$0xff] }
 0x715   : > { %7577 = vmatpush1.msra.mxu0 %v7413_v3  ;;  %9457 = vmatpush3.msra.mxu1 %v7110_v29  ;;  %v7471_v57 = vld [vmem:[#allocation14 + $0x10d0] sm:$0xff] }
 0x716   : > { %7578 = vmatprep.subr.mxu0 %v7507_v2  ;;  %9458 = vmatprep.subr.mxu1 %v11892_v6  ;;  %v7518_v2 = vld [vmem:[#allocation14 + $0x1248] sm:$0xff] }
 0x717   : > { %7579 = vmatpush2.msra.mxu0 %v7506_v41  ;;  %9459 = vmatpush3.msra.mxu1 %v7107_v9  ;;  %v7470_v41 = vld [vmem:[#allocation14 + $0x10c8] sm:$0xff] }
 0x718   : > { %7580 = vmatprep.subr.mxu0 %v7504_v38  ;;  %9460 = vmatprep.subr.mxu1 %v11892_v6  ;;  %v7516_v38 = vld [vmem:[#allocation14 + $0x1238] sm:$0xff] }
 0x719   : > { %7581 = vmatpush2.msra.mxu0 %v7503_v46  ;;  %9461 = vmatpush3.msra.mxu1 %v7104_v43  ;;  %v6139_v51 = vpop.f32.mrf.mxu1  ;;  %v7468_v46 = vld [vmem:[#allocation14 + $0x10b8] sm:$0xff] }
 0x71a   : > { %7582 = vmatprep.subr.mxu0 %v7501_v26  ;;  %9462 = vmatprep.subr.mxu1 %v11892_v6  ;;  %v11587_v56 = vadd.f32 %v8909_v7, %v6139_v51  ;;  %v5999_v7 = vadd.f32 %v11578_v22, %v5927_v13  ;;  %v7473_v22 = vld [vmem:[#allocation14 + $0x10e0] sm:$0xff]  ;;  %v6160_v26 = vadd.f32 %v6151_v12, %v6001_v14  ;;  %v7454_v13 = vld [vmem:[#allocation14 + $0x1048] sm:$0xff]  ;;  %v7472_v14 = vld [vmem:[#allocation14 + $0x10d8] sm:$0xff] }
 0x71b   : > { %7583 = vmatpush2.msra.mxu0 %v7500_v18  ;;  %9463 = vmatpush3.msra.mxu1 %v7101_v35  ;;  %v9417_v37 = vpop.f32.mrf.mxu1  ;;  %v7515_v18 = vld [vmem:[#allocation14 + $0x1230] sm:$0xff] }
 0x71c   : > { %7584 = vmatprep.subr.mxu0 %v7498_v32  ;;  %9464 = vmatprep.subr.mxu1 %v11892_v6  ;;  %v6159_v29 = vadd.f32 %v6147_v62, %v5999_v7  ;;  %v7467_v35 = vld [vmem:[#allocation14 + $0x10b0] sm:$0xff]  ;;  %v7464_v37 = vld [vmem:[#allocation14 + $0x1098] sm:$0xff]  ;;  %v7481_v7 = vld [vmem:[#allocation14 + $0x1120] sm:$0xff] }
 0x71d   : > { %7585 = vmatpush2.msra.mxu0 %v7497_v10  ;;  %9465 = vmatpush3.msra.mxu1 %v7098_v4  ;;  %v7513_v10 = vld [vmem:[#allocation14 + $0x1220] sm:$0xff] }
 0x71e   : > { %7586 = vmatprep.subr.mxu0 %v7495_v47  ;;  %9466 = vmatprep.subr.mxu1 %v11892_v6  ;;  %v7465_v4 = vld [vmem:[#allocation14 + $0x10a0] sm:$0xff]  ;;  %v7512_v47 = vld [vmem:[#allocation14 + $0x1218] sm:$0xff] }
 0x71f   : > { %7587 = vmatpush2.msra.mxu0 %v7494_v63  ;;  %9467 = vmatpush3.msra.mxu1 %v7095_v52  ;;  %v7510_v52 = vld [vmem:[#allocation14 + $0x1208] sm:$0xff]  ;;  %v7433_v62 = vld [vmem:[#allocation14 + $0xfa0] sm:$0xff] }
 0x720   : > { %7588 = vmatprep.subr.mxu0 %v7492_v55  ;;  %9468 = vmatprep.subr.mxu1 %v11892_v6  ;;  %v7462_v55 = vld [vmem:[#allocation14 + $0x1088] sm:$0xff] }
 0x721   : > { %7589 = vmatpush2.msra.mxu0 %v7491_v24  ;;  %9469 = vmatpush3.msra.mxu1 %v7092_v31  ;;  %v7509_v24 = vld [vmem:[#allocation14 + $0x1200] sm:$0xff] }
 0x722   : > { %7590 = vmatprep.subr.mxu0 %v7489_v21  ;;  %9470 = vmatprep.subr.mxu1 %v11892_v6  ;;  %v7461_v31 = vld [vmem:[#allocation14 + $0x1080] sm:$0xff]  ;;  %v7508_v21 = vld [vmem:[#allocation14 + $0x11f8] sm:$0xff] }
 0x723   : > { %7591 = vmatpush2.msra.mxu0 %v7488_v0  ;;  %9471 = vmatpush3.msra.mxu1 %v7089_v49  ;;  %v7460_v0 = vld [vmem:[#allocation14 + $0x1078] sm:$0xff]  ;;  %v7505_v49 = vld [vmem:[#allocation14 + $0x11e0] sm:$0xff] }
 0x724   : > { %9472 = vmatprep.mubr.msk.f32.mxu1 %vm9999_vm4, %v11892_v6  ;;  %7592 = vmatprep.subr.mxu0 %v7486_v27  ;;  %v7457_v27 = vld [vmem:[#allocation14 + $0x1060] sm:$0xff] }
 0x725   : > { %9473 = vmatmul.mubr.msk.f32.vlgmr.msra.gmra.mxu1 %vm5857_vm12, %v11568_v16  ;;  %7593 = vmatpush2.msra.mxu0 %v7485_v53  ;;  %v7524_v16 = vld [vmem:[#allocation14 + $0x1278] sm:$0xff]  ;;  %v7502_v53 = vld [vmem:[#allocation14 + $0x11c8] sm:$0xff] }
 0x726   : > { %7633 = vmatprep.subr.mxu1 %v7531_v42  ;;  %7594 = vmatprep.subr.mxu0 %v7483_v40  ;;  %v7499_v42 = vld [vmem:[#allocation14 + $0x11b0] sm:$0xff] }
 0x727   : > { %7634 = vmatpush1.msra.mxu1 %v7530_v50  ;;  %7595 = vmatpush2.msra.mxu0 %v7482_v61  ;;  %v7451_v40 = vld [vmem:[#allocation14 + $0x1030] sm:$0xff]  ;;  %v7496_v50 = vld [vmem:[#allocation14 + $0x1198] sm:$0xff] }
 0x728   : > { %7635 = vmatprep.subr.mxu1 %v7528_v19  ;;  %7596 = vmatprep.subr.mxu0 %v7480_v17  ;;  %v7448_v61 = vld [vmem:[#allocation14 + $0x1018] sm:$0xff]  ;;  %v7493_v19 = vld [vmem:[#allocation14 + $0x1180] sm:$0xff] }
 0x729   : > { %7636 = vmatpush1.msra.mxu1 %v7527_v20  ;;  %7597 = vmatpush2.msra.mxu0 %v7479_v25  ;;  %v7445_v17 = vld [vmem:[#allocation14 + $0x1000] sm:$0xff]  ;;  %v7490_v20 = vld [vmem:[#allocation14 + $0x1168] sm:$0xff]  ;;  %v7487_v25 = vld [vmem:[#allocation14 + $0x1150] sm:$0xff] }
 0x72a   : > { %7637 = vmatprep.subr.mxu1 %v7525_v45  ;;  %7598 = vmatprep.subr.mxu0 %v7477_v8  ;;  %v6429_v58 = vpop.f32.mrf.mxu1  ;;  %v7484_v45 = vld [vmem:[#allocation14 + $0x1138] sm:$0xff] }
 0x72b   : > { %7638 = vmatpush1.msra.mxu1 %v7524_v16  ;;  %7599 = vmatpush2.msra.mxu0 %v7476_v48  ;;  %v6358_v3 = vpop.f32.mrf.mxu0  ;;  %v7436_v8 = vld [vmem:[#allocation14 + $0xfb8] sm:$0xff]  ;;  %v7478_v16 = vld [vmem:[#allocation14 + $0x1108] sm:$0xff] }
 0x72c   : > { %7639 = vmatprep.subr.mxu1 %v7522_v5  ;;  %7600 = vmatprep.subr.mxu0 %v7474_v11  ;;  %v6430_v9 = vadd.f32 %v6429_v58, %v6358_v3  ;;  %v6431_v36 = vpop.f32.mrf.mxu1  ;;  %v7430_v48 = vld [vmem:[#allocation14 + $0xf88] sm:$0xff]  ;;  %v7475_v5 = vld [vmem:[#allocation14 + $0x10f0] sm:$0xff] }
 0x72d   : > { %7640 = vmatpush1.msra.mxu1 %v7521_v1  ;;  %7601 = vmatpush2.msra.mxu0 %v7473_v22  ;;  %v6360_v43 = vpop.f32.mrf.mxu0  ;;  %v7427_v11 = vld [vmem:[#allocation14 + $0xf70] sm:$0xff]  ;;  %v7424_v1 = vld [vmem:[#allocation14 + $0xf58] sm:$0xff]  ;;  %v7469_v22 = vld [vmem:[#allocation14 + $0x10c0] sm:$0xff] }
 0x72e   : > { %7641 = vmatprep.subr.mxu1 %v7519_v60  ;;  %7602 = vmatprep.subr.mxu0 %v7471_v57  ;;  %v11605_v32 = vadd.f32 %v6430_v9, %v6159_v29  ;;  %v6432_v51 = vadd.f32 %v6431_v36, %v6360_v43  ;;  %v7421_v60 = vld [vmem:[#allocation14 + $0xf40] sm:$0xff]  ;;  %v7466_v3 = vld [vmem:[#allocation14 + $0x10a8] sm:$0xff]  ;;  %v7532_v9 = vld [vmem:[#allocation14 + $0x12b8] sm:$0xff] }
 0x72f   : > { %7642 = vmatpush1.msra.mxu1 %v7518_v2  ;;  %7603 = vmatpush2.msra.mxu0 %v7470_v41  ;;  %v7418_v29 = vld [vmem:[#allocation14 + $0xf28] sm:$0xff]  ;;  %v7463_v2 = vld [vmem:[#allocation14 + $0x1090] sm:$0xff]  ;;  %v7529_v36 = vld [vmem:[#allocation14 + $0x12a0] sm:$0xff] }
 0x730   : > { %7643 = vmatprep.subr.mxu1 %v7516_v38  ;;  %7604 = vmatprep.subr.mxu0 %v7468_v46  ;;  %v11607_v63 = vadd.f32 %v6432_v51, %v6160_v26  ;;  %v7415_v41 = vld [vmem:[#allocation14 + $0xf10] sm:$0xff]  ;;  %v7526_v38 = vld [vmem:[#allocation14 + $0x1288] sm:$0xff]  ;;  %v6155_v46 = vrot.slane %v11595_v15, %v10475_v33  ;;  %v7517_v51 = vld [vmem:[#allocation14 + $0x1240] sm:$0xff] }
 0x731   : > { %7644 = vmatpush1.msra.mxu1 %v7515_v18  ;;  %7605 = vmatpush2.msra.mxu0 %v7467_v35  ;;  %v7523_v43 = vld [vmem:[#allocation14 + $0x1270] sm:$0xff]  ;;  %v7514_v15 = vld [vmem:[#allocation14 + $0x1228] sm:$0xff] }
 0x732   : > { %7645 = vmatprep.subr.mxu1 %v7513_v10  ;;  %7606 = vmatprep.subr.mxu0 %v7465_v4  ;;  %v6161_v18 = vadd.f32 %v6155_v46, %v11587_v56  ;;  %v8002_v46 = vld [vmem:[#allocation17 + $0x128] sm:$0xff] }
 0x733   : > { %7646 = vmatpush1.msra.mxu1 %v7512_v47  ;;  %7607 = vmatpush2.msra.mxu0 %v7464_v37  ;;  %v7511_v47 = vld [vmem:[#allocation14 + $0x1210] sm:$0xff] }
 0x734   : > { %7647 = vmatprep.subr.mxu1 %v7510_v52  ;;  %7608 = vmatprep.subr.mxu0 %v7462_v55 }
 0x735   : > { %7648 = vmatpush1.msra.mxu1 %v7509_v24  ;;  %7681 = vmatprep.mubr.f32.mxu1 %v11892_v6 }
 0x736   : > { %7609 = vmatpush2.msra.mxu0 %v7461_v31  ;;  %8529 = vmatmul.mubr.msk.f32.vlgmr.msra.gmra.mxu1 %vm5857_vm12, %v11527_v54 }
 0x737   : > { %9051 = vmatprep.subr.mxu1 %v7508_v21  ;;  %7611 = vmatmul.mubr.f32.vlgmr.msra.gmra.mxu0 %v11530_v44 }
 0x738   : > { %9052 = vmatpush3.msra.mxu1 %v7460_v0  ;;  %7752 = vmatprep.mubr.f32.mxu1 %v11524_v59  ;;  %v7442_v59 = vld [vmem:[#allocation14 + $0xfe8] sm:$0xff] }
 0x739   : > { %9053 = vmatprep.subr.mxu1 %v7505_v49  ;;  %7917 = vmatprep.subr.mxu0 %v11892_v6 }
 0x73a   : > { %9054 = vmatpush3.msra.mxu1 %v7457_v27 }
 0x73b   : > { %9055 = vmatprep.subr.mxu1 %v7502_v53 }
 0x73c   : > { %9056 = vmatpush3.msra.mxu1 %v7454_v13 }
 0x73d   : > { %9057 = vmatprep.subr.mxu1 %v7499_v42 }
 0x73e   : > { %9058 = vmatpush3.msra.mxu1 %v7451_v40 }
 0x73f   : > { %9059 = vmatprep.subr.mxu1 %v7496_v50 }
 0x740   : > { %9060 = vmatpush3.msra.mxu1 %v7448_v61 }
 0x741   : > { %9061 = vmatprep.subr.mxu1 %v7493_v19 }
 0x742   : > { %9062 = vmatpush3.msra.mxu1 %v7445_v17 }
 0x743   : > { %9063 = vmatprep.subr.mxu1 %v7490_v20 }
 0x744   : > { %9064 = vmatpush3.msra.mxu1 %v7442_v59 }
 0x745   : > { %9065 = vmatprep.subr.mxu1 %v7487_v25 }
 0x746   : > { %9066 = vmatpush3.msra.mxu1 %v7439_v39 }
 0x747   : > { %9067 = vmatprep.subr.mxu1 %v7484_v45 }
 0x748   : > { %9068 = vmatpush3.msra.mxu1 %v7436_v8 }
 0x749   : > { %9069 = vmatprep.subr.mxu1 %v7481_v7 }
 0x74a   : > { %9070 = vmatpush3.msra.mxu1 %v7433_v62 }
 0x74b   : > { %9071 = vmatprep.subr.mxu1 %v7478_v16 }
 0x74c   : > { %9072 = vmatpush3.msra.mxu1 %v7430_v48  ;;  %v8951_v12 = vpop.f32.mrf.mxu1 }
 0x74d   : > { %9073 = vmatprep.subr.mxu1 %v7475_v5 }
 0x74e   : > { %9074 = vmatpush3.msra.mxu1 %v7427_v11  ;;  %v8952_v58 = vpop.f32.mrf.mxu1 }
 0x74f   : > { %9075 = vmatprep.subr.mxu1 %v7472_v14  ;;  %v8953_v57 = vadd.f32 %v8952_v58, %v8951_v12 }
 0x750   : > { %9076 = vmatpush3.msra.mxu1 %v7424_v1 }
 0x751   : > { %9077 = vmatprep.subr.mxu1 %v7469_v22 }
 0x752   : > { %9078 = vmatpush3.msra.mxu1 %v7421_v60 }
 0x753   : > { %9079 = vmatprep.subr.mxu1 %v7466_v3 }
 0x754   : > { %9080 = vmatpush3.msra.mxu1 %v7418_v29 }
 0x755   : > { %9081 = vmatprep.subr.mxu1 %v7463_v2  ;;  %v7896_v2 = vld [vmem:[#allocation17 + $0x78] sm:$0xff] }
 0x756   : > { %9082 = vmatpush3.msra.mxu1 %v7415_v41  ;;  %v8004_v41 = vld [vmem:[#allocation17 + $0x138] sm:$0xff]  ;;  %7918 = vmatpush1.msra.mxu0 %v7896_v2 }
 0x757   : > { %7753 = vmatmul.mubr.f32.vlgmr.msra.gmra.mxu1 %v11530_v44  ;;  %9475 = vmatprep.subr.mxu1 %v11892_v6  ;;  %v7520_v44 = vld [vmem:[#allocation14 + $0x1258] sm:$0xff] }
 0x758   : > { %9476 = vmatpush3.msra.mxu1 %v7532_v9  ;;  %9491 = vmatprep.mubr.msk.f32.mxu1 %vm9999_vm4, %v11892_v6  ;;  %v7895_v9 = vld [vmem:[#allocation17 + $0x70] sm:$0xff] }
 0x759   : > { %9477 = vmatprep.subr.mxu1 %v11892_v6  ;;  %7919 = vmatprep.subr.mxu0 %v11892_v6 }
 0x75a   : > { %9478 = vmatpush3.msra.mxu1 %v7529_v36  ;;  %v8003_v36 = vld [vmem:[#allocation17 + $0x130] sm:$0xff]  ;;  %7920 = vmatpush1.msra.mxu0 %v7895_v9 }
 0x75b   : > { %9479 = vmatprep.subr.mxu1 %v11892_v6  ;;  %7921 = vmatprep.subr.mxu0 %v11892_v6 }
 0x75c   : > { %9480 = vmatpush3.msra.mxu1 %v7526_v38  ;;  %v7894_v38 = vld [vmem:[#allocation17 + $0x68] sm:$0xff] }
 0x75d   : > { %9481 = vmatprep.subr.mxu1 %v11892_v6  ;;  %v6570_v26 = vpop.f32.mrf.mxu1  ;;  %7922 = vmatpush1.msra.mxu0 %v7894_v38 }
 0x75e   : > { %9482 = vmatpush3.msra.mxu1 %v7523_v43  ;;  %v6571_v35 = vadd.f32 %v8953_v57, %v6570_v26  ;;  %v7893_v26 = vld [vmem:[#allocation17 + $0x60] sm:$0xff]  ;;  %7923 = vmatprep.subr.mxu0 %v11892_v6 }
 0x75f   : > { %9483 = vmatprep.subr.mxu1 %v11892_v6  ;;  %v9436_v10 = vpop.f32.mrf.mxu1  ;;  %7924 = vmatpush1.msra.mxu0 %v7893_v26 }
 0x760   : > { %9484 = vmatpush3.msra.mxu1 %v7520_v44  ;;  %v6576_v4 = vadd.f32 %v6571_v35, %v6161_v18  ;;  %v8001_v18 = vld [vmem:[#allocation17 + $0x120] sm:$0xff]  ;;  %v7892_v10 = vld [vmem:[#allocation17 + $0x58] sm:$0xff]  ;;  %7925 = vmatprep.subr.mxu0 %v11892_v6 }
 0x761   : > { %9485 = vmatprep.subr.mxu1 %v11892_v6  ;;  %7926 = vmatpush1.msra.mxu0 %v7892_v10  ;;  %v8019_v10 = vsub.s32 5, %v10441_v23 }
 0x762   : > { %9486 = vmatpush3.msra.mxu1 %v7517_v51  ;;  %7927 = vmatprep.subr.mxu0 %v11892_v6 }
 0x763   : > { %9487 = vmatprep.subr.mxu1 %v11892_v6 }
 0x764   : > { %9488 = vmatpush3.msra.mxu1 %v7514_v15 }
 0x765   : > { %9489 = vmatprep.subr.mxu1 %v11892_v6 }
 0x766   : > { %9490 = vmatpush3.msra.mxu1 %v7511_v47  ;;  %v7891_v47 = vld [vmem:[#allocation17 + $0x50] sm:$0xff] }
 0x767   : > { %9492 = vmatmul.mubr.msk.f32.vlgmr.msra.gmra.mxu1 %vm5857_vm12, %v11527_v54  ;;  %8024 = vmatprep.subr.mxu1 %v11892_v6 }
 0x768   : > { %8025 = vmatpush1.msra.mxu1 %v8004_v41  ;;  %7928 = vmatpush1.msra.mxu0 %v7891_v47 }
 0x769   : > { %8026 = vmatprep.subr.mxu1 %v11892_v6  ;;  %7929 = vmatprep.subr.mxu0 %v11892_v6 }
 0x76a   : > { %8027 = vmatpush1.msra.mxu1 %v8003_v36 }
 0x76b   : > { %8028 = vmatprep.subr.mxu1 %v11892_v6 }
 0x76c   : > { %8029 = vmatpush1.msra.mxu1 %v8002_v46 }
 0x76d   : > { %8030 = vmatprep.subr.mxu1 %v11892_v6 }
 0x76e   : > { %v6842_v56 = vpop.f32.mrf.mxu1  ;;  %8031 = vmatpush1.msra.mxu1 %v8001_v18 }
 0x76f   : > { %v6771_v37 = vpop.f32.mrf.mxu0  ;;  %8032 = vmatprep.subr.mxu1 %v11892_v6 }
 0x770   : > { %v6843_v52 = vadd.f32 %v6842_v56, %v6771_v37  ;;  %v6844_v55 = vpop.f32.mrf.mxu1  ;;  %v7999_v37 = vld [vmem:[#allocation17 + $0x110] sm:$0xff] }
 0x771   : > { %v6773_v24 = vpop.f32.mrf.mxu0 }
 0x772   : > { %v6987_v31 = vadd.f32 %v6843_v52, %v11605_v32  ;;  %v6845_v21 = vadd.f32 %v6844_v55, %v6773_v24  ;;  %v7890_v52 = vld [vmem:[#allocation17 + $0x48] sm:$0xff]  ;;  %v7889_v24 = vld [vmem:[#allocation17 + $0x40] sm:$0xff] }
 0x773   : > { %v7998_v55 = vld [vmem:[#allocation17 + $0x108] sm:$0xff]  ;;  %7930 = vmatpush1.msra.mxu0 %v7890_v52 }
 0x774   : > { %v6988_v0 = vadd.f32 %v6845_v21, %v11607_v63  ;;  %7931 = vmatprep.subr.mxu0 %v11892_v6  ;;  %v7888_v21 = vld [vmem:[#allocation17 + $0x38] sm:$0xff] }
 0x775   : > { %7932 = vmatpush1.msra.mxu0 %v7889_v24 }
 0x776   : > { %7933 = vmatprep.subr.mxu0 %v11892_v6 }
 0x777   : > { %7934 = vmatpush1.msra.mxu0 %v7888_v21  ;;  %v8106_v21 = vld [vmem:[#allocation17 + $0x1d0] sm:$0xff] }
 0x778   : > { %7935 = vmatprep.subr.mxu0 %v11892_v6 }
 0x790   : > { %v8995_v49 = vpop.f32.mrf.mxu1 }
 0x792   : > { %v8996_v27 = vpop.f32.mrf.mxu1 }
 0x793   : > { %v8997_v53 = vadd.f32 %v8996_v27, %v8995_v49  ;;  %v7887_v49 = vld [vmem:[#allocation17 + $0x30] sm:$0xff] }
 0x794   : > { %v7995_v27 = vld [vmem:[#allocation17 + $0xf0] sm:$0xff]  ;;  %7936 = vmatpush1.msra.mxu0 %v7887_v49  ;;  %v8104_v49 = vld [vmem:[#allocation17 + $0x1c0] sm:$0xff] }
 0x795   : > { %7937 = vmatprep.subr.mxu0 %v11892_v6 }
 0x7a1   : > { %v6983_v13 = vpop.f32.mrf.mxu1 }
 0x7a2   : > { %v6984_v42 = vadd.f32 %v8997_v53, %v6983_v13  ;;  %v7886_v53 = vld [vmem:[#allocation17 + $0x28] sm:$0xff] }
 0x7a3   : > { %v9455_v40 = vpop.f32.mrf.mxu1  ;;  %v7994_v13 = vld [vmem:[#allocation17 + $0xe8] sm:$0xff]  ;;  %7938 = vmatpush1.msra.mxu0 %v7886_v53  ;;  %v8102_v53 = vld [vmem:[#allocation17 + $0x1b0] sm:$0xff] }
 0x7a4   : > { %v6989_v50 = vadd.f32 %v6984_v42, %v6576_v4  ;;  %v8000_v4 = vld [vmem:[#allocation17 + $0x118] sm:$0xff]  ;;  %v7885_v42 = vld [vmem:[#allocation17 + $0x20] sm:$0xff]  ;;  %7939 = vmatprep.subr.mxu0 %v11892_v6 }
 0x7a5   : > { %8033 = vmatpush1.msra.mxu1 %v8000_v4  ;;  %v7993_v40 = vld [vmem:[#allocation17 + $0xe0] sm:$0xff]  ;;  %7940 = vmatpush1.msra.mxu0 %v7885_v42  ;;  %v8126_v4 = vsub.s32 6, %v10441_v23  ;;  %v8110_v23 = vld [vmem:[#allocation17 + $0x1f0] sm:$0xff] }
 0x7a6   : > { %8034 = vmatprep.subr.mxu1 %v11892_v6  ;;  %7941 = vmatprep.subr.mxu0 %v11892_v6  ;;  %v8100_v42 = vld [vmem:[#allocation17 + $0x1a0] sm:$0xff] }
 0x7a7   : > { %8035 = vmatpush1.msra.mxu1 %v7999_v37 }
 0x7a8   : > { %8036 = vmatprep.subr.mxu1 %v11892_v6 }
 0x7a9   : > { %8037 = vmatpush1.msra.mxu1 %v7998_v55  ;;  %v8111_v55 = vld [vmem:[#allocation17 + $0x1f8] sm:$0xff] }
 0x7aa   : > { %8038 = vmatprep.subr.mxu1 %v11892_v6 }
 0x7b2   : > { %v7264_v54 = vpop.f32.mrf.mxu1 }
 0x7b3   : > { %v7193_v32 = vpop.f32.mrf.mxu0 }
 0x7b4   : > { %v7266_v61 = vpop.f32.mrf.mxu1  ;;  %v7265_v7 = vadd.f32 %v7264_v54, %v7193_v32  ;;  %v7992_v54 = vld [vmem:[#allocation17 + $0xd8] sm:$0xff] }
 0x7b5   : > { %v7195_v8 = vpop.f32.mrf.mxu0 }
 0x7b6   : > { %v7267_v63 = vadd.f32 %v7266_v61, %v7195_v8  ;;  %v7409_v48 = vadd.f32 %v7265_v7, %v6987_v31  ;;  %v7997_v31 = vld [vmem:[#allocation17 + $0x100] sm:$0xff]  ;;  %v7883_v61 = vld [vmem:[#allocation17 + $0x10] sm:$0xff] }
 0x7b7   : > { %8039 = vmatpush1.msra.mxu1 %v7997_v31  ;;  %v7903_v8 = vld [vmem:[#allocation17 + $0xb0] sm:$0xff]  ;;  %v8109_v31 = vld [vmem:[#allocation17 + $0x1e8] sm:$0xff] }
 0x7b8   : > { %v7410_v12 = vadd.f32 %v7267_v63, %v6988_v0  ;;  %v7996_v0 = vld [vmem:[#allocation17 + $0xf8] sm:$0xff]  ;;  %8040 = vmatprep.subr.mxu1 %v11892_v6  ;;  %v8011_v63 = vld [vmem:[#allocation17 + $0x170] sm:$0xff] }
 0x7b9   : > { %8041 = vmatpush1.msra.mxu1 %v7996_v0  ;;  %v8105_v0 = vld [vmem:[#allocation17 + $0x1c8] sm:$0xff] }
 0x7ba   : > { %8042 = vmatprep.subr.mxu1 %v11892_v6 }
 0x7bb   : > { %8043 = vmatpush1.msra.mxu1 %v7995_v27  ;;  %v8103_v27 = vld [vmem:[#allocation17 + $0x1b8] sm:$0xff] }
 0x7bc   : > { %8044 = vmatprep.subr.mxu1 %v11892_v6 }
 0x7bd   : > { %8045 = vmatpush1.msra.mxu1 %v7994_v13  ;;  %v8101_v13 = vld [vmem:[#allocation17 + $0x1a8] sm:$0xff] }
 0x7be   : > { %8046 = vmatprep.subr.mxu1 %v11892_v6 }
 0x7bf   : > { %8047 = vmatpush1.msra.mxu1 %v7993_v40  ;;  %v8099_v40 = vld [vmem:[#allocation17 + $0x198] sm:$0xff] }
 0x7c0   : > { %8048 = vmatprep.subr.mxu1 %v11892_v6 }
 0x7c1   : > { %8049 = vmatpush1.msra.mxu1 %v7992_v54  ;;  %v8097_v54 = vld [vmem:[#allocation17 + $0x188] sm:$0xff] }
 0x7c2   : > { %8050 = vmatprep.subr.mxu1 %v11892_v6 }
 0x7d4   : > { %v9039_v19 = vpop.f32.mrf.mxu1 }
 0x7d6   : > { %v9040_v17 = vpop.f32.mrf.mxu1 }
 0x7d7   : > { %v9041_v20 = vadd.f32 %v9040_v17, %v9039_v19  ;;  %v7991_v19 = vld [vmem:[#allocation17 + $0xd0] sm:$0xff]  ;;  %v7882_v17 = vld [vmem:[#allocation17 + $0x8] sm:$0xff] }
 0x7d8   : > { %8051 = vmatpush1.msra.mxu1 %v7991_v19  ;;  %v8119_v19 = vld [vmem:[#allocation17 + $0x238] sm:$0xff] }
 0x7d9   : > { %8052 = vmatprep.subr.mxu1 %v11892_v6 }
 0x7e5   : > { %v7405_v59 = vpop.f32.mrf.mxu1 }
 0x7e6   : > { %v7406_v25 = vadd.f32 %v9041_v20, %v7405_v59  ;;  %v7990_v20 = vld [vmem:[#allocation17 + $0xc8] sm:$0xff]  ;;  %v7881_v59 = vld [vmem:[#allocation17] sm:$0xff] }
 0x7e7   : > { %v9474_v39 = vpop.f32.mrf.mxu1  ;;  %8053 = vmatpush1.msra.mxu1 %v7990_v20  ;;  %v8117_v20 = vld [vmem:[#allocation17 + $0x228] sm:$0xff] }
 0x7e8   : > { %v7411_v45 = vadd.f32 %v7406_v25, %v6989_v50  ;;  %v7884_v50 = vld [vmem:[#allocation17 + $0x18] sm:$0xff]  ;;  %8054 = vmatprep.subr.mxu1 %v11892_v6  ;;  %v7989_v25 = vld [vmem:[#allocation17 + $0xc0] sm:$0xff] }
 0x7e9   : > { %7942 = vmatpush1.msra.mxu0 %v7884_v50  ;;  %8055 = vmatpush1.msra.mxu1 %v7989_v25  ;;  %v7904_v39 = vld [vmem:[#allocation17 + $0xb8] sm:$0xff]  ;;  %v8098_v50 = vld [vmem:[#allocation17 + $0x190] sm:$0xff] }
 0x7ea   : > { %7943 = vmatprep.subr.mxu0 %v11892_v6  ;;  %8072 = vmatprep.subr.mxu1 %v11892_v6  ;;  %v8115_v25 = vld [vmem:[#allocation17 + $0x218] sm:$0xff] }
 0x7eb   : > { %7944 = vmatpush1.msra.mxu0 %v7883_v61  ;;  %v8096_v61 = vld [vmem:[#allocation17 + $0x180] sm:$0xff] }
 0x7ec   : > { %7945 = vmatprep.subr.mxu0 %v11892_v6 }
 0x7ed   : > { %7946 = vmatpush1.msra.mxu0 %v7882_v17  ;;  %v8118_v17 = vld [vmem:[#allocation17 + $0x230] sm:$0xff] }
 0x7ee   : > { %7947 = vmatprep.subr.mxu0 %v11892_v6 }
 0x7ef   : > { %7948 = vmatpush1.msra.mxu0 %v7881_v59  ;;  %v8116_v59 = vld [vmem:[#allocation17 + $0x220] sm:$0xff] }
 0x7f0   : > { %7965 = vmatprep.subr.mxu0 %v11892_v6 }
 0x7f1   : > { %7966 = vmatpush2.msra.mxu0 %v7904_v39  ;;  %v8114_v39 = vld [vmem:[#allocation17 + $0x210] sm:$0xff] }
 0x7f2   : > { %7967 = vmatprep.subr.mxu0 %v11892_v6 }
 0x7f3   : > { %7968 = vmatpush2.msra.mxu0 %v7903_v8 }
 0x7f4   : > { %7969 = vmatprep.subr.mxu0 %v11892_v6 }
 0x7f6   : > { %v7683_v62 = vpop.f32.mrf.mxu1 }
 0x7f7   : > { %v7612_v16 = vpop.f32.mrf.mxu0 }
 0x7f8   : > { %v7684_v5 = vadd.f32 %v7683_v62, %v7612_v16  ;;  %v7685_v11 = vpop.f32.mrf.mxu1  ;;  %v7902_v16 = vld [vmem:[#allocation17 + $0xa8] sm:$0xff] }
 0x7f9   : > { %v7614_v14 = vpop.f32.mrf.mxu0  ;;  %7970 = vmatpush2.msra.mxu0 %v7902_v16  ;;  %v8211_v16 = vld [vmem:[%s11854_s9 + $0x40] sm:$0xff] }
 0x7fa   : > { %v11634_v1 = vadd.f32 %v7684_v5, %v7409_v48  ;;  %v7686_v22 = vadd.f32 %v7685_v11, %v7614_v14  ;;  %v8010_v5 = vld [vmem:[#allocation17 + $0x168] sm:$0xff]  ;;  %7971 = vmatprep.subr.mxu0 %v11892_v6  ;;  %v7901_v11 = vld [vmem:[#allocation17 + $0xa0] sm:$0xff] }
 0x7fb   : > { %v8009_v14 = vld [vmem:[#allocation17 + $0x160] sm:$0xff]  ;;  %7972 = vmatpush2.msra.mxu0 %v7901_v11  ;;  %v8208_v11 = vld [vmem:[%s11854_s9 + $0x28] sm:$0xff] }
 0x7fc   : > { %v7831_v58 = vmax.f32 %v11634_v1, 0.0  ;;  %v11637_v60 = vadd.f32 %v7686_v22, %v7410_v12  ;;  %v7900_v12 = vld [vmem:[#allocation17 + $0x98] sm:$0xff]  ;;  %7973 = vmatprep.subr.mxu0 %v11892_v6  ;;  %v7899_v22 = vld [vmem:[#allocation17 + $0x90] sm:$0xff] }
 0x7fd   : > { %v8008_v1 = vld [vmem:[#allocation17 + $0x158] sm:$0xff]  ;;  %7974 = vmatpush2.msra.mxu0 %v7900_v12 }
 0x7fe   : > { %v7832_v57 = vmax.f32 %v11637_v60, 0.0  ;;  %7835 = vrot.lane.b32.xlu1 %v7831_v58, %s10001_s30  ;;  %7975 = vmatprep.subr.mxu0 %v11892_v6  ;;  %v7898_v60 = vld [vmem:[#allocation17 + $0x88] sm:$0xff]  ;;  %v8206_v12 = vld [vmem:[%s11854_s9 + $0x18] sm:$0xff] }
 0x7ff   : > { %7976 = vmatpush2.msra.mxu0 %v7899_v22  ;;  %v8204_v22 = vld [vmem:[%s11854_s9 + $0x8] sm:$0xff] }
 0x800   : > { %7842 = vrot.lane.b32.xlu0 %v7832_v57, %s10001_s30  ;;  %7977 = vmatprep.subr.mxu0 %v11892_v6 }
 0x801   : > { %7978 = vmatpush2.msra.mxu0 %v7898_v60 }
 0x802   : > { %7979 = vmatprep.subr.mxu0 %v11892_v6 }
 0x817   : > { %v9083_v3 = vpop.f32.mrf.mxu1 }
 0x819   : > { %v9084_v29 = vpop.f32.mrf.mxu1 }
 0x81a   : > { %v9085_v43 = vadd.f32 %v9084_v29, %v9083_v3  ;;  %v7897_v3 = vld [vmem:[#allocation17 + $0x80] sm:$0xff] }
 0x81b   : > { %7980 = vmatpush2.msra.mxu0 %v7897_v3  ;;  %v8005_v29 = vld [vmem:[#allocation17 + $0x140] sm:$0xff] }
 0x81c   : > { %8131 = vmatprep.subr.mxu0 %v11892_v6 }
 0x827   : > { %v7824_v44 = vpop.f32.mrf.mxu1 }
 0x828   : > { %v7825_v35 = vadd.f32 %v9085_v43, %v7824_v44 }
 0x829   : > { %v9493_v51 = vpop.f32.mrf.mxu1 }
 0x82a   : > { %v11652_v15 = vadd.f32 %v7825_v35, %v7411_v45  ;;  %v8012_v45 = vld [vmem:[#allocation17 + $0x178] sm:$0xff] }
 0x82b   : > { %8073 = vmatpush2.msra.mxu1 %v8012_v45  ;;  %v8113_v45 = vld [vmem:[#allocation17 + $0x208] sm:$0xff] }
 0x82c   : > { %v7833_v56 = vmax.f32 %v11652_v15, 0.0  ;;  %8074 = vmatprep.subr.mxu1 %v11892_v6 }
 0x82d   : > { %8075 = vmatpush2.msra.mxu1 %v8011_v63  ;;  %v8214_v63 = vld [vmem:[%s11854_s9 + $0x58] sm:$0xff] }
 0x82e   : > { %7853 = vrot.lane.b32.xlu0 %v7833_v56, %s10001_s30  ;;  %8076 = vmatprep.subr.mxu1 %v11892_v6 }
 0x82f   : > { %8077 = vmatpush2.msra.mxu1 %v8010_v5  ;;  %v8209_v5 = vld [vmem:[%s11854_s9 + $0x30] sm:$0xff] }
 0x830   : > { %8078 = vmatprep.subr.mxu1 %v11892_v6 }
 0x831   : > { %8079 = vmatpush2.msra.mxu1 %v8009_v14  ;;  %v8207_v14 = vld [vmem:[%s11854_s9 + $0x20] sm:$0xff] }
 0x832   : > { %8080 = vmatprep.subr.mxu1 %v11892_v6 }
 0x833   : > { %8081 = vmatpush2.msra.mxu1 %v8008_v1  ;;  %v8205_v1 = vld [vmem:[%s11854_s9 + $0x10] sm:$0xff] }
 0x834   : > { %8082 = vmatprep.subr.mxu1 %v11892_v6 }
 0x870   : > { %v7836_v32 = vpop.permute.xlu1 %7835 }
 0x871   : > { %v7838_v7 = vmax.f32 %v7831_v58, %v7836_v32  ;;  %v8007_v58 = vld [vmem:[#allocation17 + $0x150] sm:$0xff]  ;;  %v8112_v32 = vld [vmem:[#allocation17 + $0x200] sm:$0xff] }
 0x872   : > { %v7843_v62 = vpop.permute.xlu0 %7842  ;;  %8083 = vmatpush2.msra.mxu1 %v8007_v58  ;;  %v8203_v58 = vld [vmem:[%s11854_s9] sm:$0xff] }
 0x873   : > { %7840 = vst.msk [vmem:[#allocation4] sm:$0x3f] %vm7839_vm1, %v7838_v7  ;;  %v7845_v48 = vmax.f32 %v7832_v57, %v7843_v62  ;;  %v8006_v57 = vld [vmem:[#allocation17 + $0x148] sm:$0xff]  ;;  %8084 = vmatprep.subr.mxu1 %v11892_v6  ;;  %v8215_v7 = vld [vmem:[%s11854_s9 + $0x60] sm:$0xf]  ;;  %v8213_v62 = vld [vmem:[%s11854_s9 + $0x50] sm:$0xff] }
 0x874   : > { %8085 = vmatpush2.msra.mxu1 %v8006_v57 }
 0x875   : > { %7847 = vrot.lane.b32.xlu1 %v7845_v48, %s10001_s30  ;;  %8086 = vmatprep.subr.mxu1 %v11892_v6  ;;  %v8210_v48 = vld [vmem:[%s11854_s9 + $0x38] sm:$0xff]  ;;  %s498_s30 = sand.u32 1, %s9973_s18  }
 0x876   : > { %8087 = vmatpush2.msra.mxu1 %v8005_v29  ;;  %s499_s25 = scalar_lea.vmem [#allocation21], %s498_s30  ;;  %s8297_s2 = scalar_lea.sflag [#allocation8], %s498_s30 }
 0x877   : > { %9494 = vmatprep.subr.mxu1 %v11892_v6  ;;  %s8309_s19 = sshll.u32 %s499_s25, 4  ;;  %s8310_s19 = int_to_ptr.vmem [resolvable:$true] %s8309_s19 }
 0x878   : > { %s9901_s29 = scalar_lea.vmem %s8310_s19, 16  ;;  %p9908_p13 = scmp.lt.s32.totalorder %s8310_s19, %s9906_s15 }
 0x879   : > { %p9902_p1 = scmp.ne.s32.totalorder %s8310_s19, %s9901_s29  ;;  %p9909_p5 = scmp.lt.s32.totalorder %s9907_s24, %s9901_s29 }
 0x87b   : > { %p9903_p9 = pnand %p9902_p1, %p11897_p2  ;;  %p9910_p6 = por %p9909_p5, %p9908_p13 }
 0x87d   : > { %p9904_p3 = pneg %p9903_p9 }
 0x87f   : > { %p9911_p10 = pnand %p9910_p6, %p9904_p3 }
 0x8a0   : > { %v7854_v2 = vpop.permute.xlu0 %7853 }
 0x8a1   : > { %v7856_v41 = vmax.f32 %v7833_v56, %v7854_v2  ;;  %v7880_v2 = vld [vmem:[#allocation18] sm:$0x1] }
 0x8a3   : > { %7857 = vst.msk [vmem:[#allocation4 + $0x8] sm:$0x3f] %vm7839_vm1, %v7856_v41 }
 0x8e7   : > { %v7848_v9 = vpop.permute.xlu1 %7847 }
 0x8e8   : > { %7851 = vst.msk [vmem:[#allocation4] sm:$0x3f] %vm7850_vm2, %v7848_v9 }
 0x8ef   : > { %v7858_v36 = vld [vmem:[#allocation4] ss:$8 sm:$0x3]  ;;  %v7860_v38 = vld [vmem:[#allocation4 + $0x1] ss:$8 sm:$0x3] }
 0x8f0   : > { %v7861_v46 = vmax.f32 %v7858_v36, %v7860_v38  ;;  %v7866_v43 = vld [vmem:[#allocation4 + $0x2] ss:$8 sm:$0x3]  ;;  %v7868_v44 = vld [vmem:[#allocation4 + $0x3] ss:$8 sm:$0x3] }
 0x8f1   : > { %v7869_v26 = vmax.f32 %v7866_v43, %v7868_v44  ;;  %v7873_v18 = vld [vmem:[#allocation4 + $0x4] ss:$8 sm:$0x3]  ;;  %v7875_v35 = vld [vmem:[#allocation4 + $0x5] ss:$8 sm:$0x3] }
 0x8f2   : > { %7864 = vst.msk [vmem:[#allocation5] ss:$4 sm:$0x3] %vm7862_vm3, %v7861_v46  ;;  %v7876_v51 = vmax.f32 %v7873_v18, %v7875_v35 }
 0x8f3   : > { %7871 = vst.msk [vmem:[#allocation5 + $0x1] ss:$4 sm:$0x3] %vm7862_vm3, %v7869_v26 }
 0x8f4   : > { %7878 = vst.msk [vmem:[#allocation5 + $0x2] ss:$4 sm:$0x3] %vm7862_vm3, %v7876_v51 }
 0x8fb   : > { %v11712_v15 = vld [vmem:[#allocation5] sm:$0x77] }
 0x8fc   : > { %v7913_v47 = vrot.slane %v11712_v15, %v11896_v34  ;;  %v8020_v56 = vrot.slane %v11712_v15, %v8019_v10  ;;  %v7909_v37 = vrot.slane %v11712_v15, %v10446_v28  ;;  %v8016_v52 = vrot.slane %v11712_v15, %v10451_v30  ;;  %v8108_v28 = vld [vmem:[#allocation17 + $0x1e0] sm:$0xff]  ;;  %v8107_v30 = vld [vmem:[#allocation17 + $0x1d8] sm:$0xff] }
 0x8fd   : > { %v8127_v24 = vrot.slane %v11712_v15, %v8126_v4  ;;  %v8123_v8 = vrot.slane %v11712_v15, %v10475_v33  ;;  %v8212_v33 = vld [vmem:[%s11854_s9 + $0x48] sm:$0xff] }
 0x8fe   : > { %8531 = vmatprep.mubr.msk.f32.mxu0 %vm5857_vm12, %v7913_v47  ;;  %8532 = vmatprep.mubr.msk.f32.mxu1 %vm5857_vm12, %v8020_v56 }
 0x8ff   : > { %7982 = vmatmul.mubr.f32.vlgmr.msra.gmra.mxu0 %v7909_v37  ;;  %8089 = vmatmul.mubr.f32.vlgmr.msra.gmra.mxu1 %v8016_v52 }
 0x900   : > { %8132 = vmatpush1.msra.mxu0 %v8111_v55  ;;  %8533 = vmatprep.mubr.msk.f32.mxu0 %vm5857_vm12, %v8127_v24 }
 0x901   : > { %8133 = vmatprep.subr.mxu0 %v11892_v6  ;;  %9520 = vmatprep.mubr.msk.f32.mxu1 %vm9999_vm4, %v11892_v6  ;;  %vm8294_vm4 = vcmask 73728  }
 0x902   : > { %8134 = vmatpush1.msra.mxu0 %v8110_v23  ;;  %9495 = vmatpush3.msk.msra.mxu1 %vm532_vm0, %v8215_v7  ;;  %vm8217_vm0 = vcmask 818176  }
 0x903   : > { %8135 = vmatprep.subr.mxu0 %v11892_v6  ;;  %9496 = vmatprep.subr.mxu1 %v11892_v6 }
 0x904   : > { %8136 = vmatpush1.msra.mxu0 %v8109_v31  ;;  %9497 = vmatpush3.msra.mxu1 %v8214_v63 }
 0x905   : > { %8137 = vmatprep.subr.mxu0 %v11892_v6  ;;  %9498 = vmatprep.subr.mxu1 %v11892_v6 }
 0x906   : > { %8138 = vmatpush1.msra.mxu0 %v8108_v28  ;;  %9499 = vmatpush3.msra.mxu1 %v8213_v62 }
 0x907   : > { %8139 = vmatprep.subr.mxu0 %v11892_v6  ;;  %9500 = vmatprep.subr.mxu1 %v11892_v6 }
 0x908   : > { %8140 = vmatpush1.msra.mxu0 %v8107_v30  ;;  %9501 = vmatpush3.msra.mxu1 %v8212_v33 }
 0x909   : > { %8141 = vmatprep.subr.mxu0 %v11892_v6  ;;  %9502 = vmatprep.subr.mxu1 %v11892_v6 }
 0x90a   : > { %8142 = vmatpush1.msra.mxu0 %v8106_v21  ;;  %9503 = vmatpush3.msra.mxu1 %v8211_v16 }
 0x90b   : > { %8143 = vmatprep.subr.mxu0 %v11892_v6  ;;  %9504 = vmatprep.subr.mxu1 %v11892_v6 }
 0x90c   : > { %8144 = vmatpush1.msra.mxu0 %v8105_v0  ;;  %9505 = vmatpush3.msra.mxu1 %v8210_v48 }
 0x90d   : > { %8145 = vmatprep.subr.mxu0 %v11892_v6  ;;  %9506 = vmatprep.subr.mxu1 %v11892_v6 }
 0x90e   : > { %8146 = vmatpush1.msra.mxu0 %v8104_v49  ;;  %9507 = vmatpush3.msra.mxu1 %v8209_v5 }
 0x90f   : > { %8147 = vmatprep.subr.mxu0 %v11892_v6  ;;  %9508 = vmatprep.subr.mxu1 %v11892_v6 }
 0x910   : > { %8148 = vmatpush1.msra.mxu0 %v8103_v27  ;;  %9509 = vmatpush3.msra.mxu1 %v8208_v11 }
 0x911   : > { %8149 = vmatprep.subr.mxu0 %v11892_v6  ;;  %9510 = vmatprep.subr.mxu1 %v11892_v6 }
 0x912   : > { %8150 = vmatpush1.msra.mxu0 %v8102_v53  ;;  %9511 = vmatpush3.msra.mxu1 %v8207_v14 }
 0x913   : > { %8151 = vmatprep.subr.mxu0 %v11892_v6  ;;  %9512 = vmatprep.subr.mxu1 %v11892_v6 }
 0x914   : > { %8152 = vmatpush1.msra.mxu0 %v8101_v13  ;;  %9513 = vmatpush3.msra.mxu1 %v8206_v12 }
 0x915   : > { %8153 = vmatprep.subr.mxu0 %v11892_v6  ;;  %9514 = vmatprep.subr.mxu1 %v11892_v6 }
 0x916   : > { %8154 = vmatpush1.msra.mxu0 %v8100_v42  ;;  %9515 = vmatpush3.msra.mxu1 %v8205_v1 }
 0x917   : > { %8155 = vmatprep.subr.mxu0 %v11892_v6  ;;  %9516 = vmatprep.subr.mxu1 %v11892_v6 }
 0x918   : > { %8156 = vmatpush1.msra.mxu0 %v8099_v40  ;;  %9517 = vmatpush3.msra.mxu1 %v8204_v22 }
 0x919   : > { %8157 = vmatprep.subr.mxu0 %v11892_v6  ;;  %9518 = vmatprep.subr.mxu1 %v11892_v6 }
 0x91a   : > { %8158 = vmatpush1.msra.mxu0 %v8098_v50  ;;  %9519 = vmatpush3.msra.mxu1 %v8203_v58 }
 0x91b   : > { %8159 = vmatprep.subr.mxu0 %v11892_v6 }
 0x91c   : > { %8160 = vmatpush1.msra.mxu0 %v8097_v54 }
 0x91d   : > { %8161 = vmatprep.subr.mxu0 %v11892_v6 }
 0x91e   : > { %8162 = vmatpush1.msra.mxu0 %v8096_v61 }
 0x91f   : > { %8179 = vmatprep.subr.mxu0 %v11892_v6 }
 0x920   : > { %8180 = vmatpush2.msra.mxu0 %v8119_v19 }
 0x921   : > { %8181 = vmatprep.subr.mxu0 %v11892_v6 }
 0x922   : > { %8182 = vmatpush2.msra.mxu0 %v8118_v17 }
 0x923   : > { %8183 = vmatprep.subr.mxu0 %v11892_v6 }
 0x924   : > { %8184 = vmatpush2.msra.mxu0 %v8117_v20 }
 0x925   : > { %8185 = vmatprep.subr.mxu0 %v11892_v6 }
 0x926   : > { %8186 = vmatpush2.msra.mxu0 %v8116_v59 }
 0x927   : > { %8187 = vmatprep.subr.mxu0 %v11892_v6 }
 0x928   : > { %8188 = vmatpush2.msra.mxu0 %v8115_v25 }
 0x929   : > { %8189 = vmatprep.subr.mxu0 %v11892_v6 }
 0x92a   : > { %8190 = vmatpush2.msra.mxu0 %v8114_v39 }
 0x92b   : > { %8191 = vmatprep.subr.mxu0 %v11892_v6 }
 0x92c   : > { %8192 = vmatpush2.msra.mxu0 %v8113_v45 }
 0x92d   : > { %8193 = vmatprep.subr.mxu0 %v11892_v6  ;;  %v8216_v6 = vld [vmem:[#allocation20] sm:$0x1] }
 0x92e   : > { %8194 = vmatpush2.msra.mxu0 %v8112_v32 }
 0x92f   : > { %8196 = vmatmul.mubr.f32.vlgmr.msra.gmra.mxu0 %v8123_v8 }
 0x9bf   : > { %v7983_v60 = vpop.f32.mrf.mxu0  ;;  %v8090_v57 = vpop.f32.mrf.mxu1 }
 0x9c0   : > { %v7987_v41 = vadd.f32 %v7983_v60, %v7880_v2 }
 0x9c1   : > { %v7985_v3 = vpop.f32.mrf.mxu0  ;;  %v8092_v29 = vpop.f32.mrf.mxu1 }
 0x9c2   : > { %v8094_v9 = vadd.f32 %v8090_v57, %v7987_v41 }
 0x9ef   : > { %v8197_v36 = vpop.f32.mrf.mxu0 }
 0x9f0   : > { %v8201_v38 = vadd.f32 %v8197_v36, %v8094_v9 }
 0x9f1   : > { %v8199_v46 = vpop.f32.mrf.mxu0 }
 0x9f2   : > { %v8202_v43 = vmax.f32 %v8201_v38, 0.0 }
 0x9f4   : > { %9521 = vmatmul.mubr.msk.f32.vlgmr.msra.gmra.mxu1 %vm8217_vm0, %v8202_v43 }
 0xab4   : > { %v8290_v44 = vpop.f32.mrf.mxu1 }
 0xab5   : > { %v8291_v26 = vadd.f32 %v8290_v44, %v8216_v6 }
 0xab6   : > { %v9522_v18 = vpop.f32.mrf.mxu1 }
 0xab7   : > { %8295 = vst.msk [vmem:[%s499_s25] sm:$0x1] %vm8294_vm4, %v8291_v26 }
 0xab8   : > { %9914 = shalt.err (!%p9911_p10)
}
 0xab9   : > { %s9915_s13 = scalar_lea.hbm %s11810_s26, 16  ;;  %s9919_s30 = scalar_lea.hbm %s11856_s11, 32 }
 0xaba   : > { %p9916_p12 = scmp.ne.s32.totalorder %s11810_s26, %s9915_s13  ;;  %p9920_p8 = scmp.lt.s32.totalorder %s11810_s26, %s11856_s11 }
 0xabb   : > { %p9921_p11 = scmp.lt.s32.totalorder %s9919_s30, %s9915_s13 }
 0xabc   : > { %p9917_p4 = pnand %p9916_p12, %p11897_p2 }
 0xabd   : > { %p9922_p0 = por %p9921_p11, %p9920_p8 }
 0xabe   : > { %p9918_p7 = pneg %p9917_p4 }
 0xac0   : > { %p9923_p1 = pnand %p9922_p0, %p9918_p7 }
 0xac2   : > { %9926 = shalt.err (!%p9923_p1)
}
 0xac3   : > { %9559 = dma.vmem_to_hbm [thread:$0]  (%p11897_p2), %s8310_s19, 16, %s11810_s26, %s8297_s2  }
 0xac4 PF: > { %p9611_p9 = scmp.ge.s32.totalorder %s9981_s20, 2  ;;  %s8321_s12 = sand.u32 1, %s9969_s17  }
 0xac5   : > { %p11898_p3 = scmp.ne.s32.totalorder %s11873_s28, 0  ;;  %s8322_s22 = scalar_lea.sflag [#allocation8], %s8321_s12 }
 0xac7   : > { %p9590_p13 = pnand %p9611_p9, %p11898_p3 }
 0xac9   : > { %p9591_p5 = pneg %p9590_p13 }
 0xacb   : > { %9964 = dma.done.wait (%p9591_p5), %s8322_s22, 16  }
 0xacc   : > { %9966 = vsyncadd (%p9591_p5), %s8322_s22, 4294967280  ;;  %s11899_s29 = sld [smem:[#allocation28_spill]]  ;;  %p26_p6 = scmp.ge.s32.totalorder %s10089_s23, 4  }
 0xacd   : > { %s11900_s19 = sld [smem:[#allocation29_spill]]  ;;  %s11901_s17 = smov %s9973_s18 }
 0xace   : > { %s11903_s20 = smov %s10089_s23  ;;  %28 = sbr.rel (!%p26_p6) target bundleno = 11 (0xb), region = 185 }
 0xad2   : > { %s11902_s18 = smov %s11899_s29 }
 0xad3   :  { %8326 = vsyncpa [#allocation7], 1 }
 0xad4   :  { %8328 = vsyncpa [#allocation7 + $0x1], 1 }
 0xad5   :  { %8329 = vsyncpa [#allocation10], 1 }
 0xad6   :  { %8330 = vsyncpa [#allocation13], 1 }
 0xad7   :  { %8331 = vsyncpa [#allocation16], 1 }
 0xad8   :  { %8332 = vsyncpa [#allocation19], 1 }
 0xad9   :  { %8333 = vsyncpa [#allocation8], 1 }
 0xada   :  { %8335 = vsyncpa [#allocation8 + $0x1], 1 }

</bundles_post_ra>
